<compile_context>
chip_gen: v6e
topology: v6e:2x2x1
jax: 0.10.0
libtpu: 0.0.40
codegen_flags: <defaults>
</compile_context>

<pallas_src>
import functools
import math

import jax
import jax.numpy as jnp
from jax import lax
from jax.experimental import pallas as pl
from jax.experimental.pallas import tpu as pltpu


# --------------------------------------------------------------------------------------
# The single fused Pallas kernel
# --------------------------------------------------------------------------------------

def _lenet_kernel(p_ref, w1_ref, w2_ref, wf1_ref, wf2_ref, wf3_ref, vec_ref,
                  out_ref, pool1_ref, conv2_ref, *, batch):
    B = batch

    # ---- conv1 (BN scale folded into the weight) as one im2col matmul ---------------
    y1 = jnp.dot(p_ref[...], w1_ref[...], preferred_element_type=jnp.float32)
    y1 = jnp.maximum(y1 + vec_ref[0:1, :], 0.0)                 # (B*768, 128)

    # ---- MaxPool2d(2) #1: partners sit on leading (parity) axes ----------------------
    # rows were laid out (b, hp, hh, wp, wh_pad16) by the wrapper.
    r = y1.reshape(B, 2, 12, 2, 16, 128)
    m = jnp.maximum(r[:, 0], r[:, 1])                           # max over h parity
    pool1_ref[...] = jnp.maximum(m[:, :, 0], m[:, :, 1])        # max over w parity -> (B,12,16,128)

    # ---- conv2 (BN scale folded in) as 25 shifted-window matmuls --------------------
    acc2 = jnp.zeros((B * 64, 128), jnp.float32)
    for k in range(25):
        i, j = divmod(k, 5)
        win = pool1_ref[:, i:i + 8, j:j + 8, :]                 # (B, 8, 8, 128)
        lhs = win.reshape(B * 64, 128)[:, 0:8]                  # only 6 (+2 pad) real channels
        acc2 = acc2 + jnp.dot(lhs, w2_ref[k], preferred_element_type=jnp.float32)
    y2 = jnp.maximum(acc2 + vec_ref[1:2, :], 0.0)               # (B*64, 128)
    conv2_ref[...] = y2.reshape(B, 8, 8, 128)

    # ---- MaxPool2d(2) #2 fused with the fc1 flatten ----------------------------------
    accf = jnp.zeros((B, 128), jnp.float32)
    for s in range(16):
        yi, xi = divmod(s, 4)
        c00 = conv2_ref[:, 2 * yi,     2 * xi,     :]
        c01 = conv2_ref[:, 2 * yi,     2 * xi + 1, :]
        c10 = conv2_ref[:, 2 * yi + 1, 2 * xi,     :]
        c11 = conv2_ref[:, 2 * yi + 1, 2 * xi + 1, :]
        m4 = jnp.maximum(jnp.maximum(c00, c01), jnp.maximum(c10, c11))   # (B, 128)
        accf = accf + jnp.dot(m4[:, 0:16], wf1_ref[s],
                              preferred_element_type=jnp.float32)
    h1 = jnp.maximum(accf + vec_ref[2:3, :], 0.0)               # fc1 + ReLU, (B, 128)

    # ---- fc2, fc3 --------------------------------------------------------------------
    h2 = jnp.dot(h1, wf2_ref[...], preferred_element_type=jnp.float32) + vec_ref[3:4, :]
    out = jnp.dot(h2, wf3_ref[...], preferred_element_type=jnp.float32) + vec_ref[4:5, :]
    out_ref[...] = out.astype(out_ref.dtype)


# --------------------------------------------------------------------------------------
# Wrapper: parameter folding/padding, im2col for conv1, single pallas_call
# --------------------------------------------------------------------------------------

@jax.jit
def lenet_forward(x, p):
    """x: (B, 1, 28, 28) float32 NCHW, returns (B, 10) float32 logits."""
    B = x.shape[0]
    f32 = jnp.float32
    eps = 1e-5

    # BN folding (eval mode): conv*W*s + (beta + (bias - mean)*s)
    s1 = p["bn1_gamma"] / jnp.sqrt(p["bn1_var"] + eps)
    t1 = p["bn1_beta"] + (p["conv1_b"] - p["bn1_mean"]) * s1
    s2 = p["bn2_gamma"] / jnp.sqrt(p["bn2_var"] + eps)
    t2 = p["bn2_beta"] + (p["conv2_b"] - p["bn2_mean"]) * s2

    # conv1 weight: (6,1,5,5) -> (25, 6) with columns ordered (i, j); pad K 25->32, N 6->128
    w1f = (p["conv1_w"].reshape(6, 25) * s1[:, None]).T
    w1f = jnp.pad(w1f, ((0, 7), (0, 122)))                          # (32, 128)

    # conv2 weight: (16,6,5,5) -> (25 offsets, 6 in-ch, 16 out-ch); pad to (25, 8, 128)
    w2f = (p["conv2_w"] * s2[:, None, None, None]).transpose(2, 3, 1, 0).reshape(25, 6, 16)
    w2f = jnp.pad(w2f, ((0, 0), (0, 2), (0, 112)))                  # (25, 8, 128)

    # fc1 weight permuted so (spatial s, channel c) matches PyTorch's NCHW flatten order
    wf1 = p["fc1_w"].reshape(120, 16, 4, 4).transpose(2, 3, 1, 0).reshape(16, 16, 120)
    wf1 = jnp.pad(wf1, ((0, 0), (0, 0), (0, 8)))                    # (16, 16, 128)

    wf2 = jnp.pad(p["fc2_w"].T, ((0, 8), (0, 44)))                  # (128, 128)
    wf3 = jnp.pad(p["fc3_w"].T, ((0, 44), (0, 118)))                # (128, 128)

    # Packed per-channel shift / bias vectors (zero in the padded lanes).
    vecs = jnp.zeros((8, 128), f32)
    vecs = vecs.at[0, :6].set(t1).at[1, :16].set(t2)
    vecs = vecs.at[2, :120].set(p["fc1_b"]).at[3, :84].set(p["fc2_b"]).at[4, :10].set(p["fc3_b"])

    # im2col for conv1 with rows ordered (b, h_parity, h_half, w_parity, w_half[pad 12->16])
    xs = x[:, 0]                                                    # (B, 28, 28)
    cols = [xs[:, i:i + 24, j:j + 24] for i in range(5) for j in range(5)]
    pat = jnp.stack(cols, axis=-1)                                  # (B, 24, 24, 25)
    pat = pat.reshape(B, 12, 2, 12, 2, 25).transpose(0, 2, 1, 4, 3, 5)
    pat = jnp.pad(pat, ((0, 0),) * 4 + ((0, 4), (0, 0)))            # w_half 12 -> 16 (zero rows)
    pat = pat.reshape(B * 768, 25)
    pat = jnp.pad(pat, ((0, 0), (0, 7)))                            # K 25 -> 32

    def fullspec(shape):
        return pl.BlockSpec(shape, lambda i: (0,) * len(shape))

    out = pl.pallas_call(
        functools.partial(_lenet_kernel, batch=B),
        out_shape=jax.ShapeDtypeStruct((B, 128), f32),
        grid=(1,),
        in_specs=[fullspec(pat.shape), fullspec(w1f.shape), fullspec(w2f.shape),
                  fullspec(wf1.shape), fullspec(wf2.shape), fullspec(wf3.shape),
                  fullspec(vecs.shape)],
        out_specs=fullspec((B, 128)),
        scratch_shapes=[pltpu.VMEM((B, 12, 16, 128), f32),   # pool1 (12x12 valid, w padded to 16)
                        pltpu.VMEM((B, 8, 8, 128), f32)],    # conv2 activations
        compiler_params=pltpu.CompilerParams(dimension_semantics=("arbitrary",)),
    )(pat, w1f, w2f, wf1, wf2, wf3, vecs)

    return out[:, :10]


# --------------------------------------------------------------------------------------
# Parameter init (PyTorch-style) and a pure-JAX reference for a correctness check
# --------------------------------------------------------------------------------------

def _uniform(key, shape, fan_in):
    bound = 1.0 / math.sqrt(fan_in)
    return jax.random.uniform(key, shape, jnp.float32, -bound, bound)


def init_params(key):
    ks = jax.random.split(key, 12)
    p = {}
    p["conv1_w"] = _uniform(ks[0], (6, 1, 5, 5), 1 * 5 * 5)
    p["conv1_b"] = _uniform(ks[1], (6,), 1 * 5 * 5)
    p["bn1_gamma"] = jnp.ones((6,), jnp.float32)
    p["bn1_beta"] = jnp.zeros((6,), jnp.float32)
    p["bn1_mean"] = jnp.zeros((6,), jnp.float32)
    p["bn1_var"] = jnp.ones((6,), jnp.float32)
    p["conv2_w"] = _uniform(ks[2], (16, 6, 5, 5), 6 * 5 * 5)
    p["conv2_b"] = _uniform(ks[3], (16,), 6 * 5 * 5)
    p["bn2_gamma"] = jnp.ones((16,), jnp.float32)
    p["bn2_beta"] = jnp.zeros((16,), jnp.float32)
    p["bn2_mean"] = jnp.zeros((16,), jnp.float32)
    p["bn2_var"] = jnp.ones((16,), jnp.float32)
    p["fc1_w"] = _uniform(ks[4], (120, 16 * 4 * 4), 16 * 4 * 4)
    p["fc1_b"] = _uniform(ks[5], (120,), 16 * 4 * 4)
    p["fc2_w"] = _uniform(ks[6], (84, 120), 120)
    p["fc2_b"] = _uniform(ks[7], (84,), 120)
    p["fc3_w"] = _uniform(ks[8], (10, 84), 84)
    p["fc3_b"] = _uniform(ks[9], (10,), 84)
    return p


def _reference_forward(x, p, eps=1e-5):
    def bn(v, g, b, m, var):
        inv = (g / jnp.sqrt(var + eps))[None, :, None, None]
        return (v - m[None, :, None, None]) * inv + b[None, :, None, None]

    def pool(v):
        return lax.reduce_window(v, -jnp.inf, lax.max, (1, 1, 2, 2), (1, 1, 2, 2), "VALID")

    dn = ("NCHW", "OIHW", "NCHW")
    y = lax.conv_general_dilated(x, p["conv1_w"], (1, 1), "VALID", dimension_numbers=dn)
    y = y + p["conv1_b"][None, :, None, None]
    y = pool(jnp.maximum(bn(y, p["bn1_gamma"], p["bn1_beta"], p["bn1_mean"], p["bn1_var"]), 0))
    y = lax.conv_general_dilated(y, p["conv2_w"], (1, 1), "VALID", dimension_numbers=dn)
    y = y + p["conv2_b"][None, :, None, None]
    y = pool(jnp.maximum(bn(y, p["bn2_gamma"], p["bn2_beta"], p["bn2_mean"], p["bn2_var"]), 0))
    f = y.reshape(y.shape[0], -1)
    h = jnp.maximum(f @ p["fc1_w"].T + p["fc1_b"], 0)
    h = h @ p["fc2_w"].T + p["fc2_b"]
    return h @ p["fc3_w"].T + p["fc3_b"]


if __name__ == "__main__":
    key = jax.random.PRNGKey(0)
    kx, kp = jax.random.split(key)
    # LeNet's fc1 = Linear(16*4*4, ...) forces 28x28 spatial input; batch kept small.
    x = jax.random.normal(kx, (2, 1, 28, 28), jnp.float32)
    params = init_params(kp)

    out = jax.block_until_ready(lenet_forward(x, params))
    assert out.shape == (2, 10) and out.dtype == jnp.float32

    ref = _reference_forward(x, params)
    err = float(jnp.max(jnp.abs(out - ref)))
    assert err < 5e-2, f"mismatch vs pure-JAX reference: max abs err = {err}"

    print("KERNEL_OK")
</pallas_src>

<mosaic_0001>
module attributes {stable_mosaic.version = 11 : i64} {
  func.func @_lenet_kernel(%arg0: i32, %arg1: memref<1536x32xf32, #tpu.memory_space<vmem>>, %arg2: memref<32x128xf32, #tpu.memory_space<vmem>>, %arg3: memref<25x8x128xf32, #tpu.memory_space<vmem>>, %arg4: memref<16x16x128xf32, #tpu.memory_space<vmem>>, %arg5: memref<128x128xf32, #tpu.memory_space<vmem>>, %arg6: memref<128x128xf32, #tpu.memory_space<vmem>>, %arg7: memref<8x128xf32, #tpu.memory_space<vmem>>, %arg8: memref<2x128xf32, #tpu.memory_space<vmem>>, %arg9: memref<2x12x16x128xf32, #tpu.memory_space<vmem>>, %arg10: memref<2x8x8x128xf32, #tpu.memory_space<vmem>>) attributes {dimension_semantics = [#tpu.dimension_semantics<arbitrary>], iteration_bounds = array<i64: 1>, scalar_prefetch = 0 : i64, scratch_operands = 2 : i64, tpu.core_type = #tpu.core_type<tc>, window_params = [{pipeline_mode = #tpu.pipeline_mode<synchronous>, transform_indices = @transform_0, window_bounds = array<i64: 1536, 32>}, {pipeline_mode = #tpu.pipeline_mode<synchronous>, transform_indices = @transform_1, window_bounds = array<i64: 32, 128>}, {pipeline_mode = #tpu.pipeline_mode<synchronous>, transform_indices = @transform_2, window_bounds = array<i64: 25, 8, 128>}, {pipeline_mode = #tpu.pipeline_mode<synchronous>, transform_indices = @transform_3, window_bounds = array<i64: 16, 16, 128>}, {pipeline_mode = #tpu.pipeline_mode<synchronous>, transform_indices = @transform_4, window_bounds = array<i64: 128, 128>}, {pipeline_mode = #tpu.pipeline_mode<synchronous>, transform_indices = @transform_5, window_bounds = array<i64: 128, 128>}, {pipeline_mode = #tpu.pipeline_mode<synchronous>, transform_indices = @transform_6, window_bounds = array<i64: 8, 128>}, {pipeline_mode = #tpu.pipeline_mode<synchronous>, transform_indices = @transform_7, window_bounds = array<i64: 2, 128>}]} {
    %c0 = arith.constant 0 : index
    %c0_0 = arith.constant 0 : index
    %0 = vector.load %arg1[%c0, %c0_0] : memref<1536x32xf32, #tpu.memory_space<vmem>>, vector<1536x32xf32>
    %c0_1 = arith.constant 0 : index
    %c0_2 = arith.constant 0 : index
    %1 = vector.load %arg2[%c0_1, %c0_2] : memref<32x128xf32, #tpu.memory_space<vmem>>, vector<32x128xf32>
    %cst = arith.constant dense<0.000000e+00> : vector<1536x128xf32>
    %2 = tpu.matmul %0, %1, %cst {dimension_numbers = #tpu.dot_dimension_numbers<[1], [0], [0], [1], [0, 0, 1, 1], [], []>} : vector<1536x32xf32>, vector<32x128xf32>, vector<1536x128xf32> -> vector<1536x128xf32>
    %c0_3 = arith.constant 0 : index
    %c0_4 = arith.constant 0 : index
    %3 = vector.load %arg7[%c0_3, %c0_4] : memref<8x128xf32, #tpu.memory_space<vmem>>, vector<1x128xf32>
    %4 = vector.broadcast %3 : vector<1x128xf32> to vector<1536x128xf32>
    %5 = arith.addf %2, %4 : vector<1536x128xf32>
    %cst_5 = arith.constant 0.000000e+00 : f32
    %6 = vector.broadcast %cst_5 : f32 to vector<1536x128xf32>
    %7 = arith.maximumf %5, %6 : vector<1536x128xf32>
    %8 = vector.shape_cast %7 : vector<1536x128xf32> to vector<2x2x12x2x16x128xf32>
    %9 = vector.extract_strided_slice %8 {offsets = [0, 0, 0, 0, 0, 0], sizes = [2, 1, 12, 2, 16, 128], strides = [1, 1, 1, 1, 1, 1]} : vector<2x2x12x2x16x128xf32> to vector<2x1x12x2x16x128xf32>
    %10 = vector.shape_cast %9 : vector<2x1x12x2x16x128xf32> to vector<2x12x2x16x128xf32>
    %11 = vector.extract_strided_slice %8 {offsets = [0, 1, 0, 0, 0, 0], sizes = [2, 1, 12, 2, 16, 128], strides = [1, 1, 1, 1, 1, 1]} : vector<2x2x12x2x16x128xf32> to vector<2x1x12x2x16x128xf32>
    %12 = vector.shape_cast %11 : vector<2x1x12x2x16x128xf32> to vector<2x12x2x16x128xf32>
    %13 = arith.maximumf %10, %12 : vector<2x12x2x16x128xf32>
    %14 = vector.extract_strided_slice %13 {offsets = [0, 0, 0, 0, 0], sizes = [2, 12, 1, 16, 128], strides = [1, 1, 1, 1, 1]} : vector<2x12x2x16x128xf32> to vector<2x12x1x16x128xf32>
    %15 = vector.shape_cast %14 : vector<2x12x1x16x128xf32> to vector<2x12x16x128xf32>
    %16 = vector.extract_strided_slice %13 {offsets = [0, 0, 1, 0, 0], sizes = [2, 12, 1, 16, 128], strides = [1, 1, 1, 1, 1]} : vector<2x12x2x16x128xf32> to vector<2x12x1x16x128xf32>
    %17 = vector.shape_cast %16 : vector<2x12x1x16x128xf32> to vector<2x12x16x128xf32>
    %18 = arith.maximumf %15, %17 : vector<2x12x16x128xf32>
    %c0_6 = arith.constant 0 : index
    %c0_7 = arith.constant 0 : index
    %c0_8 = arith.constant 0 : index
    %c0_9 = arith.constant 0 : index
    %19 = vector.load %arg9[%c0_6, %c0_7, %c0_8, %c0_9] : memref<2x12x16x128xf32, #tpu.memory_space<vmem>>, vector<2x12x16x128xf32>
    tpu.vector_store %arg9[%c0_6, %c0_7, %c0_8, %c0_9], %18 {strides = array<i32>} : memref<2x12x16x128xf32, #tpu.memory_space<vmem>>, vector<2x12x16x128xf32>,
    %cst_10 = arith.constant 0.000000e+00 : f32
    %20 = vector.broadcast %cst_10 : f32 to vector<128x128xf32>
    %c0_11 = arith.constant 0 : index
    %c0_12 = arith.constant 0 : index
    %c0_13 = arith.constant 0 : index
    %c0_14 = arith.constant 0 : index
    %21 = vector.load %arg9[%c0_11, %c0_12, %c0_13, %c0_14] : memref<2x12x16x128xf32, #tpu.memory_space<vmem>>, vector<2x8x8x128xf32>
    %22 = vector.shape_cast %21 : vector<2x8x8x128xf32> to vector<128x128xf32>
    %23 = vector.extract_strided_slice %22 {offsets = [0, 0], sizes = [128, 8], strides = [1, 1]} : vector<128x128xf32> to vector<128x8xf32>
    %c0_15 = arith.constant 0 : index
    %c0_16 = arith.constant 0 : index
    %c0_17 = arith.constant 0 : index
    %24 = vector.load %arg3[%c0_15, %c0_16, %c0_17] : memref<25x8x128xf32, #tpu.memory_space<vmem>>, vector<1x8x128xf32>
    %25 = vector.shape_cast %24 : vector<1x8x128xf32> to vector<8x128xf32>
    %cst_18 = arith.constant dense<0.000000e+00> : vector<128x128xf32>
    %26 = tpu.matmul %23, %25, %cst_18 {dimension_numbers = #tpu.dot_dimension_numbers<[1], [0], [0], [1], [0, 0, 1, 1], [], []>} : vector<128x8xf32>, vector<8x128xf32>, vector<128x128xf32> -> vector<128x128xf32>
    %27 = arith.addf %20, %26 : vector<128x128xf32>
    %c0_19 = arith.constant 0 : index
    %c0_20 = arith.constant 0 : index
    %c1 = arith.constant 1 : index
    %c0_21 = arith.constant 0 : index
    %28 = vector.load %arg9[%c0_19, %c0_20, %c1, %c0_21] : memref<2x12x16x128xf32, #tpu.memory_space<vmem>>, vector<2x8x8x128xf32>
    %29 = vector.shape_cast %28 : vector<2x8x8x128xf32> to vector<128x128xf32>
    %30 = vector.extract_strided_slice %29 {offsets = [0, 0], sizes = [128, 8], strides = [1, 1]} : vector<128x128xf32> to vector<128x8xf32>
    %c1_22 = arith.constant 1 : index
    %c0_23 = arith.constant 0 : index
    %c0_24 = arith.constant 0 : index
    %31 = vector.load %arg3[%c1_22, %c0_23, %c0_24] : memref<25x8x128xf32, #tpu.memory_space<vmem>>, vector<1x8x128xf32>
    %32 = vector.shape_cast %31 : vector<1x8x128xf32> to vector<8x128xf32>
    %cst_25 = arith.constant dense<0.000000e+00> : vector<128x128xf32>
    %33 = tpu.matmul %30, %32, %cst_25 {dimension_numbers = #tpu.dot_dimension_numbers<[1], [0], [0], [1], [0, 0, 1, 1], [], []>} : vector<128x8xf32>, vector<8x128xf32>, vector<128x128xf32> -> vector<128x128xf32>
    %34 = arith.addf %27, %33 : vector<128x128xf32>
    %c0_26 = arith.constant 0 : index
    %c0_27 = arith.constant 0 : index
    %c2 = arith.constant 2 : index
    %c0_28 = arith.constant 0 : index
    %35 = vector.load %arg9[%c0_26, %c0_27, %c2, %c0_28] : memref<2x12x16x128xf32, #tpu.memory_space<vmem>>, vector<2x8x8x128xf32>
    %36 = vector.shape_cast %35 : vector<2x8x8x128xf32> to vector<128x128xf32>
    %37 = vector.extract_strided_slice %36 {offsets = [0, 0], sizes = [128, 8], strides = [1, 1]} : vector<128x128xf32> to vector<128x8xf32>
    %c2_29 = arith.constant 2 : index
    %c0_30 = arith.constant 0 : index
    %c0_31 = arith.constant 0 : index
    %38 = vector.load %arg3[%c2_29, %c0_30, %c0_31] : memref<25x8x128xf32, #tpu.memory_space<vmem>>, vector<1x8x128xf32>
    %39 = vector.shape_cast %38 : vector<1x8x128xf32> to vector<8x128xf32>
    %cst_32 = arith.constant dense<0.000000e+00> : vector<128x128xf32>
    %40 = tpu.matmul %37, %39, %cst_32 {dimension_numbers = #tpu.dot_dimension_numbers<[1], [0], [0], [1], [0, 0, 1, 1], [], []>} : vector<128x8xf32>, vector<8x128xf32>, vector<128x128xf32> -> vector<128x128xf32>
    %41 = arith.addf %34, %40 : vector<128x128xf32>
    %c0_33 = arith.constant 0 : index
    %c0_34 = arith.constant 0 : index
    %c3 = arith.constant 3 : index
    %c0_35 = arith.constant 0 : index
    %42 = vector.load %arg9[%c0_33, %c0_34, %c3, %c0_35] : memref<2x12x16x128xf32, #tpu.memory_space<vmem>>, vector<2x8x8x128xf32>
    %43 = vector.shape_cast %42 : vector<2x8x8x128xf32> to vector<128x128xf32>
    %44 = vector.extract_strided_slice %43 {offsets = [0, 0], sizes = [128, 8], strides = [1, 1]} : vector<128x128xf32> to vector<128x8xf32>
    %c3_36 = arith.constant 3 : index
    %c0_37 = arith.constant 0 : index
    %c0_38 = arith.constant 0 : index
    %45 = vector.load %arg3[%c3_36, %c0_37, %c0_38] : memref<25x8x128xf32, #tpu.memory_space<vmem>>, vector<1x8x128xf32>
    %46 = vector.shape_cast %45 : vector<1x8x128xf32> to vector<8x128xf32>
    %cst_39 = arith.constant dense<0.000000e+00> : vector<128x128xf32>
    %47 = tpu.matmul %44, %46, %cst_39 {dimension_numbers = #tpu.dot_dimension_numbers<[1], [0], [0], [1], [0, 0, 1, 1], [], []>} : vector<128x8xf32>, vector<8x128xf32>, vector<128x128xf32> -> vector<128x128xf32>
    %48 = arith.addf %41, %47 : vector<128x128xf32>
    %c0_40 = arith.constant 0 : index
    %c0_41 = arith.constant 0 : index
    %c4 = arith.constant 4 : index
    %c0_42 = arith.constant 0 : index
    %49 = vector.load %arg9[%c0_40, %c0_41, %c4, %c0_42] : memref<2x12x16x128xf32, #tpu.memory_space<vmem>>, vector<2x8x8x128xf32>
    %50 = vector.shape_cast %49 : vector<2x8x8x128xf32> to vector<128x128xf32>
    %51 = vector.extract_strided_slice %50 {offsets = [0, 0], sizes = [128, 8], strides = [1, 1]} : vector<128x128xf32> to vector<128x8xf32>
    %c4_43 = arith.constant 4 : index
    %c0_44 = arith.constant 0 : index
    %c0_45 = arith.constant 0 : index
    %52 = vector.load %arg3[%c4_43, %c0_44, %c0_45] : memref<25x8x128xf32, #tpu.memory_space<vmem>>, vector<1x8x128xf32>
    %53 = vector.shape_cast %52 : vector<1x8x128xf32> to vector<8x128xf32>
    %cst_46 = arith.constant dense<0.000000e+00> : vector<128x128xf32>
    %54 = tpu.matmul %51, %53, %cst_46 {dimension_numbers = #tpu.dot_dimension_numbers<[1], [0], [0], [1], [0, 0, 1, 1], [], []>} : vector<128x8xf32>, vector<8x128xf32>, vector<128x128xf32> -> vector<128x128xf32>
    %55 = arith.addf %48, %54 : vector<128x128xf32>
    %c0_47 = arith.constant 0 : index
    %c1_48 = arith.constant 1 : index
    %c0_49 = arith.constant 0 : index
    %c0_50 = arith.constant 0 : index
    %56 = vector.load %arg9[%c0_47, %c1_48, %c0_49, %c0_50] : memref<2x12x16x128xf32, #tpu.memory_space<vmem>>, vector<2x8x8x128xf32>
    %57 = vector.shape_cast %56 : vector<2x8x8x128xf32> to vector<128x128xf32>
    %58 = vector.extract_strided_slice %57 {offsets = [0, 0], sizes = [128, 8], strides = [1, 1]} : vector<128x128xf32> to vector<128x8xf32>
    %c5 = arith.constant 5 : index
    %c0_51 = arith.constant 0 : index
    %c0_52 = arith.constant 0 : index
    %59 = vector.load %arg3[%c5, %c0_51, %c0_52] : memref<25x8x128xf32, #tpu.memory_space<vmem>>, vector<1x8x128xf32>
    %60 = vector.shape_cast %59 : vector<1x8x128xf32> to vector<8x128xf32>
    %cst_53 = arith.constant dense<0.000000e+00> : vector<128x128xf32>
    %61 = tpu.matmul %58, %60, %cst_53 {dimension_numbers = #tpu.dot_dimension_numbers<[1], [0], [0], [1], [0, 0, 1, 1], [], []>} : vector<128x8xf32>, vector<8x128xf32>, vector<128x128xf32> -> vector<128x128xf32>
    %62 = arith.addf %55, %61 : vector<128x128xf32>
    %c0_54 = arith.constant 0 : index
    %c1_55 = arith.constant 1 : index
    %c1_56 = arith.constant 1 : index
    %c0_57 = arith.constant 0 : index
    %63 = vector.load %arg9[%c0_54, %c1_55, %c1_56, %c0_57] : memref<2x12x16x128xf32, #tpu.memory_space<vmem>>, vector<2x8x8x128xf32>
    %64 = vector.shape_cast %63 : vector<2x8x8x128xf32> to vector<128x128xf32>
    %65 = vector.extract_strided_slice %64 {offsets = [0, 0], sizes = [128, 8], strides = [1, 1]} : vector<128x128xf32> to vector<128x8xf32>
    %c6 = arith.constant 6 : index
    %c0_58 = arith.constant 0 : index
    %c0_59 = arith.constant 0 : index
    %66 = vector.load %arg3[%c6, %c0_58, %c0_59] : memref<25x8x128xf32, #tpu.memory_space<vmem>>, vector<1x8x128xf32>
    %67 = vector.shape_cast %66 : vector<1x8x128xf32> to vector<8x128xf32>
    %cst_60 = arith.constant dense<0.000000e+00> : vector<128x128xf32>
    %68 = tpu.matmul %65, %67, %cst_60 {dimension_numbers = #tpu.dot_dimension_numbers<[1], [0], [0], [1], [0, 0, 1, 1], [], []>} : vector<128x8xf32>, vector<8x128xf32>, vector<128x128xf32> -> vector<128x128xf32>
    %69 = arith.addf %62, %68 : vector<128x128xf32>
    %c0_61 = arith.constant 0 : index
    %c1_62 = arith.constant 1 : index
    %c2_63 = arith.constant 2 : index
    %c0_64 = arith.constant 0 : index
    %70 = vector.load %arg9[%c0_61, %c1_62, %c2_63, %c0_64] : memref<2x12x16x128xf32, #tpu.memory_space<vmem>>, vector<2x8x8x128xf32>
    %71 = vector.shape_cast %70 : vector<2x8x8x128xf32> to vector<128x128xf32>
    %72 = vector.extract_strided_slice %71 {offsets = [0, 0], sizes = [128, 8], strides = [1, 1]} : vector<128x128xf32> to vector<128x8xf32>
    %c7 = arith.constant 7 : index
    %c0_65 = arith.constant 0 : index
    %c0_66 = arith.constant 0 : index
    %73 = vector.load %arg3[%c7, %c0_65, %c0_66] : memref<25x8x128xf32, #tpu.memory_space<vmem>>, vector<1x8x128xf32>
    %74 = vector.shape_cast %73 : vector<1x8x128xf32> to vector<8x128xf32>
    %cst_67 = arith.constant dense<0.000000e+00> : vector<128x128xf32>
    %75 = tpu.matmul %72, %74, %cst_67 {dimension_numbers = #tpu.dot_dimension_numbers<[1], [0], [0], [1], [0, 0, 1, 1], [], []>} : vector<128x8xf32>, vector<8x128xf32>, vector<128x128xf32> -> vector<128x128xf32>
    %76 = arith.addf %69, %75 : vector<128x128xf32>
    %c0_68 = arith.constant 0 : index
    %c1_69 = arith.constant 1 : index
    %c3_70 = arith.constant 3 : index
    %c0_71 = arith.constant 0 : index
    %77 = vector.load %arg9[%c0_68, %c1_69, %c3_70, %c0_71] : memref<2x12x16x128xf32, #tpu.memory_space<vmem>>, vector<2x8x8x128xf32>
    %78 = vector.shape_cast %77 : vector<2x8x8x128xf32> to vector<128x128xf32>
    %79 = vector.extract_strided_slice %78 {offsets = [0, 0], sizes = [128, 8], strides = [1, 1]} : vector<128x128xf32> to vector<128x8xf32>
    %c8 = arith.constant 8 : index
    %c0_72 = arith.constant 0 : index
    %c0_73 = arith.constant 0 : index
    %80 = vector.load %arg3[%c8, %c0_72, %c0_73] : memref<25x8x128xf32, #tpu.memory_space<vmem>>, vector<1x8x128xf32>
    %81 = vector.shape_cast %80 : vector<1x8x128xf32> to vector<8x128xf32>
    %cst_74 = arith.constant dense<0.000000e+00> : vector<128x128xf32>
    %82 = tpu.matmul %79, %81, %cst_74 {dimension_numbers = #tpu.dot_dimension_numbers<[1], [0], [0], [1], [0, 0, 1, 1], [], []>} : vector<128x8xf32>, vector<8x128xf32>, vector<128x128xf32> -> vector<128x128xf32>
    %83 = arith.addf %76, %82 : vector<128x128xf32>
    %c0_75 = arith.constant 0 : index
    %c1_76 = arith.constant 1 : index
    %c4_77 = arith.constant 4 : index
    %c0_78 = arith.constant 0 : index
    %84 = vector.load %arg9[%c0_75, %c1_76, %c4_77, %c0_78] : memref<2x12x16x128xf32, #tpu.memory_space<vmem>>, vector<2x8x8x128xf32>
    %85 = vector.shape_cast %84 : vector<2x8x8x128xf32> to vector<128x128xf32>
    %86 = vector.extract_strided_slice %85 {offsets = [0, 0], sizes = [128, 8], strides = [1, 1]} : vector<128x128xf32> to vector<128x8xf32>
    %c9 = arith.constant 9 : index
    %c0_79 = arith.constant 0 : index
    %c0_80 = arith.constant 0 : index
    %87 = vector.load %arg3[%c9, %c0_79, %c0_80] : memref<25x8x128xf32, #tpu.memory_space<vmem>>, vector<1x8x128xf32>
    %88 = vector.shape_cast %87 : vector<1x8x128xf32> to vector<8x128xf32>
    %cst_81 = arith.constant dense<0.000000e+00> : vector<128x128xf32>
    %89 = tpu.matmul %86, %88, %cst_81 {dimension_numbers = #tpu.dot_dimension_numbers<[1], [0], [0], [1], [0, 0, 1, 1], [], []>} : vector<128x8xf32>, vector<8x128xf32>, vector<128x128xf32> -> vector<128x128xf32>
    %90 = arith.addf %83, %89 : vector<128x128xf32>
    %c0_82 = arith.constant 0 : index
    %c2_83 = arith.constant 2 : index
    %c0_84 = arith.constant 0 : index
    %c0_85 = arith.constant 0 : index
    %91 = vector.load %arg9[%c0_82, %c2_83, %c0_84, %c0_85] : memref<2x12x16x128xf32, #tpu.memory_space<vmem>>, vector<2x8x8x128xf32>
    %92 = vector.shape_cast %91 : vector<2x8x8x128xf32> to vector<128x128xf32>
    %93 = vector.extract_strided_slice %92 {offsets = [0, 0], sizes = [128, 8], strides = [1, 1]} : vector<128x128xf32> to vector<128x8xf32>
    %c10 = arith.constant 10 : index
    %c0_86 = arith.constant 0 : index
    %c0_87 = arith.constant 0 : index
    %94 = vector.load %arg3[%c10, %c0_86, %c0_87] : memref<25x8x128xf32, #tpu.memory_space<vmem>>, vector<1x8x128xf32>
    %95 = vector.shape_cast %94 : vector<1x8x128xf32> to vector<8x128xf32>
    %cst_88 = arith.constant dense<0.000000e+00> : vector<128x128xf32>
    %96 = tpu.matmul %93, %95, %cst_88 {dimension_numbers = #tpu.dot_dimension_numbers<[1], [0], [0], [1], [0, 0, 1, 1], [], []>} : vector<128x8xf32>, vector<8x128xf32>, vector<128x128xf32> -> vector<128x128xf32>
    %97 = arith.addf %90, %96 : vector<128x128xf32>
    %c0_89 = arith.constant 0 : index
    %c2_90 = arith.constant 2 : index
    %c1_91 = arith.constant 1 : index
    %c0_92 = arith.constant 0 : index
    %98 = vector.load %arg9[%c0_89, %c2_90, %c1_91, %c0_92] : memref<2x12x16x128xf32, #tpu.memory_space<vmem>>, vector<2x8x8x128xf32>
    %99 = vector.shape_cast %98 : vector<2x8x8x128xf32> to vector<128x128xf32>
    %100 = vector.extract_strided_slice %99 {offsets = [0, 0], sizes = [128, 8], strides = [1, 1]} : vector<128x128xf32> to vector<128x8xf32>
    %c11 = arith.constant 11 : index
    %c0_93 = arith.constant 0 : index
    %c0_94 = arith.constant 0 : index
    %101 = vector.load %arg3[%c11, %c0_93, %c0_94] : memref<25x8x128xf32, #tpu.memory_space<vmem>>, vector<1x8x128xf32>
    %102 = vector.shape_cast %101 : vector<1x8x128xf32> to vector<8x128xf32>
    %cst_95 = arith.constant dense<0.000000e+00> : vector<128x128xf32>
    %103 = tpu.matmul %100, %102, %cst_95 {dimension_numbers = #tpu.dot_dimension_numbers<[1], [0], [0], [1], [0, 0, 1, 1], [], []>} : vector<128x8xf32>, vector<8x128xf32>, vector<128x128xf32> -> vector<128x128xf32>
    %104 = arith.addf %97, %103 : vector<128x128xf32>
    %c0_96 = arith.constant 0 : index
    %c2_97 = arith.constant 2 : index
    %c2_98 = arith.constant 2 : index
    %c0_99 = arith.constant 0 : index
    %105 = vector.load %arg9[%c0_96, %c2_97, %c2_98, %c0_99] : memref<2x12x16x128xf32, #tpu.memory_space<vmem>>, vector<2x8x8x128xf32>
    %106 = vector.shape_cast %105 : vector<2x8x8x128xf32> to vector<128x128xf32>
    %107 = vector.extract_strided_slice %106 {offsets = [0, 0], sizes = [128, 8], strides = [1, 1]} : vector<128x128xf32> to vector<128x8xf32>
    %c12 = arith.constant 12 : index
    %c0_100 = arith.constant 0 : index
    %c0_101 = arith.constant 0 : index
    %108 = vector.load %arg3[%c12, %c0_100, %c0_101] : memref<25x8x128xf32, #tpu.memory_space<vmem>>, vector<1x8x128xf32>
    %109 = vector.shape_cast %108 : vector<1x8x128xf32> to vector<8x128xf32>
    %cst_102 = arith.constant dense<0.000000e+00> : vector<128x128xf32>
    %110 = tpu.matmul %107, %109, %cst_102 {dimension_numbers = #tpu.dot_dimension_numbers<[1], [0], [0], [1], [0, 0, 1, 1], [], []>} : vector<128x8xf32>, vector<8x128xf32>, vector<128x128xf32> -> vector<128x128xf32>
    %111 = arith.addf %104, %110 : vector<128x128xf32>
    %c0_103 = arith.constant 0 : index
    %c2_104 = arith.constant 2 : index
    %c3_105 = arith.constant 3 : index
    %c0_106 = arith.constant 0 : index
    %112 = vector.load %arg9[%c0_103, %c2_104, %c3_105, %c0_106] : memref<2x12x16x128xf32, #tpu.memory_space<vmem>>, vector<2x8x8x128xf32>
    %113 = vector.shape_cast %112 : vector<2x8x8x128xf32> to vector<128x128xf32>
    %114 = vector.extract_strided_slice %113 {offsets = [0, 0], sizes = [128, 8], strides = [1, 1]} : vector<128x128xf32> to vector<128x8xf32>
    %c13 = arith.constant 13 : index
    %c0_107 = arith.constant 0 : index
    %c0_108 = arith.constant 0 : index
    %115 = vector.load %arg3[%c13, %c0_107, %c0_108] : memref<25x8x128xf32, #tpu.memory_space<vmem>>, vector<1x8x128xf32>
    %116 = vector.shape_cast %115 : vector<1x8x128xf32> to vector<8x128xf32>
    %cst_109 = arith.constant dense<0.000000e+00> : vector<128x128xf32>
    %117 = tpu.matmul %114, %116, %cst_109 {dimension_numbers = #tpu.dot_dimension_numbers<[1], [0], [0], [1], [0, 0, 1, 1], [], []>} : vector<128x8xf32>, vector<8x128xf32>, vector<128x128xf32> -> vector<128x128xf32>
    %118 = arith.addf %111, %117 : vector<128x128xf32>
    %c0_110 = arith.constant 0 : index
    %c2_111 = arith.constant 2 : index
    %c4_112 = arith.constant 4 : index
    %c0_113 = arith.constant 0 : index
    %119 = vector.load %arg9[%c0_110, %c2_111, %c4_112, %c0_113] : memref<2x12x16x128xf32, #tpu.memory_space<vmem>>, vector<2x8x8x128xf32>
    %120 = vector.shape_cast %119 : vector<2x8x8x128xf32> to vector<128x128xf32>
    %121 = vector.extract_strided_slice %120 {offsets = [0, 0], sizes = [128, 8], strides = [1, 1]} : vector<128x128xf32> to vector<128x8xf32>
    %c14 = arith.constant 14 : index
    %c0_114 = arith.constant 0 : index
    %c0_115 = arith.constant 0 : index
    %122 = vector.load %arg3[%c14, %c0_114, %c0_115] : memref<25x8x128xf32, #tpu.memory_space<vmem>>, vector<1x8x128xf32>
    %123 = vector.shape_cast %122 : vector<1x8x128xf32> to vector<8x128xf32>
    %cst_116 = arith.constant dense<0.000000e+00> : vector<128x128xf32>
    %124 = tpu.matmul %121, %123, %cst_116 {dimension_numbers = #tpu.dot_dimension_numbers<[1], [0], [0], [1], [0, 0, 1, 1], [], []>} : vector<128x8xf32>, vector<8x128xf32>, vector<128x128xf32> -> vector<128x128xf32>
    %125 = arith.addf %118, %124 : vector<128x128xf32>
    %c0_117 = arith.constant 0 : index
    %c3_118 = arith.constant 3 : index
    %c0_119 = arith.constant 0 : index
    %c0_120 = arith.constant 0 : index
    %126 = vector.load %arg9[%c0_117, %c3_118, %c0_119, %c0_120] : memref<2x12x16x128xf32, #tpu.memory_space<vmem>>, vector<2x8x8x128xf32>
    %127 = vector.shape_cast %126 : vector<2x8x8x128xf32> to vector<128x128xf32>
    %128 = vector.extract_strided_slice %127 {offsets = [0, 0], sizes = [128, 8], strides = [1, 1]} : vector<128x128xf32> to vector<128x8xf32>
    %c15 = arith.constant 15 : index
    %c0_121 = arith.constant 0 : index
    %c0_122 = arith.constant 0 : index
    %129 = vector.load %arg3[%c15, %c0_121, %c0_122] : memref<25x8x128xf32, #tpu.memory_space<vmem>>, vector<1x8x128xf32>
    %130 = vector.shape_cast %129 : vector<1x8x128xf32> to vector<8x128xf32>
    %cst_123 = arith.constant dense<0.000000e+00> : vector<128x128xf32>
    %131 = tpu.matmul %128, %130, %cst_123 {dimension_numbers = #tpu.dot_dimension_numbers<[1], [0], [0], [1], [0, 0, 1, 1], [], []>} : vector<128x8xf32>, vector<8x128xf32>, vector<128x128xf32> -> vector<128x128xf32>
    %132 = arith.addf %125, %131 : vector<128x128xf32>
    %c0_124 = arith.constant 0 : index
    %c3_125 = arith.constant 3 : index
    %c1_126 = arith.constant 1 : index
    %c0_127 = arith.constant 0 : index
    %133 = vector.load %arg9[%c0_124, %c3_125, %c1_126, %c0_127] : memref<2x12x16x128xf32, #tpu.memory_space<vmem>>, vector<2x8x8x128xf32>
    %134 = vector.shape_cast %133 : vector<2x8x8x128xf32> to vector<128x128xf32>
    %135 = vector.extract_strided_slice %134 {offsets = [0, 0], sizes = [128, 8], strides = [1, 1]} : vector<128x128xf32> to vector<128x8xf32>
    %c16 = arith.constant 16 : index
    %c0_128 = arith.constant 0 : index
    %c0_129 = arith.constant 0 : index
    %136 = vector.load %arg3[%c16, %c0_128, %c0_129] : memref<25x8x128xf32, #tpu.memory_space<vmem>>, vector<1x8x128xf32>
    %137 = vector.shape_cast %136 : vector<1x8x128xf32> to vector<8x128xf32>
    %cst_130 = arith.constant dense<0.000000e+00> : vector<128x128xf32>
    %138 = tpu.matmul %135, %137, %cst_130 {dimension_numbers = #tpu.dot_dimension_numbers<[1], [0], [0], [1], [0, 0, 1, 1], [], []>} : vector<128x8xf32>, vector<8x128xf32>, vector<128x128xf32> -> vector<128x128xf32>
    %139 = arith.addf %132, %138 : vector<128x128xf32>
    %c0_131 = arith.constant 0 : index
    %c3_132 = arith.constant 3 : index
    %c2_133 = arith.constant 2 : index
    %c0_134 = arith.constant 0 : index
    %140 = vector.load %arg9[%c0_131, %c3_132, %c2_133, %c0_134] : memref<2x12x16x128xf32, #tpu.memory_space<vmem>>, vector<2x8x8x128xf32>
    %141 = vector.shape_cast %140 : vector<2x8x8x128xf32> to vector<128x128xf32>
    %142 = vector.extract_strided_slice %141 {offsets = [0, 0], sizes = [128, 8], strides = [1, 1]} : vector<128x128xf32> to vector<128x8xf32>
    %c17 = arith.constant 17 : index
    %c0_135 = arith.constant 0 : index
    %c0_136 = arith.constant 0 : index
    %143 = vector.load %arg3[%c17, %c0_135, %c0_136] : memref<25x8x128xf32, #tpu.memory_space<vmem>>, vector<1x8x128xf32>
    %144 = vector.shape_cast %143 : vector<1x8x128xf32> to vector<8x128xf32>
    %cst_137 = arith.constant dense<0.000000e+00> : vector<128x128xf32>
    %145 = tpu.matmul %142, %144, %cst_137 {dimension_numbers = #tpu.dot_dimension_numbers<[1], [0], [0], [1], [0, 0, 1, 1], [], []>} : vector<128x8xf32>, vector<8x128xf32>, vector<128x128xf32> -> vector<128x128xf32>
    %146 = arith.addf %139, %145 : vector<128x128xf32>
    %c0_138 = arith.constant 0 : index
    %c3_139 = arith.constant 3 : index
    %c3_140 = arith.constant 3 : index
    %c0_141 = arith.constant 0 : index
    %147 = vector.load %arg9[%c0_138, %c3_139, %c3_140, %c0_141] : memref<2x12x16x128xf32, #tpu.memory_space<vmem>>, vector<2x8x8x128xf32>
    %148 = vector.shape_cast %147 : vector<2x8x8x128xf32> to vector<128x128xf32>
    %149 = vector.extract_strided_slice %148 {offsets = [0, 0], sizes = [128, 8], strides = [1, 1]} : vector<128x128xf32> to vector<128x8xf32>
    %c18 = arith.constant 18 : index
    %c0_142 = arith.constant 0 : index
    %c0_143 = arith.constant 0 : index
    %150 = vector.load %arg3[%c18, %c0_142, %c0_143] : memref<25x8x128xf32, #tpu.memory_space<vmem>>, vector<1x8x128xf32>
    %151 = vector.shape_cast %150 : vector<1x8x128xf32> to vector<8x128xf32>
    %cst_144 = arith.constant dense<0.000000e+00> : vector<128x128xf32>
    %152 = tpu.matmul %149, %151, %cst_144 {dimension_numbers = #tpu.dot_dimension_numbers<[1], [0], [0], [1], [0, 0, 1, 1], [], []>} : vector<128x8xf32>, vector<8x128xf32>, vector<128x128xf32> -> vector<128x128xf32>
    %153 = arith.addf %146, %152 : vector<128x128xf32>
    %c0_145 = arith.constant 0 : index
    %c3_146 = arith.constant 3 : index
    %c4_147 = arith.constant 4 : index
    %c0_148 = arith.constant 0 : index
    %154 = vector.load %arg9[%c0_145, %c3_146, %c4_147, %c0_148] : memref<2x12x16x128xf32, #tpu.memory_space<vmem>>, vector<2x8x8x128xf32>
    %155 = vector.shape_cast %154 : vector<2x8x8x128xf32> to vector<128x128xf32>
    %156 = vector.extract_strided_slice %155 {offsets = [0, 0], sizes = [128, 8], strides = [1, 1]} : vector<128x128xf32> to vector<128x8xf32>
    %c19 = arith.constant 19 : index
    %c0_149 = arith.constant 0 : index
    %c0_150 = arith.constant 0 : index
    %157 = vector.load %arg3[%c19, %c0_149, %c0_150] : memref<25x8x128xf32, #tpu.memory_space<vmem>>, vector<1x8x128xf32>
    %158 = vector.shape_cast %157 : vector<1x8x128xf32> to vector<8x128xf32>
    %cst_151 = arith.constant dense<0.000000e+00> : vector<128x128xf32>
    %159 = tpu.matmul %156, %158, %cst_151 {dimension_numbers = #tpu.dot_dimension_numbers<[1], [0], [0], [1], [0, 0, 1, 1], [], []>} : vector<128x8xf32>, vector<8x128xf32>, vector<128x128xf32> -> vector<128x128xf32>
    %160 = arith.addf %153, %159 : vector<128x128xf32>
    %c0_152 = arith.constant 0 : index
    %c4_153 = arith.constant 4 : index
    %c0_154 = arith.constant 0 : index
    %c0_155 = arith.constant 0 : index
    %161 = vector.load %arg9[%c0_152, %c4_153, %c0_154, %c0_155] : memref<2x12x16x128xf32, #tpu.memory_space<vmem>>, vector<2x8x8x128xf32>
    %162 = vector.shape_cast %161 : vector<2x8x8x128xf32> to vector<128x128xf32>
    %163 = vector.extract_strided_slice %162 {offsets = [0, 0], sizes = [128, 8], strides = [1, 1]} : vector<128x128xf32> to vector<128x8xf32>
    %c20 = arith.constant 20 : index
    %c0_156 = arith.constant 0 : index
    %c0_157 = arith.constant 0 : index
    %164 = vector.load %arg3[%c20, %c0_156, %c0_157] : memref<25x8x128xf32, #tpu.memory_space<vmem>>, vector<1x8x128xf32>
    %165 = vector.shape_cast %164 : vector<1x8x128xf32> to vector<8x128xf32>
    %cst_158 = arith.constant dense<0.000000e+00> : vector<128x128xf32>
    %166 = tpu.matmul %163, %165, %cst_158 {dimension_numbers = #tpu.dot_dimension_numbers<[1], [0], [0], [1], [0, 0, 1, 1], [], []>} : vector<128x8xf32>, vector<8x128xf32>, vector<128x128xf32> -> vector<128x128xf32>
    %167 = arith.addf %160, %166 : vector<128x128xf32>
    %c0_159 = arith.constant 0 : index
    %c4_160 = arith.constant 4 : index
    %c1_161 = arith.constant 1 : index
    %c0_162 = arith.constant 0 : index
    %168 = vector.load %arg9[%c0_159, %c4_160, %c1_161, %c0_162] : memref<2x12x16x128xf32, #tpu.memory_space<vmem>>, vector<2x8x8x128xf32>
    %169 = vector.shape_cast %168 : vector<2x8x8x128xf32> to vector<128x128xf32>
    %170 = vector.extract_strided_slice %169 {offsets = [0, 0], sizes = [128, 8], strides = [1, 1]} : vector<128x128xf32> to vector<128x8xf32>
    %c21 = arith.constant 21 : index
    %c0_163 = arith.constant 0 : index
    %c0_164 = arith.constant 0 : index
    %171 = vector.load %arg3[%c21, %c0_163, %c0_164] : memref<25x8x128xf32, #tpu.memory_space<vmem>>, vector<1x8x128xf32>
    %172 = vector.shape_cast %171 : vector<1x8x128xf32> to vector<8x128xf32>
    %cst_165 = arith.constant dense<0.000000e+00> : vector<128x128xf32>
    %173 = tpu.matmul %170, %172, %cst_165 {dimension_numbers = #tpu.dot_dimension_numbers<[1], [0], [0], [1], [0, 0, 1, 1], [], []>} : vector<128x8xf32>, vector<8x128xf32>, vector<128x128xf32> -> vector<128x128xf32>
    %174 = arith.addf %167, %173 : vector<128x128xf32>
    %c0_166 = arith.constant 0 : index
    %c4_167 = arith.constant 4 : index
    %c2_168 = arith.constant 2 : index
    %c0_169 = arith.constant 0 : index
    %175 = vector.load %arg9[%c0_166, %c4_167, %c2_168, %c0_169] : memref<2x12x16x128xf32, #tpu.memory_space<vmem>>, vector<2x8x8x128xf32>
    %176 = vector.shape_cast %175 : vector<2x8x8x128xf32> to vector<128x128xf32>
    %177 = vector.extract_strided_slice %176 {offsets = [0, 0], sizes = [128, 8], strides = [1, 1]} : vector<128x128xf32> to vector<128x8xf32>
    %c22 = arith.constant 22 : index
    %c0_170 = arith.constant 0 : index
    %c0_171 = arith.constant 0 : index
    %178 = vector.load %arg3[%c22, %c0_170, %c0_171] : memref<25x8x128xf32, #tpu.memory_space<vmem>>, vector<1x8x128xf32>
    %179 = vector.shape_cast %178 : vector<1x8x128xf32> to vector<8x128xf32>
    %cst_172 = arith.constant dense<0.000000e+00> : vector<128x128xf32>
    %180 = tpu.matmul %177, %179, %cst_172 {dimension_numbers = #tpu.dot_dimension_numbers<[1], [0], [0], [1], [0, 0, 1, 1], [], []>} : vector<128x8xf32>, vector<8x128xf32>, vector<128x128xf32> -> vector<128x128xf32>
    %181 = arith.addf %174, %180 : vector<128x128xf32>
    %c0_173 = arith.constant 0 : index
    %c4_174 = arith.constant 4 : index
    %c3_175 = arith.constant 3 : index
    %c0_176 = arith.constant 0 : index
    %182 = vector.load %arg9[%c0_173, %c4_174, %c3_175, %c0_176] : memref<2x12x16x128xf32, #tpu.memory_space<vmem>>, vector<2x8x8x128xf32>
    %183 = vector.shape_cast %182 : vector<2x8x8x128xf32> to vector<128x128xf32>
    %184 = vector.extract_strided_slice %183 {offsets = [0, 0], sizes = [128, 8], strides = [1, 1]} : vector<128x128xf32> to vector<128x8xf32>
    %c23 = arith.constant 23 : index
    %c0_177 = arith.constant 0 : index
    %c0_178 = arith.constant 0 : index
    %185 = vector.load %arg3[%c23, %c0_177, %c0_178] : memref<25x8x128xf32, #tpu.memory_space<vmem>>, vector<1x8x128xf32>
    %186 = vector.shape_cast %185 : vector<1x8x128xf32> to vector<8x128xf32>
    %cst_179 = arith.constant dense<0.000000e+00> : vector<128x128xf32>
    %187 = tpu.matmul %184, %186, %cst_179 {dimension_numbers = #tpu.dot_dimension_numbers<[1], [0], [0], [1], [0, 0, 1, 1], [], []>} : vector<128x8xf32>, vector<8x128xf32>, vector<128x128xf32> -> vector<128x128xf32>
    %188 = arith.addf %181, %187 : vector<128x128xf32>
    %c0_180 = arith.constant 0 : index
    %c4_181 = arith.constant 4 : index
    %c4_182 = arith.constant 4 : index
    %c0_183 = arith.constant 0 : index
    %189 = vector.load %arg9[%c0_180, %c4_181, %c4_182, %c0_183] : memref<2x12x16x128xf32, #tpu.memory_space<vmem>>, vector<2x8x8x128xf32>
    %190 = vector.shape_cast %189 : vector<2x8x8x128xf32> to vector<128x128xf32>
    %191 = vector.extract_strided_slice %190 {offsets = [0, 0], sizes = [128, 8], strides = [1, 1]} : vector<128x128xf32> to vector<128x8xf32>
    %c24 = arith.constant 24 : index
    %c0_184 = arith.constant 0 : index
    %c0_185 = arith.constant 0 : index
    %192 = vector.load %arg3[%c24, %c0_184, %c0_185] : memref<25x8x128xf32, #tpu.memory_space<vmem>>, vector<1x8x128xf32>
    %193 = vector.shape_cast %192 : vector<1x8x128xf32> to vector<8x128xf32>
    %cst_186 = arith.constant dense<0.000000e+00> : vector<128x128xf32>
    %194 = tpu.matmul %191, %193, %cst_186 {dimension_numbers = #tpu.dot_dimension_numbers<[1], [0], [0], [1], [0, 0, 1, 1], [], []>} : vector<128x8xf32>, vector<8x128xf32>, vector<128x128xf32> -> vector<128x128xf32>
    %195 = arith.addf %188, %194 : vector<128x128xf32>
    %c1_187 = arith.constant 1 : index
    %c0_188 = arith.constant 0 : index
    %196 = vector.load %arg7[%c1_187, %c0_188] : memref<8x128xf32, #tpu.memory_space<vmem>>, vector<1x128xf32>
    %197 = vector.broadcast %196 : vector<1x128xf32> to vector<128x128xf32>
    %198 = arith.addf %195, %197 : vector<128x128xf32>
    %cst_189 = arith.constant 0.000000e+00 : f32
    %199 = vector.broadcast %cst_189 : f32 to vector<128x128xf32>
    %200 = arith.maximumf %198, %199 : vector<128x128xf32>
    %201 = vector.shape_cast %200 : vector<128x128xf32> to vector<2x8x8x128xf32>
    %c0_190 = arith.constant 0 : index
    %c0_191 = arith.constant 0 : index
    %c0_192 = arith.constant 0 : index
    %c0_193 = arith.constant 0 : index
    %202 = vector.load %arg10[%c0_190, %c0_191, %c0_192, %c0_193] : memref<2x8x8x128xf32, #tpu.memory_space<vmem>>, vector<2x8x8x128xf32>
    tpu.vector_store %arg10[%c0_190, %c0_191, %c0_192, %c0_193], %201 {strides = array<i32>} : memref<2x8x8x128xf32, #tpu.memory_space<vmem>>, vector<2x8x8x128xf32>,
    %cst_194 = arith.constant 0.000000e+00 : f32
    %203 = vector.broadcast %cst_194 : f32 to vector<2x128xf32>
    %c0_195 = arith.constant 0 : index
    %c0_196 = arith.constant 0 : index
    %c0_197 = arith.constant 0 : index
    %c0_198 = arith.constant 0 : index
    %204 = vector.load %arg10[%c0_195, %c0_196, %c0_197, %c0_198] : memref<2x8x8x128xf32, #tpu.memory_space<vmem>>, vector<2x1x1x128xf32>
    %205 = vector.shape_cast %204 : vector<2x1x1x128xf32> to vector<2x128xf32>
    %c0_199 = arith.constant 0 : index
    %c0_200 = arith.constant 0 : index
    %c1_201 = arith.constant 1 : index
    %c0_202 = arith.constant 0 : index
    %206 = vector.load %arg10[%c0_199, %c0_200, %c1_201, %c0_202] : memref<2x8x8x128xf32, #tpu.memory_space<vmem>>, vector<2x1x1x128xf32>
    %207 = vector.shape_cast %206 : vector<2x1x1x128xf32> to vector<2x128xf32>
    %c0_203 = arith.constant 0 : index
    %c1_204 = arith.constant 1 : index
    %c0_205 = arith.constant 0 : index
    %c0_206 = arith.constant 0 : index
    %208 = vector.load %arg10[%c0_203, %c1_204, %c0_205, %c0_206] : memref<2x8x8x128xf32, #tpu.memory_space<vmem>>, vector<2x1x1x128xf32>
    %209 = vector.shape_cast %208 : vector<2x1x1x128xf32> to vector<2x128xf32>
    %c0_207 = arith.constant 0 : index
    %c1_208 = arith.constant 1 : index
    %c1_209 = arith.constant 1 : index
    %c0_210 = arith.constant 0 : index
    %210 = vector.load %arg10[%c0_207, %c1_208, %c1_209, %c0_210] : memref<2x8x8x128xf32, #tpu.memory_space<vmem>>, vector<2x1x1x128xf32>
    %211 = vector.shape_cast %210 : vector<2x1x1x128xf32> to vector<2x128xf32>
    %212 = arith.maximumf %205, %207 : vector<2x128xf32>
    %213 = arith.maximumf %209, %211 : vector<2x128xf32>
    %214 = arith.maximumf %212, %213 : vector<2x128xf32>
    %215 = vector.extract_strided_slice %214 {offsets = [0, 0], sizes = [2, 16], strides = [1, 1]} : vector<2x128xf32> to vector<2x16xf32>
    %c0_211 = arith.constant 0 : index
    %c0_212 = arith.constant 0 : index
    %c0_213 = arith.constant 0 : index
    %216 = vector.load %arg4[%c0_211, %c0_212, %c0_213] : memref<16x16x128xf32, #tpu.memory_space<vmem>>, vector<1x16x128xf32>
    %217 = vector.shape_cast %216 : vector<1x16x128xf32> to vector<16x128xf32>
    %cst_214 = arith.constant dense<0.000000e+00> : vector<2x128xf32>
    %218 = tpu.matmul %215, %217, %cst_214 {dimension_numbers = #tpu.dot_dimension_numbers<[1], [0], [0], [1], [0, 0, 1, 1], [], []>} : vector<2x16xf32>, vector<16x128xf32>, vector<2x128xf32> -> vector<2x128xf32>
    %219 = arith.addf %203, %218 : vector<2x128xf32>
    %c0_215 = arith.constant 0 : index
    %c0_216 = arith.constant 0 : index
    %c2_217 = arith.constant 2 : index
    %c0_218 = arith.constant 0 : index
    %220 = vector.load %arg10[%c0_215, %c0_216, %c2_217, %c0_218] : memref<2x8x8x128xf32, #tpu.memory_space<vmem>>, vector<2x1x1x128xf32>
    %221 = vector.shape_cast %220 : vector<2x1x1x128xf32> to vector<2x128xf32>
    %c0_219 = arith.constant 0 : index
    %c0_220 = arith.constant 0 : index
    %c3_221 = arith.constant 3 : index
    %c0_222 = arith.constant 0 : index
    %222 = vector.load %arg10[%c0_219, %c0_220, %c3_221, %c0_222] : memref<2x8x8x128xf32, #tpu.memory_space<vmem>>, vector<2x1x1x128xf32>
    %223 = vector.shape_cast %222 : vector<2x1x1x128xf32> to vector<2x128xf32>
    %c0_223 = arith.constant 0 : index
    %c1_224 = arith.constant 1 : index
    %c2_225 = arith.constant 2 : index
    %c0_226 = arith.constant 0 : index
    %224 = vector.load %arg10[%c0_223, %c1_224, %c2_225, %c0_226] : memref<2x8x8x128xf32, #tpu.memory_space<vmem>>, vector<2x1x1x128xf32>
    %225 = vector.shape_cast %224 : vector<2x1x1x128xf32> to vector<2x128xf32>
    %c0_227 = arith.constant 0 : index
    %c1_228 = arith.constant 1 : index
    %c3_229 = arith.constant 3 : index
    %c0_230 = arith.constant 0 : index
    %226 = vector.load %arg10[%c0_227, %c1_228, %c3_229, %c0_230] : memref<2x8x8x128xf32, #tpu.memory_space<vmem>>, vector<2x1x1x128xf32>
    %227 = vector.shape_cast %226 : vector<2x1x1x128xf32> to vector<2x128xf32>
    %228 = arith.maximumf %221, %223 : vector<2x128xf32>
    %229 = arith.maximumf %225, %227 : vector<2x128xf32>
    %230 = arith.maximumf %228, %229 : vector<2x128xf32>
    %231 = vector.extract_strided_slice %230 {offsets = [0, 0], sizes = [2, 16], strides = [1, 1]} : vector<2x128xf32> to vector<2x16xf32>
    %c1_231 = arith.constant 1 : index
    %c0_232 = arith.constant 0 : index
    %c0_233 = arith.constant 0 : index
    %232 = vector.load %arg4[%c1_231, %c0_232, %c0_233] : memref<16x16x128xf32, #tpu.memory_space<vmem>>, vector<1x16x128xf32>
    %233 = vector.shape_cast %232 : vector<1x16x128xf32> to vector<16x128xf32>
    %cst_234 = arith.constant dense<0.000000e+00> : vector<2x128xf32>
    %234 = tpu.matmul %231, %233, %cst_234 {dimension_numbers = #tpu.dot_dimension_numbers<[1], [0], [0], [1], [0, 0, 1, 1], [], []>} : vector<2x16xf32>, vector<16x128xf32>, vector<2x128xf32> -> vector<2x128xf32>
    %235 = arith.addf %219, %234 : vector<2x128xf32>
    %c0_235 = arith.constant 0 : index
    %c0_236 = arith.constant 0 : index
    %c4_237 = arith.constant 4 : index
    %c0_238 = arith.constant 0 : index
    %236 = vector.load %arg10[%c0_235, %c0_236, %c4_237, %c0_238] : memref<2x8x8x128xf32, #tpu.memory_space<vmem>>, vector<2x1x1x128xf32>
    %237 = vector.shape_cast %236 : vector<2x1x1x128xf32> to vector<2x128xf32>
    %c0_239 = arith.constant 0 : index
    %c0_240 = arith.constant 0 : index
    %c5_241 = arith.constant 5 : index
    %c0_242 = arith.constant 0 : index
    %238 = vector.load %arg10[%c0_239, %c0_240, %c5_241, %c0_242] : memref<2x8x8x128xf32, #tpu.memory_space<vmem>>, vector<2x1x1x128xf32>
    %239 = vector.shape_cast %238 : vector<2x1x1x128xf32> to vector<2x128xf32>
    %c0_243 = arith.constant 0 : index
    %c1_244 = arith.constant 1 : index
    %c4_245 = arith.constant 4 : index
    %c0_246 = arith.constant 0 : index
    %240 = vector.load %arg10[%c0_243, %c1_244, %c4_245, %c0_246] : memref<2x8x8x128xf32, #tpu.memory_space<vmem>>, vector<2x1x1x128xf32>
    %241 = vector.shape_cast %240 : vector<2x1x1x128xf32> to vector<2x128xf32>
    %c0_247 = arith.constant 0 : index
    %c1_248 = arith.constant 1 : index
    %c5_249 = arith.constant 5 : index
    %c0_250 = arith.constant 0 : index
    %242 = vector.load %arg10[%c0_247, %c1_248, %c5_249, %c0_250] : memref<2x8x8x128xf32, #tpu.memory_space<vmem>>, vector<2x1x1x128xf32>
    %243 = vector.shape_cast %242 : vector<2x1x1x128xf32> to vector<2x128xf32>
    %244 = arith.maximumf %237, %239 : vector<2x128xf32>
    %245 = arith.maximumf %241, %243 : vector<2x128xf32>
    %246 = arith.maximumf %244, %245 : vector<2x128xf32>
    %247 = vector.extract_strided_slice %246 {offsets = [0, 0], sizes = [2, 16], strides = [1, 1]} : vector<2x128xf32> to vector<2x16xf32>
    %c2_251 = arith.constant 2 : index
    %c0_252 = arith.constant 0 : index
    %c0_253 = arith.constant 0 : index
    %248 = vector.load %arg4[%c2_251, %c0_252, %c0_253] : memref<16x16x128xf32, #tpu.memory_space<vmem>>, vector<1x16x128xf32>
    %249 = vector.shape_cast %248 : vector<1x16x128xf32> to vector<16x128xf32>
    %cst_254 = arith.constant dense<0.000000e+00> : vector<2x128xf32>
    %250 = tpu.matmul %247, %249, %cst_254 {dimension_numbers = #tpu.dot_dimension_numbers<[1], [0], [0], [1], [0, 0, 1, 1], [], []>} : vector<2x16xf32>, vector<16x128xf32>, vector<2x128xf32> -> vector<2x128xf32>
    %251 = arith.addf %235, %250 : vector<2x128xf32>
    %c0_255 = arith.constant 0 : index
    %c0_256 = arith.constant 0 : index
    %c6_257 = arith.constant 6 : index
    %c0_258 = arith.constant 0 : index
    %252 = vector.load %arg10[%c0_255, %c0_256, %c6_257, %c0_258] : memref<2x8x8x128xf32, #tpu.memory_space<vmem>>, vector<2x1x1x128xf32>
    %253 = vector.shape_cast %252 : vector<2x1x1x128xf32> to vector<2x128xf32>
    %c0_259 = arith.constant 0 : index
    %c0_260 = arith.constant 0 : index
    %c7_261 = arith.constant 7 : index
    %c0_262 = arith.constant 0 : index
    %254 = vector.load %arg10[%c0_259, %c0_260, %c7_261, %c0_262] : memref<2x8x8x128xf32, #tpu.memory_space<vmem>>, vector<2x1x1x128xf32>
    %255 = vector.shape_cast %254 : vector<2x1x1x128xf32> to vector<2x128xf32>
    %c0_263 = arith.constant 0 : index
    %c1_264 = arith.constant 1 : index
    %c6_265 = arith.constant 6 : index
    %c0_266 = arith.constant 0 : index
    %256 = vector.load %arg10[%c0_263, %c1_264, %c6_265, %c0_266] : memref<2x8x8x128xf32, #tpu.memory_space<vmem>>, vector<2x1x1x128xf32>
    %257 = vector.shape_cast %256 : vector<2x1x1x128xf32> to vector<2x128xf32>
    %c0_267 = arith.constant 0 : index
    %c1_268 = arith.constant 1 : index
    %c7_269 = arith.constant 7 : index
    %c0_270 = arith.constant 0 : index
    %258 = vector.load %arg10[%c0_267, %c1_268, %c7_269, %c0_270] : memref<2x8x8x128xf32, #tpu.memory_space<vmem>>, vector<2x1x1x128xf32>
    %259 = vector.shape_cast %258 : vector<2x1x1x128xf32> to vector<2x128xf32>
    %260 = arith.maximumf %253, %255 : vector<2x128xf32>
    %261 = arith.maximumf %257, %259 : vector<2x128xf32>
    %262 = arith.maximumf %260, %261 : vector<2x128xf32>
    %263 = vector.extract_strided_slice %262 {offsets = [0, 0], sizes = [2, 16], strides = [1, 1]} : vector<2x128xf32> to vector<2x16xf32>
    %c3_271 = arith.constant 3 : index
    %c0_272 = arith.constant 0 : index
    %c0_273 = arith.constant 0 : index
    %264 = vector.load %arg4[%c3_271, %c0_272, %c0_273] : memref<16x16x128xf32, #tpu.memory_space<vmem>>, vector<1x16x128xf32>
    %265 = vector.shape_cast %264 : vector<1x16x128xf32> to vector<16x128xf32>
    %cst_274 = arith.constant dense<0.000000e+00> : vector<2x128xf32>
    %266 = tpu.matmul %263, %265, %cst_274 {dimension_numbers = #tpu.dot_dimension_numbers<[1], [0], [0], [1], [0, 0, 1, 1], [], []>} : vector<2x16xf32>, vector<16x128xf32>, vector<2x128xf32> -> vector<2x128xf32>
    %267 = arith.addf %251, %266 : vector<2x128xf32>
    %c0_275 = arith.constant 0 : index
    %c2_276 = arith.constant 2 : index
    %c0_277 = arith.constant 0 : index
    %c0_278 = arith.constant 0 : index
    %268 = vector.load %arg10[%c0_275, %c2_276, %c0_277, %c0_278] : memref<2x8x8x128xf32, #tpu.memory_space<vmem>>, vector<2x1x1x128xf32>
    %269 = vector.shape_cast %268 : vector<2x1x1x128xf32> to vector<2x128xf32>
    %c0_279 = arith.constant 0 : index
    %c2_280 = arith.constant 2 : index
    %c1_281 = arith.constant 1 : index
    %c0_282 = arith.constant 0 : index
    %270 = vector.load %arg10[%c0_279, %c2_280, %c1_281, %c0_282] : memref<2x8x8x128xf32, #tpu.memory_space<vmem>>, vector<2x1x1x128xf32>
    %271 = vector.shape_cast %270 : vector<2x1x1x128xf32> to vector<2x128xf32>
    %c0_283 = arith.constant 0 : index
    %c3_284 = arith.constant 3 : index
    %c0_285 = arith.constant 0 : index
    %c0_286 = arith.constant 0 : index
    %272 = vector.load %arg10[%c0_283, %c3_284, %c0_285, %c0_286] : memref<2x8x8x128xf32, #tpu.memory_space<vmem>>, vector<2x1x1x128xf32>
    %273 = vector.shape_cast %272 : vector<2x1x1x128xf32> to vector<2x128xf32>
    %c0_287 = arith.constant 0 : index
    %c3_288 = arith.constant 3 : index
    %c1_289 = arith.constant 1 : index
    %c0_290 = arith.constant 0 : index
    %274 = vector.load %arg10[%c0_287, %c3_288, %c1_289, %c0_290] : memref<2x8x8x128xf32, #tpu.memory_space<vmem>>, vector<2x1x1x128xf32>
    %275 = vector.shape_cast %274 : vector<2x1x1x128xf32> to vector<2x128xf32>
    %276 = arith.maximumf %269, %271 : vector<2x128xf32>
    %277 = arith.maximumf %273, %275 : vector<2x128xf32>
    %278 = arith.maximumf %276, %277 : vector<2x128xf32>
    %279 = vector.extract_strided_slice %278 {offsets = [0, 0], sizes = [2, 16], strides = [1, 1]} : vector<2x128xf32> to vector<2x16xf32>
    %c4_291 = arith.constant 4 : index
    %c0_292 = arith.constant 0 : index
    %c0_293 = arith.constant 0 : index
    %280 = vector.load %arg4[%c4_291, %c0_292, %c0_293] : memref<16x16x128xf32, #tpu.memory_space<vmem>>, vector<1x16x128xf32>
    %281 = vector.shape_cast %280 : vector<1x16x128xf32> to vector<16x128xf32>
    %cst_294 = arith.constant dense<0.000000e+00> : vector<2x128xf32>
    %282 = tpu.matmul %279, %281, %cst_294 {dimension_numbers = #tpu.dot_dimension_numbers<[1], [0], [0], [1], [0, 0, 1, 1], [], []>} : vector<2x16xf32>, vector<16x128xf32>, vector<2x128xf32> -> vector<2x128xf32>
    %283 = arith.addf %267, %282 : vector<2x128xf32>
    %c0_295 = arith.constant 0 : index
    %c2_296 = arith.constant 2 : index
    %c2_297 = arith.constant 2 : index
    %c0_298 = arith.constant 0 : index
    %284 = vector.load %arg10[%c0_295, %c2_296, %c2_297, %c0_298] : memref<2x8x8x128xf32, #tpu.memory_space<vmem>>, vector<2x1x1x128xf32>
    %285 = vector.shape_cast %284 : vector<2x1x1x128xf32> to vector<2x128xf32>
    %c0_299 = arith.constant 0 : index
    %c2_300 = arith.constant 2 : index
    %c3_301 = arith.constant 3 : index
    %c0_302 = arith.constant 0 : index
    %286 = vector.load %arg10[%c0_299, %c2_300, %c3_301, %c0_302] : memref<2x8x8x128xf32, #tpu.memory_space<vmem>>, vector<2x1x1x128xf32>
    %287 = vector.shape_cast %286 : vector<2x1x1x128xf32> to vector<2x128xf32>
    %c0_303 = arith.constant 0 : index
    %c3_304 = arith.constant 3 : index
    %c2_305 = arith.constant 2 : index
    %c0_306 = arith.constant 0 : index
    %288 = vector.load %arg10[%c0_303, %c3_304, %c2_305, %c0_306] : memref<2x8x8x128xf32, #tpu.memory_space<vmem>>, vector<2x1x1x128xf32>
    %289 = vector.shape_cast %288 : vector<2x1x1x128xf32> to vector<2x128xf32>
    %c0_307 = arith.constant 0 : index
    %c3_308 = arith.constant 3 : index
    %c3_309 = arith.constant 3 : index
    %c0_310 = arith.constant 0 : index
    %290 = vector.load %arg10[%c0_307, %c3_308, %c3_309, %c0_310] : memref<2x8x8x128xf32, #tpu.memory_space<vmem>>, vector<2x1x1x128xf32>
    %291 = vector.shape_cast %290 : vector<2x1x1x128xf32> to vector<2x128xf32>
    %292 = arith.maximumf %285, %287 : vector<2x128xf32>
    %293 = arith.maximumf %289, %291 : vector<2x128xf32>
    %294 = arith.maximumf %292, %293 : vector<2x128xf32>
    %295 = vector.extract_strided_slice %294 {offsets = [0, 0], sizes = [2, 16], strides = [1, 1]} : vector<2x128xf32> to vector<2x16xf32>
    %c5_311 = arith.constant 5 : index
    %c0_312 = arith.constant 0 : index
    %c0_313 = arith.constant 0 : index
    %296 = vector.load %arg4[%c5_311, %c0_312, %c0_313] : memref<16x16x128xf32, #tpu.memory_space<vmem>>, vector<1x16x128xf32>
    %297 = vector.shape_cast %296 : vector<1x16x128xf32> to vector<16x128xf32>
    %cst_314 = arith.constant dense<0.000000e+00> : vector<2x128xf32>
    %298 = tpu.matmul %295, %297, %cst_314 {dimension_numbers = #tpu.dot_dimension_numbers<[1], [0], [0], [1], [0, 0, 1, 1], [], []>} : vector<2x16xf32>, vector<16x128xf32>, vector<2x128xf32> -> vector<2x128xf32>
    %299 = arith.addf %283, %298 : vector<2x128xf32>
    %c0_315 = arith.constant 0 : index
    %c2_316 = arith.constant 2 : index
    %c4_317 = arith.constant 4 : index
    %c0_318 = arith.constant 0 : index
    %300 = vector.load %arg10[%c0_315, %c2_316, %c4_317, %c0_318] : memref<2x8x8x128xf32, #tpu.memory_space<vmem>>, vector<2x1x1x128xf32>
    %301 = vector.shape_cast %300 : vector<2x1x1x128xf32> to vector<2x128xf32>
    %c0_319 = arith.constant 0 : index
    %c2_320 = arith.constant 2 : index
    %c5_321 = arith.constant 5 : index
    %c0_322 = arith.constant 0 : index
    %302 = vector.load %arg10[%c0_319, %c2_320, %c5_321, %c0_322] : memref<2x8x8x128xf32, #tpu.memory_space<vmem>>, vector<2x1x1x128xf32>
    %303 = vector.shape_cast %302 : vector<2x1x1x128xf32> to vector<2x128xf32>
    %c0_323 = arith.constant 0 : index
    %c3_324 = arith.constant 3 : index
    %c4_325 = arith.constant 4 : index
    %c0_326 = arith.constant 0 : index
    %304 = vector.load %arg10[%c0_323, %c3_324, %c4_325, %c0_326] : memref<2x8x8x128xf32, #tpu.memory_space<vmem>>, vector<2x1x1x128xf32>
    %305 = vector.shape_cast %304 : vector<2x1x1x128xf32> to vector<2x128xf32>
    %c0_327 = arith.constant 0 : index
    %c3_328 = arith.constant 3 : index
    %c5_329 = arith.constant 5 : index
    %c0_330 = arith.constant 0 : index
    %306 = vector.load %arg10[%c0_327, %c3_328, %c5_329, %c0_330] : memref<2x8x8x128xf32, #tpu.memory_space<vmem>>, vector<2x1x1x128xf32>
    %307 = vector.shape_cast %306 : vector<2x1x1x128xf32> to vector<2x128xf32>
    %308 = arith.maximumf %301, %303 : vector<2x128xf32>
    %309 = arith.maximumf %305, %307 : vector<2x128xf32>
    %310 = arith.maximumf %308, %309 : vector<2x128xf32>
    %311 = vector.extract_strided_slice %310 {offsets = [0, 0], sizes = [2, 16], strides = [1, 1]} : vector<2x128xf32> to vector<2x16xf32>
    %c6_331 = arith.constant 6 : index
    %c0_332 = arith.constant 0 : index
    %c0_333 = arith.constant 0 : index
    %312 = vector.load %arg4[%c6_331, %c0_332, %c0_333] : memref<16x16x128xf32, #tpu.memory_space<vmem>>, vector<1x16x128xf32>
    %313 = vector.shape_cast %312 : vector<1x16x128xf32> to vector<16x128xf32>
    %cst_334 = arith.constant dense<0.000000e+00> : vector<2x128xf32>
    %314 = tpu.matmul %311, %313, %cst_334 {dimension_numbers = #tpu.dot_dimension_numbers<[1], [0], [0], [1], [0, 0, 1, 1], [], []>} : vector<2x16xf32>, vector<16x128xf32>, vector<2x128xf32> -> vector<2x128xf32>
    %315 = arith.addf %299, %314 : vector<2x128xf32>
    %c0_335 = arith.constant 0 : index
    %c2_336 = arith.constant 2 : index
    %c6_337 = arith.constant 6 : index
    %c0_338 = arith.constant 0 : index
    %316 = vector.load %arg10[%c0_335, %c2_336, %c6_337, %c0_338] : memref<2x8x8x128xf32, #tpu.memory_space<vmem>>, vector<2x1x1x128xf32>
    %317 = vector.shape_cast %316 : vector<2x1x1x128xf32> to vector<2x128xf32>
    %c0_339 = arith.constant 0 : index
    %c2_340 = arith.constant 2 : index
    %c7_341 = arith.constant 7 : index
    %c0_342 = arith.constant 0 : index
    %318 = vector.load %arg10[%c0_339, %c2_340, %c7_341, %c0_342] : memref<2x8x8x128xf32, #tpu.memory_space<vmem>>, vector<2x1x1x128xf32>
    %319 = vector.shape_cast %318 : vector<2x1x1x128xf32> to vector<2x128xf32>
    %c0_343 = arith.constant 0 : index
    %c3_344 = arith.constant 3 : index
    %c6_345 = arith.constant 6 : index
    %c0_346 = arith.constant 0 : index
    %320 = vector.load %arg10[%c0_343, %c3_344, %c6_345, %c0_346] : memref<2x8x8x128xf32, #tpu.memory_space<vmem>>, vector<2x1x1x128xf32>
    %321 = vector.shape_cast %320 : vector<2x1x1x128xf32> to vector<2x128xf32>
    %c0_347 = arith.constant 0 : index
    %c3_348 = arith.constant 3 : index
    %c7_349 = arith.constant 7 : index
    %c0_350 = arith.constant 0 : index
    %322 = vector.load %arg10[%c0_347, %c3_348, %c7_349, %c0_350] : memref<2x8x8x128xf32, #tpu.memory_space<vmem>>, vector<2x1x1x128xf32>
    %323 = vector.shape_cast %322 : vector<2x1x1x128xf32> to vector<2x128xf32>
    %324 = arith.maximumf %317, %319 : vector<2x128xf32>
    %325 = arith.maximumf %321, %323 : vector<2x128xf32>
    %326 = arith.maximumf %324, %325 : vector<2x128xf32>
    %327 = vector.extract_strided_slice %326 {offsets = [0, 0], sizes = [2, 16], strides = [1, 1]} : vector<2x128xf32> to vector<2x16xf32>
    %c7_351 = arith.constant 7 : index
    %c0_352 = arith.constant 0 : index
    %c0_353 = arith.constant 0 : index
    %328 = vector.load %arg4[%c7_351, %c0_352, %c0_353] : memref<16x16x128xf32, #tpu.memory_space<vmem>>, vector<1x16x128xf32>
    %329 = vector.shape_cast %328 : vector<1x16x128xf32> to vector<16x128xf32>
    %cst_354 = arith.constant dense<0.000000e+00> : vector<2x128xf32>
    %330 = tpu.matmul %327, %329, %cst_354 {dimension_numbers = #tpu.dot_dimension_numbers<[1], [0], [0], [1], [0, 0, 1, 1], [], []>} : vector<2x16xf32>, vector<16x128xf32>, vector<2x128xf32> -> vector<2x128xf32>
    %331 = arith.addf %315, %330 : vector<2x128xf32>
    %c0_355 = arith.constant 0 : index
    %c4_356 = arith.constant 4 : index
    %c0_357 = arith.constant 0 : index
    %c0_358 = arith.constant 0 : index
    %332 = vector.load %arg10[%c0_355, %c4_356, %c0_357, %c0_358] : memref<2x8x8x128xf32, #tpu.memory_space<vmem>>, vector<2x1x1x128xf32>
    %333 = vector.shape_cast %332 : vector<2x1x1x128xf32> to vector<2x128xf32>
    %c0_359 = arith.constant 0 : index
    %c4_360 = arith.constant 4 : index
    %c1_361 = arith.constant 1 : index
    %c0_362 = arith.constant 0 : index
    %334 = vector.load %arg10[%c0_359, %c4_360, %c1_361, %c0_362] : memref<2x8x8x128xf32, #tpu.memory_space<vmem>>, vector<2x1x1x128xf32>
    %335 = vector.shape_cast %334 : vector<2x1x1x128xf32> to vector<2x128xf32>
    %c0_363 = arith.constant 0 : index
    %c5_364 = arith.constant 5 : index
    %c0_365 = arith.constant 0 : index
    %c0_366 = arith.constant 0 : index
    %336 = vector.load %arg10[%c0_363, %c5_364, %c0_365, %c0_366] : memref<2x8x8x128xf32, #tpu.memory_space<vmem>>, vector<2x1x1x128xf32>
    %337 = vector.shape_cast %336 : vector<2x1x1x128xf32> to vector<2x128xf32>
    %c0_367 = arith.constant 0 : index
    %c5_368 = arith.constant 5 : index
    %c1_369 = arith.constant 1 : index
    %c0_370 = arith.constant 0 : index
    %338 = vector.load %arg10[%c0_367, %c5_368, %c1_369, %c0_370] : memref<2x8x8x128xf32, #tpu.memory_space<vmem>>, vector<2x1x1x128xf32>
    %339 = vector.shape_cast %338 : vector<2x1x1x128xf32> to vector<2x128xf32>
    %340 = arith.maximumf %333, %335 : vector<2x128xf32>
    %341 = arith.maximumf %337, %339 : vector<2x128xf32>
    %342 = arith.maximumf %340, %341 : vector<2x128xf32>
    %343 = vector.extract_strided_slice %342 {offsets = [0, 0], sizes = [2, 16], strides = [1, 1]} : vector<2x128xf32> to vector<2x16xf32>
    %c8_371 = arith.constant 8 : index
    %c0_372 = arith.constant 0 : index
    %c0_373 = arith.constant 0 : index
    %344 = vector.load %arg4[%c8_371, %c0_372, %c0_373] : memref<16x16x128xf32, #tpu.memory_space<vmem>>, vector<1x16x128xf32>
    %345 = vector.shape_cast %344 : vector<1x16x128xf32> to vector<16x128xf32>
    %cst_374 = arith.constant dense<0.000000e+00> : vector<2x128xf32>
    %346 = tpu.matmul %343, %345, %cst_374 {dimension_numbers = #tpu.dot_dimension_numbers<[1], [0], [0], [1], [0, 0, 1, 1], [], []>} : vector<2x16xf32>, vector<16x128xf32>, vector<2x128xf32> -> vector<2x128xf32>
    %347 = arith.addf %331, %346 : vector<2x128xf32>
    %c0_375 = arith.constant 0 : index
    %c4_376 = arith.constant 4 : index
    %c2_377 = arith.constant 2 : index
    %c0_378 = arith.constant 0 : index
    %348 = vector.load %arg10[%c0_375, %c4_376, %c2_377, %c0_378] : memref<2x8x8x128xf32, #tpu.memory_space<vmem>>, vector<2x1x1x128xf32>
    %349 = vector.shape_cast %348 : vector<2x1x1x128xf32> to vector<2x128xf32>
    %c0_379 = arith.constant 0 : index
    %c4_380 = arith.constant 4 : index
    %c3_381 = arith.constant 3 : index
    %c0_382 = arith.constant 0 : index
    %350 = vector.load %arg10[%c0_379, %c4_380, %c3_381, %c0_382] : memref<2x8x8x128xf32, #tpu.memory_space<vmem>>, vector<2x1x1x128xf32>
    %351 = vector.shape_cast %350 : vector<2x1x1x128xf32> to vector<2x128xf32>
    %c0_383 = arith.constant 0 : index
    %c5_384 = arith.constant 5 : index
    %c2_385 = arith.constant 2 : index
    %c0_386 = arith.constant 0 : index
    %352 = vector.load %arg10[%c0_383, %c5_384, %c2_385, %c0_386] : memref<2x8x8x128xf32, #tpu.memory_space<vmem>>, vector<2x1x1x128xf32>
    %353 = vector.shape_cast %352 : vector<2x1x1x128xf32> to vector<2x128xf32>
    %c0_387 = arith.constant 0 : index
    %c5_388 = arith.constant 5 : index
    %c3_389 = arith.constant 3 : index
    %c0_390 = arith.constant 0 : index
    %354 = vector.load %arg10[%c0_387, %c5_388, %c3_389, %c0_390] : memref<2x8x8x128xf32, #tpu.memory_space<vmem>>, vector<2x1x1x128xf32>
    %355 = vector.shape_cast %354 : vector<2x1x1x128xf32> to vector<2x128xf32>
    %356 = arith.maximumf %349, %351 : vector<2x128xf32>
    %357 = arith.maximumf %353, %355 : vector<2x128xf32>
    %358 = arith.maximumf %356, %357 : vector<2x128xf32>
    %359 = vector.extract_strided_slice %358 {offsets = [0, 0], sizes = [2, 16], strides = [1, 1]} : vector<2x128xf32> to vector<2x16xf32>
    %c9_391 = arith.constant 9 : index
    %c0_392 = arith.constant 0 : index
    %c0_393 = arith.constant 0 : index
    %360 = vector.load %arg4[%c9_391, %c0_392, %c0_393] : memref<16x16x128xf32, #tpu.memory_space<vmem>>, vector<1x16x128xf32>
    %361 = vector.shape_cast %360 : vector<1x16x128xf32> to vector<16x128xf32>
    %cst_394 = arith.constant dense<0.000000e+00> : vector<2x128xf32>
    %362 = tpu.matmul %359, %361, %cst_394 {dimension_numbers = #tpu.dot_dimension_numbers<[1], [0], [0], [1], [0, 0, 1, 1], [], []>} : vector<2x16xf32>, vector<16x128xf32>, vector<2x128xf32> -> vector<2x128xf32>
    %363 = arith.addf %347, %362 : vector<2x128xf32>
    %c0_395 = arith.constant 0 : index
    %c4_396 = arith.constant 4 : index
    %c4_397 = arith.constant 4 : index
    %c0_398 = arith.constant 0 : index
    %364 = vector.load %arg10[%c0_395, %c4_396, %c4_397, %c0_398] : memref<2x8x8x128xf32, #tpu.memory_space<vmem>>, vector<2x1x1x128xf32>
    %365 = vector.shape_cast %364 : vector<2x1x1x128xf32> to vector<2x128xf32>
    %c0_399 = arith.constant 0 : index
    %c4_400 = arith.constant 4 : index
    %c5_401 = arith.constant 5 : index
    %c0_402 = arith.constant 0 : index
    %366 = vector.load %arg10[%c0_399, %c4_400, %c5_401, %c0_402] : memref<2x8x8x128xf32, #tpu.memory_space<vmem>>, vector<2x1x1x128xf32>
    %367 = vector.shape_cast %366 : vector<2x1x1x128xf32> to vector<2x128xf32>
    %c0_403 = arith.constant 0 : index
    %c5_404 = arith.constant 5 : index
    %c4_405 = arith.constant 4 : index
    %c0_406 = arith.constant 0 : index
    %368 = vector.load %arg10[%c0_403, %c5_404, %c4_405, %c0_406] : memref<2x8x8x128xf32, #tpu.memory_space<vmem>>, vector<2x1x1x128xf32>
    %369 = vector.shape_cast %368 : vector<2x1x1x128xf32> to vector<2x128xf32>
    %c0_407 = arith.constant 0 : index
    %c5_408 = arith.constant 5 : index
    %c5_409 = arith.constant 5 : index
    %c0_410 = arith.constant 0 : index
    %370 = vector.load %arg10[%c0_407, %c5_408, %c5_409, %c0_410] : memref<2x8x8x128xf32, #tpu.memory_space<vmem>>, vector<2x1x1x128xf32>
    %371 = vector.shape_cast %370 : vector<2x1x1x128xf32> to vector<2x128xf32>
    %372 = arith.maximumf %365, %367 : vector<2x128xf32>
    %373 = arith.maximumf %369, %371 : vector<2x128xf32>
    %374 = arith.maximumf %372, %373 : vector<2x128xf32>
    %375 = vector.extract_strided_slice %374 {offsets = [0, 0], sizes = [2, 16], strides = [1, 1]} : vector<2x128xf32> to vector<2x16xf32>
    %c10_411 = arith.constant 10 : index
    %c0_412 = arith.constant 0 : index
    %c0_413 = arith.constant 0 : index
    %376 = vector.load %arg4[%c10_411, %c0_412, %c0_413] : memref<16x16x128xf32, #tpu.memory_space<vmem>>, vector<1x16x128xf32>
    %377 = vector.shape_cast %376 : vector<1x16x128xf32> to vector<16x128xf32>
    %cst_414 = arith.constant dense<0.000000e+00> : vector<2x128xf32>
    %378 = tpu.matmul %375, %377, %cst_414 {dimension_numbers = #tpu.dot_dimension_numbers<[1], [0], [0], [1], [0, 0, 1, 1], [], []>} : vector<2x16xf32>, vector<16x128xf32>, vector<2x128xf32> -> vector<2x128xf32>
    %379 = arith.addf %363, %378 : vector<2x128xf32>
    %c0_415 = arith.constant 0 : index
    %c4_416 = arith.constant 4 : index
    %c6_417 = arith.constant 6 : index
    %c0_418 = arith.constant 0 : index
    %380 = vector.load %arg10[%c0_415, %c4_416, %c6_417, %c0_418] : memref<2x8x8x128xf32, #tpu.memory_space<vmem>>, vector<2x1x1x128xf32>
    %381 = vector.shape_cast %380 : vector<2x1x1x128xf32> to vector<2x128xf32>
    %c0_419 = arith.constant 0 : index
    %c4_420 = arith.constant 4 : index
    %c7_421 = arith.constant 7 : index
    %c0_422 = arith.constant 0 : index
    %382 = vector.load %arg10[%c0_419, %c4_420, %c7_421, %c0_422] : memref<2x8x8x128xf32, #tpu.memory_space<vmem>>, vector<2x1x1x128xf32>
    %383 = vector.shape_cast %382 : vector<2x1x1x128xf32> to vector<2x128xf32>
    %c0_423 = arith.constant 0 : index
    %c5_424 = arith.constant 5 : index
    %c6_425 = arith.constant 6 : index
    %c0_426 = arith.constant 0 : index
    %384 = vector.load %arg10[%c0_423, %c5_424, %c6_425, %c0_426] : memref<2x8x8x128xf32, #tpu.memory_space<vmem>>, vector<2x1x1x128xf32>
    %385 = vector.shape_cast %384 : vector<2x1x1x128xf32> to vector<2x128xf32>
    %c0_427 = arith.constant 0 : index
    %c5_428 = arith.constant 5 : index
    %c7_429 = arith.constant 7 : index
    %c0_430 = arith.constant 0 : index
    %386 = vector.load %arg10[%c0_427, %c5_428, %c7_429, %c0_430] : memref<2x8x8x128xf32, #tpu.memory_space<vmem>>, vector<2x1x1x128xf32>
    %387 = vector.shape_cast %386 : vector<2x1x1x128xf32> to vector<2x128xf32>
    %388 = arith.maximumf %381, %383 : vector<2x128xf32>
    %389 = arith.maximumf %385, %387 : vector<2x128xf32>
    %390 = arith.maximumf %388, %389 : vector<2x128xf32>
    %391 = vector.extract_strided_slice %390 {offsets = [0, 0], sizes = [2, 16], strides = [1, 1]} : vector<2x128xf32> to vector<2x16xf32>
    %c11_431 = arith.constant 11 : index
    %c0_432 = arith.constant 0 : index
    %c0_433 = arith.constant 0 : index
    %392 = vector.load %arg4[%c11_431, %c0_432, %c0_433] : memref<16x16x128xf32, #tpu.memory_space<vmem>>, vector<1x16x128xf32>
    %393 = vector.shape_cast %392 : vector<1x16x128xf32> to vector<16x128xf32>
    %cst_434 = arith.constant dense<0.000000e+00> : vector<2x128xf32>
    %394 = tpu.matmul %391, %393, %cst_434 {dimension_numbers = #tpu.dot_dimension_numbers<[1], [0], [0], [1], [0, 0, 1, 1], [], []>} : vector<2x16xf32>, vector<16x128xf32>, vector<2x128xf32> -> vector<2x128xf32>
    %395 = arith.addf %379, %394 : vector<2x128xf32>
    %c0_435 = arith.constant 0 : index
    %c6_436 = arith.constant 6 : index
    %c0_437 = arith.constant 0 : index
    %c0_438 = arith.constant 0 : index
    %396 = vector.load %arg10[%c0_435, %c6_436, %c0_437, %c0_438] : memref<2x8x8x128xf32, #tpu.memory_space<vmem>>, vector<2x1x1x128xf32>
    %397 = vector.shape_cast %396 : vector<2x1x1x128xf32> to vector<2x128xf32>
    %c0_439 = arith.constant 0 : index
    %c6_440 = arith.constant 6 : index
    %c1_441 = arith.constant 1 : index
    %c0_442 = arith.constant 0 : index
    %398 = vector.load %arg10[%c0_439, %c6_440, %c1_441, %c0_442] : memref<2x8x8x128xf32, #tpu.memory_space<vmem>>, vector<2x1x1x128xf32>
    %399 = vector.shape_cast %398 : vector<2x1x1x128xf32> to vector<2x128xf32>
    %c0_443 = arith.constant 0 : index
    %c7_444 = arith.constant 7 : index
    %c0_445 = arith.constant 0 : index
    %c0_446 = arith.constant 0 : index
    %400 = vector.load %arg10[%c0_443, %c7_444, %c0_445, %c0_446] : memref<2x8x8x128xf32, #tpu.memory_space<vmem>>, vector<2x1x1x128xf32>
    %401 = vector.shape_cast %400 : vector<2x1x1x128xf32> to vector<2x128xf32>
    %c0_447 = arith.constant 0 : index
    %c7_448 = arith.constant 7 : index
    %c1_449 = arith.constant 1 : index
    %c0_450 = arith.constant 0 : index
    %402 = vector.load %arg10[%c0_447, %c7_448, %c1_449, %c0_450] : memref<2x8x8x128xf32, #tpu.memory_space<vmem>>, vector<2x1x1x128xf32>
    %403 = vector.shape_cast %402 : vector<2x1x1x128xf32> to vector<2x128xf32>
    %404 = arith.maximumf %397, %399 : vector<2x128xf32>
    %405 = arith.maximumf %401, %403 : vector<2x128xf32>
    %406 = arith.maximumf %404, %405 : vector<2x128xf32>
    %407 = vector.extract_strided_slice %406 {offsets = [0, 0], sizes = [2, 16], strides = [1, 1]} : vector<2x128xf32> to vector<2x16xf32>
    %c12_451 = arith.constant 12 : index
    %c0_452 = arith.constant 0 : index
    %c0_453 = arith.constant 0 : index
    %408 = vector.load %arg4[%c12_451, %c0_452, %c0_453] : memref<16x16x128xf32, #tpu.memory_space<vmem>>, vector<1x16x128xf32>
    %409 = vector.shape_cast %408 : vector<1x16x128xf32> to vector<16x128xf32>
    %cst_454 = arith.constant dense<0.000000e+00> : vector<2x128xf32>
    %410 = tpu.matmul %407, %409, %cst_454 {dimension_numbers = #tpu.dot_dimension_numbers<[1], [0], [0], [1], [0, 0, 1, 1], [], []>} : vector<2x16xf32>, vector<16x128xf32>, vector<2x128xf32> -> vector<2x128xf32>
    %411 = arith.addf %395, %410 : vector<2x128xf32>
    %c0_455 = arith.constant 0 : index
    %c6_456 = arith.constant 6 : index
    %c2_457 = arith.constant 2 : index
    %c0_458 = arith.constant 0 : index
    %412 = vector.load %arg10[%c0_455, %c6_456, %c2_457, %c0_458] : memref<2x8x8x128xf32, #tpu.memory_space<vmem>>, vector<2x1x1x128xf32>
    %413 = vector.shape_cast %412 : vector<2x1x1x128xf32> to vector<2x128xf32>
    %c0_459 = arith.constant 0 : index
    %c6_460 = arith.constant 6 : index
    %c3_461 = arith.constant 3 : index
    %c0_462 = arith.constant 0 : index
    %414 = vector.load %arg10[%c0_459, %c6_460, %c3_461, %c0_462] : memref<2x8x8x128xf32, #tpu.memory_space<vmem>>, vector<2x1x1x128xf32>
    %415 = vector.shape_cast %414 : vector<2x1x1x128xf32> to vector<2x128xf32>
    %c0_463 = arith.constant 0 : index
    %c7_464 = arith.constant 7 : index
    %c2_465 = arith.constant 2 : index
    %c0_466 = arith.constant 0 : index
    %416 = vector.load %arg10[%c0_463, %c7_464, %c2_465, %c0_466] : memref<2x8x8x128xf32, #tpu.memory_space<vmem>>, vector<2x1x1x128xf32>
    %417 = vector.shape_cast %416 : vector<2x1x1x128xf32> to vector<2x128xf32>
    %c0_467 = arith.constant 0 : index
    %c7_468 = arith.constant 7 : index
    %c3_469 = arith.constant 3 : index
    %c0_470 = arith.constant 0 : index
    %418 = vector.load %arg10[%c0_467, %c7_468, %c3_469, %c0_470] : memref<2x8x8x128xf32, #tpu.memory_space<vmem>>, vector<2x1x1x128xf32>
    %419 = vector.shape_cast %418 : vector<2x1x1x128xf32> to vector<2x128xf32>
    %420 = arith.maximumf %413, %415 : vector<2x128xf32>
    %421 = arith.maximumf %417, %419 : vector<2x128xf32>
    %422 = arith.maximumf %420, %421 : vector<2x128xf32>
    %423 = vector.extract_strided_slice %422 {offsets = [0, 0], sizes = [2, 16], strides = [1, 1]} : vector<2x128xf32> to vector<2x16xf32>
    %c13_471 = arith.constant 13 : index
    %c0_472 = arith.constant 0 : index
    %c0_473 = arith.constant 0 : index
    %424 = vector.load %arg4[%c13_471, %c0_472, %c0_473] : memref<16x16x128xf32, #tpu.memory_space<vmem>>, vector<1x16x128xf32>
    %425 = vector.shape_cast %424 : vector<1x16x128xf32> to vector<16x128xf32>
    %cst_474 = arith.constant dense<0.000000e+00> : vector<2x128xf32>
    %426 = tpu.matmul %423, %425, %cst_474 {dimension_numbers = #tpu.dot_dimension_numbers<[1], [0], [0], [1], [0, 0, 1, 1], [], []>} : vector<2x16xf32>, vector<16x128xf32>, vector<2x128xf32> -> vector<2x128xf32>
    %427 = arith.addf %411, %426 : vector<2x128xf32>
    %c0_475 = arith.constant 0 : index
    %c6_476 = arith.constant 6 : index
    %c4_477 = arith.constant 4 : index
    %c0_478 = arith.constant 0 : index
    %428 = vector.load %arg10[%c0_475, %c6_476, %c4_477, %c0_478] : memref<2x8x8x128xf32, #tpu.memory_space<vmem>>, vector<2x1x1x128xf32>
    %429 = vector.shape_cast %428 : vector<2x1x1x128xf32> to vector<2x128xf32>
    %c0_479 = arith.constant 0 : index
    %c6_480 = arith.constant 6 : index
    %c5_481 = arith.constant 5 : index
    %c0_482 = arith.constant 0 : index
    %430 = vector.load %arg10[%c0_479, %c6_480, %c5_481, %c0_482] : memref<2x8x8x128xf32, #tpu.memory_space<vmem>>, vector<2x1x1x128xf32>
    %431 = vector.shape_cast %430 : vector<2x1x1x128xf32> to vector<2x128xf32>
    %c0_483 = arith.constant 0 : index
    %c7_484 = arith.constant 7 : index
    %c4_485 = arith.constant 4 : index
    %c0_486 = arith.constant 0 : index
    %432 = vector.load %arg10[%c0_483, %c7_484, %c4_485, %c0_486] : memref<2x8x8x128xf32, #tpu.memory_space<vmem>>, vector<2x1x1x128xf32>
    %433 = vector.shape_cast %432 : vector<2x1x1x128xf32> to vector<2x128xf32>
    %c0_487 = arith.constant 0 : index
    %c7_488 = arith.constant 7 : index
    %c5_489 = arith.constant 5 : index
    %c0_490 = arith.constant 0 : index
    %434 = vector.load %arg10[%c0_487, %c7_488, %c5_489, %c0_490] : memref<2x8x8x128xf32, #tpu.memory_space<vmem>>, vector<2x1x1x128xf32>
    %435 = vector.shape_cast %434 : vector<2x1x1x128xf32> to vector<2x128xf32>
    %436 = arith.maximumf %429, %431 : vector<2x128xf32>
    %437 = arith.maximumf %433, %435 : vector<2x128xf32>
    %438 = arith.maximumf %436, %437 : vector<2x128xf32>
    %439 = vector.extract_strided_slice %438 {offsets = [0, 0], sizes = [2, 16], strides = [1, 1]} : vector<2x128xf32> to vector<2x16xf32>
    %c14_491 = arith.constant 14 : index
    %c0_492 = arith.constant 0 : index
    %c0_493 = arith.constant 0 : index
    %440 = vector.load %arg4[%c14_491, %c0_492, %c0_493] : memref<16x16x128xf32, #tpu.memory_space<vmem>>, vector<1x16x128xf32>
    %441 = vector.shape_cast %440 : vector<1x16x128xf32> to vector<16x128xf32>
    %cst_494 = arith.constant dense<0.000000e+00> : vector<2x128xf32>
    %442 = tpu.matmul %439, %441, %cst_494 {dimension_numbers = #tpu.dot_dimension_numbers<[1], [0], [0], [1], [0, 0, 1, 1], [], []>} : vector<2x16xf32>, vector<16x128xf32>, vector<2x128xf32> -> vector<2x128xf32>
    %443 = arith.addf %427, %442 : vector<2x128xf32>
    %c0_495 = arith.constant 0 : index
    %c6_496 = arith.constant 6 : index
    %c6_497 = arith.constant 6 : index
    %c0_498 = arith.constant 0 : index
    %444 = vector.load %arg10[%c0_495, %c6_496, %c6_497, %c0_498] : memref<2x8x8x128xf32, #tpu.memory_space<vmem>>, vector<2x1x1x128xf32>
    %445 = vector.shape_cast %444 : vector<2x1x1x128xf32> to vector<2x128xf32>
    %c0_499 = arith.constant 0 : index
    %c6_500 = arith.constant 6 : index
    %c7_501 = arith.constant 7 : index
    %c0_502 = arith.constant 0 : index
    %446 = vector.load %arg10[%c0_499, %c6_500, %c7_501, %c0_502] : memref<2x8x8x128xf32, #tpu.memory_space<vmem>>, vector<2x1x1x128xf32>
    %447 = vector.shape_cast %446 : vector<2x1x1x128xf32> to vector<2x128xf32>
    %c0_503 = arith.constant 0 : index
    %c7_504 = arith.constant 7 : index
    %c6_505 = arith.constant 6 : index
    %c0_506 = arith.constant 0 : index
    %448 = vector.load %arg10[%c0_503, %c7_504, %c6_505, %c0_506] : memref<2x8x8x128xf32, #tpu.memory_space<vmem>>, vector<2x1x1x128xf32>
    %449 = vector.shape_cast %448 : vector<2x1x1x128xf32> to vector<2x128xf32>
    %c0_507 = arith.constant 0 : index
    %c7_508 = arith.constant 7 : index
    %c7_509 = arith.constant 7 : index
    %c0_510 = arith.constant 0 : index
    %450 = vector.load %arg10[%c0_507, %c7_508, %c7_509, %c0_510] : memref<2x8x8x128xf32, #tpu.memory_space<vmem>>, vector<2x1x1x128xf32>
    %451 = vector.shape_cast %450 : vector<2x1x1x128xf32> to vector<2x128xf32>
    %452 = arith.maximumf %445, %447 : vector<2x128xf32>
    %453 = arith.maximumf %449, %451 : vector<2x128xf32>
    %454 = arith.maximumf %452, %453 : vector<2x128xf32>
    %455 = vector.extract_strided_slice %454 {offsets = [0, 0], sizes = [2, 16], strides = [1, 1]} : vector<2x128xf32> to vector<2x16xf32>
    %c15_511 = arith.constant 15 : index
    %c0_512 = arith.constant 0 : index
    %c0_513 = arith.constant 0 : index
    %456 = vector.load %arg4[%c15_511, %c0_512, %c0_513] : memref<16x16x128xf32, #tpu.memory_space<vmem>>, vector<1x16x128xf32>
    %457 = vector.shape_cast %456 : vector<1x16x128xf32> to vector<16x128xf32>
    %cst_514 = arith.constant dense<0.000000e+00> : vector<2x128xf32>
    %458 = tpu.matmul %455, %457, %cst_514 {dimension_numbers = #tpu.dot_dimension_numbers<[1], [0], [0], [1], [0, 0, 1, 1], [], []>} : vector<2x16xf32>, vector<16x128xf32>, vector<2x128xf32> -> vector<2x128xf32>
    %459 = arith.addf %443, %458 : vector<2x128xf32>
    %c2_515 = arith.constant 2 : index
    %c0_516 = arith.constant 0 : index
    %460 = vector.load %arg7[%c2_515, %c0_516] : memref<8x128xf32, #tpu.memory_space<vmem>>, vector<1x128xf32>
    %461 = vector.broadcast %460 : vector<1x128xf32> to vector<2x128xf32>
    %462 = arith.addf %459, %461 : vector<2x128xf32>
    %cst_517 = arith.constant 0.000000e+00 : f32
    %463 = vector.broadcast %cst_517 : f32 to vector<2x128xf32>
    %464 = arith.maximumf %462, %463 : vector<2x128xf32>
    %c0_518 = arith.constant 0 : index
    %c0_519 = arith.constant 0 : index
    %465 = vector.load %arg5[%c0_518, %c0_519] : memref<128x128xf32, #tpu.memory_space<vmem>>, vector<128x128xf32>
    %cst_520 = arith.constant dense<0.000000e+00> : vector<2x128xf32>
    %466 = tpu.matmul %464, %465, %cst_520 {dimension_numbers = #tpu.dot_dimension_numbers<[1], [0], [0], [1], [0, 0, 1, 1], [], []>} : vector<2x128xf32>, vector<128x128xf32>, vector<2x128xf32> -> vector<2x128xf32>
    %c3_521 = arith.constant 3 : index
    %c0_522 = arith.constant 0 : index
    %467 = vector.load %arg7[%c3_521, %c0_522] : memref<8x128xf32, #tpu.memory_space<vmem>>, vector<1x128xf32>
    %468 = vector.broadcast %467 : vector<1x128xf32> to vector<2x128xf32>
    %469 = arith.addf %466, %468 : vector<2x128xf32>
    %c0_523 = arith.constant 0 : index
    %c0_524 = arith.constant 0 : index
    %470 = vector.load %arg6[%c0_523, %c0_524] : memref<128x128xf32, #tpu.memory_space<vmem>>, vector<128x128xf32>
    %cst_525 = arith.constant dense<0.000000e+00> : vector<2x128xf32>
    %471 = tpu.matmul %469, %470, %cst_525 {dimension_numbers = #tpu.dot_dimension_numbers<[1], [0], [0], [1], [0, 0, 1, 1], [], []>} : vector<2x128xf32>, vector<128x128xf32>, vector<2x128xf32> -> vector<2x128xf32>
    %c4_526 = arith.constant 4 : index
    %c0_527 = arith.constant 0 : index
    %472 = vector.load %arg7[%c4_526, %c0_527] : memref<8x128xf32, #tpu.memory_space<vmem>>, vector<1x128xf32>
    %473 = vector.broadcast %472 : vector<1x128xf32> to vector<2x128xf32>
    %474 = arith.addf %471, %473 : vector<2x128xf32>
    %c0_528 = arith.constant 0 : index
    %c0_529 = arith.constant 0 : index
    %475 = vector.load %arg8[%c0_528, %c0_529] : memref<2x128xf32, #tpu.memory_space<vmem>>, vector<2x128xf32>
    tpu.vector_store %arg8[%c0_528, %c0_529], %474 {strides = array<i32>} : memref<2x128xf32, #tpu.memory_space<vmem>>, vector<2x128xf32>,
    return
  }
  func.func @transform_0(%arg0: i32) -> (i32, i32) {
    %c0_i32 = arith.constant 0 : i32
    %c0_i32_0 = arith.constant 0 : i32
    %c0_i32_1 = arith.constant 0 : i32
    return %c0_i32, %c0_i32_0 : i32, i32
  }
  func.func @transform_1(%arg0: i32) -> (i32, i32) {
    %c0_i32 = arith.constant 0 : i32
    %c0_i32_0 = arith.constant 0 : i32
    %c0_i32_1 = arith.constant 0 : i32
    return %c0_i32, %c0_i32_0 : i32, i32
  }
  func.func @transform_2(%arg0: i32) -> (i32, i32, i32) {
    %c0_i32 = arith.constant 0 : i32
    %c0_i32_0 = arith.constant 0 : i32
    %c0_i32_1 = arith.constant 0 : i32
    %c0_i32_2 = arith.constant 0 : i32
    return %c0_i32, %c0_i32_0, %c0_i32_1 : i32, i32, i32
  }
  func.func @transform_3(%arg0: i32) -> (i32, i32, i32) {
    %c0_i32 = arith.constant 0 : i32
    %c0_i32_0 = arith.constant 0 : i32
    %c0_i32_1 = arith.constant 0 : i32
    %c0_i32_2 = arith.constant 0 : i32
    return %c0_i32, %c0_i32_0, %c0_i32_1 : i32, i32, i32
  }
  func.func @transform_4(%arg0: i32) -> (i32, i32) {
    %c0_i32 = arith.constant 0 : i32
    %c0_i32_0 = arith.constant 0 : i32
    %c0_i32_1 = arith.constant 0 : i32
    return %c0_i32, %c0_i32_0 : i32, i32
  }
  func.func @transform_5(%arg0: i32) -> (i32, i32) {
    %c0_i32 = arith.constant 0 : i32
    %c0_i32_0 = arith.constant 0 : i32
    %c0_i32_1 = arith.constant 0 : i32
    return %c0_i32, %c0_i32_0 : i32, i32
  }
  func.func @transform_6(%arg0: i32) -> (i32, i32) {
    %c0_i32 = arith.constant 0 : i32
    %c0_i32_0 = arith.constant 0 : i32
    %c0_i32_1 = arith.constant 0 : i32
    return %c0_i32, %c0_i32_0 : i32, i32
  }
  func.func @transform_7(%arg0: i32) -> (i32, i32) {
    %c0_i32 = arith.constant 0 : i32
    %c0_i32_0 = arith.constant 0 : i32
    %c0_i32_1 = arith.constant 0 : i32
    return %c0_i32, %c0_i32_0 : i32, i32
  }
}

</mosaic_0001>

<bundles_post_ra>
// kernel: lenet_forward.1
= control target key start
LH: loop header
LB: loop body
LE: loop exit
PB: predicated region body
PF: predicated region fallthrough
CT: control target
= control target key end

     0   :  { %vm228_vm0 = vcmask 261120   ;;  %s15651_s0 = inlined_call_operand.vmem [shape: f32[1536,32], index: 0, kind: input, shape index: {}]   ;;  %s15652_s1 = inlined_call_operand.vmem [shape: f32[32,128], index: 1, kind: input, shape index: {}]   ;;  %s15653_s2 = inlined_call_operand.vmem [shape: f32[25,8,128], index: 2, kind: input, shape index: {}]   ;;  %s15654_s3 = inlined_call_operand.vmem [shape: f32[16,16,128], index: 3, kind: input, shape index: {}]   ;;  %s15655_s4 = inlined_call_operand.vmem [shape: f32[128,128], index: 4, kind: input, shape index: {}]   ;;  %s15656_s5 = inlined_call_operand.vmem [shape: f32[128,128], index: 5, kind: input, shape index: {}]   ;;  %s15657_s6 = inlined_call_operand.vmem [shape: f32[8,128], index: 6, kind: input, shape index: {}]   ;;  %s15658_s7 = inlined_call_operand.hbm [shape: f32[2,128], index: 7, kind: output, shape index: {}]  }
   0x1   :  { %v222_v0 = vld [vmem:[%s15652_s1 + $0x18] sm:$0xff]  ;;  %v221_v1 = vld [vmem:[%s15652_s1 + $0x10] sm:$0xff]  ;;  %v27_v2 = vld [vmem:[%s15651_s0] sm:$0xff] }
   0x2   :  { %10998 = vmatprep.subr.mxu0 %v222_v0  ;;  %v220_v3 = vld [vmem:[%s15652_s1 + $0x8] sm:$0xff]  ;;  %11006 = vmatprep.mubr.msk.f32.mxu0 %vm228_vm0, %v27_v2  ;;  %v219_v4 = vld [vmem:[%s15652_s1] sm:$0xff]  ;;  %v29_v6 = vld [vmem:[%s15651_s0 + $0x10] sm:$0xff] }
   0x3   :  { %10999 = vmatpush3.msra.mxu0 %v222_v0  ;;  %v28_v5 = vld [vmem:[%s15651_s0 + $0x8] sm:$0xff]  ;;  %v30_v7 = vld [vmem:[%s15651_s0 + $0x18] sm:$0xff]  ;;  %v31_v8 = vld [vmem:[%s15651_s0 + $0x20] sm:$0xff] }
   0x4   :  { %11000 = vmatprep.subr.mxu0 %v221_v1  ;;  %v32_v9 = vld [vmem:[%s15651_s0 + $0x28] sm:$0xff]  ;;  %v33_v10 = vld [vmem:[%s15651_s0 + $0x30] sm:$0xff]  ;;  %v34_v11 = vld [vmem:[%s15651_s0 + $0x38] sm:$0xff] }
   0x5   :  { %11001 = vmatpush3.msra.mxu0 %v221_v1  ;;  %v35_v12 = vld [vmem:[%s15651_s0 + $0x40] sm:$0xff]  ;;  %v36_v13 = vld [vmem:[%s15651_s0 + $0x48] sm:$0xff]  ;;  %v37_v14 = vld [vmem:[%s15651_s0 + $0x50] sm:$0xff] }
   0x6   :  { %11002 = vmatprep.subr.mxu0 %v220_v3  ;;  %v38_v15 = vld [vmem:[%s15651_s0 + $0x58] sm:$0xff] }
   0x7   :  { %11003 = vmatpush3.msra.mxu0 %v220_v3 }
   0x8   :  { %11004 = vmatprep.subr.mxu0 %v219_v4 }
   0x9   :  { %11005 = vmatpush3.msra.mxu0 %v219_v4 }
   0xa   :  { %11007 = vmatmul.mubr.msk.f32.vlgmr.msra.gmra.mxu0 %vm228_vm0, %v28_v5 }
   0xb   :  { %11009 = vmatprep.mubr.msk.f32.mxu0 %vm228_vm0, %v29_v6 }
   0xe   :  { %11010 = vmatmul.mubr.msk.f32.gmra.mxu0 %vm228_vm0, %v30_v7 }
   0xf   :  { %11012 = vmatprep.mubr.msk.f32.mxu0 %vm228_vm0, %v31_v8 }
  0x12   :  { %11013 = vmatmul.mubr.msk.f32.gmra.mxu0 %vm228_vm0, %v32_v9 }
  0x13   :  { %11015 = vmatprep.mubr.msk.f32.mxu0 %vm228_vm0, %v33_v10 }
  0x16   :  { %11016 = vmatmul.mubr.msk.f32.gmra.mxu0 %vm228_vm0, %v34_v11 }
  0x17   :  { %11018 = vmatprep.mubr.msk.f32.mxu0 %vm228_vm0, %v35_v12 }
  0x1a   :  { %11019 = vmatmul.mubr.msk.f32.gmra.mxu0 %vm228_vm0, %v36_v13 }
  0x1b   :  { %11021 = vmatprep.mubr.msk.f32.mxu0 %vm228_vm0, %v37_v14 }
  0x1c   :  { %12 = vsyncpa [#allocation5], 0  ;;  %v39_v16 = vld [vmem:[%s15651_s0 + $0x60] sm:$0xff]  ;;  %v40_v17 = vld [vmem:[%s15651_s0 + $0x68] sm:$0xff]  ;;  %vm2249_vm1 = vcmask 64512   ;;  %vm12153_vm2 = vmmov 0  }
  0x1d   :  { %v41_v18 = vld [vmem:[%s15651_s0 + $0x70] sm:$0xff]  ;;  %v42_v19 = vld [vmem:[%s15651_s0 + $0x78] sm:$0xff]  ;;  %v43_v20 = vld [vmem:[%s15651_s0 + $0x80] sm:$0xff]  ;;  %vm7951_vm3 = vcmask 1041409   ;;  %vm7953_vm4 = vcmask 130048  }
  0x1e   :  { %11022 = vmatmul.mubr.msk.f32.gmra.mxu0 %vm228_vm0, %v38_v15  ;;  %v44_v21 = vld [vmem:[%s15651_s0 + $0x88] sm:$0xff]  ;;  %v45_v22 = vld [vmem:[%s15651_s0 + $0x90] sm:$0xff]  ;;  %v46_v23 = vld [vmem:[%s15651_s0 + $0x98] sm:$0xff] }
  0x1f   :  { %11024 = vmatprep.mubr.msk.f32.mxu0 %vm228_vm0, %v39_v16  ;;  %v47_v24 = vld [vmem:[%s15651_s0 + $0xa0] sm:$0xff]  ;;  %v48_v25 = vld [vmem:[%s15651_s0 + $0xa8] sm:$0xff]  ;;  %v49_v26 = vld [vmem:[%s15651_s0 + $0xb0] sm:$0xff] }
  0x20   :  { %v50_v27 = vld [vmem:[%s15651_s0 + $0xb8] sm:$0xff]  ;;  %v51_v28 = vld [vmem:[%s15651_s0 + $0xc0] sm:$0xff]  ;;  %v52_v29 = vld [vmem:[%s15651_s0 + $0xc8] sm:$0xff] }
  0x21   :  { %v53_v30 = vld [vmem:[%s15651_s0 + $0xd0] sm:$0xff]  ;;  %v54_v31 = vld [vmem:[%s15651_s0 + $0xd8] sm:$0xff]  ;;  %v55_v32 = vld [vmem:[%s15651_s0 + $0xe0] sm:$0xff] }
  0x22   :  { %11025 = vmatmul.mubr.msk.f32.gmra.mxu0 %vm228_vm0, %v40_v17  ;;  %v56_v33 = vld [vmem:[%s15651_s0 + $0xe8] sm:$0xff]  ;;  %v57_v34 = vld [vmem:[%s15651_s0 + $0xf0] sm:$0xff]  ;;  %v58_v35 = vld [vmem:[%s15651_s0 + $0xf8] sm:$0xff] }
  0x23   :  { %11027 = vmatprep.mubr.msk.f32.mxu0 %vm228_vm0, %v41_v18  ;;  %v59_v36 = vld [vmem:[%s15651_s0 + $0x100] sm:$0xff]  ;;  %v60_v37 = vld [vmem:[%s15651_s0 + $0x108] sm:$0xff]  ;;  %v61_v38 = vld [vmem:[%s15651_s0 + $0x110] sm:$0xff] }
  0x24   :  { %v62_v39 = vld [vmem:[%s15651_s0 + $0x118] sm:$0xff]  ;;  %v63_v40 = vld [vmem:[%s15651_s0 + $0x120] sm:$0xff]  ;;  %v64_v41 = vld [vmem:[%s15651_s0 + $0x128] sm:$0xff] }
  0x25   :  { %v65_v42 = vld [vmem:[%s15651_s0 + $0x130] sm:$0xff]  ;;  %v66_v43 = vld [vmem:[%s15651_s0 + $0x138] sm:$0xff]  ;;  %v67_v44 = vld [vmem:[%s15651_s0 + $0x140] sm:$0xff] }
  0x26   :  { %11028 = vmatmul.mubr.msk.f32.gmra.mxu0 %vm228_vm0, %v42_v19  ;;  %v68_v45 = vld [vmem:[%s15651_s0 + $0x148] sm:$0xff]  ;;  %v69_v46 = vld [vmem:[%s15651_s0 + $0x150] sm:$0xff]  ;;  %v70_v47 = vld [vmem:[%s15651_s0 + $0x158] sm:$0xff] }
  0x27   :  { %11030 = vmatprep.mubr.msk.f32.mxu0 %vm228_vm0, %v43_v20  ;;  %v71_v48 = vld [vmem:[%s15651_s0 + $0x160] sm:$0xff]  ;;  %v72_v49 = vld [vmem:[%s15651_s0 + $0x168] sm:$0xff]  ;;  %v73_v50 = vld [vmem:[%s15651_s0 + $0x170] sm:$0xff] }
  0x28   :  { %v74_v51 = vld [vmem:[%s15651_s0 + $0x178] sm:$0xff]  ;;  %v75_v52 = vld [vmem:[%s15651_s0 + $0x180] sm:$0xff]  ;;  %v76_v53 = vld [vmem:[%s15651_s0 + $0x188] sm:$0xff] }
  0x29   :  { %v77_v54 = vld [vmem:[%s15651_s0 + $0x190] sm:$0xff]  ;;  %v78_v55 = vld [vmem:[%s15651_s0 + $0x198] sm:$0xff]  ;;  %v79_v56 = vld [vmem:[%s15651_s0 + $0x1a0] sm:$0xff] }
  0x2a   :  { %11031 = vmatmul.mubr.msk.f32.gmra.mxu0 %vm228_vm0, %v44_v21  ;;  %v80_v57 = vld [vmem:[%s15651_s0 + $0x1a8] sm:$0xff]  ;;  %v81_v58 = vld [vmem:[%s15651_s0 + $0x1b0] sm:$0xff]  ;;  %v82_v59 = vld [vmem:[%s15651_s0 + $0x1b8] sm:$0xff] }
  0x2b   :  { %11033 = vmatprep.mubr.msk.f32.mxu0 %vm228_vm0, %v45_v22  ;;  %v83_v60 = vld [vmem:[%s15651_s0 + $0x1c0] sm:$0xff]  ;;  %v84_v61 = vld [vmem:[%s15651_s0 + $0x1c8] sm:$0xff]  ;;  %v85_v62 = vld [vmem:[%s15651_s0 + $0x1d0] sm:$0xff] }
  0x2c   :  { %v86_v63 = vld [vmem:[%s15651_s0 + $0x1d8] sm:$0xff]  ;;  %v87_v0 = vld [vmem:[%s15651_s0 + $0x1e0] sm:$0xff]  ;;  %v88_v1 = vld [vmem:[%s15651_s0 + $0x1e8] sm:$0xff] }
  0x2d   :  { %v89_v2 = vld [vmem:[%s15651_s0 + $0x1f0] sm:$0xff]  ;;  %v90_v3 = vld [vmem:[%s15651_s0 + $0x1f8] sm:$0xff]  ;;  %v91_v4 = vld [vmem:[%s15651_s0 + $0x200] sm:$0xff] }
  0x2e   :  { %11034 = vmatmul.mubr.msk.f32.gmra.mxu0 %vm228_vm0, %v46_v23  ;;  %v92_v5 = vld [vmem:[%s15651_s0 + $0x208] sm:$0xff]  ;;  %v93_v6 = vld [vmem:[%s15651_s0 + $0x210] sm:$0xff]  ;;  %v94_v7 = vld [vmem:[%s15651_s0 + $0x218] sm:$0xff] }
  0x2f   :  { %11036 = vmatprep.mubr.msk.f32.mxu0 %vm228_vm0, %v47_v24  ;;  %v95_v8 = vld [vmem:[%s15651_s0 + $0x220] sm:$0xff]  ;;  %v96_v9 = vld [vmem:[%s15651_s0 + $0x228] sm:$0xff]  ;;  %v97_v10 = vld [vmem:[%s15651_s0 + $0x230] sm:$0xff] }
  0x30   :  { %v98_v11 = vld [vmem:[%s15651_s0 + $0x238] sm:$0xff]  ;;  %v99_v12 = vld [vmem:[%s15651_s0 + $0x240] sm:$0xff]  ;;  %v100_v13 = vld [vmem:[%s15651_s0 + $0x248] sm:$0xff] }
  0x31   :  { %v101_v14 = vld [vmem:[%s15651_s0 + $0x250] sm:$0xff]  ;;  %v102_v15 = vld [vmem:[%s15651_s0 + $0x258] sm:$0xff]  ;;  %v103_v16 = vld [vmem:[%s15651_s0 + $0x260] sm:$0xff] }
  0x32   :  { %11037 = vmatmul.mubr.msk.f32.gmra.mxu0 %vm228_vm0, %v48_v25  ;;  %v104_v17 = vld [vmem:[%s15651_s0 + $0x268] sm:$0xff]  ;;  %v105_v18 = vld [vmem:[%s15651_s0 + $0x270] sm:$0xff]  ;;  %v106_v19 = vld [vmem:[%s15651_s0 + $0x278] sm:$0xff] }
  0x33   :  { %11039 = vmatprep.mubr.msk.f32.mxu0 %vm228_vm0, %v49_v26  ;;  %v107_v20 = vld [vmem:[%s15651_s0 + $0x280] sm:$0xff]  ;;  %v108_v21 = vld [vmem:[%s15651_s0 + $0x288] sm:$0xff]  ;;  %v109_v22 = vld [vmem:[%s15651_s0 + $0x290] sm:$0xff] }
  0x34   :  { %v110_v23 = vld [vmem:[%s15651_s0 + $0x298] sm:$0xff]  ;;  %v111_v24 = vld [vmem:[%s15651_s0 + $0x2a0] sm:$0xff]  ;;  %v112_v25 = vld [vmem:[%s15651_s0 + $0x2a8] sm:$0xff] }
  0x35   :  { %v113_v26 = vld [vmem:[%s15651_s0 + $0x2b0] sm:$0xff] }
  0x36   :  { %11040 = vmatmul.mubr.msk.f32.gmra.mxu0 %vm228_vm0, %v50_v27  ;;  %v114_v27 = vld [vmem:[%s15651_s0 + $0x2b8] sm:$0xff] }
  0x37   :  { %11042 = vmatprep.mubr.msk.f32.mxu0 %vm228_vm0, %v51_v28  ;;  %v115_v28 = vld [vmem:[%s15651_s0 + $0x2c0] sm:$0xff] }
  0x3a   :  { %11043 = vmatmul.mubr.msk.f32.gmra.mxu0 %vm228_vm0, %v52_v29  ;;  %v116_v29 = vld [vmem:[%s15651_s0 + $0x2c8] sm:$0xff] }
  0x3b   :  { %11045 = vmatprep.mubr.msk.f32.mxu0 %vm228_vm0, %v53_v30  ;;  %v117_v30 = vld [vmem:[%s15651_s0 + $0x2d0] sm:$0xff] }
  0x3e   :  { %11046 = vmatmul.mubr.msk.f32.gmra.mxu0 %vm228_vm0, %v54_v31  ;;  %v118_v31 = vld [vmem:[%s15651_s0 + $0x2d8] sm:$0xff] }
  0x3f   :  { %11048 = vmatprep.mubr.msk.f32.mxu0 %vm228_vm0, %v55_v32  ;;  %v119_v32 = vld [vmem:[%s15651_s0 + $0x2e0] sm:$0xff] }
  0x42   :  { %11049 = vmatmul.mubr.msk.f32.gmra.mxu0 %vm228_vm0, %v56_v33  ;;  %v120_v33 = vld [vmem:[%s15651_s0 + $0x2e8] sm:$0xff] }
  0x43   :  { %11051 = vmatprep.mubr.msk.f32.mxu0 %vm228_vm0, %v57_v34  ;;  %v121_v34 = vld [vmem:[%s15651_s0 + $0x2f0] sm:$0xff] }
  0x46   :  { %11052 = vmatmul.mubr.msk.f32.gmra.mxu0 %vm228_vm0, %v58_v35  ;;  %v122_v35 = vld [vmem:[%s15651_s0 + $0x2f8] sm:$0xff] }
  0x47   :  { %11054 = vmatprep.mubr.msk.f32.mxu0 %vm228_vm0, %v59_v36  ;;  %v123_v36 = vld [vmem:[%s15651_s0 + $0x300] sm:$0xff] }
  0x4a   :  { %11055 = vmatmul.mubr.msk.f32.gmra.mxu0 %vm228_vm0, %v60_v37  ;;  %v9821_v37 = vld [vmem:[%s15653_s2 + $0x8] sm:$0xff] }
  0x4b   :  { %11057 = vmatprep.mubr.msk.f32.mxu0 %vm228_vm0, %v61_v38  ;;  %v124_v38 = vld [vmem:[%s15651_s0 + $0x308] sm:$0xff]  ;;  %11294 = vmatprep.subr.mxu1 %v9821_v37 }
  0x4c   :  { %11295 = vmatpush3.msra.mxu1 %v9821_v37  ;;  %v156_v37 = vld [vmem:[%s15651_s0 + $0x408] sm:$0xff] }
  0x4e   :  { %11058 = vmatmul.mubr.msk.f32.gmra.mxu0 %vm228_vm0, %v62_v39  ;;  %v125_v39 = vld [vmem:[%s15651_s0 + $0x310] sm:$0xff] }
  0x4f   :  { %11060 = vmatprep.mubr.msk.f32.mxu0 %vm228_vm0, %v63_v40 }
  0x52   :  { %11061 = vmatmul.mubr.msk.f32.gmra.mxu0 %vm228_vm0, %v64_v41  ;;  %v126_v41 = vld [vmem:[%s15651_s0 + $0x318] sm:$0xff] }
  0x53   :  { %11063 = vmatprep.mubr.msk.f32.mxu0 %vm228_vm0, %v65_v42 }
  0x56   :  { %11064 = vmatmul.mubr.msk.f32.gmra.mxu0 %vm228_vm0, %v66_v43  ;;  %v127_v43 = vld [vmem:[%s15651_s0 + $0x320] sm:$0xff] }
  0x57   :  { %11066 = vmatprep.mubr.msk.f32.mxu0 %vm228_vm0, %v67_v44 }
  0x5a   :  { %11067 = vmatmul.mubr.msk.f32.gmra.mxu0 %vm228_vm0, %v68_v45  ;;  %v128_v45 = vld [vmem:[%s15651_s0 + $0x328] sm:$0xff] }
  0x5b   :  { %11069 = vmatprep.mubr.msk.f32.mxu0 %vm228_vm0, %v69_v46 }
  0x5e   :  { %11070 = vmatmul.mubr.msk.f32.gmra.mxu0 %vm228_vm0, %v70_v47  ;;  %v129_v47 = vld [vmem:[%s15651_s0 + $0x330] sm:$0xff] }
  0x5f   :  { %11072 = vmatprep.mubr.msk.f32.mxu0 %vm228_vm0, %v71_v48 }
  0x62   :  { %11073 = vmatmul.mubr.msk.f32.gmra.mxu0 %vm228_vm0, %v72_v49  ;;  %v130_v49 = vld [vmem:[%s15651_s0 + $0x338] sm:$0xff] }
  0x63   :  { %11075 = vmatprep.mubr.msk.f32.mxu0 %vm228_vm0, %v73_v50 }
  0x66   :  { %11076 = vmatmul.mubr.msk.f32.gmra.mxu0 %vm228_vm0, %v74_v51  ;;  %v131_v51 = vld [vmem:[%s15651_s0 + $0x340] sm:$0xff] }
  0x67   :  { %11078 = vmatprep.mubr.msk.f32.mxu0 %vm228_vm0, %v75_v52 }
  0x6a   :  { %11079 = vmatmul.mubr.msk.f32.gmra.mxu0 %vm228_vm0, %v76_v53  ;;  %v132_v53 = vld [vmem:[%s15651_s0 + $0x348] sm:$0xff] }
  0x6b   :  { %11081 = vmatprep.mubr.msk.f32.mxu0 %vm228_vm0, %v77_v54 }
  0x6e   :  { %11082 = vmatmul.mubr.msk.f32.gmra.mxu0 %vm228_vm0, %v78_v55  ;;  %v133_v55 = vld [vmem:[%s15651_s0 + $0x350] sm:$0xff] }
  0x6f   :  { %11084 = vmatprep.mubr.msk.f32.mxu0 %vm228_vm0, %v79_v56 }
  0x72   :  { %11085 = vmatmul.mubr.msk.f32.gmra.mxu0 %vm228_vm0, %v80_v57  ;;  %v134_v57 = vld [vmem:[%s15651_s0 + $0x358] sm:$0xff] }
  0x73   :  { %11087 = vmatprep.mubr.msk.f32.mxu0 %vm228_vm0, %v81_v58 }
  0x76   :  { %11088 = vmatmul.mubr.msk.f32.gmra.mxu0 %vm228_vm0, %v82_v59  ;;  %v135_v59 = vld [vmem:[%s15651_s0 + $0x360] sm:$0xff] }
  0x77   :  { %11090 = vmatprep.mubr.msk.f32.mxu0 %vm228_vm0, %v83_v60 }
  0x7a   :  { %11091 = vmatmul.mubr.msk.f32.gmra.mxu0 %vm228_vm0, %v84_v61  ;;  %v136_v61 = vld [vmem:[%s15651_s0 + $0x368] sm:$0xff] }
  0x7b   :  { %11093 = vmatprep.mubr.msk.f32.mxu0 %vm228_vm0, %v85_v62 }
  0x7e   :  { %11094 = vmatmul.mubr.msk.f32.gmra.mxu0 %vm228_vm0, %v86_v63  ;;  %v137_v63 = vld [vmem:[%s15651_s0 + $0x370] sm:$0xff] }
  0x7f   :  { %11096 = vmatprep.mubr.msk.f32.mxu0 %vm228_vm0, %v87_v0 }
  0x82   :  { %11097 = vmatmul.mubr.msk.f32.gmra.mxu0 %vm228_vm0, %v88_v1  ;;  %v138_v1 = vld [vmem:[%s15651_s0 + $0x378] sm:$0xff] }
  0x83   :  { %11099 = vmatprep.mubr.msk.f32.mxu0 %vm228_vm0, %v89_v2 }
  0x86   :  { %11100 = vmatmul.mubr.msk.f32.gmra.mxu0 %vm228_vm0, %v90_v3  ;;  %v139_v3 = vld [vmem:[%s15651_s0 + $0x380] sm:$0xff] }
  0x87   :  { %11102 = vmatprep.mubr.msk.f32.mxu0 %vm228_vm0, %v91_v4 }
  0x8a   :  { %11103 = vmatmul.mubr.msk.f32.gmra.mxu0 %vm228_vm0, %v92_v5  ;;  %v140_v5 = vld [vmem:[%s15651_s0 + $0x388] sm:$0xff] }
  0x8b   :  { %11105 = vmatprep.mubr.msk.f32.mxu0 %vm228_vm0, %v93_v6 }
  0x8e   :  { %11106 = vmatmul.mubr.msk.f32.gmra.mxu0 %vm228_vm0, %v94_v7  ;;  %v141_v7 = vld [vmem:[%s15651_s0 + $0x390] sm:$0xff] }
  0x8f   :  { %11108 = vmatprep.mubr.msk.f32.mxu0 %vm228_vm0, %v95_v8 }
  0x92   :  { %11109 = vmatmul.mubr.msk.f32.gmra.mxu0 %vm228_vm0, %v96_v9  ;;  %v142_v9 = vld [vmem:[%s15651_s0 + $0x398] sm:$0xff] }
  0x93   :  { %11111 = vmatprep.mubr.msk.f32.mxu0 %vm228_vm0, %v97_v10 }
  0x96   :  { %11112 = vmatmul.mubr.msk.f32.gmra.mxu0 %vm228_vm0, %v98_v11  ;;  %v143_v11 = vld [vmem:[%s15651_s0 + $0x3a0] sm:$0xff] }
  0x97   :  { %11114 = vmatprep.mubr.msk.f32.mxu0 %vm228_vm0, %v99_v12 }
  0x9a   :  { %11115 = vmatmul.mubr.msk.f32.gmra.mxu0 %vm228_vm0, %v100_v13  ;;  %v144_v13 = vld [vmem:[%s15651_s0 + $0x3a8] sm:$0xff] }
  0x9b   :  { %11117 = vmatprep.mubr.msk.f32.mxu0 %vm228_vm0, %v101_v14 }
  0x9e   :  { %11118 = vmatmul.mubr.msk.f32.gmra.mxu0 %vm228_vm0, %v102_v15  ;;  %v145_v15 = vld [vmem:[%s15651_s0 + $0x3b0] sm:$0xff] }
  0x9f   :  { %11120 = vmatprep.mubr.msk.f32.mxu0 %vm228_vm0, %v103_v16 }
  0xa2   :  { %11121 = vmatmul.mubr.msk.f32.gmra.mxu0 %vm228_vm0, %v104_v17  ;;  %v146_v17 = vld [vmem:[%s15651_s0 + $0x3b8] sm:$0xff] }
  0xa3   :  { %11123 = vmatprep.mubr.msk.f32.mxu0 %vm228_vm0, %v105_v18 }
  0xa6   :  { %11124 = vmatmul.mubr.msk.f32.gmra.mxu0 %vm228_vm0, %v106_v19  ;;  %v147_v19 = vld [vmem:[%s15651_s0 + $0x3c0] sm:$0xff] }
  0xa7   :  { %11126 = vmatprep.mubr.msk.f32.mxu0 %vm228_vm0, %v107_v20 }
  0xaa   :  { %11127 = vmatmul.mubr.msk.f32.gmra.mxu0 %vm228_vm0, %v108_v21  ;;  %v148_v21 = vld [vmem:[%s15651_s0 + $0x3c8] sm:$0xff] }
  0xab   :  { %11129 = vmatprep.mubr.msk.f32.mxu0 %vm228_vm0, %v109_v22 }
  0xae   :  { %11130 = vmatmul.mubr.msk.f32.gmra.mxu0 %vm228_vm0, %v110_v23  ;;  %v149_v23 = vld [vmem:[%s15651_s0 + $0x3d0] sm:$0xff] }
  0xaf   :  { %11132 = vmatprep.mubr.msk.f32.mxu0 %vm228_vm0, %v111_v24 }
  0xb2   :  { %11133 = vmatmul.mubr.msk.f32.gmra.mxu0 %vm228_vm0, %v112_v25  ;;  %v150_v25 = vld [vmem:[%s15651_s0 + $0x3d8] sm:$0xff] }
  0xb3   :  { %11135 = vmatprep.mubr.msk.f32.mxu0 %vm228_vm0, %v113_v26 }
  0xb6   :  { %11136 = vmatmul.mubr.msk.f32.gmra.mxu0 %vm228_vm0, %v114_v27  ;;  %v151_v27 = vld [vmem:[%s15651_s0 + $0x3e0] sm:$0xff] }
  0xb7   :  { %11138 = vmatprep.mubr.msk.f32.mxu0 %vm228_vm0, %v115_v28 }
  0xba   :  { %11139 = vmatmul.mubr.msk.f32.gmra.mxu0 %vm228_vm0, %v116_v29  ;;  %v152_v29 = vld [vmem:[%s15651_s0 + $0x3e8] sm:$0xff] }
  0xbb   :  { %11141 = vmatprep.mubr.msk.f32.mxu0 %vm228_vm0, %v117_v30 }
  0xbe   :  { %11142 = vmatmul.mubr.msk.f32.gmra.mxu0 %vm228_vm0, %v118_v31  ;;  %v153_v31 = vld [vmem:[%s15651_s0 + $0x3f0] sm:$0xff] }
  0xbf   :  { %11144 = vmatprep.mubr.msk.f32.mxu0 %vm228_vm0, %v119_v32 }
  0xc2   :  { %11145 = vmatmul.mubr.msk.f32.gmra.mxu0 %vm228_vm0, %v120_v33  ;;  %v154_v33 = vld [vmem:[%s15651_s0 + $0x3f8] sm:$0xff] }
  0xc3   :  { %11147 = vmatprep.mubr.msk.f32.mxu0 %vm228_vm0, %v121_v34 }
  0xc6   :  { %11148 = vmatmul.mubr.msk.f32.gmra.mxu0 %vm228_vm0, %v122_v35  ;;  %v155_v35 = vld [vmem:[%s15651_s0 + $0x400] sm:$0xff] }
  0xc7   :  { %11150 = vmatprep.mubr.msk.f32.mxu0 %vm228_vm0, %v123_v36 }
  0xca   :  { %v12604_v40 = vpop.f32.mrf.mxu0  ;;  %11151 = vmatmul.mubr.msk.f32.gmra.mxu0 %vm228_vm0, %v124_v38  ;;  %v10041_v38 = vld [vmem:[%s15653_s2 + $0x68] sm:$0xff] }
  0xcb   :  { %11153 = vmatprep.mubr.msk.f32.mxu0 %vm228_vm0, %v125_v39  ;;  %11632 = vmatprep.subr.mxu0 %v10041_v38 }
  0xcc   :  { %v12611_v42 = vpop.f32.mrf.mxu0  ;;  %11633 = vmatpush3.msra.mxu0 %v10041_v38 }
  0xce   :  { %v12616_v44 = vpop.f32.mrf.mxu0  ;;  %11154 = vmatmul.mubr.msk.f32.gmra.mxu0 %vm228_vm0, %v126_v41  ;;  %v157_v41 = vld [vmem:[%s15651_s0 + $0x410] sm:$0xff] }
  0xcf   :  { %11156 = vmatprep.mubr.msk.f32.mxu0 %vm228_vm0, %v127_v43 }
  0xd0   :  { %v12623_v46 = vpop.f32.mrf.mxu0 }
  0xd2   :  { %v12628_v48 = vpop.f32.mrf.mxu0  ;;  %11157 = vmatmul.mubr.msk.f32.gmra.mxu0 %vm228_vm0, %v128_v45  ;;  %v158_v45 = vld [vmem:[%s15651_s0 + $0x418] sm:$0xff] }
  0xd3   :  { %11159 = vmatprep.mubr.msk.f32.mxu0 %vm228_vm0, %v129_v47 }
  0xd4   :  { %v12635_v50 = vpop.f32.mrf.mxu0 }
  0xd6   :  { %v12640_v52 = vpop.f32.mrf.mxu0  ;;  %11160 = vmatmul.mubr.msk.f32.gmra.mxu0 %vm228_vm0, %v130_v49  ;;  %v159_v49 = vld [vmem:[%s15651_s0 + $0x420] sm:$0xff] }
  0xd7   :  { %11162 = vmatprep.mubr.msk.f32.mxu0 %vm228_vm0, %v131_v51 }
  0xd8   :  { %v12647_v54 = vpop.f32.mrf.mxu0 }
  0xda   :  { %v12652_v56 = vpop.f32.mrf.mxu0  ;;  %11163 = vmatmul.mubr.msk.f32.gmra.mxu0 %vm228_vm0, %v132_v53  ;;  %v160_v53 = vld [vmem:[%s15651_s0 + $0x428] sm:$0xff] }
  0xdb   :  { %11165 = vmatprep.mubr.msk.f32.mxu0 %vm228_vm0, %v133_v55 }
  0xdc   :  { %v12659_v58 = vpop.f32.mrf.mxu0 }
  0xde   :  { %v12664_v60 = vpop.f32.mrf.mxu0  ;;  %11166 = vmatmul.mubr.msk.f32.gmra.mxu0 %vm228_vm0, %v134_v57  ;;  %v161_v57 = vld [vmem:[%s15651_s0 + $0x430] sm:$0xff] }
  0xdf   :  { %11168 = vmatprep.mubr.msk.f32.mxu0 %vm228_vm0, %v135_v59 }
  0xe0   :  { %v12671_v62 = vpop.f32.mrf.mxu0 }
  0xe2   :  { %v12676_v0 = vpop.f32.mrf.mxu0  ;;  %11169 = vmatmul.mubr.msk.f32.gmra.mxu0 %vm228_vm0, %v136_v61  ;;  %v162_v61 = vld [vmem:[%s15651_s0 + $0x438] sm:$0xff] }
  0xe3   :  { %11171 = vmatprep.mubr.msk.f32.mxu0 %vm228_vm0, %v137_v63 }
  0xe4   :  { %v12683_v2 = vpop.f32.mrf.mxu0 }
  0xe6   :  { %v12688_v4 = vpop.f32.mrf.mxu0  ;;  %11172 = vmatmul.mubr.msk.f32.gmra.mxu0 %vm228_vm0, %v138_v1  ;;  %v163_v1 = vld [vmem:[%s15651_s0 + $0x440] sm:$0xff] }
  0xe7   :  { %11174 = vmatprep.mubr.msk.f32.mxu0 %vm228_vm0, %v139_v3 }
  0xe8   :  { %v12695_v6 = vpop.f32.mrf.mxu0 }
  0xea   :  { %v12700_v8 = vpop.f32.mrf.mxu0  ;;  %11175 = vmatmul.mubr.msk.f32.gmra.mxu0 %vm228_vm0, %v140_v5  ;;  %v164_v5 = vld [vmem:[%s15651_s0 + $0x448] sm:$0xff] }
  0xeb   :  { %11177 = vmatprep.mubr.msk.f32.mxu0 %vm228_vm0, %v141_v7 }
  0xec   :  { %v12707_v10 = vpop.f32.mrf.mxu0 }
  0xee   :  { %v12712_v12 = vpop.f32.mrf.mxu0  ;;  %11178 = vmatmul.mubr.msk.f32.gmra.mxu0 %vm228_vm0, %v142_v9  ;;  %v165_v9 = vld [vmem:[%s15651_s0 + $0x450] sm:$0xff] }
  0xef   :  { %11180 = vmatprep.mubr.msk.f32.mxu0 %vm228_vm0, %v143_v11 }
  0xf0   :  { %v12719_v14 = vpop.f32.mrf.mxu0 }
  0xf2   :  { %v12724_v16 = vpop.f32.mrf.mxu0  ;;  %11181 = vmatmul.mubr.msk.f32.gmra.mxu0 %vm228_vm0, %v144_v13  ;;  %v166_v13 = vld [vmem:[%s15651_s0 + $0x458] sm:$0xff] }
  0xf3   :  { %11183 = vmatprep.mubr.msk.f32.mxu0 %vm228_vm0, %v145_v15 }
  0xf4   :  { %v12731_v18 = vpop.f32.mrf.mxu0 }
  0xf6   :  { %v12736_v20 = vpop.f32.mrf.mxu0  ;;  %11184 = vmatmul.mubr.msk.f32.gmra.mxu0 %vm228_vm0, %v146_v17  ;;  %v167_v17 = vld [vmem:[%s15651_s0 + $0x460] sm:$0xff] }
  0xf7   :  { %11186 = vmatprep.mubr.msk.f32.mxu0 %vm228_vm0, %v147_v19 }
  0xf8   :  { %v12743_v22 = vpop.f32.mrf.mxu0 }
  0xfa   :  { %v12748_v24 = vpop.f32.mrf.mxu0  ;;  %11187 = vmatmul.mubr.msk.f32.gmra.mxu0 %vm228_vm0, %v148_v21  ;;  %v168_v21 = vld [vmem:[%s15651_s0 + $0x468] sm:$0xff] }
  0xfb   :  { %11189 = vmatprep.mubr.msk.f32.mxu0 %vm228_vm0, %v149_v23 }
  0xfc   :  { %v12755_v26 = vpop.f32.mrf.mxu0 }
  0xfe   :  { %v12760_v28 = vpop.f32.mrf.mxu0  ;;  %11190 = vmatmul.mubr.msk.f32.gmra.mxu0 %vm228_vm0, %v150_v25  ;;  %v169_v25 = vld [vmem:[%s15651_s0 + $0x470] sm:$0xff] }
  0xff   :  { %11192 = vmatprep.mubr.msk.f32.mxu0 %vm228_vm0, %v151_v27 }
 0x100   :  { %v12767_v30 = vpop.f32.mrf.mxu0 }
 0x102   :  { %v12772_v32 = vpop.f32.mrf.mxu0  ;;  %11193 = vmatmul.mubr.msk.f32.gmra.mxu0 %vm228_vm0, %v152_v29  ;;  %v170_v29 = vld [vmem:[%s15651_s0 + $0x478] sm:$0xff] }
 0x103   :  { %11195 = vmatprep.mubr.msk.f32.mxu0 %vm228_vm0, %v153_v31 }
 0x104   :  { %v12779_v34 = vpop.f32.mrf.mxu0 }
 0x106   :  { %v12784_v36 = vpop.f32.mrf.mxu0  ;;  %11196 = vmatmul.mubr.msk.f32.gmra.mxu0 %vm228_vm0, %v154_v33  ;;  %v171_v33 = vld [vmem:[%s15651_s0 + $0x480] sm:$0xff] }
 0x107   :  { %11198 = vmatprep.mubr.msk.f32.mxu0 %vm228_vm0, %v155_v35 }
 0x108   :  { %v12794_v39 = vpop.f32.mrf.mxu0 }
 0x10a   :  { %v12799_v43 = vpop.f32.mrf.mxu0  ;;  %11199 = vmatmul.mubr.msk.f32.gmra.mxu0 %vm228_vm0, %v156_v37  ;;  %v172_v37 = vld [vmem:[%s15651_s0 + $0x488] sm:$0xff] }
 0x10b   :  { %11201 = vmatprep.mubr.msk.f32.mxu0 %vm228_vm0, %v157_v41  ;;  %v173_v41 = vld [vmem:[%s15651_s0 + $0x490] sm:$0xff] }
 0x10c   :  { %v12806_v47 = vpop.f32.mrf.mxu0 }
 0x10e   :  { %v12811_v51 = vpop.f32.mrf.mxu0  ;;  %11202 = vmatmul.mubr.msk.f32.gmra.mxu0 %vm228_vm0, %v158_v45  ;;  %v12898_v45 = vld [vmem:[%s15657_s6] ss:$0 sm:$0xff] }
 0x10f   :  { %11204 = vmatprep.mubr.msk.f32.mxu0 %vm228_vm0, %v159_v49 }
 0x110   :  { %v12818_v55 = vpop.f32.mrf.mxu0 }
 0x112   :  { %v12823_v59 = vpop.f32.mrf.mxu0  ;;  %11205 = vmatmul.mubr.msk.f32.gmra.mxu0 %vm228_vm0, %v160_v53 }
 0x113   :  { %11207 = vmatprep.mubr.msk.f32.mxu0 %vm228_vm0, %v161_v57  ;;  %v174_v57 = vld [vmem:[%s15651_s0 + $0x498] sm:$0xff] }
 0x114   :  { %v12830_v63 = vpop.f32.mrf.mxu0 }
 0x116   :  { %v12835_v3 = vpop.f32.mrf.mxu0  ;;  %11208 = vmatmul.mubr.msk.f32.gmra.mxu0 %vm228_vm0, %v162_v61  ;;  %v877_v61 = vadd.f32 %v12604_v40, %v12898_v45 }
 0x117   :  { %11210 = vmatprep.mubr.msk.f32.mxu0 %vm228_vm0, %v163_v1 }
 0x118   :  { %v12842_v7 = vpop.f32.mrf.mxu0 }
 0x11a   :  { %v12847_v11 = vpop.f32.mrf.mxu0  ;;  %11211 = vmatmul.mubr.msk.f32.gmra.mxu0 %vm228_vm0, %v164_v5  ;;  %v175_v5 = vld [vmem:[%s15651_s0 + $0x4a0] sm:$0xff] }
 0x11b   :  { %11213 = vmatprep.mubr.msk.f32.mxu0 %vm228_vm0, %v165_v9  ;;  %v887_v9 = vadd.f32 %v12616_v44, %v12898_v45  ;;  %v176_v44 = vld [vmem:[%s15651_s0 + $0x4a8] sm:$0xff] }
 0x11c   :  { %v12854_v15 = vpop.f32.mrf.mxu0 }
 0x11e   :  { %v12859_v19 = vpop.f32.mrf.mxu0  ;;  %11214 = vmatmul.mubr.msk.f32.gmra.mxu0 %vm228_vm0, %v166_v13 }
 0x11f   :  { %11216 = vmatprep.mubr.msk.f32.mxu0 %vm228_vm0, %v167_v17  ;;  %v872_v17 = vadd.f32 %v12898_v45, %v12611_v42  ;;  %v177_v42 = vld [vmem:[%s15651_s0 + $0x4b0] sm:$0xff] }
 0x120   :  { %v12866_v23 = vpop.f32.mrf.mxu0 }
 0x122   :  { %v12871_v27 = vpop.f32.mrf.mxu0  ;;  %11217 = vmatmul.mubr.msk.f32.gmra.mxu0 %vm228_vm0, %v168_v21  ;;  %v882_v21 = vadd.f32 %v12898_v45, %v12623_v46 }
 0x123   :  { %11219 = vmatprep.mubr.msk.f32.mxu0 %vm228_vm0, %v169_v25 }
 0x124   :  { %v12878_v31 = vpop.f32.mrf.mxu0 }
 0x125   :  { %15682 = vst [vmem:[#allocation7_spill] sm:$0xff] %v12878_v31 }
 0x126   :  { %v12883_v35 = vpop.f32.mrf.mxu0  ;;  %11220 = vmatmul.mubr.msk.f32.gmra.mxu0 %vm228_vm0, %v170_v29 }
 0x127   :  { %11222 = vmatprep.mubr.msk.f32.mxu0 %vm228_vm0, %v171_v33  ;;  %v1831_v33 = vmax.f32 %v877_v61, 0.0 }
 0x128   :  { %v12890_v38 = vpop.f32.mrf.mxu0 }
 0x129   :  { %15683 = vst [vmem:[#allocation8_spill] sm:$0xff] %v12890_v38 }
 0x12a   :  { %v11080_v49 = vpop.f32.mrf.mxu0  ;;  %11223 = vmatmul.mubr.msk.f32.gmra.mxu0 %vm228_vm0, %v172_v37 }
 0x12b   :  { %v1117_v53 = vadd.f32 %v11080_v49, %v12898_v45  ;;  %11225 = vmatprep.mubr.msk.f32.mxu0 %vm228_vm0, %v173_v41  ;;  %v1833_v41 = vmax.f32 %v887_v9, 0.0  ;;  %v178_v9 = vld [vmem:[%s15651_s0 + $0x4b8] sm:$0xff] }
 0x12c   :  { %v1111_v1 = vpop.f32.mrf.mxu0 }
 0x12d   :  { %v1112_v13 = vadd.f32 %v12898_v45, %v1111_v1  ;;  %v1879_v40 = vmax.f32 %v1117_v53, 0.0  ;;  %v1830_v53 = vmax.f32 %v872_v17, 0.0  ;;  %v1832_v1 = vmax.f32 %v882_v21, 0.0 }
 0x12e   :  { %v11083_v25 = vpop.f32.mrf.mxu0  ;;  %11226 = vmatmul.mubr.msk.f32.gmra.mxu0 %vm228_vm0, %v174_v57  ;;  %v907_v17 = vadd.f32 %v12640_v52, %v12898_v45 }
 0x12f   :  { %v1127_v29 = vadd.f32 %v11083_v25, %v12898_v45  ;;  %11228 = vmatprep.mubr.msk.f32.mxu0 %vm228_vm0, %v175_v5  ;;  %v1878_v46 = vmax.f32 %v1112_v13, 0.0  ;;  %v2023_v5 = vmax.f32 %v1831_v33, %v1879_v40  ;;  %v897_v13 = vadd.f32 %v12628_v48, %v12898_v45  ;;  %v179_v40 = vld [vmem:[%s15651_s0 + $0x4c0] sm:$0xff] }
 0x130   :  { %v1121_v37 = vpop.f32.mrf.mxu0 }
 0x131   :  { %v1881_v49 = vmax.f32 %v1127_v29, 0.0  ;;  %v1122_v57 = vadd.f32 %v12898_v45, %v1121_v37  ;;  %v2022_v29 = vmax.f32 %v1830_v53, %v1878_v46 }
 0x132   :  { %v11086_v25 = vpop.f32.mrf.mxu0  ;;  %11229 = vmatmul.mubr.msk.f32.gmra.mxu0 %vm228_vm0, %v176_v44 }
 0x133   :  { %v2025_v38 = vmax.f32 %v1833_v41, %v1881_v49  ;;  %v1880_v31 = vmax.f32 %v1122_v57, 0.0  ;;  %v1137_v61 = vadd.f32 %v11086_v25, %v12898_v45  ;;  %11231 = vmatprep.mubr.msk.f32.mxu0 %vm228_vm0, %v177_v42  ;;  %v892_v42 = vadd.f32 %v12898_v45, %v12635_v50  ;;  %v181_v50 = vld [vmem:[%s15651_s0 + $0x4d0] sm:$0xff] }
 0x134   :  { %v1131_v21 = vpop.f32.mrf.mxu0  ;;  %v902_v41 = vadd.f32 %v12898_v45, %v12647_v54  ;;  %v1837_v54 = vmax.f32 %v907_v17, 0.0  ;;  %v182_v17 = vld [vmem:[%s15651_s0 + $0x4d8] sm:$0xff] }
 0x135   :  { %v2119_v44 = vmax.f32 %v2023_v5, %v2025_v38  ;;  %v2024_v33 = vmax.f32 %v1832_v1, %v1880_v31  ;;  %v1132_v37 = vadd.f32 %v12898_v45, %v1131_v21  ;;  %v1883_v49 = vmax.f32 %v1137_v61, 0.0  ;;  %v180_v31 = vld [vmem:[%s15651_s0 + $0x4c8] sm:$0xff] }
 0x136   :  { %v11089_v48 = vpop.f32.mrf.mxu0  ;;  %11232 = vmatmul.mubr.msk.f32.gmra.mxu0 %vm228_vm0, %v178_v9  ;;  %v1835_v38 = vmax.f32 %v897_v13, 0.0  ;;  %v1834_v5 = vmax.f32 %v892_v42, 0.0  ;;  %v1836_v61 = vmax.f32 %v902_v41, 0.0  ;;  %v183_v42 = vld [vmem:[%s15651_s0 + $0x4e0] sm:$0xff] }
 0x137   :  { %2167 = vst [vmem:[#allocation2 + $0x8] sm:$0xff] %v2119_v44  ;;  %v2118_v52 = vmax.f32 %v2022_v29, %v2024_v33  ;;  %v1147_v57 = vadd.f32 %v11089_v48, %v12898_v45  ;;  %11234 = vmatprep.mubr.msk.f32.mxu0 %vm228_vm0, %v179_v40  ;;  %v1882_v53 = vmax.f32 %v1132_v37, 0.0  ;;  %v917_v44 = vadd.f32 %v12652_v56, %v12898_v45 }
 0x138   :  { %v1141_v46 = vpop.f32.mrf.mxu0  ;;  %v2027_v21 = vmax.f32 %v1835_v38, %v1883_v49  ;;  %v927_v33 = vadd.f32 %v12664_v60, %v12898_v45 }
 0x139   :  { %2166 = vst [vmem:[#allocation2] sm:$0xff] %v2118_v52  ;;  %v1885_v1 = vmax.f32 %v1147_v57, 0.0  ;;  %v1142_v25 = vadd.f32 %v12898_v45, %v1141_v46  ;;  %v2026_v41 = vmax.f32 %v1834_v5, %v1882_v53  ;;  %v912_v57 = vadd.f32 %v12898_v45, %v12659_v58 }
 0x13a   :  { %v11092_v9 = vpop.f32.mrf.mxu0  ;;  %11235 = vmatmul.mubr.msk.f32.gmra.mxu0 %vm228_vm0, %v180_v31  ;;  %v922_v31 = vadd.f32 %v12898_v45, %v12671_v62  ;;  %v185_v62 = vld [vmem:[%s15651_s0 + $0x4f0] sm:$0xff] }
 0x13b   :  { %v2029_v40 = vmax.f32 %v1837_v54, %v1885_v1  ;;  %v1884_v29 = vmax.f32 %v1142_v25, 0.0  ;;  %v1157_v13 = vadd.f32 %v11092_v9, %v12898_v45  ;;  %11237 = vmatprep.mubr.msk.f32.mxu0 %vm228_vm0, %v181_v50  ;;  %v184_v50 = vld [vmem:[%s15651_s0 + $0x4e8] sm:$0xff]  ;;  %v1839_v54 = vmax.f32 %v917_v44, 0.0 }
 0x13c   :  { %v1151_v37 = vpop.f32.mrf.mxu0  ;;  %v1841_v1 = vmax.f32 %v927_v33, 0.0  ;;  %v1838_v9 = vmax.f32 %v912_v57, 0.0  ;;  %v186_v33 = vld [vmem:[%s15651_s0 + $0x4f8] sm:$0xff] }
 0x13d   :  { %v2121_v48 = vmax.f32 %v2027_v21, %v2029_v40  ;;  %v2028_v52 = vmax.f32 %v1836_v61, %v1884_v29  ;;  %v1152_v49 = vadd.f32 %v12898_v45, %v1151_v37  ;;  %v1887_v38 = vmax.f32 %v1157_v13, 0.0 }
 0x13e   :  { %v11095_v56 = vpop.f32.mrf.mxu0  ;;  %11238 = vmatmul.mubr.msk.f32.gmra.mxu0 %vm228_vm0, %v182_v17  ;;  %v1840_v21 = vmax.f32 %v922_v31, 0.0  ;;  %v937_v37 = vadd.f32 %v12676_v0, %v12898_v45 }
 0x13f   :  { %2169 = vst [vmem:[#allocation2 + $0x18] sm:$0xff] %v2121_v48  ;;  %v2120_v60 = vmax.f32 %v2026_v41, %v2028_v52  ;;  %v1167_v46 = vadd.f32 %v11095_v56, %v12898_v45  ;;  %11240 = vmatprep.mubr.msk.f32.mxu0 %vm228_vm0, %v183_v42  ;;  %v1886_v25 = vmax.f32 %v1152_v49, 0.0  ;;  %v2031_v29 = vmax.f32 %v1839_v54, %v1887_v38  ;;  %v187_v48 = vld [vmem:[%s15651_s0 + $0x500] sm:$0xff] }
 0x140   :  { %v1161_v58 = vpop.f32.mrf.mxu0  ;;  %v2231_v53 = vld [vmem:[#allocation2 + $0x1] sm:$0xff]  ;;  %v947_v42 = vadd.f32 %v12688_v4, %v12898_v45  ;;  %v932_v56 = vadd.f32 %v12898_v45, %v12683_v2  ;;  %v1843_v54 = vmax.f32 %v937_v37, 0.0 }
 0x141   :  { %2168 = vst [vmem:[#allocation2 + $0x10] sm:$0xff] %v2120_v60  ;;  %v1889_v5 = vmax.f32 %v1167_v46, 0.0  ;;  %v1162_v61 = vadd.f32 %v12898_v45, %v1161_v58  ;;  %11296 = vmatprep.mubr.msk.f32.mxu1 %vm2249_vm1, %v2231_v53  ;;  %v2030_v52 = vmax.f32 %v1838_v9, %v1886_v25  ;;  %v942_v60 = vadd.f32 %v12898_v45, %v12695_v6  ;;  %v189_v6 = vld [vmem:[%s15651_s0 + $0x510] sm:$0xff] }
 0x142   :  { %v11098_v40 = vpop.f32.mrf.mxu0  ;;  %11241 = vmatmul.mubr.msk.f32.gmra.mxu0 %vm228_vm0, %v184_v50  ;;  %v188_v50 = vld [vmem:[%s15651_s0 + $0x508] sm:$0xff]  ;;  %v1845_v53 = vmax.f32 %v947_v42, 0.0  ;;  %v191_v42 = vld [vmem:[%s15651_s0 + $0x520] sm:$0xff] }
 0x143   :  { %v2033_v13 = vmax.f32 %v1841_v1, %v1889_v5  ;;  %v1888_v17 = vmax.f32 %v1162_v61, 0.0  ;;  %v1177_v44 = vadd.f32 %v11098_v40, %v12898_v45  ;;  %11243 = vmatprep.mubr.msk.f32.mxu0 %vm228_vm0, %v185_v62  ;;  %v1842_v5 = vmax.f32 %v932_v56, 0.0 }
 0x144   :  { %v1171_v41 = vpop.f32.mrf.mxu0  ;;  %v1844_v61 = vmax.f32 %v942_v60, 0.0 }
 0x145   :  { %v2123_v49 = vmax.f32 %v2031_v29, %v2033_v13  ;;  %v2032_v57 = vmax.f32 %v1840_v21, %v1888_v17  ;;  %v1172_v31 = vadd.f32 %v12898_v45, %v1171_v41  ;;  %v1891_v38 = vmax.f32 %v1177_v44, 0.0  ;;  %v190_v17 = vld [vmem:[%s15651_s0 + $0x518] sm:$0xff] }
 0x146   :  { %v11101_v0 = vpop.f32.mrf.mxu0  ;;  %11244 = vmatmul.mubr.msk.f32.gmra.mxu0 %vm228_vm0, %v186_v33  ;;  %v957_v44 = vadd.f32 %v12700_v8, %v12898_v45  ;;  %v967_v33 = vadd.f32 %v12712_v12, %v12898_v45 }
 0x147   :  { %2171 = vst [vmem:[#allocation2 + $0x28] sm:$0xff] %v2123_v49  ;;  %v2122_v4 = vmax.f32 %v2030_v52, %v2032_v57  ;;  %v1187_v46 = vadd.f32 %v11101_v0, %v12898_v45  ;;  %11246 = vmatprep.mubr.msk.f32.mxu0 %vm228_vm0, %v187_v48  ;;  %v1890_v62 = vmax.f32 %v1172_v31, 0.0  ;;  %v2035_v21 = vmax.f32 %v1843_v54, %v1891_v38  ;;  %v192_v0 = vld [vmem:[%s15651_s0 + $0x528] sm:$0xff] }
 0x148   :  { %v1181_v58 = vpop.f32.mrf.mxu0  ;;  %v2232_v2 = vld [vmem:[#allocation2 + $0x11] sm:$0xff]  ;;  %v952_v57 = vadd.f32 %v12898_v45, %v12707_v10  ;;  %v962_v31 = vadd.f32 %v12898_v45, %v12719_v14 }
 0x149   :  { %2170 = vst [vmem:[#allocation2 + $0x20] sm:$0xff] %v2122_v4  ;;  %v1893_v1 = vmax.f32 %v1187_v46, 0.0  ;;  %v1182_v25 = vadd.f32 %v12898_v45, %v1181_v58  ;;  %11297 = vmatmul.mubr.msk.f32.vlgmr.msra.gmra.mxu1 %vm2249_vm1, %v2232_v2  ;;  %v2034_v41 = vmax.f32 %v1842_v5, %v1890_v62  ;;  %v1847_v4 = vmax.f32 %v957_v44, 0.0  ;;  %v193_v14 = vld [vmem:[%s15651_s0 + $0x530] sm:$0xff] }
 0x14a   :  { %v11104_v9 = vpop.f32.mrf.mxu0  ;;  %11247 = vmatmul.mubr.msk.f32.gmra.mxu0 %vm228_vm0, %v188_v50  ;;  %v1849_v46 = vmax.f32 %v967_v33, 0.0  ;;  %v1846_v2 = vmax.f32 %v952_v57, 0.0 }
 0x14b   :  { %v2037_v40 = vmax.f32 %v1845_v53, %v1893_v1  ;;  %v1892_v29 = vmax.f32 %v1182_v25, 0.0  ;;  %v1197_v13 = vadd.f32 %v11104_v9, %v12898_v45  ;;  %11249 = vmatprep.mubr.msk.f32.mxu0 %vm228_vm0, %v189_v6  ;;  %v1848_v6 = vmax.f32 %v962_v31, 0.0 }
 0x14c   :  { %v1191_v37 = vpop.f32.mrf.mxu0  ;;  %v977_v9 = vadd.f32 %v12724_v16, %v12898_v45 }
 0x14d   :  { %v2125_v48 = vmax.f32 %v2035_v21, %v2037_v40  ;;  %v2036_v52 = vmax.f32 %v1844_v61, %v1892_v29  ;;  %v1192_v49 = vadd.f32 %v12898_v45, %v1191_v37  ;;  %v1895_v56 = vmax.f32 %v1197_v13, 0.0  ;;  %v194_v61 = vld [vmem:[%s15651_s0 + $0x538] sm:$0xff]  ;;  %v195_v29 = vld [vmem:[%s15651_s0 + $0x540] sm:$0xff] }
 0x14e   :  { %v11107_v8 = vpop.f32.mrf.mxu0  ;;  %11250 = vmatmul.mubr.msk.f32.gmra.mxu0 %vm228_vm0, %v190_v17  ;;  %v987_v21 = vadd.f32 %v12736_v20, %v12898_v45  ;;  %v972_v37 = vadd.f32 %v12898_v45, %v12731_v18 }
 0x14f   :  { %2173 = vst [vmem:[#allocation2 + $0x38] sm:$0xff] %v2125_v48  ;;  %v2124_v12 = vmax.f32 %v2034_v41, %v2036_v52  ;;  %v1207_v60 = vadd.f32 %v11107_v8, %v12898_v45  ;;  %11252 = vmatprep.mubr.msk.f32.mxu0 %vm228_vm0, %v191_v42  ;;  %v1894_v50 = vmax.f32 %v1192_v49, 0.0  ;;  %v2039_v62 = vmax.f32 %v1847_v4, %v1895_v56  ;;  %v196_v52 = vld [vmem:[%s15651_s0 + $0x548] sm:$0xff] }
 0x150   :  { %v1201_v38 = vpop.f32.mrf.mxu0  ;;  %v2233_v10 = vld [vmem:[#allocation2 + $0x21] sm:$0xff]  ;;  %v982_v42 = vadd.f32 %v12898_v45, %v12743_v22  ;;  %v1851_v49 = vmax.f32 %v977_v9, 0.0  ;;  %v197_v22 = vld [vmem:[%s15651_s0 + $0x550] sm:$0xff]  ;;  %v1853_v31 = vmax.f32 %v987_v21, 0.0 }
 0x151   :  { %2172 = vst [vmem:[#allocation2 + $0x30] sm:$0xff] %v2124_v12  ;;  %v1897_v54 = vmax.f32 %v1207_v60, 0.0  ;;  %v1202_v58 = vadd.f32 %v12898_v45, %v1201_v38  ;;  %11299 = vmatprep.mubr.msk.f32.mxu1 %vm2249_vm1, %v2233_v10  ;;  %v2038_v13 = vmax.f32 %v1846_v2, %v1894_v50  ;;  %v1850_v60 = vmax.f32 %v972_v37, 0.0  ;;  %v198_v50 = vld [vmem:[%s15651_s0 + $0x558] sm:$0xff] }
 0x152   :  { %v11110_v53 = vpop.f32.mrf.mxu0  ;;  %11253 = vmatmul.mubr.msk.f32.gmra.mxu0 %vm228_vm0, %v192_v0  ;;  %v1852_v0 = vmax.f32 %v982_v42, 0.0 }
 0x153   :  { %v2041_v1 = vmax.f32 %v1849_v46, %v1897_v54  ;;  %v1896_v25 = vmax.f32 %v1202_v58, 0.0  ;;  %v1217_v5 = vadd.f32 %v11110_v53, %v12898_v45  ;;  %11255 = vmatprep.mubr.msk.f32.mxu0 %vm228_vm0, %v193_v14  ;;  %v997_v54 = vadd.f32 %v12748_v24, %v12898_v45 }
 0x154   :  { %v1211_v40 = vpop.f32.mrf.mxu0  ;;  %v1007_v58 = vadd.f32 %v12760_v28, %v12898_v45 }
 0x155   :  { %v2127_v17 = vmax.f32 %v2039_v62, %v2041_v1  ;;  %v2040_v44 = vmax.f32 %v1848_v6, %v1896_v25  ;;  %v1212_v33 = vadd.f32 %v12898_v45, %v1211_v40  ;;  %v1899_v41 = vmax.f32 %v1217_v5, 0.0  ;;  %v199_v6 = vld [vmem:[%s15651_s0 + $0x560] sm:$0xff]  ;;  %v200_v40 = vld [vmem:[%s15651_s0 + $0x568] sm:$0xff] }
 0x156   :  { %v11113_v16 = vpop.f32.mrf.mxu0  ;;  %11256 = vmatmul.mubr.msk.f32.gmra.mxu0 %vm228_vm0, %v194_v61  ;;  %v992_v5 = vadd.f32 %v12898_v45, %v12755_v26  ;;  %v1002_v61 = vadd.f32 %v12898_v45, %v12767_v30  ;;  %v201_v30 = vld [vmem:[%s15651_s0 + $0x570] sm:$0xff] }
 0x157   :  { %2175 = vst [vmem:[#allocation2 + $0x48] sm:$0xff] %v2127_v17  ;;  %v2126_v20 = vmax.f32 %v2038_v13, %v2040_v44  ;;  %v1227_v48 = vadd.f32 %v11113_v16, %v12898_v45  ;;  %11258 = vmatprep.mubr.msk.f32.mxu0 %vm228_vm0, %v195_v29  ;;  %v1898_v8 = vmax.f32 %v1212_v33, 0.0  ;;  %v2043_v38 = vmax.f32 %v1851_v49, %v1899_v41 }
 0x158   :  { %v1221_v57 = vpop.f32.mrf.mxu0  ;;  %v2234_v18 = vld [vmem:[#allocation2 + $0x31] sm:$0xff]  ;;  %v1855_v29 = vmax.f32 %v997_v54, 0.0  ;;  %v1857_v17 = vmax.f32 %v1007_v58, 0.0  ;;  %v1854_v42 = vmax.f32 %v992_v5, 0.0  ;;  %v1856_v16 = vmax.f32 %v1002_v61, 0.0 }
 0x159   :  { %2174 = vst [vmem:[#allocation2 + $0x40] sm:$0xff] %v2126_v20  ;;  %v1901_v12 = vmax.f32 %v1227_v48, 0.0  ;;  %v1222_v56 = vadd.f32 %v12898_v45, %v1221_v57  ;;  %11300 = vmatmul.mubr.msk.f32.gmra.mxu1 %vm2249_vm1, %v2234_v18  ;;  %v2042_v53 = vmax.f32 %v1850_v60, %v1898_v8  ;;  %v202_v57 = vld [vmem:[%s15651_s0 + $0x578] sm:$0xff]  ;;  %v1017_v18 = vadd.f32 %v12772_v32, %v12898_v45  ;;  %v203_v8 = vld [vmem:[%s15651_s0 + $0x580] sm:$0xff] }
 0x15a   :  { %v11116_v4 = vpop.f32.mrf.mxu0  ;;  %11259 = vmatmul.mubr.msk.f32.gmra.mxu0 %vm228_vm0, %v196_v52 }
 0x15b   :  { %v2045_v10 = vmax.f32 %v1853_v31, %v1901_v12  ;;  %v1900_v14 = vmax.f32 %v1222_v56, 0.0  ;;  %v1237_v46 = vadd.f32 %v11116_v4, %v12898_v45  ;;  %11261 = vmatprep.mubr.msk.f32.mxu0 %vm228_vm0, %v197_v22  ;;  %v1027_v22 = vadd.f32 %v12784_v36, %v12898_v45 }
 0x15c   :  { %v1231_v2 = vpop.f32.mrf.mxu0  ;;  %v1012_v4 = vadd.f32 %v12898_v45, %v12779_v34 }
 0x15d   :  { %v2129_v62 = vmax.f32 %v2043_v38, %v2045_v10  ;;  %v2044_v1 = vmax.f32 %v1852_v0, %v1900_v14  ;;  %v1232_v25 = vadd.f32 %v12898_v45, %v1231_v2  ;;  %v1903_v9 = vmax.f32 %v1237_v46, 0.0  ;;  %v204_v46 = vld [vmem:[%s15651_s0 + $0x588] sm:$0xff] }
 0x15e   :  { %v11119_v24 = vpop.f32.mrf.mxu0  ;;  %11262 = vmatmul.mubr.msk.f32.gmra.mxu0 %vm228_vm0, %v198_v50  ;;  %v1022_v38 = vadd.f32 %v12898_v45, %v12794_v39  ;;  %v1859_v50 = vmax.f32 %v1017_v18, 0.0  ;;  %v205_v39 = vld [vmem:[%s15651_s0 + $0x590] sm:$0xff]  ;;  %v1861_v58 = vmax.f32 %v1027_v22, 0.0 }
 0x15f   :  { %2177 = vst [vmem:[#allocation2 + $0x58] sm:$0xff] %v2129_v62  ;;  %v2128_v28 = vmax.f32 %v2042_v53, %v2044_v1  ;;  %v1247_v21 = vadd.f32 %v11119_v24, %v12898_v45  ;;  %11264 = vmatprep.mubr.msk.f32.mxu0 %vm228_vm0, %v199_v6  ;;  %v1902_v44 = vmax.f32 %v1232_v25, 0.0  ;;  %v2047_v41 = vmax.f32 %v1855_v29, %v1903_v9  ;;  %v206_v9 = vld [vmem:[%s15651_s0 + $0x598] sm:$0xff] }
 0x160   :  { %v1241_v13 = vpop.f32.mrf.mxu0  ;;  %v2235_v26 = vld [vmem:[#allocation2 + $0x41] sm:$0xff]  ;;  %v1858_v62 = vmax.f32 %v1012_v4, 0.0  ;;  %v1860_v1 = vmax.f32 %v1022_v38, 0.0  ;;  %v210_v4 = vld [vmem:[%s15651_s0 + $0x5b8] sm:$0xff]  ;;  %v1057_v38 = vadd.f32 %v12823_v59, %v12898_v45 }
 0x161   :  { %2176 = vst [vmem:[#allocation2 + $0x50] sm:$0xff] %v2128_v28  ;;  %v1905_v33 = vmax.f32 %v1247_v21, 0.0  ;;  %v1242_v37 = vadd.f32 %v12898_v45, %v1241_v13  ;;  %11302 = vmatprep.mubr.msk.f32.mxu1 %vm2249_vm1, %v2235_v26  ;;  %v2046_v12 = vmax.f32 %v1854_v42, %v1902_v44  ;;  %v1037_v21 = vadd.f32 %v12799_v43, %v12898_v45  ;;  %v207_v13 = vld [vmem:[%s15651_s0 + $0x5a0] sm:$0xff] }
 0x162   :  { %v11122_v20 = vpop.f32.mrf.mxu0  ;;  %11265 = vmatmul.mubr.msk.f32.gmra.mxu0 %vm228_vm0, %v200_v40  ;;  %v1047_v40 = vadd.f32 %v12811_v51, %v12898_v45 }
 0x163   :  { %v2049_v48 = vmax.f32 %v1857_v17, %v1905_v33  ;;  %v1904_v52 = vmax.f32 %v1242_v37, 0.0  ;;  %v1257_v49 = vadd.f32 %v11122_v20, %v12898_v45  ;;  %11267 = vmatprep.mubr.msk.f32.mxu0 %vm228_vm0, %v201_v30  ;;  %v1032_v33 = vadd.f32 %v12898_v45, %v12806_v47  ;;  %v208_v20 = vld [vmem:[%s15651_s0 + $0x5a8] sm:$0xff] }
 0x164   :  { %v1251_v31 = vpop.f32.mrf.mxu0  ;;  %v1042_v37 = vadd.f32 %v12898_v45, %v12818_v55  ;;  %v209_v55 = vld [vmem:[%s15651_s0 + $0x5b0] sm:$0xff] }
 0x165   :  { %v2131_v56 = vmax.f32 %v2047_v41, %v2049_v48  ;;  %v2048_v60 = vmax.f32 %v1856_v16, %v1904_v52  ;;  %v1252_v0 = vadd.f32 %v12898_v45, %v1251_v31  ;;  %v1907_v10 = vmax.f32 %v1257_v49, 0.0 }
 0x166   :  { %v11125_v32 = vpop.f32.mrf.mxu0  ;;  %11268 = vmatmul.mubr.msk.f32.gmra.mxu0 %vm228_vm0, %v202_v57  ;;  %v1863_v41 = vmax.f32 %v1037_v21, 0.0  ;;  %v1865_v52 = vmax.f32 %v1047_v40, 0.0  ;;  %v1862_v22 = vmax.f32 %v1032_v33, 0.0  ;;  %v1864_v31 = vmax.f32 %v1042_v37, 0.0  ;;  %v215_v33 = vld [vmem:[%s15651_s0 + $0x5e0] sm:$0xff] }
 0x167   :  { %2179 = vst [vmem:[#allocation2 + $0x68] sm:$0xff] %v2131_v56  ;;  %v2130_v36 = vmax.f32 %v2046_v12, %v2048_v60  ;;  %v1267_v14 = vadd.f32 %v11125_v32, %v12898_v45  ;;  %11270 = vmatprep.mubr.msk.f32.mxu0 %vm228_vm0, %v203_v8  ;;  %v1906_v2 = vmax.f32 %v1252_v0, 0.0  ;;  %v2051_v5 = vmax.f32 %v1859_v50, %v1907_v10  ;;  %v211_v10 = vld [vmem:[%s15651_s0 + $0x5c0] sm:$0xff] }
 0x168   :  { %v1261_v54 = vpop.f32.mrf.mxu0  ;;  %v2236_v34 = vld [vmem:[#allocation2 + $0x51] sm:$0xff]  ;;  %v1067_v32 = vadd.f32 %v12835_v3, %v12898_v45 }
 0x169   :  { %2178 = vst [vmem:[#allocation2 + $0x60] sm:$0xff] %v2130_v36  ;;  %v1909_v6 = vmax.f32 %v1267_v14, 0.0  ;;  %v1262_v53 = vadd.f32 %v12898_v45, %v1261_v54  ;;  %11303 = vmatmul.mubr.msk.f32.gmra.mxu1 %vm2249_vm1, %v2236_v34  ;;  %v2050_v26 = vmax.f32 %v1858_v62, %v1906_v2  ;;  %v1052_v34 = vadd.f32 %v12898_v45, %v12830_v63 }
 0x16a   :  { %v11128_v25 = vpop.f32.mrf.mxu0  ;;  %11271 = vmatmul.mubr.msk.f32.gmra.mxu0 %vm228_vm0, %v204_v46 }
 0x16b   :  { %v2053_v61 = vmax.f32 %v1861_v58, %v1909_v6  ;;  %v1908_v24 = vmax.f32 %v1262_v53, 0.0  ;;  %v1277_v28 = vadd.f32 %v11128_v25, %v12898_v45  ;;  %11273 = vmatprep.mubr.msk.f32.mxu0 %vm228_vm0, %v205_v39  ;;  %v1062_v39 = vadd.f32 %v12898_v45, %v12842_v7  ;;  %v212_v6 = vld [vmem:[%s15651_s0 + $0x5c8] sm:$0xff]  ;;  %v213_v7 = vld [vmem:[%s15651_s0 + $0x5d0] sm:$0xff] }
 0x16c   :  { %v1271_v29 = vpop.f32.mrf.mxu0  ;;  %v1867_v53 = vmax.f32 %v1057_v38, 0.0  ;;  %v1097_v38 = vadd.f32 %v12871_v27, %v12898_v45 }
 0x16d   :  { %v2133_v30 = vmax.f32 %v2051_v5, %v2053_v61  ;;  %v2052_v17 = vmax.f32 %v1860_v1, %v1908_v24  ;;  %v1272_v44 = vadd.f32 %v12898_v45, %v1271_v29  ;;  %v1911_v42 = vmax.f32 %v1277_v28, 0.0 }
 0x16e   :  { %v11131_v43 = vpop.f32.mrf.mxu0  ;;  %11274 = vmatmul.mubr.msk.f32.gmra.mxu0 %vm228_vm0, %v206_v9  ;;  %v1869_v1 = vmax.f32 %v1067_v32, 0.0  ;;  %v1866_v24 = vmax.f32 %v1052_v34, 0.0  ;;  %v1868_v28 = vmax.f32 %v1062_v39, 0.0  ;;  %v1107_v32 = vadd.f32 %v12883_v35, %v12898_v45 }
 0x16f   :  { %2181 = vst [vmem:[#allocation2 + $0x78] sm:$0xff] %v2133_v30  ;;  %v2132_v51 = vmax.f32 %v2050_v26, %v2052_v17  ;;  %v1287_v16 = vadd.f32 %v11131_v43, %v12898_v45  ;;  %11276 = vmatprep.mubr.msk.f32.mxu0 %vm228_vm0, %v207_v13  ;;  %v1910_v49 = vmax.f32 %v1272_v44, 0.0  ;;  %v2055_v12 = vmax.f32 %v1863_v41, %v1911_v42  ;;  %v214_v26 = vld [vmem:[%s15651_s0 + $0x5d8] sm:$0xff] }
 0x170   :  { %v1281_v48 = vpop.f32.mrf.mxu0  ;;  %v2237_v47 = vld [vmem:[#allocation2 + $0x61] sm:$0xff]  ;;  %v1077_v30 = vadd.f32 %v12847_v11, %v12898_v45  ;;  %v1087_v17 = vadd.f32 %v12859_v19, %v12898_v45 }
 0x171   :  { %2180 = vst [vmem:[#allocation2 + $0x70] sm:$0xff] %v2132_v51  ;;  %v1913_v57 = vmax.f32 %v1287_v16, 0.0  ;;  %v1282_v18 = vadd.f32 %v12898_v45, %v1281_v48  ;;  %11305 = vmatprep.mubr.msk.f32.mxu1 %vm2249_vm1, %v2237_v47  ;;  %v2054_v14 = vmax.f32 %v1862_v22, %v1910_v49  ;;  %v1072_v16 = vadd.f32 %v12898_v45, %v12854_v15  ;;  %v216_v47 = vld [vmem:[%s15651_s0 + $0x5e8] sm:$0xff]  ;;  %v217_v15 = vld [vmem:[%s15651_s0 + $0x5f0] sm:$0xff] }
 0x172   :  { %v11134_v8 = vpop.f32.mrf.mxu0  ;;  %11277 = vmatmul.mubr.msk.f32.gmra.mxu0 %vm228_vm0, %v208_v20  ;;  %v1082_v20 = vadd.f32 %v12898_v45, %v12866_v23  ;;  %v1873_v23 = vmax.f32 %v1087_v17, 0.0  ;;  %v5138_v17 = vld [vmem:[#allocation2 + $0x53] sm:$0xff] }
 0x173   :  { %v2057_v56 = vmax.f32 %v1865_v52, %v1913_v57  ;;  %v1912_v60 = vmax.f32 %v1282_v18, 0.0  ;;  %v1297_v0 = vadd.f32 %v11134_v8, %v12898_v45  ;;  %11279 = vmatprep.mubr.msk.f32.mxu0 %vm228_vm0, %v209_v55  ;;  %v1871_v55 = vmax.f32 %v1077_v30, 0.0 }
 0x174   :  { %v1291_v36 = vpop.f32.mrf.mxu0  ;;  %v1870_v22 = vmax.f32 %v1072_v16, 0.0 }
 0x175   :  { %v2135_v46 = vmax.f32 %v2055_v12, %v2057_v56  ;;  %v2056_v50 = vmax.f32 %v1864_v31, %v1912_v60  ;;  %v1292_v54 = vadd.f32 %v12898_v45, %v1291_v36  ;;  %v1915_v58 = vmax.f32 %v1297_v0, 0.0 }
 0x176   :  { %v11137_v59 = vpop.f32.mrf.mxu0  ;;  %11280 = vmatmul.mubr.msk.f32.gmra.mxu0 %vm228_vm0, %v210_v4  ;;  %v1872_v31 = vmax.f32 %v1082_v20, 0.0  ;;  %v218_v4 = vld [vmem:[%s15651_s0 + $0x5f8] sm:$0xff] }
 0x177   :  { %2183 = vst [vmem:[#allocation2 + $0x88] sm:$0xff] %v2135_v46  ;;  %v2134_v3 = vmax.f32 %v2054_v14, %v2056_v50  ;;  %v1307_v2 = vadd.f32 %v11137_v59, %v12898_v45  ;;  %11282 = vmatprep.mubr.msk.f32.mxu0 %vm228_vm0, %v211_v10  ;;  %v1914_v25 = vmax.f32 %v1292_v54, 0.0  ;;  %v2059_v21 = vmax.f32 %v1867_v53, %v1915_v58  ;;  %v15684_v54 = vld [vmem:[#allocation7_spill] sm:$0xff] }
 0x178   :  { %v1301_v62 = vpop.f32.mrf.mxu0  ;;  %v2238_v63 = vld [vmem:[#allocation2 + $0x71] sm:$0xff]  ;;  %v1092_v34 = vadd.f32 %v12898_v45, %v15684_v54  ;;  %v5135_v59 = vld [vmem:[#allocation2 + $0x23] sm:$0xff] }
 0x179   :  { %2182 = vst [vmem:[#allocation2 + $0x80] sm:$0xff] %v2134_v3  ;;  %v1917_v5 = vmax.f32 %v1307_v2, 0.0  ;;  %v1302_v61 = vadd.f32 %v12898_v45, %v1301_v62  ;;  %11306 = vmatmul.mubr.msk.f32.gmra.mxu1 %vm2249_vm1, %v2238_v63  ;;  %v2058_v37 = vmax.f32 %v1866_v24, %v1914_v25  ;;  %v15685_v3 = vld [vmem:[#allocation8_spill] sm:$0xff]  ;;  %v1877_v62 = vmax.f32 %v1107_v32, 0.0  ;;  %v5136_v25 = vld [vmem:[#allocation2 + $0x33] sm:$0xff] }
 0x17a   :  { %v11140_v9 = vpop.f32.mrf.mxu0  ;;  %11283 = vmatmul.mubr.msk.f32.gmra.mxu0 %vm228_vm0, %v212_v6  ;;  %v1102_v58 = vadd.f32 %v12898_v45, %v15685_v3  ;;  %v1875_v6 = vmax.f32 %v1097_v38, 0.0  ;;  %v5137_v24 = vld [vmem:[#allocation2 + $0x43] sm:$0xff] }
 0x17b   :  { %v2061_v40 = vmax.f32 %v1869_v1, %v1917_v5  ;;  %v1916_v29 = vmax.f32 %v1302_v61, 0.0  ;;  %v1317_v13 = vadd.f32 %v11140_v9, %v12898_v45  ;;  %11285 = vmatprep.mubr.msk.f32.mxu0 %vm228_vm0, %v213_v7  ;;  %v1874_v5 = vmax.f32 %v1092_v34, 0.0 }
 0x17c   :  { %v1311_v44 = vpop.f32.mrf.mxu0 }
 0x17d   :  { %v2137_v43 = vmax.f32 %v2059_v21, %v2061_v40  ;;  %v2060_v51 = vmax.f32 %v1868_v28, %v1916_v29  ;;  %v1312_v42 = vadd.f32 %v12898_v45, %v1311_v44  ;;  %v1919_v41 = vmax.f32 %v1317_v13, 0.0  ;;  %v5139_v44 = vld [vmem:[#allocation2 + $0x63] sm:$0xff] }
 0x17e   :  { %v11143_v11 = vpop.f32.mrf.mxu0  ;;  %11286 = vmatmul.mubr.msk.f32.gmra.mxu0 %vm228_vm0, %v214_v26  ;;  %v1876_v28 = vmax.f32 %v1102_v58, 0.0 }
 0x17f   :  { %2185 = vst [vmem:[#allocation2 + $0x98] sm:$0xff] %v2137_v43  ;;  %v2136_v19 = vmax.f32 %v2058_v37, %v2060_v51  ;;  %v1327_v48 = vadd.f32 %v11143_v11, %v12898_v45  ;;  %11288 = vmatprep.mubr.msk.f32.mxu0 %vm228_vm0, %v215_v33  ;;  %v1918_v49 = vmax.f32 %v1312_v42, 0.0  ;;  %v2063_v12 = vmax.f32 %v1871_v55, %v1919_v41  ;;  %v5140_v43 = vld [vmem:[#allocation2 + $0x73] sm:$0xff] }
 0x180   :  { %v1321_v52 = vpop.f32.mrf.mxu0  ;;  %v5141_v42 = vld [vmem:[#allocation2 + $0x83] sm:$0xff] }
 0x181   :  { %2184 = vst [vmem:[#allocation2 + $0x90] sm:$0xff] %v2136_v19  ;;  %v1921_v57 = vmax.f32 %v1327_v48, 0.0  ;;  %v1322_v18 = vadd.f32 %v12898_v45, %v1321_v52  ;;  %v2062_v10 = vmax.f32 %v1870_v22, %v1918_v49  ;;  %v2230_v52 = vld [vmem:[%s15653_s2] sm:$0xff] }
 0x182   :  { %v11146_v8 = vpop.f32.mrf.mxu0  ;;  %11289 = vmatmul.mubr.msk.f32.gmra.mxu0 %vm228_vm0, %v216_v47  ;;  %11320 = vmatprep.subr.mxu1 %v2230_v52 }
 0x183   :  { %v2065_v56 = vmax.f32 %v1873_v23, %v1921_v57  ;;  %v1920_v60 = vmax.f32 %v1322_v18, 0.0  ;;  %v1337_v0 = vadd.f32 %v11146_v8, %v12898_v45  ;;  %11291 = vmatprep.mubr.msk.f32.mxu0 %vm228_vm0, %v217_v15  ;;  %11321 = vmatpush3.msra.mxu1 %v2230_v52 }
 0x184   :  { %v1331_v36 = vpop.f32.mrf.mxu0 }
 0x185   :  { %v2139_v14 = vmax.f32 %v2063_v12, %v2065_v56  ;;  %v2064_v46 = vmax.f32 %v1872_v31, %v1920_v60  ;;  %v1332_v50 = vadd.f32 %v12898_v45, %v1331_v36  ;;  %v1923_v2 = vmax.f32 %v1337_v0, 0.0 }
 0x186   :  { %v11149_v39 = vpop.f32.mrf.mxu0  ;;  %11292 = vmatmul.mubr.msk.f32.gmra.mxu0 %vm228_vm0, %v218_v4 }
 0x187   :  { %2187 = vst [vmem:[#allocation2 + $0xa8] sm:$0xff] %v2139_v14  ;;  %v2138_v27 = vmax.f32 %v2062_v10, %v2064_v46  ;;  %v1347_v35 = vadd.f32 %v11149_v39, %v12898_v45  ;;  %11634 = vmatprep.mubr.msk.f32.mxu0 %vm2249_vm1, %v5135_v59  ;;  %v1922_v63 = vmax.f32 %v1332_v50, 0.0  ;;  %v2067_v9 = vmax.f32 %v1875_v6, %v1923_v2  ;;  %v13304_v10 = vld [vmem:[%s15653_s2 + $0x10] sm:$0xff]  ;;  %v10075_v39 = vld [vmem:[%s15653_s2 + $0x78] sm:$0xff] }
 0x188   :  { %v1341_v53 = vpop.f32.mrf.mxu0  ;;  %v5142_v20 = vld [vmem:[#allocation2 + $0x93] sm:$0xff]  ;;  %15686 = vst [vmem:[#allocation7_spill] sm:$0xff] %v13304_v10  ;;  %11346 = vmatprep.subr.mxu1 %v13304_v10  ;;  %11684 = vmatprep.subr.mxu0 %v10075_v39 }
 0x189   :  { %2186 = vst [vmem:[#allocation2 + $0xa0] sm:$0xff] %v2138_v27  ;;  %v1925_v7 = vmax.f32 %v1347_v35, 0.0  ;;  %v1342_v1 = vadd.f32 %v12898_v45, %v1341_v53  ;;  %v2066_v13 = vmax.f32 %v1874_v5, %v1922_v63 }
 0x18a   :  { %v13235_v61 = vpop.f32.mrf.mxu0  ;;  %11635 = vmatmul.mubr.msk.f32.vlgmr.msra.gmra.mxu0 %vm2249_vm1, %v5136_v25 }
 0x18b   :  { %v2069_v21 = vmax.f32 %v1877_v62, %v1925_v7  ;;  %v1924_v40 = vmax.f32 %v1342_v1, 0.0  ;;  %11637 = vmatprep.mubr.msk.f32.mxu0 %vm2249_vm1, %v5137_v24  ;;  %11685 = vmatpush3.msra.mxu0 %v10075_v39 }
 0x18c   :  { %v13239_v29 = vpop.f32.mrf.mxu0 }
 0x18d   :  { %v2141_v26 = vmax.f32 %v2067_v9, %v2069_v21  ;;  %v2068_v30 = vmax.f32 %v1876_v28, %v1924_v40  ;;  %v13353_v9 = vld [vmem:[%s15653_s2 + $0x88] sm:$0xff]  ;;  %v13358_v21 = vld [vmem:[%s15657_s6] ss:$0 sm:$0xff] }
 0x18e   :  { %v13241_v45 = vpop.f32.mrf.mxu0  ;;  %11638 = vmatmul.mubr.msk.f32.gmra.mxu0 %vm2249_vm1, %v5138_v17  ;;  %15691 = vst [vmem:[#allocation12_spill] sm:$0xff] %v13353_v9  ;;  %11736 = vmatprep.subr.mxu0 %v13353_v9 }
 0x18f   :  { %2189 = vst [vmem:[#allocation2 + $0xb8] sm:$0xff] %v2141_v26  ;;  %v2140_v33 = vmax.f32 %v2066_v13, %v2068_v30  ;;  %11640 = vmatprep.mubr.msk.f32.mxu0 %vm2249_vm1, %v5139_v44  ;;  %v1357_v13 = vadd.f32 %v13358_v21, %v13235_v61  ;;  %v1367_v30 = vadd.f32 %v13358_v21, %v13241_v45 }
 0x190   :  { %v13245_v37 = vpop.f32.mrf.mxu0  ;;  %v1352_v44 = vadd.f32 %v13358_v21, %v13239_v29 }
 0x191   :  { %2188 = vst [vmem:[#allocation2 + $0xb0] sm:$0xff] %v2140_v33  ;;  %v1362_v33 = vadd.f32 %v13358_v21, %v13245_v37  ;;  %v1927_v52 = vmax.f32 %v1357_v13, 0.0 }
 0x192   :  { %v13247_v51 = vpop.f32.mrf.mxu0  ;;  %11641 = vmatmul.mubr.msk.f32.gmra.mxu0 %vm2249_vm1, %v5140_v43  ;;  %v1926_v45 = vmax.f32 %v1352_v44, 0.0 }
 0x193   :  { %11643 = vmatprep.mubr.msk.f32.mxu0 %vm2249_vm1, %v5141_v42  ;;  %v1377_v37 = vadd.f32 %v13358_v21, %v13247_v51 }
 0x194   :  { %v13251_v16 = vpop.f32.mrf.mxu0 }
 0x195   :  { %v1372_v44 = vadd.f32 %v13358_v21, %v13251_v16 }
 0x196   :  { %v13253_v11 = vpop.f32.mrf.mxu0  ;;  %11644 = vmatmul.mubr.msk.f32.gmra.mxu0 %vm2249_vm1, %v5142_v20 }
 0x197   :  { %v1930_v16 = vmax.f32 %v1372_v44, 0.0 }
 0x198   :  { %v13256_v19 = vpop.f32.mrf.mxu0 }
 0x19a   :  { %v13258_v41 = vpop.f32.mrf.mxu0 }
 0x19c   :  { %v13260_v48 = vpop.f32.mrf.mxu0 }
 0x19e   :  { %v13262_v47 = vpop.f32.mrf.mxu0 }
 0x1a0   :  { %v13264_v55 = vpop.f32.mrf.mxu0 }
 0x1a1   :  { %v1402_v44 = vadd.f32 %v13358_v21, %v13264_v55 }
 0x1a2   :  { %v13269_v15 = vpop.f32.mrf.mxu0 }
 0x1a4   :  { %v13271_v23 = vpop.f32.mrf.mxu0 }
 0x1a6   :  { %v13273_v49 = vpop.f32.mrf.mxu0 }
 0x1a8   :  { %v13275_v57 = vpop.f32.mrf.mxu0 }
 0x1aa   :  { %v13277_v18 = vpop.f32.mrf.mxu0 }
 0x1ac   :  { %v13279_v22 = vpop.f32.mrf.mxu0 }
 0x1ae   :  { %v13281_v31 = vpop.f32.mrf.mxu0 }
 0x1b0   :  { %v13283_v8 = vpop.f32.mrf.mxu0 }
 0x1b2   :  { %v13285_v12 = vpop.f32.mrf.mxu0 }
 0x1b4   :  { %v13287_v56 = vpop.f32.mrf.mxu0 }
 0x1b6   :  { %v13289_v60 = vpop.f32.mrf.mxu0 }
 0x1b8   :  { %v13291_v0 = vpop.f32.mrf.mxu0 }
 0x1ba   :  { %v13293_v4 = vpop.f32.mrf.mxu0 }
 0x1bc   :  { %v13295_v38 = vpop.f32.mrf.mxu0 }
 0x1be   :  { %v13297_v32 = vpop.f32.mrf.mxu0 }
 0x1c0   :  { %v13299_v36 = vpop.f32.mrf.mxu0 }
 0x1c2   :  { %v13306_v14 = vpop.f32.mrf.mxu0 }
 0x1c4   :  { %v13309_v46 = vpop.f32.mrf.mxu0 }
 0x1c6   :  { %v13311_v50 = vpop.f32.mrf.mxu0 }
 0x1c8   :  { %v13313_v54 = vpop.f32.mrf.mxu0 }
 0x1ca   :  { %v13315_v34 = vpop.f32.mrf.mxu0 }
 0x1cc   :  { %v13320_v59 = vpop.f32.mrf.mxu0 }
 0x1ce   :  { %v13322_v3 = vpop.f32.mrf.mxu0 }
 0x1d0   :  { %v13324_v58 = vpop.f32.mrf.mxu0 }
 0x1d2   :  { %v13326_v27 = vpop.f32.mrf.mxu0 }
 0x1d4   :  { %v13328_v2 = vpop.f32.mrf.mxu0 }
 0x1d6   :  { %v13330_v35 = vpop.f32.mrf.mxu0 }
 0x1d8   :  { %v13332_v6 = vpop.f32.mrf.mxu0 }
 0x1da   :  { %v13334_v53 = vpop.f32.mrf.mxu0 }
 0x1dc   :  { %v13336_v62 = vpop.f32.mrf.mxu0 }
 0x1de   :  { %v13338_v63 = vpop.f32.mrf.mxu0 }
 0x1e0   :  { %v13340_v7 = vpop.f32.mrf.mxu0 }
 0x1e2   :  { %v13342_v1 = vpop.f32.mrf.mxu0 }
 0x1e3   :  { %15687 = vst [vmem:[#allocation8_spill] sm:$0xff] %v13342_v1 }
 0x1e4   :  { %v13344_v25 = vpop.f32.mrf.mxu0 }
 0x1e5   :  { %15688 = vst [vmem:[#allocation9_spill] sm:$0xff] %v13344_v25  ;;  %v1928_v25 = vmax.f32 %v1362_v33, 0.0 }
 0x1e6   :  { %v13346_v5 = vpop.f32.mrf.mxu0 }
 0x1e7   :  { %15689 = vst [vmem:[#allocation10_spill] sm:$0xff] %v13346_v5 }
 0x1e8   :  { %v13348_v24 = vpop.f32.mrf.mxu0 }
 0x1e9   :  { %15690 = vst [vmem:[#allocation11_spill] sm:$0xff] %v13348_v24 }
 0x1ea   :  { %v11224_v28 = vpop.f32.mrf.mxu0 }
 0x1eb   :  { %v1597_v40 = vadd.f32 %v13358_v21, %v11224_v28  ;;  %v1929_v28 = vmax.f32 %v1367_v30, 0.0 }
 0x1ec   :  { %v1591_v26 = vpop.f32.mrf.mxu0 }
 0x1ed   :  { %v1592_v17 = vadd.f32 %v13358_v21, %v1591_v26  ;;  %v1975_v42 = vmax.f32 %v1597_v40, 0.0  ;;  %v1387_v40 = vadd.f32 %v13358_v21, %v13253_v11  ;;  %v1931_v11 = vmax.f32 %v1377_v37, 0.0 }
 0x1ee   :  { %v11227_v43 = vpop.f32.mrf.mxu0  ;;  %v1407_v37 = vadd.f32 %v13358_v21, %v13262_v47 }
 0x1ef   :  { %v1607_v20 = vadd.f32 %v13358_v21, %v11227_v43  ;;  %v1974_v61 = vmax.f32 %v1592_v17, 0.0  ;;  %v2071_v5 = vmax.f32 %v1927_v52, %v1975_v42 }
 0x1f0   :  { %v1601_v39 = vpop.f32.mrf.mxu0 }
 0x1f1   :  { %v1977_v9 = vmax.f32 %v1607_v20, 0.0  ;;  %v1602_v24 = vadd.f32 %v13358_v21, %v1601_v39  ;;  %v2070_v30 = vmax.f32 %v1926_v45, %v1974_v61  ;;  %v1933_v39 = vmax.f32 %v1387_v40, 0.0 }
 0x1f2   :  { %v11230_v26 = vpop.f32.mrf.mxu0 }
 0x1f3   :  { %v2073_v1 = vmax.f32 %v1929_v28, %v1977_v9  ;;  %v1976_v29 = vmax.f32 %v1602_v24, 0.0  ;;  %v1617_v10 = vadd.f32 %v13358_v21, %v11230_v26  ;;  %v1382_v24 = vadd.f32 %v13358_v21, %v13256_v19 }
 0x1f4   :  { %v1611_v13 = vpop.f32.mrf.mxu0 }
 0x1f5   :  { %v2143_v17 = vmax.f32 %v2071_v5, %v2073_v1  ;;  %v2072_v43 = vmax.f32 %v1928_v25, %v1976_v29  ;;  %v1612_v20 = vadd.f32 %v13358_v21, %v1611_v13  ;;  %v1979_v51 = vmax.f32 %v1617_v10, 0.0 }
 0x1f6   :  { %v11233_v9 = vpop.f32.mrf.mxu0  ;;  %v1932_v28 = vmax.f32 %v1382_v24, 0.0  ;;  %v1397_v10 = vadd.f32 %v13358_v21, %v13258_v41 }
 0x1f7   :  { %2191 = vst [vmem:[#allocation2 + $0xc8] sm:$0xff] %v2143_v17  ;;  %v13383_v33 = vmax.f32 %v2070_v30, %v2072_v43  ;;  %v1627_v42 = vadd.f32 %v13358_v21, %v11233_v9  ;;  %v1978_v1 = vmax.f32 %v1612_v20, 0.0  ;;  %v2075_v19 = vmax.f32 %v1931_v11, %v1979_v51 }
 0x1f8   :  { %v1621_v52 = vpop.f32.mrf.mxu0  ;;  %v1392_v20 = vadd.f32 %v13358_v21, %v13260_v48  ;;  %v1935_v47 = vmax.f32 %v1397_v10, 0.0 }
 0x1f9   :  { %2190 = vst [vmem:[#allocation2 + $0xc0] sm:$0xff] %v13383_v33  ;;  %v1981_v25 = vmax.f32 %v1627_v42, 0.0  ;;  %v1622_v5 = vadd.f32 %v13358_v21, %v1621_v52  ;;  %v2074_v13 = vmax.f32 %v1930_v16, %v1978_v1  ;;  %v1937_v52 = vmax.f32 %v1407_v37, 0.0 }
 0x1fa   :  { %v11236_v61 = vpop.f32.mrf.mxu0  ;;  %v1934_v55 = vmax.f32 %v1392_v20, 0.0 }
 0x1fb   :  { %v2077_v45 = vmax.f32 %v1933_v39, %v1981_v25  ;;  %v1980_v26 = vmax.f32 %v1622_v5, 0.0  ;;  %v1637_v29 = vadd.f32 %v13358_v21, %v11236_v61  ;;  %v1936_v25 = vmax.f32 %v1402_v44, 0.0 }
 0x1fc   :  { %v1631_v40 = vpop.f32.mrf.mxu0 }
 0x1fd   :  { %v2145_v30 = vmax.f32 %v2075_v19, %v2077_v45  ;;  %v2076_v17 = vmax.f32 %v1932_v28, %v1980_v26  ;;  %v1632_v43 = vadd.f32 %v13358_v21, %v1631_v40  ;;  %v1983_v41 = vmax.f32 %v1637_v29, 0.0 }
 0x1fe   :  { %v11239_v24 = vpop.f32.mrf.mxu0  ;;  %v1417_v45 = vadd.f32 %v13358_v21, %v13269_v15  ;;  %v1427_v26 = vadd.f32 %v13358_v21, %v13273_v49 }
 0x1ff   :  { %2193 = vst [vmem:[#allocation2 + $0xd8] sm:$0xff] %v2145_v30  ;;  %v13398_v9 = vmax.f32 %v2074_v13, %v2076_v17  ;;  %v1647_v51 = vadd.f32 %v13358_v21, %v11239_v24  ;;  %v1982_v39 = vmax.f32 %v1632_v43, 0.0  ;;  %v2079_v16 = vmax.f32 %v1935_v47, %v1983_v41 }
 0x200   :  { %v1641_v42 = vpop.f32.mrf.mxu0  ;;  %v2239_v11 = vld [vmem:[#allocation2 + $0xc1] sm:$0xff]  ;;  %v1412_v30 = vadd.f32 %v13358_v21, %v13271_v23  ;;  %v1422_v17 = vadd.f32 %v13358_v21, %v13275_v57  ;;  %v1939_v49 = vmax.f32 %v1417_v45, 0.0 }
 0x201   :  { %2192 = vst [vmem:[#allocation2 + $0xd0] sm:$0xff] %v13398_v9  ;;  %v1985_v1 = vmax.f32 %v1647_v51, 0.0  ;;  %v1642_v48 = vadd.f32 %v13358_v21, %v1641_v42  ;;  %11308 = vmatprep.mubr.msk.f32.mxu1 %vm2249_vm1, %v2239_v11  ;;  %v2078_v10 = vmax.f32 %v1934_v55, %v1982_v39  ;;  %v1941_v51 = vmax.f32 %v1427_v26, 0.0 }
 0x202   :  { %v11242_v5 = vpop.f32.mrf.mxu0  ;;  %v1938_v57 = vmax.f32 %v1412_v30, 0.0  ;;  %v1940_v11 = vmax.f32 %v1422_v17, 0.0  ;;  %v1432_v26 = vadd.f32 %v13358_v21, %v13279_v22 }
 0x203   :  { %v2081_v28 = vmax.f32 %v1937_v52, %v1985_v1  ;;  %v1984_v61 = vmax.f32 %v1642_v48, 0.0  ;;  %v1657_v19 = vadd.f32 %v13358_v21, %v11242_v5  ;;  %v1447_v5 = vadd.f32 %v13358_v21, %v13281_v31 }
 0x204   :  { %v1651_v29 = vpop.f32.mrf.mxu0 }
 0x205   :  { %v2147_v37 = vmax.f32 %v2079_v16, %v2081_v28  ;;  %v2080_v40 = vmax.f32 %v1936_v25, %v1984_v61  ;;  %v1652_v13 = vadd.f32 %v13358_v21, %v1651_v29  ;;  %v1987_v15 = vmax.f32 %v1657_v19, 0.0 }
 0x206   :  { %v11245_v43 = vpop.f32.mrf.mxu0  ;;  %v1437_v25 = vadd.f32 %v13358_v21, %v13277_v18  ;;  %v1442_v29 = vadd.f32 %v13358_v21, %v13283_v8  ;;  %v1942_v8 = vmax.f32 %v1432_v26, 0.0 }
 0x207   :  { %2195 = vst [vmem:[#allocation2 + $0xe8] sm:$0xff] %v2147_v37  ;;  %v13414_v20 = vmax.f32 %v2078_v10, %v2080_v40  ;;  %v1667_v44 = vadd.f32 %v13358_v21, %v11245_v43  ;;  %v1986_v47 = vmax.f32 %v1652_v13, 0.0  ;;  %v2083_v39 = vmax.f32 %v1939_v49, %v1987_v15 }
 0x208   :  { %v1661_v24 = vpop.f32.mrf.mxu0  ;;  %v2240_v41 = vld [vmem:[#allocation2 + $0xd1] sm:$0xff]  ;;  %v1943_v31 = vmax.f32 %v1437_v25, 0.0  ;;  %v1945_v43 = vmax.f32 %v1447_v5, 0.0  ;;  %v1944_v49 = vmax.f32 %v1442_v29, 0.0  ;;  %v1462_v25 = vadd.f32 %v13358_v21, %v13291_v0 }
 0x209   :  { %2194 = vst [vmem:[#allocation2 + $0xe0] sm:$0xff] %v13414_v20  ;;  %v1989_v42 = vmax.f32 %v1667_v44, 0.0  ;;  %v1662_v23 = vadd.f32 %v13358_v21, %v1661_v24  ;;  %11309 = vmatmul.mubr.msk.f32.gmra.mxu1 %vm2249_vm1, %v2240_v41  ;;  %v2082_v28 = vmax.f32 %v1938_v57, %v1986_v47  ;;  %v1467_v57 = vadd.f32 %v13358_v21, %v13289_v60 }
 0x20a   :  { %v11248_v52 = vpop.f32.mrf.mxu0 }
 0x20b   :  { %v2085_v1 = vmax.f32 %v1941_v51, %v1989_v42  ;;  %v1988_v48 = vmax.f32 %v1662_v23, 0.0  ;;  %v1677_v55 = vadd.f32 %v13358_v21, %v11248_v52  ;;  %v1457_v23 = vadd.f32 %v13358_v21, %v13285_v12 }
 0x20c   :  { %v1671_v16 = vpop.f32.mrf.mxu0  ;;  %v1949_v26 = vmax.f32 %v1467_v57, 0.0 }
 0x20d   :  { %v2149_v61 = vmax.f32 %v2083_v39, %v2085_v1  ;;  %v2084_v19 = vmax.f32 %v1940_v11, %v1988_v48  ;;  %v1672_v45 = vadd.f32 %v13358_v21, %v1671_v16  ;;  %v1991_v18 = vmax.f32 %v1677_v55, 0.0 }
 0x20e   :  { %v11251_v10 = vpop.f32.mrf.mxu0  ;;  %v1452_v55 = vadd.f32 %v13358_v21, %v13287_v56  ;;  %v1947_v60 = vmax.f32 %v1457_v23, 0.0 }
 0x20f   :  { %2197 = vst [vmem:[#allocation2 + $0xf8] sm:$0xff] %v2149_v61  ;;  %v13430_v37 = vmax.f32 %v2082_v28, %v2084_v19  ;;  %v1687_v40 = vadd.f32 %v13358_v21, %v11251_v10  ;;  %v1990_v15 = vmax.f32 %v1672_v45, 0.0  ;;  %v2087_v41 = vmax.f32 %v1943_v31, %v1991_v18 }
 0x210   :  { %v1681_v13 = vpop.f32.mrf.mxu0  ;;  %v2241_v30 = vld [vmem:[#allocation2 + $0xe1] sm:$0xff]  ;;  %v1946_v0 = vmax.f32 %v1452_v55, 0.0  ;;  %v1948_v18 = vmax.f32 %v1462_v25, 0.0 }
 0x211   :  { %v13433_v17 = vld [vmem:[#allocation2 + $0xe3] sm:$0xff]  ;;  %2196 = vst [vmem:[#allocation2 + $0xf0] sm:$0xff] %v13430_v37  ;;  %v1993_v22 = vmax.f32 %v1687_v40, 0.0  ;;  %v1682_v44 = vadd.f32 %v13358_v21, %v1681_v13  ;;  %11311 = vmatprep.mubr.msk.f32.mxu1 %vm2249_vm1, %v2241_v30  ;;  %v2086_v52 = vmax.f32 %v1942_v8, %v1990_v15  ;;  %v1477_v15 = vadd.f32 %v13358_v21, %v13293_v4 }
 0x212   :  { %11646 = vmatprep.mubr.msk.f32.mxu0 %vm2249_vm1, %v13433_v17  ;;  %v11254_v24 = vpop.f32.mrf.mxu0 }
 0x213   :  { %v2089_v51 = vmax.f32 %v1945_v43, %v1993_v22  ;;  %v1992_v47 = vmax.f32 %v1682_v44, 0.0  ;;  %v1697_v42 = vadd.f32 %v13358_v21, %v11254_v24  ;;  %v1487_v22 = vadd.f32 %v13358_v21, %v13297_v32 }
 0x214   :  { %v1691_v11 = vpop.f32.mrf.mxu0  ;;  %v1951_v32 = vmax.f32 %v1477_v15, 0.0 }
 0x215   :  { %v2151_v39 = vmax.f32 %v2087_v41, %v2089_v51  ;;  %v2088_v1 = vmax.f32 %v1944_v49, %v1992_v47  ;;  %v1692_v48 = vadd.f32 %v13358_v21, %v1691_v11  ;;  %v1995_v12 = vmax.f32 %v1697_v42, 0.0 }
 0x216   :  { %v11257_v5 = vpop.f32.mrf.mxu0  ;;  %v1472_v51 = vadd.f32 %v13358_v21, %v13295_v38  ;;  %v1482_v47 = vadd.f32 %v13358_v21, %v13299_v36 }
 0x217   :  { %2199 = vst [vmem:[#allocation2 + $0x108] sm:$0xff] %v2151_v39  ;;  %v13450_v16 = vmax.f32 %v2086_v52, %v2088_v1  ;;  %v1707_v28 = vadd.f32 %v13358_v21, %v11257_v5  ;;  %v1994_v29 = vmax.f32 %v1692_v48, 0.0  ;;  %v2091_v31 = vmax.f32 %v1947_v60, %v1995_v12 }
 0x218   :  { %v1701_v61 = vpop.f32.mrf.mxu0  ;;  %v2242_v19 = vld [vmem:[#allocation2 + $0xf1] sm:$0xff]  ;;  %v1953_v1 = vmax.f32 %v1487_v22, 0.0  ;;  %v1950_v55 = vmax.f32 %v1472_v51, 0.0  ;;  %v1952_v25 = vmax.f32 %v1482_v47, 0.0 }
 0x219   :  { %v13453_v45 = vld [vmem:[#allocation2 + $0xf3] sm:$0xff]  ;;  %2198 = vst [vmem:[#allocation2 + $0x100] sm:$0xff] %v13450_v16  ;;  %v1997_v56 = vmax.f32 %v1707_v28, 0.0  ;;  %v1702_v10 = vadd.f32 %v13358_v21, %v1701_v61  ;;  %11312 = vmatmul.mubr.msk.f32.gmra.mxu1 %vm2249_vm1, %v2242_v19  ;;  %v2090_v8 = vmax.f32 %v1946_v0, %v1994_v29  ;;  %v1497_v19 = vadd.f32 %v13358_v21, %v13306_v14 }
 0x21a   :  { %11647 = vmatmul.mubr.msk.f32.gmra.mxu0 %vm2249_vm1, %v13453_v45  ;;  %v11260_v40 = vpop.f32.mrf.mxu0 }
 0x21b   :  { %v2093_v13 = vmax.f32 %v1949_v26, %v1997_v56  ;;  %v1996_v30 = vmax.f32 %v1702_v10, 0.0  ;;  %v1717_v43 = vadd.f32 %v13358_v21, %v11260_v40  ;;  %v1507_v26 = vadd.f32 %v13358_v21, %v13311_v50 }
 0x21c   :  { %v1711_v44 = vpop.f32.mrf.mxu0  ;;  %v1492_v40 = vadd.f32 %v13358_v21, %v13309_v46  ;;  %v1955_v50 = vmax.f32 %v1497_v19, 0.0 }
 0x21d   :  { %v2153_v49 = vmax.f32 %v2091_v31, %v2093_v13  ;;  %v2092_v24 = vmax.f32 %v1948_v18, %v1996_v30  ;;  %v1712_v41 = vadd.f32 %v13358_v21, %v1711_v44  ;;  %v1999_v4 = vmax.f32 %v1717_v43, 0.0 }
 0x21e   :  { %v11263_v42 = vpop.f32.mrf.mxu0  ;;  %v1502_v31 = vadd.f32 %v13358_v21, %v13313_v54 }
 0x21f   :  { %2201 = vst [vmem:[#allocation2 + $0x118] sm:$0xff] %v2153_v49  ;;  %v13470_v23 = vmax.f32 %v2090_v8, %v2092_v24  ;;  %v1727_v57 = vadd.f32 %v13358_v21, %v11263_v42  ;;  %v1998_v38 = vmax.f32 %v1712_v41, 0.0  ;;  %v2095_v12 = vmax.f32 %v1951_v32, %v1999_v4 }
 0x220   :  { %v1721_v11 = vpop.f32.mrf.mxu0  ;;  %v13473_v52 = vld [vmem:[#allocation2 + $0x101] sm:$0xff]  ;;  %v1957_v8 = vmax.f32 %v1507_v26, 0.0  ;;  %v1954_v24 = vmax.f32 %v1492_v40, 0.0  ;;  %v1956_v41 = vmax.f32 %v1502_v31, 0.0  ;;  %v1517_v32 = vadd.f32 %v13358_v21, %v13315_v34 }
 0x221   :  { %v13475_v39 = vld [vmem:[#allocation2 + $0x103] sm:$0xff]  ;;  %2200 = vst [vmem:[#allocation2 + $0x110] sm:$0xff] %v13470_v23  ;;  %v2001_v48 = vmax.f32 %v1727_v57, 0.0  ;;  %v1722_v36 = vadd.f32 %v13358_v21, %v1721_v11  ;;  %11314 = vmatprep.mubr.msk.f32.mxu1 %vm2249_vm1, %v13473_v52  ;;  %v2094_v56 = vmax.f32 %v1950_v55, %v1998_v38  ;;  %v1527_v11 = vadd.f32 %v13358_v21, %v13322_v3 }
 0x222   :  { %11649 = vmatprep.mubr.msk.f32.mxu0 %vm2249_vm1, %v13475_v39  ;;  %v11266_v5 = vpop.f32.mrf.mxu0  ;;  %v1959_v3 = vmax.f32 %v1517_v32, 0.0 }
 0x223   :  { %v2097_v28 = vmax.f32 %v1953_v1, %v2001_v48  ;;  %v2000_v60 = vmax.f32 %v1722_v36, 0.0  ;;  %v1737_v61 = vadd.f32 %v13358_v21, %v11266_v5  ;;  %v1522_v5 = vadd.f32 %v13358_v21, %v13324_v58 }
 0x224   :  { %v1731_v29 = vpop.f32.mrf.mxu0 }
 0x225   :  { %v2155_v10 = vmax.f32 %v2095_v12, %v2097_v28  ;;  %v2096_v0 = vmax.f32 %v1952_v25, %v2000_v60  ;;  %v1732_v18 = vadd.f32 %v13358_v21, %v1731_v29  ;;  %v2003_v14 = vmax.f32 %v1737_v61, 0.0 }
 0x226   :  { %v11269_v13 = vpop.f32.mrf.mxu0  ;;  %v1512_v25 = vadd.f32 %v13358_v21, %v13320_v59  ;;  %v1961_v29 = vmax.f32 %v1527_v11, 0.0 }
 0x227   :  { %2203 = vst [vmem:[#allocation2 + $0x128] sm:$0xff] %v2155_v10  ;;  %v13493_v30 = vmax.f32 %v2094_v56, %v2096_v0  ;;  %v1747_v43 = vadd.f32 %v13358_v21, %v11269_v13  ;;  %v2002_v46 = vmax.f32 %v1732_v18, 0.0  ;;  %v2099_v47 = vmax.f32 %v1955_v50, %v2003_v14 }
 0x228   :  { %v1741_v15 = vpop.f32.mrf.mxu0  ;;  %v13496_v22 = vld [vmem:[#allocation2 + $0x111] sm:$0xff]  ;;  %v1958_v10 = vmax.f32 %v1512_v25, 0.0  ;;  %v1960_v0 = vmax.f32 %v1522_v5, 0.0  ;;  %v1547_v50 = vadd.f32 %v13358_v21, %v13330_v35 }
 0x229   :  { %v13498_v44 = vld [vmem:[#allocation2 + $0x113] sm:$0xff]  ;;  %2202 = vst [vmem:[#allocation2 + $0x120] sm:$0xff] %v13493_v30  ;;  %v2005_v49 = vmax.f32 %v1747_v43, 0.0  ;;  %v1742_v54 = vadd.f32 %v13358_v21, %v1741_v15  ;;  %11315 = vmatmul.mubr.msk.f32.gmra.mxu1 %vm2249_vm1, %v13496_v22  ;;  %v2098_v38 = vmax.f32 %v1954_v24, %v2002_v46  ;;  %v1537_v43 = vadd.f32 %v13358_v21, %v13326_v27 }
 0x22a   :  { %11650 = vmatmul.mubr.msk.f32.gmra.mxu0 %vm2249_vm1, %v13498_v44  ;;  %v11272_v51 = vpop.f32.mrf.mxu0  ;;  %v1532_v24 = vadd.f32 %v13358_v21, %v13328_v2  ;;  %v1965_v11 = vmax.f32 %v1547_v50, 0.0 }
 0x22b   :  { %v2101_v42 = vmax.f32 %v1957_v8, %v2005_v49  ;;  %v2004_v4 = vmax.f32 %v1742_v54, 0.0  ;;  %v1757_v57 = vadd.f32 %v13358_v21, %v11272_v51  ;;  %v1963_v35 = vmax.f32 %v1537_v43, 0.0 }
 0x22c   :  { %v1751_v1 = vpop.f32.mrf.mxu0 }
 0x22d   :  { %v2157_v48 = vmax.f32 %v2099_v47, %v2101_v42  ;;  %v2100_v36 = vmax.f32 %v1956_v41, %v2004_v4  ;;  %v1752_v55 = vadd.f32 %v13358_v21, %v1751_v1  ;;  %v2007_v34 = vmax.f32 %v1757_v57, 0.0 }
 0x22e   :  { %v11275_v12 = vpop.f32.mrf.mxu0  ;;  %v1542_v41 = vadd.f32 %v13358_v21, %v13332_v6 }
 0x22f   :  { %2205 = vst [vmem:[#allocation2 + $0x138] sm:$0xff] %v2157_v48  ;;  %v13516_v28 = vmax.f32 %v2098_v38, %v2100_v36  ;;  %v1767_v60 = vadd.f32 %v13358_v21, %v11275_v12  ;;  %v2006_v59 = vmax.f32 %v1752_v55, 0.0  ;;  %v2103_v40 = vmax.f32 %v1959_v3, %v2007_v34  ;;  %v2214_v38 = vld [vmem:[#allocation2] sm:$0xff] }
 0x230   :  { %v1761_v61 = vpop.f32.mrf.mxu0  ;;  %v13519_v19 = vld [vmem:[#allocation2 + $0x121] sm:$0xff]  ;;  %v1962_v48 = vmax.f32 %v1532_v24, 0.0  ;;  %v1964_v36 = vmax.f32 %v1542_v41, 0.0  ;;  %v1567_v3 = vadd.f32 %v13358_v21, %v13338_v63  ;;  %v1552_v63 = vadd.f32 %v13358_v21, %v13336_v62  ;;  %v13581_v62 = vld [vmem:[#allocation2 + $0x30] sm:$0xff] }
 0x231   :  { %v13521_v26 = vld [vmem:[#allocation2 + $0x123] sm:$0xff]  ;;  %2204 = vst [vmem:[#allocation2 + $0x130] sm:$0xff] %v13516_v28  ;;  %v2009_v56 = vmax.f32 %v1767_v60, 0.0  ;;  %v1762_v58 = vadd.f32 %v13358_v21, %v1761_v61  ;;  %11317 = vmatprep.mubr.msk.f32.mxu1 %vm2249_vm1, %v13519_v19  ;;  %v2102_v8 = vmax.f32 %v1958_v10, %v2006_v59  ;;  %v1557_v60 = vadd.f32 %v13358_v21, %v13334_v53  ;;  %v13563_v59 = vld [vmem:[%s15653_s2 + $0x18] sm:$0xff] }
 0x232   :  { %11652 = vmatprep.mubr.msk.f32.mxu0 %vm2249_vm1, %v13521_v26  ;;  %v11278_v18 = vpop.f32.mrf.mxu0  ;;  %v13568_v53 = vld [vmem:[#allocation2 + $0x20] sm:$0xff]  ;;  %v1966_v41 = vmax.f32 %v1552_v63, 0.0 }
 0x233   :  { %v2105_v31 = vmax.f32 %v1961_v29, %v2009_v56  ;;  %v2008_v13 = vmax.f32 %v1762_v58, 0.0  ;;  %v1777_v14 = vadd.f32 %v13358_v21, %v11278_v18  ;;  %v13558_v29 = vld [vmem:[#allocation2 + $0x10] sm:$0xff]  ;;  %v1562_v18 = vadd.f32 %v13358_v21, %v13340_v7  ;;  %v13591_v24 = vld [vmem:[#allocation2 + $0x40] sm:$0xff] }
 0x234   :  { %v1771_v15 = vpop.f32.mrf.mxu0  ;;  %v1967_v50 = vmax.f32 %v1557_v60, 0.0  ;;  %v1969_v7 = vmax.f32 %v1567_v3, 0.0  ;;  %v15695_v60 = vld [vmem:[#allocation9_spill] sm:$0xff] }
 0x235   :  { %v2159_v46 = vmax.f32 %v2103_v40, %v2105_v31  ;;  %v2104_v49 = vmax.f32 %v1960_v0, %v2008_v13  ;;  %v1772_v54 = vadd.f32 %v13358_v21, %v1771_v15  ;;  %v2011_v27 = vmax.f32 %v1777_v14, 0.0  ;;  %v15692_v40 = vld [vmem:[#allocation7_spill] sm:$0xff] }
 0x236   :  { %v11281_v51 = vpop.f32.mrf.mxu0  ;;  %v1572_v3 = vadd.f32 %v13358_v21, %v15695_v60  ;;  %v13725_v60 = vld [vmem:[%s15653_s2 + $0xa8] sm:$0xff] }
 0x237   :  { %2207 = vst [vmem:[#allocation2 + $0x148] sm:$0xff] %v2159_v46  ;;  %v13539_v47 = vmax.f32 %v2102_v8, %v2104_v49  ;;  %v1787_v42 = vadd.f32 %v13358_v21, %v11281_v51  ;;  %v2010_v2 = vmax.f32 %v1772_v54, 0.0  ;;  %v2107_v25 = vmax.f32 %v1963_v35, %v2011_v27 }
 0x238   :  { %v1781_v4 = vpop.f32.mrf.mxu0  ;;  %v13542_v57 = vld [vmem:[#allocation2 + $0x131] sm:$0xff]  ;;  %v1968_v51 = vmax.f32 %v1562_v18, 0.0 }
 0x239   :  { %v13544_v32 = vld [vmem:[#allocation2 + $0x133] sm:$0xff]  ;;  %2206 = vst [vmem:[#allocation2 + $0x140] sm:$0xff] %v13539_v47  ;;  %v2013_v1 = vmax.f32 %v1787_v42, 0.0  ;;  %v1782_v6 = vadd.f32 %v13358_v21, %v1781_v4  ;;  %11318 = vmatmul.mubr.msk.f32.gmra.mxu1 %vm2249_vm1, %v13542_v57  ;;  %v2106_v56 = vmax.f32 %v1962_v48, %v2010_v2  ;;  %v15693_v2 = vld [vmem:[#allocation8_spill] sm:$0xff] }
 0x23a   :  { %11653 = vmatmul.mubr.msk.f32.gmra.mxu0 %vm2249_vm1, %v13544_v32  ;;  %v11284_v55 = vpop.f32.mrf.mxu0  ;;  %11322 = vmatprep.mubr.msk.f32.mxu1 %vm2249_vm1, %v2214_v38 }
 0x23b   :  { %v2109_v5 = vmax.f32 %v1965_v11, %v2013_v1  ;;  %v2012_v12 = vmax.f32 %v1782_v6, 0.0  ;;  %v1797_v34 = vadd.f32 %v13358_v21, %v11284_v55  ;;  %v1577_v1 = vadd.f32 %v13358_v21, %v15693_v2  ;;  %v15694_v6 = vld [vmem:[#allocation10_spill] sm:$0xff]  ;;  %v2636_v2 = vld [vmem:[#allocation2 + $0x2] sm:$0xff] }
 0x23c   :  { %v1791_v61 = vpop.f32.mrf.mxu0  ;;  %v1587_v38 = vadd.f32 %v13358_v21, %v15694_v6  ;;  %v9888_v6 = vld [vmem:[%s15653_s2 + $0x20] sm:$0xff] }
 0x23d   :  { %v2161_v58 = vmax.f32 %v2107_v25, %v2109_v5  ;;  %v2108_v10 = vmax.f32 %v1964_v36, %v2012_v12  ;;  %v1792_v0 = vadd.f32 %v13358_v21, %v1791_v61  ;;  %11323 = vmatmul.mubr.msk.f32.vlgmr.msra.gmra.mxu1 %vm2249_vm1, %v13558_v29  ;;  %v2015_v14 = vmax.f32 %v1797_v34, 0.0  ;;  %v13600_v36 = vld [vmem:[#allocation2 + $0x50] sm:$0xff]  ;;  %v13605_v34 = vld [vmem:[#allocation2 + $0x60] sm:$0xff] }
 0x23e   :  { %11347 = vmatpush3.msra.mxu1 %v15692_v40  ;;  %v11287_v31 = vpop.f32.mrf.mxu0  ;;  %11325 = vmatprep.mubr.msk.f32.mxu1 %vm2249_vm1, %v13568_v53  ;;  %v1971_v18 = vmax.f32 %v1577_v1, 0.0  ;;  %v13665_v1 = vld [vmem:[#allocation2 + $0x12] sm:$0xff] }
 0x23f   :  { %2209 = vst [vmem:[#allocation2 + $0x158] sm:$0xff] %v2161_v58  ;;  %v13577_v13 = vmax.f32 %v2106_v56, %v2108_v10  ;;  %v1807_v43 = vadd.f32 %v13358_v21, %v11287_v31  ;;  %11372 = vmatprep.subr.mxu1 %v13563_v59  ;;  %v2014_v46 = vmax.f32 %v1792_v0, 0.0  ;;  %v2111_v42 = vmax.f32 %v1967_v50, %v2015_v14  ;;  %v15696_v56 = vld [vmem:[#allocation11_spill] sm:$0xff]  ;;  %v13616_v31 = vld [vmem:[#allocation2 + $0x70] sm:$0xff] }
 0x240   :  { %v1801_v15 = vpop.f32.mrf.mxu0  ;;  %v13583_v8 = vld [vmem:[#allocation2 + $0x143] sm:$0xff]  ;;  %v1582_v58 = vadd.f32 %v13358_v21, %v15696_v56  ;;  %v13744_v56 = vld [vmem:[#allocation2 + $0x112] sm:$0xff] }
 0x241   :  { %2208 = vst [vmem:[#allocation2 + $0x150] sm:$0xff] %v13577_v13  ;;  %v2017_v49 = vmax.f32 %v1807_v43, 0.0  ;;  %v1802_v54 = vadd.f32 %v13358_v21, %v1801_v15  ;;  %11326 = vmatmul.mubr.msk.f32.gmra.mxu1 %vm2249_vm1, %v13581_v62  ;;  %11655 = vmatprep.mubr.msk.f32.mxu0 %vm2249_vm1, %v13583_v8  ;;  %v2110_v55 = vmax.f32 %v1966_v41, %v2014_v46  ;;  %v1973_v43 = vmax.f32 %v1587_v38, 0.0  ;;  %v13674_v38 = vld [vmem:[#allocation2 + $0x22] sm:$0xff] }
 0x242   :  { %v11290_v27 = vpop.f32.mrf.mxu0  ;;  %11328 = vmatprep.mubr.msk.f32.mxu1 %vm2249_vm1, %v13591_v24  ;;  %v1970_v46 = vmax.f32 %v1572_v3, 0.0  ;;  %v13731_v3 = vld [vmem:[#allocation2 + $0xf2] sm:$0xff] }
 0x243   :  { %v2113_v35 = vmax.f32 %v1969_v7, %v2017_v49  ;;  %v2016_v4 = vmax.f32 %v1802_v54, 0.0  ;;  %v1817_v11 = vadd.f32 %v13358_v21, %v11290_v27  ;;  %v1972_v49 = vmax.f32 %v1582_v58, 0.0  ;;  %v13746_v58 = vld [vmem:[#allocation2 + $0x82] sm:$0xff] }
 0x244   :  { %v1811_v48 = vpop.f32.mrf.mxu0 }
 0x245   :  { %v2163_v25 = vmax.f32 %v2111_v42, %v2113_v35  ;;  %v2112_v5 = vmax.f32 %v1968_v51, %v2016_v4  ;;  %v1812_v12 = vadd.f32 %v13358_v21, %v1811_v48  ;;  %11329 = vmatmul.mubr.msk.f32.gmra.mxu1 %vm2249_vm1, %v13600_v36  ;;  %v2019_v0 = vmax.f32 %v1817_v11, 0.0  ;;  %v15697_v4 = vld [vmem:[#allocation12_spill] sm:$0xff]  ;;  %v5597_v11 = vld [vmem:[#allocation2 + $0xa0] sm:$0xff] }
 0x246   :  { %v11293_v61 = vpop.f32.mrf.mxu0  ;;  %11331 = vmatprep.mubr.msk.f32.mxu1 %vm2249_vm1, %v13605_v34  ;;  %v13687_v48 = vld [vmem:[#allocation2 + $0x42] sm:$0xff] }
 0x247   :  { %2211 = vst [vmem:[#allocation2 + $0x168] sm:$0xff] %v2163_v25  ;;  %v13613_v10 = vmax.f32 %v2110_v55, %v2112_v5  ;;  %v1827_v63 = vadd.f32 %v13358_v21, %v11293_v61  ;;  %v2018_v50 = vmax.f32 %v1812_v12, 0.0  ;;  %v2115_v54 = vmax.f32 %v1971_v18, %v2019_v0  ;;  %v13699_v55 = vld [vmem:[#allocation2 + $0x62] sm:$0xff]  ;;  %v13705_v25 = vld [vmem:[#allocation2 + $0x72] sm:$0xff] }
 0x248   :  { %v1821_v40 = vpop.f32.mrf.mxu0  ;;  %v13618_v14 = vld [vmem:[#allocation2 + $0x153] sm:$0xff]  ;;  %v2644_v5 = vld [vmem:[#allocation2 + $0xc2] sm:$0xff] }
 0x249   :  { %2210 = vst [vmem:[#allocation2 + $0x160] sm:$0xff] %v13613_v10  ;;  %v2021_v15 = vmax.f32 %v1827_v63, 0.0  ;;  %v1822_v7 = vadd.f32 %v13358_v21, %v1821_v40  ;;  %11332 = vmatmul.mubr.msk.f32.gmra.mxu1 %vm2249_vm1, %v13616_v31  ;;  %11656 = vmatmul.mubr.msk.f32.gmra.mxu0 %vm2249_vm1, %v13618_v14  ;;  %v2114_v27 = vmax.f32 %v1970_v46, %v2018_v50  ;;  %v13714_v12 = vld [vmem:[#allocation2 + $0xd2] sm:$0xff]  ;;  %v13738_v61 = vld [vmem:[#allocation2 + $0x102] sm:$0xff] }
 0x24a   :  { %11334 = vmatprep.mubr.msk.f32.mxu1 %vm2249_vm1, %v13383_v33  ;;  %11686 = vmatprep.mubr.msk.f32.mxu0 %vm2249_vm1, %v13581_v62  ;;  %v10143_v33 = vld [vmem:[%s15653_s2 + $0x98] sm:$0xff]  ;;  %v6051_v18 = vld [vmem:[#allocation2 + $0xa2] sm:$0xff] }
 0x24b   :  { %v2117_v41 = vmax.f32 %v1973_v43, %v2021_v15  ;;  %v2020_v51 = vmax.f32 %v1822_v7, 0.0  ;;  %v6050_v0 = vld [vmem:[#allocation2 + $0x92] sm:$0xff]  ;;  %v2863_v40 = vld [vmem:[#allocation2 + $0x3] sm:$0xff] }
 0x24c   :  { %v13757_v63 = vld [vmem:[#allocation2 + $0x132] sm:$0xff]  ;;  %v13770_v50 = vld [vmem:[%s15653_s2 + $0x28] sm:$0xff] }
 0x24d   :  { %v2165_v42 = vmax.f32 %v2115_v54, %v2117_v41  ;;  %v2116_v21 = vmax.f32 %v1972_v49, %v2020_v51  ;;  %11335 = vmatmul.mubr.msk.f32.gmra.mxu1 %vm2249_vm1, %v13398_v9  ;;  %11687 = vmatmul.mubr.msk.f32.vlgmr.msra.gmra.mxu0 %vm2249_vm1, %v13591_v24  ;;  %v13650_v9 = vld [vmem:[#allocation2 + $0x80] sm:$0xff]  ;;  %v13765_v43 = vld [vmem:[#allocation2 + $0x13] sm:$0xff] }
 0x24e   :  { %11337 = vmatprep.mubr.msk.f32.mxu1 %vm2249_vm1, %v13414_v20  ;;  %11689 = vmatprep.mubr.msk.f32.mxu0 %vm2249_vm1, %v13600_v36  ;;  %v5596_v20 = vld [vmem:[#allocation2 + $0x90] sm:$0xff]  ;;  %v13776_v15 = vld [vmem:[#allocation2 + $0x23] sm:$0xff] }
 0x24f   :  { %2213 = vst [vmem:[#allocation2 + $0x178] sm:$0xff] %v2165_v42  ;;  %v2164_v35 = vmax.f32 %v2114_v27, %v2116_v21  ;;  %11737 = vmatpush3.msra.mxu0 %v15697_v4  ;;  %v13783_v7 = vld [vmem:[#allocation2 + $0x33] sm:$0xff]  ;;  %v13789_v46 = vld [vmem:[#allocation2 + $0x43] sm:$0xff] }
 0x250   :  { %11788 = vmatprep.subr.mxu0 %v10143_v33  ;;  %v13795_v49 = vld [vmem:[#allocation2 + $0x53] sm:$0xff]  ;;  %v13797_v54 = vld [vmem:[#allocation2 + $0x142] sm:$0xff] }
 0x251   :  { %2212 = vst [vmem:[#allocation2 + $0x170] sm:$0xff] %v2164_v35  ;;  %11338 = vmatmul.mubr.msk.f32.gmra.mxu1 %vm2249_vm1, %v13430_v37  ;;  %11690 = vmatmul.mubr.msk.f32.gmra.mxu0 %vm2249_vm1, %v13605_v34  ;;  %v13803_v41 = vld [vmem:[#allocation2 + $0x63] sm:$0xff]  ;;  %v6058_v51 = vld [vmem:[#allocation2 + $0x152] sm:$0xff] }
 0x252   :  { %11340 = vmatprep.mubr.msk.f32.mxu1 %vm2249_vm1, %v13450_v16  ;;  %11692 = vmatprep.mubr.msk.f32.mxu0 %vm2249_vm1, %v13616_v31  ;;  %v13808_v27 = vld [vmem:[#allocation2 + $0x73] sm:$0xff]  ;;  %v6059_v42 = vld [vmem:[#allocation2 + $0x162] sm:$0xff] }
 0x253   :  { %v2871_v21 = vld [vmem:[#allocation2 + $0xc3] sm:$0xff]  ;;  %v13818_v35 = vld [vmem:[#allocation2 + $0xd3] sm:$0xff] }
 0x254   :  { %v13820_v4 = vld [vmem:[#allocation2 + $0x44] sm:$0xff] }
 0x255   :  { %11341 = vmatmul.mubr.msk.f32.gmra.mxu1 %vm2249_vm1, %v13470_v23  ;;  %11693 = vmatmul.mubr.msk.f32.gmra.mxu0 %vm2249_vm1, %v13650_v9  ;;  %15699 = vst [vmem:[#allocation8_spill] sm:$0xff] %v13820_v4 }
 0x256   :  { %11343 = vmatprep.mubr.msk.f32.mxu1 %vm2249_vm1, %v13493_v30  ;;  %11695 = vmatprep.mubr.msk.f32.mxu0 %vm2249_vm1, %v5596_v20  ;;  %v13826_v20 = vld [vmem:[#allocation2 + $0x54] sm:$0xff] }
 0x257   :  { %15700 = vst [vmem:[#allocation10_spill] sm:$0xff] %v13826_v20 }
 0x259   :  { %11344 = vmatmul.mubr.msk.f32.gmra.mxu1 %vm2249_vm1, %v13516_v28  ;;  %11696 = vmatmul.mubr.msk.f32.gmra.mxu0 %vm2249_vm1, %v5597_v11  ;;  %v10211_v11 = vld [vmem:[%s15653_s2 + $0xb8] sm:$0xff] }
 0x25a   :  { %11348 = vmatprep.mubr.msk.f32.mxu1 %vm2249_vm1, %v2636_v2  ;;  %11698 = vmatprep.mubr.msk.f32.mxu0 %vm2249_vm1, %v13430_v37  ;;  %v13681_v37 = vld [vmem:[#allocation2 + $0x32] sm:$0xff]  ;;  %v13836_v2 = vld [vmem:[#allocation2 + $0x64] sm:$0xff] }
 0x25d   :  { %11349 = vmatmul.mubr.msk.f32.vlgmr.msra.gmra.mxu1 %vm2249_vm1, %v13665_v1  ;;  %11699 = vmatmul.mubr.msk.f32.gmra.mxu0 %vm2249_vm1, %v13450_v16 }
 0x25e   :  { %11373 = vmatpush3.msra.mxu1 %v13563_v59  ;;  %11351 = vmatprep.mubr.msk.f32.mxu1 %vm2249_vm1, %v13674_v38  ;;  %v13693_v59 = vld [vmem:[#allocation2 + $0x52] sm:$0xff] }
 0x25f   :  { %11701 = vmatprep.mubr.msk.f32.mxu0 %vm2249_vm1, %v13470_v23  ;;  %11398 = vmatprep.subr.mxu1 %v9888_v6 }
 0x261   :  { %11352 = vmatmul.mubr.msk.f32.gmra.mxu1 %vm2249_vm1, %v13681_v37  ;;  %11702 = vmatmul.mubr.msk.f32.gmra.mxu0 %vm2249_vm1, %v13493_v30 }
 0x262   :  { %11354 = vmatprep.mubr.msk.f32.mxu1 %vm2249_vm1, %v13687_v48  ;;  %11704 = vmatprep.mubr.msk.f32.mxu0 %vm2249_vm1, %v13516_v28 }
 0x265   :  { %11355 = vmatmul.mubr.msk.f32.gmra.mxu1 %vm2249_vm1, %v13693_v59  ;;  %11705 = vmatmul.mubr.msk.f32.gmra.mxu0 %vm2249_vm1, %v13539_v47 }
 0x266   :  { %11357 = vmatprep.mubr.msk.f32.mxu1 %vm2249_vm1, %v13699_v55  ;;  %11707 = vmatprep.mubr.msk.f32.mxu0 %vm2249_vm1, %v13577_v13  ;;  %v13720_v13 = vld [vmem:[#allocation2 + $0xe2] sm:$0xff] }
 0x269   :  { %11358 = vmatmul.mubr.msk.f32.gmra.mxu1 %vm2249_vm1, %v13705_v25  ;;  %11708 = vmatmul.mubr.msk.f32.gmra.mxu0 %vm2249_vm1, %v13613_v10  ;;  %v13752_v10 = vld [vmem:[#allocation2 + $0x122] sm:$0xff] }
 0x26a   :  { %11360 = vmatprep.mubr.msk.f32.mxu1 %vm2249_vm1, %v2644_v5  ;;  %11738 = vmatprep.mubr.msk.f32.mxu0 %vm2249_vm1, %v13681_v37  ;;  %v6505_v5 = vld [vmem:[#allocation2 + $0xa4] sm:$0xff] }
 0x26d   :  { %11361 = vmatmul.mubr.msk.f32.gmra.mxu1 %vm2249_vm1, %v13714_v12  ;;  %11739 = vmatmul.mubr.msk.f32.vlgmr.msra.gmra.mxu0 %vm2249_vm1, %v13687_v48 }
 0x26e   :  { %11363 = vmatprep.mubr.msk.f32.mxu1 %vm2249_vm1, %v13720_v13  ;;  %11741 = vmatprep.mubr.msk.f32.mxu0 %vm2249_vm1, %v13693_v59 }
 0x26f   :  { %11789 = vmatpush3.msra.mxu0 %v10143_v33  ;;  %v13813_v33 = vld [vmem:[#allocation2 + $0x34] sm:$0xff] }
 0x270   :  { %11840 = vmatprep.subr.mxu0 %v13725_v60  ;;  %15698 = vst [vmem:[#allocation7_spill] sm:$0xff] %v13813_v33 }
 0x271   :  { %11364 = vmatmul.mubr.msk.f32.gmra.mxu1 %vm2249_vm1, %v13731_v3  ;;  %11742 = vmatmul.mubr.msk.f32.gmra.mxu0 %vm2249_vm1, %v13699_v55 }
 0x272   :  { %11366 = vmatprep.mubr.msk.f32.mxu1 %vm2249_vm1, %v13738_v61  ;;  %11744 = vmatprep.mubr.msk.f32.mxu0 %vm2249_vm1, %v13705_v25 }
 0x275   :  { %11367 = vmatmul.mubr.msk.f32.gmra.mxu1 %vm2249_vm1, %v13744_v56  ;;  %11745 = vmatmul.mubr.msk.f32.gmra.mxu0 %vm2249_vm1, %v13746_v58 }
 0x276   :  { %11369 = vmatprep.mubr.msk.f32.mxu1 %vm2249_vm1, %v13752_v10  ;;  %11747 = vmatprep.mubr.msk.f32.mxu0 %vm2249_vm1, %v6050_v0  ;;  %v13860_v0 = vld [vmem:[#allocation2 + $0xf4] sm:$0xff] }
 0x277   :  { %15702 = vst [vmem:[#allocation11_spill] sm:$0xff] %v13860_v0 }
 0x279   :  { %11370 = vmatmul.mubr.msk.f32.gmra.mxu1 %vm2249_vm1, %v13757_v63  ;;  %11748 = vmatmul.mubr.msk.f32.gmra.mxu0 %vm2249_vm1, %v6051_v18  ;;  %v13865_v18 = vld [vmem:[#allocation2 + $0x14] sm:$0xff] }
 0x27a   :  { %11374 = vmatprep.mubr.msk.f32.mxu1 %vm2249_vm1, %v2863_v40  ;;  %11750 = vmatprep.mubr.msk.f32.mxu0 %vm2249_vm1, %v13731_v3  ;;  %v13867_v40 = vld [vmem:[#allocation2 + $0x104] sm:$0xff] }
 0x27d   :  { %11375 = vmatmul.mubr.msk.f32.vlgmr.msra.gmra.mxu1 %vm2249_vm1, %v13765_v43  ;;  %11751 = vmatmul.mubr.msk.f32.gmra.mxu0 %vm2249_vm1, %v13738_v61 }
 0x27e   :  { %11399 = vmatpush3.msra.mxu1 %v9888_v6  ;;  %11377 = vmatprep.mubr.msk.f32.mxu1 %vm2249_vm1, %v13776_v15  ;;  %v13842_v6 = vld [vmem:[#allocation2 + $0x74] sm:$0xff] }
 0x27f   :  { %11753 = vmatprep.mubr.msk.f32.mxu0 %vm2249_vm1, %v13744_v56  ;;  %11424 = vmatprep.subr.mxu1 %v13770_v50 }
 0x281   :  { %11378 = vmatmul.mubr.msk.f32.gmra.mxu1 %vm2249_vm1, %v13783_v7  ;;  %11754 = vmatmul.mubr.msk.f32.gmra.mxu0 %vm2249_vm1, %v13752_v10 }
 0x282   :  { %11380 = vmatprep.mubr.msk.f32.mxu1 %vm2249_vm1, %v13789_v46  ;;  %11756 = vmatprep.mubr.msk.f32.mxu0 %vm2249_vm1, %v13757_v63 }
 0x285   :  { %11381 = vmatmul.mubr.msk.f32.gmra.mxu1 %vm2249_vm1, %v13795_v49  ;;  %11757 = vmatmul.mubr.msk.f32.gmra.mxu0 %vm2249_vm1, %v13797_v54 }
 0x286   :  { %11383 = vmatprep.mubr.msk.f32.mxu1 %vm2249_vm1, %v13803_v41  ;;  %11759 = vmatprep.mubr.msk.f32.mxu0 %vm2249_vm1, %v6058_v51  ;;  %v9922_v51 = vld [vmem:[%s15653_s2 + $0x30] sm:$0xff] }
 0x289   :  { %11384 = vmatmul.mubr.msk.f32.gmra.mxu1 %vm2249_vm1, %v13808_v27  ;;  %11760 = vmatmul.mubr.msk.f32.gmra.mxu0 %vm2249_vm1, %v6059_v42  ;;  %v13876_v42 = vld [vmem:[#allocation2 + $0x24] sm:$0xff] }
 0x28a   :  { %11386 = vmatprep.mubr.msk.f32.mxu1 %vm2249_vm1, %v2871_v21  ;;  %11790 = vmatprep.mubr.msk.f32.mxu0 %vm2249_vm1, %v13813_v33  ;;  %v13881_v21 = vld [vmem:[#allocation2 + $0x114] sm:$0xff] }
 0x28d   :  { %11387 = vmatmul.mubr.msk.f32.gmra.mxu1 %vm2249_vm1, %v13818_v35  ;;  %11791 = vmatmul.mubr.msk.f32.vlgmr.msra.gmra.mxu0 %vm2249_vm1, %v13820_v4 }
 0x28e   :  { %11389 = vmatprep.mubr.msk.f32.mxu1 %vm2249_vm1, %v13433_v17  ;;  %11793 = vmatprep.mubr.msk.f32.mxu0 %vm2249_vm1, %v13826_v20  ;;  %v13848_v17 = vld [vmem:[#allocation2 + $0x84] sm:$0xff] }
 0x28f   :  { %11841 = vmatpush3.msra.mxu0 %v13725_v60  ;;  %15701 = vst [vmem:[#allocation9_spill] sm:$0xff] %v13848_v17  ;;  %v3090_v60 = vld [vmem:[#allocation2 + $0x4] sm:$0xff] }
 0x290   :  { %11892 = vmatprep.subr.mxu0 %v10211_v11 }
 0x291   :  { %11390 = vmatmul.mubr.msk.f32.gmra.mxu1 %vm2249_vm1, %v13453_v45  ;;  %11794 = vmatmul.mubr.msk.f32.gmra.mxu0 %vm2249_vm1, %v13836_v2  ;;  %v6504_v45 = vld [vmem:[#allocation2 + $0x94] sm:$0xff] }
 0x292   :  { %11392 = vmatprep.mubr.msk.f32.mxu1 %vm2249_vm1, %v13475_v39  ;;  %11796 = vmatprep.mubr.msk.f32.mxu0 %vm2249_vm1, %v13842_v6 }
 0x295   :  { %11393 = vmatmul.mubr.msk.f32.gmra.mxu1 %vm2249_vm1, %v13498_v44  ;;  %11797 = vmatmul.mubr.msk.f32.gmra.mxu0 %vm2249_vm1, %v13848_v17  ;;  %v6513_v17 = vld [vmem:[#allocation2 + $0x164] sm:$0xff] }
 0x296   :  { %11395 = vmatprep.mubr.msk.f32.mxu1 %vm2249_vm1, %v13521_v26  ;;  %11799 = vmatprep.mubr.msk.f32.mxu0 %vm2249_vm1, %v6504_v45  ;;  %v13885_v45 = vld [vmem:[#allocation2 + $0x124] sm:$0xff] }
 0x299   :  { %11396 = vmatmul.mubr.msk.f32.gmra.mxu1 %vm2249_vm1, %v13544_v32  ;;  %11800 = vmatmul.mubr.msk.f32.gmra.mxu0 %vm2249_vm1, %v6505_v5  ;;  %v13891_v5 = vld [vmem:[#allocation2 + $0x134] sm:$0xff] }
 0x29a   :  { %11400 = vmatprep.mubr.msk.f32.mxu1 %vm2249_vm1, %v3090_v60  ;;  %11802 = vmatprep.mubr.msk.f32.mxu0 %vm2249_vm1, %v13860_v0  ;;  %v6512_v60 = vld [vmem:[#allocation2 + $0x154] sm:$0xff] }
 0x29d   :  { %11401 = vmatmul.mubr.msk.f32.vlgmr.msra.gmra.mxu1 %vm2249_vm1, %v13865_v18  ;;  %11803 = vmatmul.mubr.msk.f32.gmra.mxu0 %vm2249_vm1, %v13867_v40 }
 0x29e   :  { %11425 = vmatpush3.msra.mxu1 %v13770_v50  ;;  %11403 = vmatprep.mubr.msk.f32.mxu1 %vm2249_vm1, %v13876_v42  ;;  %v13897_v50 = vld [vmem:[#allocation2 + $0x144] sm:$0xff] }
 0x29f   :  { %11805 = vmatprep.mubr.msk.f32.mxu0 %vm2249_vm1, %v13881_v21  ;;  %11450 = vmatprep.subr.mxu1 %v9922_v51  ;;  %15703 = vst [vmem:[#allocation12_spill] sm:$0xff] %v13897_v50 }
 0x2a1   :  { %11404 = vmatmul.mubr.msk.f32.gmra.mxu1 %vm2249_vm1, %v13813_v33  ;;  %11806 = vmatmul.mubr.msk.f32.gmra.mxu0 %vm2249_vm1, %v13885_v45  ;;  %v13909_v33 = vld [vmem:[#allocation2 + $0x41] sm:$0xff] }
 0x2a2   :  { %11406 = vmatprep.mubr.msk.f32.mxu1 %vm2249_vm1, %v13820_v4  ;;  %11808 = vmatprep.mubr.msk.f32.mxu0 %vm2249_vm1, %v13891_v5  ;;  %v3098_v4 = vld [vmem:[#allocation2 + $0xc4] sm:$0xff] }
 0x2a5   :  { %11407 = vmatmul.mubr.msk.f32.gmra.mxu1 %vm2249_vm1, %v13826_v20  ;;  %11809 = vmatmul.mubr.msk.f32.gmra.mxu0 %vm2249_vm1, %v13897_v50  ;;  %v13914_v50 = vld [vmem:[#allocation2 + $0xd4] sm:$0xff] }
 0x2a6   :  { %11409 = vmatprep.mubr.msk.f32.mxu1 %vm2249_vm1, %v13836_v2  ;;  %11811 = vmatprep.mubr.msk.f32.mxu0 %vm2249_vm1, %v6512_v60  ;;  %15704 = vst [vmem:[#allocation13_spill] sm:$0xff] %v13914_v50  ;;  %v13916_v20 = vld [vmem:[#allocation2 + $0x51] sm:$0xff]  ;;  %v13922_v60 = vld [vmem:[#allocation2 + $0xe4] sm:$0xff] }
 0x2a7   :  { %15705 = vst [vmem:[#allocation14_spill] sm:$0xff] %v13922_v60 }
 0x2a9   :  { %11410 = vmatmul.mubr.msk.f32.gmra.mxu1 %vm2249_vm1, %v13842_v6  ;;  %11812 = vmatmul.mubr.msk.f32.gmra.mxu0 %vm2249_vm1, %v6513_v17  ;;  %v13924_v17 = vld [vmem:[#allocation2 + $0x61] sm:$0xff] }
 0x2aa   :  { %11412 = vmatprep.mubr.msk.f32.mxu1 %vm2249_vm1, %v3098_v4  ;;  %11842 = vmatprep.mubr.msk.f32.mxu0 %vm2249_vm1, %v13909_v33  ;;  %v13930_v4 = vld [vmem:[#allocation2 + $0x71] sm:$0xff] }
 0x2ab   :  { %15706 = vst [vmem:[#allocation15_spill] sm:$0xff] %v13930_v4 }
 0x2ad   :  { %11413 = vmatmul.mubr.msk.f32.gmra.mxu1 %vm2249_vm1, %v13914_v50  ;;  %11843 = vmatmul.mubr.msk.f32.vlgmr.msra.gmra.mxu0 %vm2249_vm1, %v13916_v20  ;;  %v13936_v50 = vld [vmem:[#allocation2 + $0x81] sm:$0xff] }
 0x2ae   :  { %11415 = vmatprep.mubr.msk.f32.mxu1 %vm2249_vm1, %v13922_v60  ;;  %11845 = vmatprep.mubr.msk.f32.mxu0 %vm2249_vm1, %v13924_v17  ;;  %15707 = vst [vmem:[#allocation16_spill] sm:$0xff] %v13936_v50  ;;  %v13942_v60 = vld [vmem:[#allocation2 + $0x91] sm:$0xff] }
 0x2af   :  { %11893 = vmatpush3.msra.mxu0 %v10211_v11  ;;  %15708 = vst [vmem:[#allocation17_spill] sm:$0xff] %v13942_v60  ;;  %v6959_v11 = vld [vmem:[#allocation2 + $0xa1] sm:$0xff] }
 0x2b1   :  { %11416 = vmatmul.mubr.msk.f32.gmra.mxu1 %vm2249_vm1, %v13860_v0  ;;  %11846 = vmatmul.mubr.msk.f32.gmra.mxu0 %vm2249_vm1, %v13930_v4  ;;  %v6960_v0 = vld [vmem:[#allocation2 + $0xb1] sm:$0xff] }
 0x2b2   :  { %11418 = vmatprep.mubr.msk.f32.mxu1 %vm2249_vm1, %v13867_v40  ;;  %11848 = vmatprep.mubr.msk.f32.mxu0 %vm2249_vm1, %v13936_v50 }
 0x2b5   :  { %11419 = vmatmul.mubr.msk.f32.gmra.mxu1 %vm2249_vm1, %v13881_v21  ;;  %11849 = vmatmul.mubr.msk.f32.gmra.mxu0 %vm2249_vm1, %v13942_v60  ;;  %v9939_v60 = vld [vmem:[%s15653_s2 + $0x38] sm:$0xff] }
 0x2b6   :  { %11421 = vmatprep.mubr.msk.f32.mxu1 %vm2249_vm1, %v13885_v45  ;;  %11851 = vmatprep.mubr.msk.f32.mxu0 %vm2249_vm1, %v6959_v11 }
 0x2b9   :  { %11422 = vmatmul.mubr.msk.f32.gmra.mxu1 %vm2249_vm1, %v13891_v5  ;;  %11852 = vmatmul.mubr.msk.f32.gmra.mxu0 %vm2249_vm1, %v6960_v0 }
 0x2ba   :  { %11426 = vmatprep.mubr.msk.f32.mxu1 %vm2249_vm1, %v13558_v29  ;;  %11854 = vmatprep.mubr.msk.f32.mxu0 %vm2249_vm1, %v13473_v52  ;;  %v13973_v52 = vld [vmem:[#allocation2 + $0x141] sm:$0xff]  ;;  %v6966_v29 = vld [vmem:[#allocation2 + $0x151] sm:$0xff] }
 0x2bb   :  { %15709 = vst [vmem:[#allocation18_spill] sm:$0xff] %v13973_v52 }
 0x2bd   :  { %11427 = vmatmul.mubr.msk.f32.vlgmr.msra.gmra.mxu1 %vm2249_vm1, %v13568_v53  ;;  %11855 = vmatmul.mubr.msk.f32.gmra.mxu0 %vm2249_vm1, %v13496_v22  ;;  %v6967_v53 = vld [vmem:[#allocation2 + $0x161] sm:$0xff] }
 0x2be   :  { %11451 = vmatpush3.msra.mxu1 %v9922_v51  ;;  %11429 = vmatprep.mubr.msk.f32.mxu1 %vm2249_vm1, %v13581_v62  ;;  %v6968_v62 = vld [vmem:[#allocation2 + $0x171] sm:$0xff] }
 0x2bf   :  { %11857 = vmatprep.mubr.msk.f32.mxu0 %vm2249_vm1, %v13519_v19  ;;  %11476 = vmatprep.subr.mxu1 %v9939_v60  ;;  %v7412_v51 = vld [vmem:[#allocation2 + $0x93] sm:$0xff] }
 0x2c1   :  { %11430 = vmatmul.mubr.msk.f32.gmra.mxu1 %vm2249_vm1, %v13591_v24  ;;  %11858 = vmatmul.mubr.msk.f32.gmra.mxu0 %vm2249_vm1, %v13542_v57  ;;  %v3326_v24 = vld [vmem:[#allocation2 + $0xd0] sm:$0xff] }
 0x2c2   :  { %11432 = vmatprep.mubr.msk.f32.mxu1 %vm2249_vm1, %v13600_v36  ;;  %11860 = vmatprep.mubr.msk.f32.mxu0 %vm2249_vm1, %v13973_v52  ;;  %v13991_v36 = vld [vmem:[#allocation2 + $0xe0] sm:$0xff] }
 0x2c5   :  { %11433 = vmatmul.mubr.msk.f32.gmra.mxu1 %vm2249_vm1, %v13605_v34  ;;  %11861 = vmatmul.mubr.msk.f32.gmra.mxu0 %vm2249_vm1, %v6966_v29  ;;  %v13997_v34 = vld [vmem:[#allocation2 + $0xf0] sm:$0xff] }
 0x2c6   :  { %11435 = vmatprep.mubr.msk.f32.mxu1 %vm2249_vm1, %v13616_v31  ;;  %11863 = vmatprep.mubr.msk.f32.mxu0 %vm2249_vm1, %v6967_v53  ;;  %v14003_v31 = vpop.f32.mrf.mxu1  ;;  %v3545_v53 = vld [vmem:[#allocation2 + $0x11] sm:$0xff] }
 0x2c8   :  { %v14015_v0 = vpop.f32.mrf.mxu1 }
 0x2c9   :  { %11436 = vmatmul.mubr.msk.f32.gmra.mxu1 %vm2249_vm1, %v13650_v9  ;;  %11864 = vmatmul.mubr.msk.f32.gmra.mxu0 %vm2249_vm1, %v6968_v62  ;;  %v14009_v9 = vld [vmem:[#allocation2 + $0x83] sm:$0xff] }
 0x2ca   :  { %11438 = vmatprep.mubr.msk.f32.mxu1 %vm2249_vm1, %v3326_v24  ;;  %11894 = vmatprep.mubr.msk.f32.mxu0 %vm2249_vm1, %v13789_v46  ;;  %v14017_v11 = vpop.f32.mrf.mxu1  ;;  %v14035_v62 = vld [vmem:[#allocation2 + $0x21] sm:$0xff] }
 0x2cc   :  { %v14025_v29 = vpop.f32.mrf.mxu1 }
 0x2cd   :  { %11439 = vmatmul.mubr.msk.f32.gmra.mxu1 %vm2249_vm1, %v13991_v36  ;;  %11895 = vmatmul.mubr.msk.f32.vlgmr.msra.gmra.mxu0 %vm2249_vm1, %v13795_v49 }
 0x2ce   :  { %11441 = vmatprep.mubr.msk.f32.mxu1 %vm2249_vm1, %v13997_v34  ;;  %11897 = vmatprep.mubr.msk.f32.mxu0 %vm2249_vm1, %v13803_v41 }
 0x2d1   :  { %11442 = vmatmul.mubr.msk.f32.gmra.mxu1 %vm2249_vm1, %v13450_v16  ;;  %11898 = vmatmul.mubr.msk.f32.gmra.mxu0 %vm2249_vm1, %v13808_v27  ;;  %v7413_v16 = vld [vmem:[#allocation2 + $0xa3] sm:$0xff] }
 0x2d2   :  { %11444 = vmatprep.mubr.msk.f32.mxu1 %vm2249_vm1, %v13470_v23  ;;  %11900 = vmatprep.mubr.msk.f32.mxu0 %vm2249_vm1, %v14009_v9  ;;  %v7414_v23 = vld [vmem:[#allocation2 + $0xb3] sm:$0xff] }
 0x2d5   :  { %11445 = vmatmul.mubr.msk.f32.gmra.mxu1 %vm2249_vm1, %v13493_v30  ;;  %11901 = vmatmul.mubr.msk.f32.gmra.mxu0 %vm2249_vm1, %v7412_v51  ;;  %v14033_v30 = vpop.f32.mrf.mxu1 }
 0x2d6   :  { %11447 = vmatprep.mubr.msk.f32.mxu1 %vm2249_vm1, %v13516_v28  ;;  %11903 = vmatprep.mubr.msk.f32.mxu0 %vm2249_vm1, %v7413_v16  ;;  %v9956_v28 = vld [vmem:[%s15653_s2 + $0x40] sm:$0xff] }
 0x2d7   :  { %v14077_v16 = vld [vmem:[#allocation2 + $0xe1] sm:$0xff] }
 0x2d8   :  { %15710 = vst [vmem:[#allocation19_spill] sm:$0xff] %v14077_v16 }
 0x2d9   :  { %11448 = vmatmul.mubr.msk.f32.gmra.mxu1 %vm2249_vm1, %v13539_v47  ;;  %11904 = vmatmul.mubr.msk.f32.gmra.mxu0 %vm2249_vm1, %v7414_v23  ;;  %v14044_v47 = vld [vmem:[#allocation2 + $0x31] sm:$0xff] }
 0x2da   :  { %11452 = vmatprep.mubr.msk.f32.mxu1 %vm2249_vm1, %v3545_v53  ;;  %11906 = vmatprep.mubr.msk.f32.mxu0 %vm2249_vm1, %v13475_v39  ;;  %v14048_v39 = vpop.f32.mrf.mxu1  ;;  %v14081_v23 = vld [vmem:[#allocation2 + $0xf1] sm:$0xff]  ;;  %v14085_v53 = vld [vmem:[#allocation2 + $0x101] sm:$0xff] }
 0x2db   :  { %15711 = vst [vmem:[#allocation20_spill] sm:$0xff] %v14081_v23  ;;  %15712 = vst [vmem:[#allocation21_spill] sm:$0xff] %v14085_v53 }
 0x2dc   :  { %v14052_v24 = vpop.f32.mrf.mxu1 }
 0x2dd   :  { %11453 = vmatmul.mubr.msk.f32.vlgmr.msra.gmra.mxu1 %vm2249_vm1, %v14035_v62  ;;  %11907 = vmatmul.mubr.msk.f32.gmra.mxu0 %vm2249_vm1, %v13498_v44 }
 0x2de   :  { %11477 = vmatpush3.msra.mxu1 %v9939_v60  ;;  %11455 = vmatprep.mubr.msk.f32.mxu1 %vm2249_vm1, %v14044_v47  ;;  %v14062_v44 = vpop.f32.mrf.mxu1  ;;  %v7422_v60 = vld [vmem:[#allocation2 + $0x173] sm:$0xff] }
 0x2df   :  { %11909 = vmatprep.mubr.msk.f32.mxu0 %vm2249_vm1, %v13521_v26  ;;  %11502 = vmatprep.subr.mxu1 %v9956_v28  ;;  %v7421_v26 = vld [vmem:[#allocation2 + $0x163] sm:$0xff] }
 0x2e1   :  { %11456 = vmatmul.mubr.msk.f32.gmra.mxu1 %vm2249_vm1, %v13909_v33  ;;  %11910 = vmatmul.mubr.msk.f32.gmra.mxu0 %vm2249_vm1, %v13544_v32  ;;  %v14071_v32 = vpop.f32.mrf.mxu1 }
 0x2e2   :  { %11458 = vmatprep.mubr.msk.f32.mxu1 %vm2249_vm1, %v13916_v20  ;;  %11912 = vmatprep.mubr.msk.f32.mxu0 %vm2249_vm1, %v13583_v8  ;;  %v3553_v8 = vld [vmem:[#allocation2 + $0xd1] sm:$0xff] }
 0x2e3   :  { %v2404_v51 = vpop.f32.mrf.mxu1 }
 0x2e5   :  { %11459 = vmatmul.mubr.msk.f32.gmra.mxu1 %vm2249_vm1, %v13924_v17  ;;  %11913 = vmatmul.mubr.msk.f32.gmra.mxu0 %vm2249_vm1, %v13618_v14  ;;  %v11313_v14 = vpop.f32.mrf.mxu1 }
 0x2e6   :  { %11461 = vmatprep.mubr.msk.f32.mxu1 %vm2249_vm1, %v13930_v4  ;;  %11915 = vmatprep.mubr.msk.f32.mxu0 %vm2249_vm1, %v7421_v26 }
 0x2e7   :  { %v2414_v26 = vpop.f32.mrf.mxu1 }
 0x2e9   :  { %11462 = vmatmul.mubr.msk.f32.gmra.mxu1 %vm2249_vm1, %v13936_v50  ;;  %11916 = vmatmul.mubr.msk.f32.gmra.mxu0 %vm2249_vm1, %v7422_v60  ;;  %v11316_v60 = vpop.f32.mrf.mxu1 }
 0x2ea   :  { %11464 = vmatprep.mubr.msk.f32.mxu1 %vm2249_vm1, %v3553_v8 }
 0x2eb   :  { %v2424_v8 = vpop.f32.mrf.mxu1 }
 0x2ed   :  { %11465 = vmatmul.mubr.msk.f32.gmra.mxu1 %vm2249_vm1, %v14077_v16 }
 0x2ee   :  { %11467 = vmatprep.mubr.msk.f32.mxu1 %vm2249_vm1, %v14081_v23 }
 0x2f1   :  { %11468 = vmatmul.mubr.msk.f32.gmra.mxu1 %vm2249_vm1, %v14085_v53 }
 0x2f2   :  { %11470 = vmatprep.mubr.msk.f32.mxu1 %vm2249_vm1, %v13496_v22  ;;  %v9973_v22 = vld [vmem:[%s15653_s2 + $0x48] sm:$0xff] }
 0x2f5   :  { %11471 = vmatmul.mubr.msk.f32.gmra.mxu1 %vm2249_vm1, %v13519_v19 }
 0x2f6   :  { %11473 = vmatprep.mubr.msk.f32.mxu1 %vm2249_vm1, %v13542_v57 }
 0x2f9   :  { %v11319_v16 = vpop.f32.mrf.mxu1  ;;  %11474 = vmatmul.mubr.msk.f32.gmra.mxu1 %vm2249_vm1, %v13973_v52 }
 0x2fa   :  { %11478 = vmatprep.mubr.msk.f32.mxu1 %vm2249_vm1, %v13665_v1 }
 0x2fb   :  { %v2434_v23 = vpop.f32.mrf.mxu1 }
 0x2fd   :  { %v11324_v53 = vpop.f32.mrf.mxu1  ;;  %11479 = vmatmul.mubr.msk.f32.vlgmr.msra.gmra.mxu1 %vm2249_vm1, %v13674_v38 }
 0x2fe   :  { %11503 = vmatpush3.msra.mxu1 %v9956_v28  ;;  %11481 = vmatprep.mubr.msk.f32.mxu1 %vm2249_vm1, %v13681_v37 }
 0x2ff   :  { %v2557_v19 = vpop.f32.mrf.mxu1  ;;  %11528 = vmatprep.subr.mxu1 %v9973_v22 }
 0x301   :  { %v11327_v57 = vpop.f32.mrf.mxu1  ;;  %11482 = vmatmul.mubr.msk.f32.gmra.mxu1 %vm2249_vm1, %v13687_v48 }
 0x302   :  { %11484 = vmatprep.mubr.msk.f32.mxu1 %vm2249_vm1, %v13693_v59 }
 0x303   :  { %v2567_v1 = vpop.f32.mrf.mxu1 }
 0x305   :  { %v11330_v52 = vpop.f32.mrf.mxu1  ;;  %11485 = vmatmul.mubr.msk.f32.gmra.mxu1 %vm2249_vm1, %v13699_v55 }
 0x306   :  { %11487 = vmatprep.mubr.msk.f32.mxu1 %vm2249_vm1, %v13705_v25 }
 0x307   :  { %v2577_v38 = vpop.f32.mrf.mxu1 }
 0x309   :  { %v11333_v28 = vpop.f32.mrf.mxu1  ;;  %11488 = vmatmul.mubr.msk.f32.gmra.mxu1 %vm2249_vm1, %v13746_v58 }
 0x30a   :  { %11490 = vmatprep.mubr.msk.f32.mxu1 %vm2249_vm1, %v13714_v12 }
 0x30b   :  { %v2587_v37 = vpop.f32.mrf.mxu1 }
 0x30d   :  { %v11336_v48 = vpop.f32.mrf.mxu1  ;;  %11491 = vmatmul.mubr.msk.f32.gmra.mxu1 %vm2249_vm1, %v13720_v13 }
 0x30e   :  { %11493 = vmatprep.mubr.msk.f32.mxu1 %vm2249_vm1, %v13731_v3 }
 0x30f   :  { %v2597_v59 = vpop.f32.mrf.mxu1 }
 0x310   :  { %v2598_v55 = vadd.f32 %v2597_v59, %v2404_v51  ;;  %v4010_v59 = vld [vmem:[#allocation2 + $0x103] sm:$0xff] }
 0x311   :  { %v11339_v50 = vpop.f32.mrf.mxu1  ;;  %11494 = vmatmul.mubr.msk.f32.gmra.mxu1 %vm2249_vm1, %v13738_v61 }
 0x312   :  { %v14124_v25 = vadd.f32 %v11339_v50, %v11313_v14  ;;  %11496 = vmatprep.mubr.msk.f32.mxu1 %vm2249_vm1, %v13744_v56 }
 0x313   :  { %v2607_v12 = vpop.f32.mrf.mxu1 }
 0x314   :  { %v14128_v58 = vadd.f32 %v2607_v12, %v2414_v26  ;;  %v4012_v12 = vld [vmem:[#allocation2 + $0x123] sm:$0xff] }
 0x315   :  { %v11342_v4 = vpop.f32.mrf.mxu1  ;;  %11497 = vmatmul.mubr.msk.f32.gmra.mxu1 %vm2249_vm1, %v13752_v10  ;;  %v2563_v10 = vadd.f32 %v11324_v53, %v14003_v31  ;;  %v2573_v31 = vadd.f32 %v11327_v57, %v14017_v11  ;;  %v2578_v11 = vadd.f32 %v2577_v38, %v14048_v39 }
 0x316   :  { %v14132_v13 = vadd.f32 %v11342_v4, %v11316_v60  ;;  %11499 = vmatprep.mubr.msk.f32.mxu1 %vm2249_vm1, %v13757_v63  ;;  %v14150_v63 = vld [vmem:[%s15653_s2 + $0x50] sm:$0xff] }
 0x317   :  { %v2617_v3 = vpop.f32.mrf.mxu1 }
 0x318   :  { %v14136_v51 = vadd.f32 %v2617_v3, %v2424_v8 }
 0x319   :  { %v11345_v61 = vpop.f32.mrf.mxu1  ;;  %11500 = vmatmul.mubr.msk.f32.gmra.mxu1 %vm2249_vm1, %v13797_v54  ;;  %v2558_v54 = vadd.f32 %v2557_v19, %v14015_v0 }
 0x31a   :  { %v14140_v56 = vadd.f32 %v11345_v61, %v11319_v16  ;;  %11504 = vmatprep.mubr.msk.f32.mxu1 %vm2249_vm1, %v13765_v43  ;;  %v4013_v61 = vld [vmem:[#allocation2 + $0x133] sm:$0xff] }
 0x31b   :  { %v2627_v50 = vpop.f32.mrf.mxu1 }
 0x31c   :  { %v14145_v4 = vadd.f32 %v2627_v50, %v2434_v23 }
 0x31d   :  { %v11350_v14 = vpop.f32.mrf.mxu1  ;;  %11505 = vmatmul.mubr.msk.f32.vlgmr.msra.gmra.mxu1 %vm2249_vm1, %v13776_v15  ;;  %v2568_v15 = vadd.f32 %v2567_v1, %v14025_v29  ;;  %v2593_v29 = vadd.f32 %v11333_v28, %v14052_v24  ;;  %v4008_v1 = vld [vmem:[#allocation2 + $0xe3] sm:$0xff]  ;;  %v4009_v24 = vld [vmem:[#allocation2 + $0xf3] sm:$0xff] }
 0x31e   :  { %v14155_v16 = vadd.f32 %v11350_v14, %v2563_v10  ;;  %11529 = vmatpush3.msra.mxu1 %v9973_v22  ;;  %11507 = vmatprep.mubr.msk.f32.mxu1 %vm2249_vm1, %v13783_v7  ;;  %v2583_v7 = vadd.f32 %v11330_v52, %v14033_v30  ;;  %v2603_v30 = vadd.f32 %v11336_v48, %v14071_v32  ;;  %v4014_v14 = vld [vmem:[#allocation2 + $0x143] sm:$0xff] }
 0x31f   :  { %v2768_v43 = vpop.f32.mrf.mxu1  ;;  %11554 = vmatprep.subr.mxu1 %v14150_v63 }
 0x320   :  { %v14161_v23 = vadd.f32 %v2768_v43, %v2558_v54 }
 0x321   :  { %v11353_v53 = vpop.f32.mrf.mxu1  ;;  %11508 = vmatmul.mubr.msk.f32.gmra.mxu1 %vm2249_vm1, %v13789_v46 }
 0x322   :  { %v14166_v0 = vadd.f32 %v11353_v53, %v2573_v31  ;;  %11510 = vmatprep.mubr.msk.f32.mxu1 %vm2249_vm1, %v13795_v49  ;;  %v2588_v49 = vadd.f32 %v2587_v37, %v14062_v44  ;;  %v4011_v37 = vld [vmem:[#allocation2 + $0x113] sm:$0xff]  ;;  %v15713_v53 = vld [vmem:[#allocation7_spill] sm:$0xff] }
 0x323   :  { %v2778_v26 = vpop.f32.mrf.mxu1 }
 0x324   :  { %v2849_v60 = vadd.f32 %v2778_v26, %v2568_v15  ;;  %v15714_v15 = vld [vmem:[#allocation8_spill] sm:$0xff] }
 0x325   :  { %v11356_v8 = vpop.f32.mrf.mxu1  ;;  %11511 = vmatmul.mubr.msk.f32.gmra.mxu1 %vm2249_vm1, %v13803_v41 }
 0x326   :  { %v2852_v22 = vadd.f32 %v11356_v8, %v2583_v7  ;;  %11513 = vmatprep.mubr.msk.f32.mxu1 %vm2249_vm1, %v13808_v27  ;;  %v15715_v7 = vld [vmem:[#allocation10_spill] sm:$0xff] }
 0x327   :  { %v2788_v46 = vpop.f32.mrf.mxu1 }
 0x328   :  { %v2851_v19 = vadd.f32 %v2788_v46, %v2578_v11 }
 0x329   :  { %v11359_v57 = vpop.f32.mrf.mxu1  ;;  %11514 = vmatmul.mubr.msk.f32.gmra.mxu1 %vm2249_vm1, %v14009_v9 }
 0x32a   :  { %v2854_v52 = vadd.f32 %v11359_v57, %v2593_v29  ;;  %11516 = vmatprep.mubr.msk.f32.mxu1 %vm2249_vm1, %v13818_v35  ;;  %v15716_v29 = vld [vmem:[#allocation9_spill] sm:$0xff] }
 0x32b   :  { %v2798_v41 = vpop.f32.mrf.mxu1  ;;  %v15717_v57 = vld [vmem:[#allocation13_spill] sm:$0xff] }
 0x32c   :  { %v2853_v39 = vadd.f32 %v2798_v41, %v2588_v49 }
 0x32d   :  { %v11362_v27 = vpop.f32.mrf.mxu1  ;;  %11517 = vmatmul.mubr.msk.f32.gmra.mxu1 %vm2249_vm1, %v4008_v1 }
 0x32e   :  { %v2856_v38 = vadd.f32 %v11362_v27, %v2603_v30  ;;  %11519 = vmatprep.mubr.msk.f32.mxu1 %vm2249_vm1, %v4009_v24  ;;  %v15718_v30 = vld [vmem:[#allocation14_spill] sm:$0xff] }
 0x32f   :  { %v2808_v28 = vpop.f32.mrf.mxu1 }
 0x330   :  { %v2855_v9 = vadd.f32 %v2808_v28, %v2598_v55 }
 0x331   :  { %v11365_v44 = vpop.f32.mrf.mxu1  ;;  %11520 = vmatmul.mubr.msk.f32.gmra.mxu1 %vm2249_vm1, %v4010_v59 }
 0x332   :  { %v2858_v35 = vadd.f32 %v11365_v44, %v14124_v25  ;;  %11522 = vmatprep.mubr.msk.f32.mxu1 %vm2249_vm1, %v4011_v37  ;;  %v4454_v44 = vld [vmem:[#allocation2 + $0x20] sm:$0xff] }
 0x333   :  { %v2818_v32 = vpop.f32.mrf.mxu1 }
 0x334   :  { %v2857_v48 = vadd.f32 %v2818_v32, %v14128_v58 }
 0x335   :  { %v11368_v3 = vpop.f32.mrf.mxu1  ;;  %11523 = vmatmul.mubr.msk.f32.gmra.mxu1 %vm2249_vm1, %v4012_v12 }
 0x336   :  { %v2860_v50 = vadd.f32 %v11368_v3, %v14132_v13  ;;  %11525 = vmatprep.mubr.msk.f32.mxu1 %vm2249_vm1, %v4013_v61  ;;  %v10007_v13 = vld [vmem:[%s15653_s2 + $0x58] sm:$0xff] }
 0x337   :  { %v2828_v55 = vpop.f32.mrf.mxu1 }
 0x338   :  { %v2859_v10 = vadd.f32 %v2828_v55, %v14136_v51 }
 0x339   :  { %v11371_v54 = vpop.f32.mrf.mxu1  ;;  %11526 = vmatmul.mubr.msk.f32.gmra.mxu1 %vm2249_vm1, %v4014_v14 }
 0x33a   :  { %v2862_v25 = vadd.f32 %v11371_v54, %v14140_v56  ;;  %11530 = vmatprep.mubr.msk.f32.mxu1 %vm2249_vm1, %v13865_v18 }
 0x33b   :  { %v2838_v58 = vpop.f32.mrf.mxu1 }
 0x33c   :  { %v2861_v43 = vadd.f32 %v2838_v58, %v14145_v4  ;;  %v14263_v58 = vld [vmem:[#allocation2 + $0x70] sm:$0xff] }
 0x33d   :  { %v11376_v31 = vpop.f32.mrf.mxu1  ;;  %11531 = vmatmul.mubr.msk.f32.vlgmr.msra.gmra.mxu1 %vm2249_vm1, %v13876_v42 }
 0x33e   :  { %v3075_v51 = vadd.f32 %v11376_v31, %v14155_v16  ;;  %11555 = vmatpush3.msra.mxu1 %v14150_v63  ;;  %11533 = vmatprep.mubr.msk.f32.mxu1 %vm2249_vm1, %v15713_v53 }
 0x33f   :  { %v2995_v56 = vpop.f32.mrf.mxu1  ;;  %11580 = vmatprep.subr.mxu1 %v10007_v13 }
 0x340   :  { %v3074_v18 = vadd.f32 %v2995_v56, %v14161_v23  ;;  %v14271_v56 = vld [vmem:[#allocation2 + $0x90] sm:$0xff] }
 0x341   :  { %v11379_v4 = vpop.f32.mrf.mxu1  ;;  %11534 = vmatmul.mubr.msk.f32.gmra.mxu1 %vm2249_vm1, %v15714_v15 }
 0x342   :  { %v3077_v26 = vadd.f32 %v11379_v4, %v14166_v0  ;;  %11536 = vmatprep.mubr.msk.f32.mxu1 %vm2249_vm1, %v15715_v7 }
 0x343   :  { %v3005_v42 = vpop.f32.mrf.mxu1 }
 0x344   :  { %v3076_v16 = vadd.f32 %v3005_v42, %v2849_v60  ;;  %v14279_v42 = vld [vmem:[#allocation2 + $0x100] sm:$0xff] }
 0x345   :  { %v11382_v8 = vpop.f32.mrf.mxu1  ;;  %11537 = vmatmul.mubr.msk.f32.gmra.mxu1 %vm2249_vm1, %v13836_v2 }
 0x346   :  { %v3079_v63 = vadd.f32 %v11382_v8, %v2852_v22  ;;  %11539 = vmatprep.mubr.msk.f32.mxu1 %vm2249_vm1, %v13842_v6  ;;  %v15719_v22 = vld [vmem:[#allocation11_spill] sm:$0xff] }
 0x347   :  { %v3015_v23 = vpop.f32.mrf.mxu1 }
 0x348   :  { %v3078_v11 = vadd.f32 %v3015_v23, %v2851_v19  ;;  %v14283_v23 = vld [vmem:[#allocation2 + $0x110] sm:$0xff] }
 0x349   :  { %v11385_v46 = vpop.f32.mrf.mxu1  ;;  %11540 = vmatmul.mubr.msk.f32.gmra.mxu1 %vm2249_vm1, %v15716_v29 }
 0x34a   :  { %v3081_v0 = vadd.f32 %v11385_v46, %v2854_v52  ;;  %11542 = vmatprep.mubr.msk.f32.mxu1 %vm2249_vm1, %v15717_v57 }
 0x34b   :  { %v3025_v49 = vpop.f32.mrf.mxu1 }
 0x34c   :  { %v3080_v60 = vadd.f32 %v3025_v49, %v2853_v39  ;;  %v14295_v49 = vld [vmem:[#allocation2 + $0x140] sm:$0xff] }
 0x34d   :  { %v11388_v41 = vpop.f32.mrf.mxu1  ;;  %11543 = vmatmul.mubr.msk.f32.gmra.mxu1 %vm2249_vm1, %v15718_v30 }
 0x34e   :  { %v3083_v2 = vadd.f32 %v11388_v41, %v2856_v38  ;;  %11545 = vmatprep.mubr.msk.f32.mxu1 %vm2249_vm1, %v15719_v22 }
 0x34f   :  { %v3035_v6 = vpop.f32.mrf.mxu1 }
 0x350   :  { %v3082_v19 = vadd.f32 %v3035_v6, %v2855_v9 }
 0x351   :  { %v11391_v1 = vpop.f32.mrf.mxu1  ;;  %11546 = vmatmul.mubr.msk.f32.gmra.mxu1 %vm2249_vm1, %v13867_v40  ;;  %v15720_v40 = vld [vmem:[#allocation12_spill] sm:$0xff] }
 0x352   :  { %v3085_v52 = vadd.f32 %v11391_v1, %v2858_v35  ;;  %11548 = vmatprep.mubr.msk.f32.mxu1 %vm2249_vm1, %v13881_v21 }
 0x353   :  { %v3045_v27 = vpop.f32.mrf.mxu1 }
 0x354   :  { %v3084_v39 = vadd.f32 %v3045_v27, %v2857_v48  ;;  %v14250_v48 = vld [vmem:[#allocation2 + $0x40] sm:$0xff] }
 0x355   :  { %v11394_v24 = vpop.f32.mrf.mxu1  ;;  %11549 = vmatmul.mubr.msk.f32.gmra.mxu1 %vm2249_vm1, %v13885_v45  ;;  %v4455_v45 = vld [vmem:[#allocation2 + $0x30] sm:$0xff] }
 0x356   :  { %v14231_v38 = vadd.f32 %v11394_v24, %v2860_v50  ;;  %11551 = vmatprep.mubr.msk.f32.mxu1 %vm2249_vm1, %v13891_v5  ;;  %v14247_v5 = vld [vmem:[%s15653_s2 + $0x60] sm:$0xff]  ;;  %v14255_v50 = vld [vmem:[#allocation2 + $0x50] sm:$0xff] }
 0x357   :  { %v3055_v28 = vpop.f32.mrf.mxu1 }
 0x358   :  { %v14235_v9 = vadd.f32 %v3055_v28, %v2859_v10  ;;  %v14259_v10 = vld [vmem:[#allocation2 + $0x60] sm:$0xff] }
 0x359   :  { %v11397_v59 = vpop.f32.mrf.mxu1  ;;  %11552 = vmatmul.mubr.msk.f32.gmra.mxu1 %vm2249_vm1, %v15720_v40  ;;  %v15721_v40 = vld [vmem:[#allocation15_spill] sm:$0xff] }
 0x35a   :  { %v14239_v21 = vadd.f32 %v11397_v59, %v2862_v25  ;;  %11556 = vmatprep.mubr.msk.f32.mxu1 %vm2249_vm1, %v4454_v44 }
 0x35b   :  { %v3065_v37 = vpop.f32.mrf.mxu1 }
 0x35c   :  { %v14242_v35 = vadd.f32 %v3065_v37, %v2861_v43 }
 0x35d   :  { %v11402_v32 = vpop.f32.mrf.mxu1  ;;  %11557 = vmatmul.mubr.msk.f32.vlgmr.msra.gmra.mxu1 %vm2249_vm1, %v4455_v45  ;;  %v15723_v45 = vld [vmem:[#allocation17_spill] sm:$0xff] }
 0x35e   :  { %v3302_v12 = vadd.f32 %v11402_v32, %v3075_v51  ;;  %11581 = vmatpush3.msra.mxu1 %v10007_v13  ;;  %11559 = vmatprep.mubr.msk.f32.mxu1 %vm2249_vm1, %v14250_v48  ;;  %v14267_v13 = vld [vmem:[#allocation2 + $0x80] sm:$0xff] }
 0x35f   :  { %v3222_v3 = vpop.f32.mrf.mxu1  ;;  %11606 = vmatprep.subr.mxu1 %v14247_v5 }
 0x360   :  { %v3301_v61 = vadd.f32 %v3222_v3, %v3074_v18  ;;  %v15725_v3 = vld [vmem:[#allocation20_spill] sm:$0xff] }
 0x361   :  { %v11405_v55 = vpop.f32.mrf.mxu1  ;;  %11560 = vmatmul.mubr.msk.f32.gmra.mxu1 %vm2249_vm1, %v14255_v50 }
 0x362   :  { %v3304_v14 = vadd.f32 %v11405_v55, %v3077_v26  ;;  %11562 = vmatprep.mubr.msk.f32.mxu1 %vm2249_vm1, %v14259_v10  ;;  %v15726_v55 = vld [vmem:[#allocation21_spill] sm:$0xff] }
 0x363   :  { %v3232_v54 = vpop.f32.mrf.mxu1 }
 0x364   :  { %v3303_v25 = vadd.f32 %v3232_v54, %v3076_v16 }
 0x365   :  { %v11408_v43 = vpop.f32.mrf.mxu1  ;;  %11563 = vmatmul.mubr.msk.f32.gmra.mxu1 %vm2249_vm1, %v14263_v58 }
 0x366   :  { %v3306_v31 = vadd.f32 %v11408_v43, %v3079_v63  ;;  %11565 = vmatprep.mubr.msk.f32.mxu1 %vm2249_vm1, %v14267_v13 }
 0x367   :  { %v3242_v51 = vpop.f32.mrf.mxu1 }
 0x368   :  { %v3305_v53 = vadd.f32 %v3242_v51, %v3078_v11 }
 0x369   :  { %v11411_v18 = vpop.f32.mrf.mxu1  ;;  %11566 = vmatmul.mubr.msk.f32.gmra.mxu1 %vm2249_vm1, %v14271_v56 }
 0x36a   :  { %v3308_v4 = vadd.f32 %v11411_v18, %v3081_v0  ;;  %11568 = vmatprep.mubr.msk.f32.mxu1 %vm2249_vm1, %v13991_v36  ;;  %v14287_v36 = vld [vmem:[#allocation2 + $0x120] sm:$0xff]  ;;  %v14291_v0 = vld [vmem:[#allocation2 + $0x130] sm:$0xff] }
 0x36b   :  { %v3252_v15 = vpop.f32.mrf.mxu1 }
 0x36c   :  { %v3307_v26 = vadd.f32 %v3252_v15, %v3080_v60 }
 0x36d   :  { %v11414_v7 = vpop.f32.mrf.mxu1  ;;  %11569 = vmatmul.mubr.msk.f32.gmra.mxu1 %vm2249_vm1, %v13997_v34 }
 0x36e   :  { %v3310_v16 = vadd.f32 %v11414_v7, %v3083_v2  ;;  %11571 = vmatprep.mubr.msk.f32.mxu1 %vm2249_vm1, %v14279_v42  ;;  %v14301_v2 = vld [vmem:[#allocation2 + $0x150] sm:$0xff]  ;;  %v15727_v7 = vld [vmem:[#allocation18_spill] sm:$0xff] }
 0x36f   :  { %v3262_v8 = vpop.f32.mrf.mxu1 }
 0x370   :  { %v3309_v63 = vadd.f32 %v3262_v8, %v3082_v19 }
 0x371   :  { %v11417_v11 = vpop.f32.mrf.mxu1  ;;  %11572 = vmatmul.mubr.msk.f32.gmra.mxu1 %vm2249_vm1, %v14283_v23 }
 0x372   :  { %v3312_v46 = vadd.f32 %v11417_v11, %v3085_v52  ;;  %11574 = vmatprep.mubr.msk.f32.mxu1 %vm2249_vm1, %v14287_v36  ;;  %v10058_v52 = vld [vmem:[%s15653_s2 + $0x70] sm:$0xff] }
 0x373   :  { %v3272_v34 = vpop.f32.mrf.mxu1 }
 0x374   :  { %v3311_v29 = vadd.f32 %v3272_v34, %v3084_v39 }
 0x375   :  { %v11420_v57 = vpop.f32.mrf.mxu1  ;;  %11575 = vmatmul.mubr.msk.f32.gmra.mxu1 %vm2249_vm1, %v14291_v0 }
 0x376   :  { %v3314_v60 = vadd.f32 %v11420_v57, %v14231_v38  ;;  %11577 = vmatprep.mubr.msk.f32.mxu1 %vm2249_vm1, %v14295_v49 }
 0x377   :  { %v3282_v41 = vpop.f32.mrf.mxu1 }
 0x378   :  { %v3313_v30 = vadd.f32 %v3282_v41, %v14235_v9  ;;  %v14375_v41 = vld [vmem:[%s15653_s2 + $0x80] sm:$0xff] }
 0x379   :  { %v11423_v22 = vpop.f32.mrf.mxu1  ;;  %11578 = vmatmul.mubr.msk.f32.gmra.mxu1 %vm2249_vm1, %v14301_v2 }
 0x37a   :  { %v3316_v6 = vadd.f32 %v11423_v22, %v14239_v21  ;;  %11582 = vmatprep.mubr.msk.f32.mxu1 %vm2249_vm1, %v14035_v62  ;;  %v15722_v21 = vld [vmem:[#allocation16_spill] sm:$0xff]  ;;  %v14378_v22 = vld [vmem:[#allocation2 + $0x42] sm:$0xff] }
 0x37b   :  { %v3292_v19 = vpop.f32.mrf.mxu1 }
 0x37c   :  { %v3315_v1 = vadd.f32 %v3292_v19, %v14242_v35 }
 0x37d   :  { %v11428_v27 = vpop.f32.mrf.mxu1  ;;  %11583 = vmatmul.mubr.msk.f32.vlgmr.msra.gmra.mxu1 %vm2249_vm1, %v14044_v47 }
 0x37e   :  { %v3530_v39 = vadd.f32 %v11428_v27, %v3302_v12  ;;  %11607 = vmatpush3.msra.mxu1 %v14247_v5  ;;  %11585 = vmatprep.mubr.msk.f32.mxu1 %vm2249_vm1, %v13909_v33  ;;  %v15724_v5 = vld [vmem:[#allocation19_spill] sm:$0xff]  ;;  %v14387_v27 = vld [vmem:[#allocation2 + $0x52] sm:$0xff] }
 0x37f   :  { %v3450_v24 = vpop.f32.mrf.mxu1  ;;  %11658 = vmatprep.subr.mxu1 %v10058_v52 }
 0x380   :  { %v3529_v62 = vadd.f32 %v3450_v24, %v3301_v61 }
 0x381   :  { %v11431_v38 = vpop.f32.mrf.mxu1  ;;  %11586 = vmatmul.mubr.msk.f32.gmra.mxu1 %vm2249_vm1, %v13916_v20 }
 0x382   :  { %v3532_v28 = vadd.f32 %v11431_v38, %v3304_v14  ;;  %11588 = vmatprep.mubr.msk.f32.mxu1 %vm2249_vm1, %v13924_v17  ;;  %v14391_v38 = vld [vmem:[#allocation2 + $0x62] sm:$0xff] }
 0x383   :  { %v3460_v9 = vpop.f32.mrf.mxu1 }
 0x384   :  { %v3531_v59 = vadd.f32 %v3460_v9, %v3303_v25  ;;  %v14341_v25 = vld [vmem:[#allocation2 + $0x111] sm:$0xff] }
 0x385   :  { %v11434_v47 = vpop.f32.mrf.mxu1  ;;  %11589 = vmatmul.mubr.msk.f32.gmra.mxu1 %vm2249_vm1, %v15721_v40  ;;  %v14403_v40 = vld [vmem:[#allocation2 + $0x82] sm:$0xff] }
 0x386   :  { %v3534_v44 = vadd.f32 %v11434_v47, %v3306_v31  ;;  %11591 = vmatprep.mubr.msk.f32.mxu1 %vm2249_vm1, %v15722_v21  ;;  %v14345_v31 = vld [vmem:[#allocation2 + $0x121] sm:$0xff]  ;;  %v14399_v47 = vld [vmem:[#allocation2 + $0x72] sm:$0xff] }
 0x387   :  { %v3470_v33 = vpop.f32.mrf.mxu1 }
 0x388   :  { %v3533_v37 = vadd.f32 %v3470_v33, %v3305_v53 }
 0x389   :  { %v11437_v35 = vpop.f32.mrf.mxu1  ;;  %11592 = vmatmul.mubr.msk.f32.gmra.mxu1 %vm2249_vm1, %v15723_v45  ;;  %v4916_v45 = vld [vmem:[#allocation2 + $0xe2] sm:$0xff] }
 0x38a   :  { %v14327_v20 = vadd.f32 %v11437_v35, %v3308_v4  ;;  %11594 = vmatprep.mubr.msk.f32.mxu1 %vm2249_vm1, %v15724_v5  ;;  %v14353_v4 = vld [vmem:[#allocation2 + $0x131] sm:$0xff] }
 0x38b   :  { %v3480_v17 = vpop.f32.mrf.mxu1  ;;  %v14411_v35 = vld [vmem:[#allocation2 + $0x92] sm:$0xff] }
 0x38c   :  { %v14331_v32 = vadd.f32 %v3480_v17, %v3307_v26 }
 0x38d   :  { %v11440_v12 = vpop.f32.mrf.mxu1  ;;  %11595 = vmatmul.mubr.msk.f32.gmra.mxu1 %vm2249_vm1, %v15725_v3 }
 0x38e   :  { %v14335_v61 = vadd.f32 %v11440_v12, %v3310_v16  ;;  %11597 = vmatprep.mubr.msk.f32.mxu1 %vm2249_vm1, %v15726_v55  ;;  %v4917_v12 = vld [vmem:[#allocation2 + $0xf2] sm:$0xff] }
 0x38f   :  { %v3490_v14 = vpop.f32.mrf.mxu1 }
 0x390   :  { %v14339_v54 = vadd.f32 %v3490_v14, %v3309_v63  ;;  %v14363_v63 = vld [vmem:[#allocation2 + $0x151] sm:$0xff] }
 0x391   :  { %v11443_v43 = vpop.f32.mrf.mxu1  ;;  %11598 = vmatmul.mubr.msk.f32.gmra.mxu1 %vm2249_vm1, %v14341_v25 }
 0x392   :  { %v14347_v51 = vadd.f32 %v11443_v43, %v3312_v46  ;;  %11600 = vmatprep.mubr.msk.f32.mxu1 %vm2249_vm1, %v14345_v31  ;;  %v4908_v46 = vld [vmem:[#allocation2 + $0x22] sm:$0xff]  ;;  %v14433_v43 = vld [vmem:[#allocation2 + $0x112] sm:$0xff] }
 0x393   :  { %v3500_v53 = vpop.f32.mrf.mxu1 }
 0x394   :  { %v14351_v18 = vadd.f32 %v3500_v53, %v3311_v29  ;;  %v14437_v53 = vld [vmem:[#allocation2 + $0x122] sm:$0xff] }
 0x395   :  { %v11446_v15 = vpop.f32.mrf.mxu1  ;;  %11601 = vmatmul.mubr.msk.f32.gmra.mxu1 %vm2249_vm1, %v14353_v4 }
 0x396   :  { %v14357_v26 = vadd.f32 %v11446_v15, %v3314_v60  ;;  %11603 = vmatprep.mubr.msk.f32.mxu1 %vm2249_vm1, %v15727_v7  ;;  %v4909_v60 = vld [vmem:[#allocation2 + $0x32] sm:$0xff] }
 0x397   :  { %v3510_v16 = vpop.f32.mrf.mxu1 }
 0x398   :  { %v14361_v8 = vadd.f32 %v3510_v16, %v3313_v30 }
 0x399   :  { %v11449_v11 = vpop.f32.mrf.mxu1  ;;  %11604 = vmatmul.mubr.msk.f32.gmra.mxu1 %vm2249_vm1, %v14363_v63 }
 0x39a   :  { %v14367_v34 = vadd.f32 %v11449_v11, %v3316_v6  ;;  %11608 = vmatprep.mubr.msk.f32.mxu1 %vm2249_vm1, %v4908_v46  ;;  %v14451_v11 = vld [vmem:[#allocation2 + $0x142] sm:$0xff] }
 0x39b   :  { %v3520_v29 = vpop.f32.mrf.mxu1 }
 0x39c   :  { %v14370_v57 = vadd.f32 %v3520_v29, %v3315_v1 }
 0x39d   :  { %v11454_v30 = vpop.f32.mrf.mxu1  ;;  %11609 = vmatmul.mubr.msk.f32.vlgmr.msra.gmra.mxu1 %vm2249_vm1, %v4909_v60 }
 0x39e   :  { %v14380_v19 = vadd.f32 %v11454_v30, %v3530_v39  ;;  %11659 = vmatpush3.msra.mxu1 %v10058_v52  ;;  %11611 = vmatprep.mubr.msk.f32.mxu1 %vm2249_vm1, %v14378_v22  ;;  %v5362_v30 = vld [vmem:[#allocation2 + $0x24] sm:$0xff] }
 0x39f   :  { %v3677_v6 = vpop.f32.mrf.mxu1  ;;  %11710 = vmatprep.subr.mxu1 %v14375_v41 }
 0x3a0   :  { %v14385_v1 = vadd.f32 %v3677_v6, %v3529_v62 }
 0x3a1   :  { %v11457_v24 = vpop.f32.mrf.mxu1  ;;  %11612 = vmatmul.mubr.msk.f32.gmra.mxu1 %vm2249_vm1, %v14387_v27 }
 0x3a2   :  { %v14393_v9 = vadd.f32 %v11457_v24, %v3532_v28  ;;  %11614 = vmatprep.mubr.msk.f32.mxu1 %vm2249_vm1, %v14391_v38 }
 0x3a3   :  { %v3687_v52 = vpop.f32.mrf.mxu1 }
 0x3a4   :  { %v14397_v39 = vadd.f32 %v3687_v52, %v3531_v59  ;;  %v5363_v52 = vld [vmem:[#allocation2 + $0x34] sm:$0xff] }
 0x3a5   :  { %v11460_v62 = vpop.f32.mrf.mxu1  ;;  %11615 = vmatmul.mubr.msk.f32.gmra.mxu1 %vm2249_vm1, %v14399_v47 }
 0x3a6   :  { %v14405_v21 = vadd.f32 %v11460_v62, %v3534_v44  ;;  %11617 = vmatprep.mubr.msk.f32.mxu1 %vm2249_vm1, %v14403_v40 }
 0x3a7   :  { %v3697_v28 = vpop.f32.mrf.mxu1 }
 0x3a8   :  { %v14409_v33 = vadd.f32 %v3697_v28, %v3533_v37  ;;  %v14423_v37 = vld [vmem:[#allocation2 + $0x102] sm:$0xff] }
 0x3a9   :  { %v11463_v59 = vpop.f32.mrf.mxu1  ;;  %11618 = vmatmul.mubr.msk.f32.gmra.mxu1 %vm2249_vm1, %v14411_v35  ;;  %v14478_v28 = vld [vmem:[#allocation2 + $0x44] sm:$0xff] }
 0x3aa   :  { %v14416_v5 = vadd.f32 %v11463_v59, %v14327_v20  ;;  %11620 = vmatprep.mubr.msk.f32.mxu1 %vm2249_vm1, %v4916_v45  ;;  %v14490_v45 = vld [vmem:[#allocation2 + $0x54] sm:$0xff] }
 0x3ab   :  { %v3707_v44 = vpop.f32.mrf.mxu1 }
 0x3ac   :  { %v14420_v17 = vadd.f32 %v3707_v44, %v14331_v32 }
 0x3ad   :  { %v11466_v3 = vpop.f32.mrf.mxu1  ;;  %11621 = vmatmul.mubr.msk.f32.gmra.mxu1 %vm2249_vm1, %v4917_v12  ;;  %v14494_v12 = vld [vmem:[#allocation2 + $0x64] sm:$0xff] }
 0x3ae   :  { %v14426_v55 = vadd.f32 %v11466_v3, %v14335_v61  ;;  %11623 = vmatprep.mubr.msk.f32.mxu1 %vm2249_vm1, %v14423_v37 }
 0x3af   :  { %v3717_v20 = vpop.f32.mrf.mxu1 }
 0x3b0   :  { %v14431_v14 = vadd.f32 %v3717_v20, %v14339_v54  ;;  %v14447_v54 = vld [vmem:[#allocation2 + $0x132] sm:$0xff]  ;;  %v14506_v20 = vpop.f32.mrf.mxu0 }
 0x3b1   :  { %v11469_v32 = vpop.f32.mrf.mxu1  ;;  %11624 = vmatmul.mubr.msk.f32.gmra.mxu1 %vm2249_vm1, %v14433_v43  ;;  %15728 = vst [vmem:[#allocation7_spill] sm:$0xff] %v14506_v20  ;;  %v5817_v20 = vld [vmem:[#allocation2 + $0x31] sm:$0xff] }
 0x3b2   :  { %v14440_v15 = vadd.f32 %v11469_v32, %v14347_v51  ;;  %11626 = vmatprep.mubr.msk.f32.mxu1 %vm2249_vm1, %v14437_v53 }
 0x3b3   :  { %v3727_v61 = vpop.f32.mrf.mxu1 }
 0x3b4   :  { %v14445_v7 = vadd.f32 %v3727_v61, %v14351_v18  ;;  %v14461_v18 = vld [vmem:[#allocation2 + $0x152] sm:$0xff]  ;;  %v14510_v61 = vld [vmem:[#allocation2 + $0x84] sm:$0xff] }
 0x3b5   :  { %v11472_v16 = vpop.f32.mrf.mxu1  ;;  %11627 = vmatmul.mubr.msk.f32.gmra.mxu1 %vm2249_vm1, %v14447_v54 }
 0x3b6   :  { %v14454_v46 = vadd.f32 %v11472_v16, %v14357_v26  ;;  %11629 = vmatprep.mubr.msk.f32.mxu1 %vm2249_vm1, %v14451_v11 }
 0x3b7   :  { %v3737_v51 = vpop.f32.mrf.mxu1 }
 0x3b8   :  { %v14459_v29 = vadd.f32 %v3737_v51, %v14361_v8  ;;  %v14475_v8 = vld [vmem:[%s15653_s2 + $0x90] sm:$0xff] }
 0x3b9   :  { %v11475_v60 = vpop.f32.mrf.mxu1  ;;  %11630 = vmatmul.mubr.msk.f32.gmra.mxu1 %vm2249_vm1, %v14461_v18  ;;  %v14520_v51 = vld [vmem:[#allocation2 + $0x94] sm:$0xff] }
 0x3ba   :  { %v14466_v6 = vadd.f32 %v11475_v60, %v14367_v34  ;;  %11660 = vmatprep.mubr.msk.f32.mxu1 %vm2249_vm1, %v5362_v30  ;;  %v14522_v60 = vpop.f32.mrf.mxu0 }
 0x3bb   :  { %v3747_v26 = vpop.f32.mrf.mxu1  ;;  %15729 = vst [vmem:[#allocation8_spill] sm:$0xff] %v14522_v60 }
 0x3bc   :  { %v14470_v24 = vadd.f32 %v3747_v26, %v14370_v57  ;;  %v5370_v26 = vld [vmem:[#allocation2 + $0xe4] sm:$0xff] }
 0x3bd   :  { %v11480_v62 = vpop.f32.mrf.mxu1  ;;  %11661 = vmatmul.mubr.msk.f32.vlgmr.msra.gmra.mxu1 %vm2249_vm1, %v5363_v52 }
 0x3be   :  { %v14481_v34 = vadd.f32 %v11480_v62, %v14380_v19  ;;  %11711 = vmatpush3.msra.mxu1 %v14375_v41  ;;  %11663 = vmatprep.mubr.msk.f32.mxu1 %vm2249_vm1, %v14478_v28 }
 0x3bf   :  { %v3904_v57 = vpop.f32.mrf.mxu1  ;;  %11762 = vmatprep.subr.mxu1 %v14475_v8 }
 0x3c0   :  { %v14488_v59 = vadd.f32 %v3904_v57, %v14385_v1  ;;  %v14504_v1 = vld [vmem:[#allocation2 + $0x74] sm:$0xff]  ;;  %v14533_v57 = vpop.f32.mrf.mxu0 }
 0x3c1   :  { %v11483_v44 = vpop.f32.mrf.mxu1  ;;  %11664 = vmatmul.mubr.msk.f32.gmra.mxu1 %vm2249_vm1, %v14490_v45  ;;  %15730 = vst [vmem:[#allocation10_spill] sm:$0xff] %v14533_v57  ;;  %v14568_v57 = vld [vmem:[#allocation2 + $0x144] sm:$0xff] }
 0x3c2   :  { %v14497_v19 = vadd.f32 %v11483_v44, %v14393_v9  ;;  %11666 = vmatprep.mubr.msk.f32.mxu1 %vm2249_vm1, %v14494_v12  ;;  %15735 = vst [vmem:[#allocation12_spill] sm:$0xff] %v14568_v57 }
 0x3c3   :  { %v3914_v41 = vpop.f32.mrf.mxu1 }
 0x3c4   :  { %v14502_v3 = vadd.f32 %v3914_v41, %v14397_v39  ;;  %v14536_v41 = vld [vmem:[#allocation2 + $0x104] sm:$0xff] }
 0x3c5   :  { %v11486_v32 = vpop.f32.mrf.mxu1  ;;  %11667 = vmatmul.mubr.msk.f32.gmra.mxu1 %vm2249_vm1, %v14504_v1 }
 0x3c6   :  { %v14513_v9 = vadd.f32 %v11486_v32, %v14405_v21  ;;  %11669 = vmatprep.mubr.msk.f32.mxu1 %vm2249_vm1, %v14510_v61 }
 0x3c7   :  { %v3924_v16 = vpop.f32.mrf.mxu1 }
 0x3c8   :  { %v14518_v39 = vadd.f32 %v3924_v16, %v14409_v33  ;;  %v5371_v33 = vld [vmem:[#allocation2 + $0xf4] sm:$0xff] }
 0x3c9   :  { %v11489_v30 = vpop.f32.mrf.mxu1  ;;  %11670 = vmatmul.mubr.msk.f32.gmra.mxu1 %vm2249_vm1, %v14520_v51 }
 0x3ca   :  { %v14527_v52 = vadd.f32 %v11489_v30, %v14416_v5  ;;  %11672 = vmatprep.mubr.msk.f32.mxu1 %vm2249_vm1, %v5370_v26  ;;  %v14548_v30 = vpop.f32.mrf.mxu0 }
 0x3cb   :  { %v3934_v21 = vpop.f32.mrf.mxu1  ;;  %15731 = vst [vmem:[#allocation9_spill] sm:$0xff] %v14548_v30 }
 0x3cc   :  { %v14531_v62 = vadd.f32 %v3934_v21, %v14420_v17  ;;  %v14546_v17 = vld [vmem:[#allocation2 + $0x114] sm:$0xff]  ;;  %v14552_v21 = vld [vmem:[#allocation2 + $0x124] sm:$0xff] }
 0x3cd   :  { %v11492_v44 = vpop.f32.mrf.mxu1  ;;  %11673 = vmatmul.mubr.msk.f32.gmra.mxu1 %vm2249_vm1, %v5371_v33  ;;  %15732 = vst [vmem:[#allocation13_spill] sm:$0xff] %v14552_v21 }
 0x3ce   :  { %v14539_v32 = vadd.f32 %v11492_v44, %v14426_v55  ;;  %11675 = vmatprep.mubr.msk.f32.mxu1 %vm2249_vm1, %v14536_v41  ;;  %v14562_v44 = vld [vmem:[#allocation2 + $0x134] sm:$0xff] }
 0x3cf   :  { %v3944_v5 = vpop.f32.mrf.mxu1  ;;  %15733 = vst [vmem:[#allocation14_spill] sm:$0xff] %v14562_v44 }
 0x3d0   :  { %v14544_v16 = vadd.f32 %v3944_v5, %v14431_v14  ;;  %v14564_v5 = vpop.f32.mrf.mxu0 }
 0x3d1   :  { %v11495_v26 = vpop.f32.mrf.mxu1  ;;  %11676 = vmatmul.mubr.msk.f32.gmra.mxu1 %vm2249_vm1, %v14546_v17  ;;  %15734 = vst [vmem:[#allocation11_spill] sm:$0xff] %v14564_v5 }
 0x3d2   :  { %v14555_v55 = vadd.f32 %v11495_v26, %v14440_v15  ;;  %11678 = vmatprep.mubr.msk.f32.mxu1 %vm2249_vm1, %v14552_v21  ;;  %v14580_v60 = vpop.f32.mrf.mxu0 }
 0x3d3   :  { %v3954_v33 = vpop.f32.mrf.mxu1  ;;  %15737 = vst [vmem:[#allocation16_spill] sm:$0xff] %v14580_v60 }
 0x3d4   :  { %v14560_v14 = vadd.f32 %v3954_v33, %v14445_v7  ;;  %v14578_v33 = vld [vmem:[#allocation2 + $0x154] sm:$0xff]  ;;  %v14596_v60 = vpop.f32.mrf.mxu0 }
 0x3d5   :  { %v11498_v30 = vpop.f32.mrf.mxu1  ;;  %11679 = vmatmul.mubr.msk.f32.gmra.mxu1 %vm2249_vm1, %v14562_v44  ;;  %15736 = vst [vmem:[#allocation15_spill] sm:$0xff] %v14578_v33  ;;  %15738 = vst [vmem:[#allocation17_spill] sm:$0xff] %v14596_v60 }
 0x3d6   :  { %v14571_v15 = vadd.f32 %v11498_v30, %v14454_v46  ;;  %11681 = vmatprep.mubr.msk.f32.mxu1 %vm2249_vm1, %v14568_v57 }
 0x3d7   :  { %v3964_v26 = vpop.f32.mrf.mxu1 }
 0x3d8   :  { %v14576_v7 = vadd.f32 %v3964_v26, %v14459_v29  ;;  %v5818_v29 = vld [vmem:[#allocation2 + $0x41] sm:$0xff] }
 0x3d9   :  { %v11501_v5 = vpop.f32.mrf.mxu1  ;;  %11682 = vmatmul.mubr.msk.f32.gmra.mxu1 %vm2249_vm1, %v14578_v33  ;;  %v14594_v26 = vld [vmem:[%s15653_s2 + $0xa0] sm:$0xff]  ;;  %v5819_v33 = vld [vmem:[#allocation2 + $0x51] sm:$0xff] }
 0x3da   :  { %v14585_v44 = vadd.f32 %v11501_v5, %v14466_v6  ;;  %11712 = vmatprep.mubr.msk.f32.mxu1 %vm2249_vm1, %v5817_v20  ;;  %v5820_v5 = vld [vmem:[#allocation2 + $0x61] sm:$0xff] }
 0x3db   :  { %v3974_v46 = vpop.f32.mrf.mxu1 }
 0x3dc   :  { %v14589_v30 = vadd.f32 %v3974_v46, %v14470_v24  ;;  %v14608_v46 = vpop.f32.mrf.mxu0 }
 0x3dd   :  { %v11506_v57 = vpop.f32.mrf.mxu1  ;;  %11713 = vmatmul.mubr.msk.f32.vlgmr.msra.gmra.mxu1 %vm2249_vm1, %v5818_v29  ;;  %15739 = vst [vmem:[#allocation19_spill] sm:$0xff] %v14608_v46  ;;  %v5821_v29 = vld [vmem:[#allocation2 + $0x71] sm:$0xff] }
 0x3de   :  { %v14600_v6 = vadd.f32 %v11506_v57, %v14481_v34  ;;  %11763 = vmatpush3.msra.mxu1 %v14475_v8  ;;  %11715 = vmatprep.mubr.msk.f32.mxu1 %vm2249_vm1, %v5819_v33  ;;  %v14615_v8 = vpop.f32.mrf.mxu0  ;;  %v5823_v46 = vld [vmem:[#allocation2 + $0x91] sm:$0xff] }
 0x3df   :  { %v4131_v24 = vpop.f32.mrf.mxu1  ;;  %11814 = vmatprep.subr.mxu1 %v14594_v26  ;;  %15740 = vst [vmem:[#allocation20_spill] sm:$0xff] %v14615_v8 }
 0x3e0   :  { %v14606_v20 = vadd.f32 %v4131_v24, %v14488_v59  ;;  %v5822_v59 = vld [vmem:[#allocation2 + $0x81] sm:$0xff] }
 0x3e1   :  { %v11509_v60 = vpop.f32.mrf.mxu1  ;;  %11716 = vmatmul.mubr.msk.f32.gmra.mxu1 %vm2249_vm1, %v5820_v5 }
 0x3e2   :  { %v14612_v34 = vadd.f32 %v11509_v60, %v14497_v19  ;;  %11718 = vmatprep.mubr.msk.f32.mxu1 %vm2249_vm1, %v5821_v29  ;;  %v14625_v19 = vpop.f32.mrf.mxu0  ;;  %v5824_v29 = vld [vmem:[#allocation2 + $0xa1] sm:$0xff] }
 0x3e3   :  { %v4141_v57 = vpop.f32.mrf.mxu1  ;;  %15741 = vst [vmem:[#allocation21_spill] sm:$0xff] %v14625_v19 }
 0x3e4   :  { %v14618_v33 = vadd.f32 %v4141_v57, %v14502_v3  ;;  %v14630_v8 = vpop.f32.mrf.mxu0  ;;  %v5825_v57 = vld [vmem:[#allocation2 + $0xf1] sm:$0xff] }
 0x3e5   :  { %v11512_v24 = vpop.f32.mrf.mxu1  ;;  %11719 = vmatmul.mubr.msk.f32.gmra.mxu1 %vm2249_vm1, %v5822_v59 }
 0x3e6   :  { %v14622_v21 = vadd.f32 %v11512_v24, %v14513_v9  ;;  %11721 = vmatprep.mubr.msk.f32.mxu1 %vm2249_vm1, %v5823_v46  ;;  %v5826_v24 = vld [vmem:[#allocation2 + $0x101] sm:$0xff]  ;;  %v14640_v19 = vpop.f32.mrf.mxu0 }
 0x3e7   :  { %v4151_v60 = vpop.f32.mrf.mxu1 }
 0x3e8   :  { %v14628_v5 = vadd.f32 %v4151_v60, %v14518_v39 }
 0x3e9   :  { %v11515_v3 = vpop.f32.mrf.mxu1  ;;  %11722 = vmatmul.mubr.msk.f32.gmra.mxu1 %vm2249_vm1, %v5824_v29 }
 0x3ea   :  { %v14634_v59 = vadd.f32 %v11515_v3, %v14527_v52  ;;  %11724 = vmatprep.mubr.msk.f32.mxu1 %vm2249_vm1, %v5825_v57  ;;  %v14648_v52 = vpop.f32.mrf.mxu0 }
 0x3eb   :  { %v4161_v9 = vpop.f32.mrf.mxu1 }
 0x3ec   :  { %v14638_v46 = vadd.f32 %v4161_v9, %v14531_v62 }
 0x3ed   :  { %v11518_v39 = vpop.f32.mrf.mxu1  ;;  %11725 = vmatmul.mubr.msk.f32.gmra.mxu1 %vm2249_vm1, %v5826_v24  ;;  %v5830_v24 = vld [vmem:[#allocation2 + $0x141] sm:$0xff] }
 0x3ee   :  { %v14644_v60 = vadd.f32 %v11518_v39, %v14539_v32  ;;  %11727 = vmatprep.mubr.msk.f32.mxu1 %vm2249_vm1, %v14341_v25  ;;  %v14660_v32 = vpop.f32.mrf.mxu0 }
 0x3ef   :  { %v4171_v29 = vpop.f32.mrf.mxu1 }
 0x3f0   :  { %v14651_v3 = vadd.f32 %v4171_v29, %v14544_v16  ;;  %v14665_v39 = vpop.f32.mrf.mxu0  ;;  %v5832_v29 = vld [vmem:[#allocation2 + $0x161] sm:$0xff] }
 0x3f1   :  { %v11521_v62 = vpop.f32.mrf.mxu1  ;;  %11728 = vmatmul.mubr.msk.f32.gmra.mxu1 %vm2249_vm1, %v14345_v31  ;;  %15742 = vst [vmem:[#allocation18_spill] sm:$0xff] %v14665_v39 }
 0x3f2   :  { %v14656_v57 = vadd.f32 %v11521_v62, %v14555_v55  ;;  %11730 = vmatprep.mubr.msk.f32.mxu1 %vm2249_vm1, %v14353_v4  ;;  %v14676_v62 = vpop.f32.mrf.mxu0 }
 0x3f3   :  { %v4181_v9 = vpop.f32.mrf.mxu1  ;;  %15743 = vst [vmem:[#allocation22_spill] sm:$0xff] %v14676_v62 }
 0x3f4   :  { %v14663_v25 = vadd.f32 %v4181_v9, %v14560_v14  ;;  %v6271_v9 = vld [vmem:[#allocation2 + $0x33] sm:$0xff] }
 0x3f5   :  { %v11524_v16 = vpop.f32.mrf.mxu1  ;;  %11731 = vmatmul.mubr.msk.f32.gmra.mxu1 %vm2249_vm1, %v5830_v24 }
 0x3f6   :  { %v14669_v31 = vadd.f32 %v11524_v16, %v14571_v15  ;;  %11733 = vmatprep.mubr.msk.f32.mxu1 %vm2249_vm1, %v14363_v63  ;;  %v6272_v63 = vld [vmem:[#allocation2 + $0x43] sm:$0xff]  ;;  %v14691_v16 = vpop.f32.mrf.mxu0 }
 0x3f7   :  { %v4191_v55 = vpop.f32.mrf.mxu1  ;;  %15744 = vst [vmem:[#allocation23_spill] sm:$0xff] %v14691_v16 }
 0x3f8   :  { %v14674_v4 = vadd.f32 %v4191_v55, %v14576_v7  ;;  %v14689_v7 = vld [vmem:[%s15653_s2 + $0xb0] sm:$0xff] }
 0x3f9   :  { %v11527_v14 = vpop.f32.mrf.mxu1  ;;  %11734 = vmatmul.mubr.msk.f32.gmra.mxu1 %vm2249_vm1, %v5832_v29  ;;  %v6273_v29 = vld [vmem:[#allocation2 + $0x53] sm:$0xff] }
 0x3fa   :  { %v14680_v39 = vadd.f32 %v11527_v14, %v14585_v44  ;;  %11764 = vmatprep.mubr.msk.f32.mxu1 %vm2249_vm1, %v6271_v9  ;;  %v6274_v9 = vld [vmem:[#allocation2 + $0x63] sm:$0xff] }
 0x3fb   :  { %v4201_v15 = vpop.f32.mrf.mxu1 }
 0x3fc   :  { %v14684_v24 = vadd.f32 %v4201_v15, %v14589_v30  ;;  %v14703_v15 = vpop.f32.mrf.mxu0 }
 0x3fd   :  { %v11532_v55 = vpop.f32.mrf.mxu1  ;;  %11765 = vmatmul.mubr.msk.f32.vlgmr.msra.gmra.mxu1 %vm2249_vm1, %v6272_v63  ;;  %15745 = vst [vmem:[#allocation24_spill] sm:$0xff] %v14703_v15  ;;  %v6275_v63 = vld [vmem:[#allocation2 + $0x73] sm:$0xff] }
 0x3fe   :  { %v14695_v44 = vadd.f32 %v11532_v55, %v14600_v6  ;;  %11815 = vmatpush3.msra.mxu1 %v14594_v26  ;;  %11767 = vmatprep.mubr.msk.f32.mxu1 %vm2249_vm1, %v6273_v29  ;;  %v6276_v29 = vld [vmem:[#allocation2 + $0x83] sm:$0xff]  ;;  %v14713_v62 = vpop.f32.mrf.mxu0 }
 0x3ff   :  { %v4358_v30 = vpop.f32.mrf.mxu1  ;;  %11866 = vmatprep.subr.mxu1 %v14689_v7  ;;  %15746 = vst [vmem:[#allocation25_spill] sm:$0xff] %v14713_v62 }
 0x400   :  { %v14701_v14 = vadd.f32 %v4358_v30, %v14606_v20  ;;  %v6277_v30 = vld [vmem:[#allocation2 + $0x93] sm:$0xff] }
 0x401   :  { %v11535_v16 = vpop.f32.mrf.mxu1  ;;  %11768 = vmatmul.mubr.msk.f32.gmra.mxu1 %vm2249_vm1, %v6274_v9  ;;  %v6278_v9 = vld [vmem:[#allocation2 + $0xa3] sm:$0xff] }
 0x402   :  { %v14707_v6 = vadd.f32 %v11535_v16, %v14612_v34  ;;  %11770 = vmatprep.mubr.msk.f32.mxu1 %vm2249_vm1, %v6275_v63  ;;  %v14723_v63 = vpop.f32.mrf.mxu0 }
 0x403   :  { %v4368_v26 = vpop.f32.mrf.mxu1  ;;  %15747 = vst [vmem:[#allocation26_spill] sm:$0xff] %v14723_v63 }
 0x404   :  { %v14711_v55 = vadd.f32 %v4368_v26, %v14618_v33  ;;  %v6279_v26 = vld [vmem:[#allocation2 + $0xf3] sm:$0xff] }
 0x405   :  { %v11538_v20 = vpop.f32.mrf.mxu1  ;;  %11771 = vmatmul.mubr.msk.f32.gmra.mxu1 %vm2249_vm1, %v6276_v29 }
 0x406   :  { %v14717_v15 = vadd.f32 %v11538_v20, %v14622_v21  ;;  %11773 = vmatprep.mubr.msk.f32.mxu1 %vm2249_vm1, %v6277_v30  ;;  %v6280_v20 = vld [vmem:[#allocation2 + $0x103] sm:$0xff]  ;;  %v14733_v30 = vpop.f32.mrf.mxu0 }
 0x407   :  { %v4378_v34 = vpop.f32.mrf.mxu1  ;;  %15748 = vst [vmem:[#allocation27_spill] sm:$0xff] %v14733_v30 }
 0x408   :  { %v14721_v16 = vadd.f32 %v4378_v34, %v14628_v5  ;;  %v6281_v34 = vld [vmem:[#allocation2 + $0x113] sm:$0xff] }
 0x409   :  { %v11541_v33 = vpop.f32.mrf.mxu1  ;;  %11774 = vmatmul.mubr.msk.f32.gmra.mxu1 %vm2249_vm1, %v6278_v9 }
 0x40a   :  { %v14727_v62 = vadd.f32 %v11541_v33, %v14634_v59  ;;  %11776 = vmatprep.mubr.msk.f32.mxu1 %vm2249_vm1, %v6279_v26  ;;  %v6282_v33 = vld [vmem:[#allocation2 + $0x123] sm:$0xff]  ;;  %v14743_v26 = vpop.f32.mrf.mxu0 }
 0x40b   :  { %v4388_v21 = vpop.f32.mrf.mxu1  ;;  %15749 = vst [vmem:[#allocation28_spill] sm:$0xff] %v14743_v26 }
 0x40c   :  { %v14731_v29 = vadd.f32 %v4388_v21, %v14638_v46  ;;  %v6283_v21 = vld [vmem:[#allocation2 + $0x133] sm:$0xff] }
 0x40d   :  { %v11544_v5 = vpop.f32.mrf.mxu1  ;;  %11777 = vmatmul.mubr.msk.f32.gmra.mxu1 %vm2249_vm1, %v6280_v20 }
 0x40e   :  { %v14737_v63 = vadd.f32 %v11544_v5, %v14644_v60  ;;  %11779 = vmatprep.mubr.msk.f32.mxu1 %vm2249_vm1, %v6281_v34  ;;  %v6284_v5 = vld [vmem:[#allocation2 + $0x143] sm:$0xff]  ;;  %v14753_v34 = vpop.f32.mrf.mxu0 }
 0x40f   :  { %v4398_v59 = vpop.f32.mrf.mxu1 }
 0x410   :  { %v14741_v9 = vadd.f32 %v4398_v59, %v14651_v3  ;;  %v6285_v59 = vld [vmem:[#allocation2 + $0x153] sm:$0xff] }
 0x411   :  { %v11547_v46 = vpop.f32.mrf.mxu1  ;;  %11780 = vmatmul.mubr.msk.f32.gmra.mxu1 %vm2249_vm1, %v6282_v33 }
 0x412   :  { %v14747_v30 = vadd.f32 %v11547_v46, %v14656_v57  ;;  %11782 = vmatprep.mubr.msk.f32.mxu1 %vm2249_vm1, %v6283_v21  ;;  %v6286_v46 = vld [vmem:[#allocation2 + $0x163] sm:$0xff]  ;;  %v14763_v21 = vpop.f32.mrf.mxu0 }
 0x413   :  { %v4408_v60 = vpop.f32.mrf.mxu1 }
 0x414   :  { %v14751_v20 = vadd.f32 %v4408_v60, %v14663_v25 }
 0x415   :  { %v11550_v3 = vpop.f32.mrf.mxu1  ;;  %11783 = vmatmul.mubr.msk.f32.gmra.mxu1 %vm2249_vm1, %v6284_v5 }
 0x416   :  { %v14757_v26 = vadd.f32 %v11550_v3, %v14669_v31  ;;  %11785 = vmatprep.mubr.msk.f32.mxu1 %vm2249_vm1, %v6285_v59  ;;  %v14779_v3 = vpop.f32.mrf.mxu0 }
 0x417   :  { %v4418_v57 = vpop.f32.mrf.mxu1 }
 0x418   :  { %v14761_v33 = vadd.f32 %v4418_v57, %v14674_v4  ;;  %v14777_v4 = vld [vmem:[%s15653_s2 + $0xc0] sm:$0xff]  ;;  %v14789_v57 = vpop.f32.mrf.mxu0 }
 0x419   :  { %v11553_v25 = vpop.f32.mrf.mxu1  ;;  %11786 = vmatmul.mubr.msk.f32.gmra.mxu1 %vm2249_vm1, %v6286_v46 }
 0x41a   :  { %v14767_v60 = vadd.f32 %v11553_v25, %v14680_v39  ;;  %11816 = vmatprep.mubr.msk.f32.mxu1 %vm2249_vm1, %v14250_v48 }
 0x41b   :  { %v4428_v31 = vpop.f32.mrf.mxu1 }
 0x41c   :  { %v14772_v5 = vadd.f32 %v4428_v31, %v14684_v24 }
 0x41d   :  { %v11558_v59 = vpop.f32.mrf.mxu1  ;;  %11817 = vmatmul.mubr.msk.f32.vlgmr.msra.gmra.mxu1 %vm2249_vm1, %v14255_v50 }
 0x41e   :  { %v4666_v39 = vadd.f32 %v11558_v59, %v14695_v44  ;;  %11867 = vmatpush3.msra.mxu1 %v14689_v7  ;;  %11819 = vmatprep.mubr.msk.f32.mxu1 %vm2249_vm1, %v14259_v10  ;;  %v14797_v10 = vpop.f32.mrf.mxu0  ;;  %v6733_v59 = vld [vmem:[#allocation2 + $0xb0] sm:$0xff] }
 0x41f   :  { %v4586_v48 = vpop.f32.mrf.mxu1  ;;  %11918 = vmatprep.subr.mxu1 %v14777_v4 }
 0x420   :  { %v4665_v24 = vadd.f32 %v4586_v48, %v14701_v14  ;;  %v6732_v14 = vld [vmem:[#allocation2 + $0xa0] sm:$0xff]  ;;  %v14804_v48 = vpop.f32.mrf.mxu0 }
 0x421   :  { %v11561_v46 = vpop.f32.mrf.mxu1  ;;  %11820 = vmatmul.mubr.msk.f32.gmra.mxu1 %vm2249_vm1, %v14263_v58 }
 0x422   :  { %v4668_v50 = vadd.f32 %v11561_v46, %v14707_v6  ;;  %11822 = vmatprep.mubr.msk.f32.mxu1 %vm2249_vm1, %v14267_v13 }
 0x423   :  { %v4596_v7 = vpop.f32.mrf.mxu1 }
 0x424   :  { %v4667_v44 = vadd.f32 %v4596_v7, %v14711_v55 }
 0x425   :  { %v11564_v25 = vpop.f32.mrf.mxu1  ;;  %11823 = vmatmul.mubr.msk.f32.gmra.mxu1 %vm2249_vm1, %v14271_v56 }
 0x426   :  { %v4670_v31 = vadd.f32 %v11564_v25, %v14717_v15  ;;  %11825 = vmatprep.mubr.msk.f32.mxu1 %vm2249_vm1, %v6732_v14  ;;  %v14811_v15 = vpop.f32.mrf.mxu0 }
 0x427   :  { %v4606_v58 = vpop.f32.mrf.mxu1 }
 0x428   :  { %v4669_v6 = vadd.f32 %v4606_v58, %v14721_v16  ;;  %v14819_v14 = vpop.f32.mrf.mxu0 }
 0x429   :  { %v11567_v13 = vpop.f32.mrf.mxu1  ;;  %11826 = vmatmul.mubr.msk.f32.gmra.mxu1 %vm2249_vm1, %v6733_v59 }
 0x42a   :  { %v4672_v55 = vadd.f32 %v11567_v13, %v14727_v62  ;;  %11828 = vmatprep.mubr.msk.f32.mxu1 %vm2249_vm1, %v14279_v42  ;;  %v14827_v58 = vpop.f32.mrf.mxu0  ;;  %v6741_v13 = vld [vmem:[#allocation2 + $0x170] sm:$0xff] }
 0x42b   :  { %v4616_v56 = vpop.f32.mrf.mxu1 }
 0x42c   :  { %v4671_v46 = vadd.f32 %v4616_v56, %v14731_v29  ;;  %v14834_v56 = vpop.f32.mrf.mxu0 }
 0x42d   :  { %v11570_v7 = vpop.f32.mrf.mxu1  ;;  %11829 = vmatmul.mubr.msk.f32.gmra.mxu1 %vm2249_vm1, %v14283_v23 }
 0x42e   :  { %v4674_v16 = vadd.f32 %v11570_v7, %v14737_v63  ;;  %11831 = vmatprep.mubr.msk.f32.mxu1 %vm2249_vm1, %v14287_v36 }
 0x42f   :  { %v4626_v25 = vpop.f32.mrf.mxu1 }
 0x430   :  { %v4673_v62 = vadd.f32 %v4626_v25, %v14741_v9  ;;  %v6740_v9 = vld [vmem:[#allocation2 + $0x160] sm:$0xff] }
 0x431   :  { %v11573_v42 = vpop.f32.mrf.mxu1  ;;  %11832 = vmatmul.mubr.msk.f32.gmra.mxu1 %vm2249_vm1, %v14291_v0 }
 0x432   :  { %v4676_v29 = vadd.f32 %v11573_v42, %v14747_v30  ;;  %11834 = vmatprep.mubr.msk.f32.mxu1 %vm2249_vm1, %v14295_v49 }
 0x433   :  { %v4636_v23 = vpop.f32.mrf.mxu1 }
 0x434   :  { %v4675_v63 = vadd.f32 %v4636_v23, %v14751_v20 }
 0x435   :  { %v11576_v36 = vpop.f32.mrf.mxu1  ;;  %11835 = vmatmul.mubr.msk.f32.gmra.mxu1 %vm2249_vm1, %v14301_v2 }
 0x436   :  { %v4678_v59 = vadd.f32 %v11576_v36, %v14757_v26  ;;  %11837 = vmatprep.mubr.msk.f32.mxu1 %vm2249_vm1, %v6740_v9  ;;  %v14841_v26 = vpop.f32.mrf.mxu0 }
 0x437   :  { %v4646_v0 = vpop.f32.mrf.mxu1 }
 0x438   :  { %v4677_v30 = vadd.f32 %v4646_v0, %v14761_v33  ;;  %v14850_v23 = vpop.f32.mrf.mxu0 }
 0x439   :  { %v11579_v49 = vpop.f32.mrf.mxu1  ;;  %11838 = vmatmul.mubr.msk.f32.gmra.mxu1 %vm2249_vm1, %v6741_v13 }
 0x43a   :  { %v4680_v20 = vadd.f32 %v11579_v49, %v14767_v60  ;;  %11868 = vmatprep.mubr.msk.f32.mxu1 %vm2249_vm1, %v14378_v22 }
 0x43b   :  { %v4656_v2 = vpop.f32.mrf.mxu1 }
 0x43c   :  { %v4679_v7 = vadd.f32 %v4656_v2, %v14772_v5 }
 0x43d   :  { %v11584_v25 = vpop.f32.mrf.mxu1  ;;  %11869 = vmatmul.mubr.msk.f32.vlgmr.msra.gmra.mxu1 %vm2249_vm1, %v14387_v27 }
 0x43e   :  { %v4893_v33 = vadd.f32 %v11584_v25, %v4666_v39  ;;  %11919 = vmatpush3.msra.mxu1 %v14777_v4  ;;  %11871 = vmatprep.mubr.msk.f32.mxu1 %vm2249_vm1, %v14391_v38  ;;  %v14858_v4 = vpop.f32.mrf.mxu0  ;;  %v7186_v38 = vld [vmem:[#allocation2 + $0xa2] sm:$0xff] }
 0x43f   :  { %v4813_v42 = vpop.f32.mrf.mxu1 }
 0x440   :  { %v14848_v60 = vadd.f32 %v4813_v42, %v4665_v24 }
 0x441   :  { %v11587_v22 = vpop.f32.mrf.mxu1  ;;  %11872 = vmatmul.mubr.msk.f32.gmra.mxu1 %vm2249_vm1, %v14399_v47  ;;  %v7187_v47 = vld [vmem:[#allocation2 + $0xb2] sm:$0xff] }
 0x442   :  { %v4895_v5 = vadd.f32 %v11587_v22, %v4668_v50  ;;  %11874 = vmatprep.mubr.msk.f32.mxu1 %vm2249_vm1, %v14403_v40  ;;  %v14865_v50 = vpop.f32.mrf.mxu0 }
 0x443   :  { %v4823_v27 = vpop.f32.mrf.mxu1 }
 0x444   :  { %v14856_v39 = vadd.f32 %v4823_v27, %v4667_v44 }
 0x445   :  { %v11590_v36 = vpop.f32.mrf.mxu1  ;;  %11875 = vmatmul.mubr.msk.f32.gmra.mxu1 %vm2249_vm1, %v14411_v35  ;;  %v14872_v35 = vpop.f32.mrf.mxu0 }
 0x446   :  { %v4897_v24 = vadd.f32 %v11590_v36, %v4670_v31  ;;  %11877 = vmatprep.mubr.msk.f32.mxu1 %vm2249_vm1, %v7186_v38 }
 0x447   :  { %v4833_v9 = vpop.f32.mrf.mxu1 }
 0x448   :  { %v14863_v0 = vadd.f32 %v4833_v9, %v4669_v6 }
 0x449   :  { %v11593_v40 = vpop.f32.mrf.mxu1  ;;  %11878 = vmatmul.mubr.msk.f32.gmra.mxu1 %vm2249_vm1, %v7187_v47 }
 0x44a   :  { %v4899_v44 = vadd.f32 %v11593_v40, %v4672_v55  ;;  %11880 = vmatprep.mubr.msk.f32.mxu1 %vm2249_vm1, %v14423_v37  ;;  %v14880_v55 = vpop.f32.mrf.mxu0 }
 0x44b   :  { %v4843_v13 = vpop.f32.mrf.mxu1 }
 0x44c   :  { %v14870_v49 = vadd.f32 %v4843_v13, %v4671_v46 }
 0x44d   :  { %v11596_v31 = vpop.f32.mrf.mxu1  ;;  %11881 = vmatmul.mubr.msk.f32.gmra.mxu1 %vm2249_vm1, %v14433_v43  ;;  %v14888_v43 = vpop.f32.mrf.mxu0 }
 0x44e   :  { %v4901_v6 = vadd.f32 %v11596_v31, %v4674_v16  ;;  %11883 = vmatprep.mubr.msk.f32.mxu1 %vm2249_vm1, %v14437_v53  ;;  %v7194_v53 = vld [vmem:[#allocation2 + $0x162] sm:$0xff] }
 0x44f   :  { %v4853_v2 = vpop.f32.mrf.mxu1 }
 0x450   :  { %v14878_v25 = vadd.f32 %v4853_v2, %v4673_v62  ;;  %v7641_v2 = vld [vmem:[#allocation2 + $0xb4] sm:$0xff] }
 0x451   :  { %v11599_v42 = vpop.f32.mrf.mxu1  ;;  %11884 = vmatmul.mubr.msk.f32.gmra.mxu1 %vm2249_vm1, %v14447_v54  ;;  %v7195_v54 = vld [vmem:[#allocation2 + $0x172] sm:$0xff] }
 0x452   :  { %v4903_v37 = vadd.f32 %v11599_v42, %v4676_v29  ;;  %11886 = vmatprep.mubr.msk.f32.mxu1 %vm2249_vm1, %v14451_v11  ;;  %v14893_v29 = vpop.f32.mrf.mxu0 }
 0x453   :  { %v4863_v46 = vpop.f32.mrf.mxu1 }
 0x454   :  { %v14886_v22 = vadd.f32 %v4863_v46, %v4675_v63  ;;  %v14898_v47 = vpop.f32.mrf.mxu0 }
 0x455   :  { %v11602_v16 = vpop.f32.mrf.mxu1  ;;  %11887 = vmatmul.mubr.msk.f32.gmra.mxu1 %vm2249_vm1, %v14461_v18 }
 0x456   :  { %v4905_v62 = vadd.f32 %v11602_v16, %v4678_v59  ;;  %11889 = vmatprep.mubr.msk.f32.mxu1 %vm2249_vm1, %v7194_v53  ;;  %v14904_v40 = vpop.f32.mrf.mxu0 }
 0x457   :  { %v4873_v27 = vpop.f32.mrf.mxu1 }
 0x458   :  { %v4904_v36 = vadd.f32 %v4873_v27, %v4677_v30 }
 0x459   :  { %v11605_v38 = vpop.f32.mrf.mxu1  ;;  %11890 = vmatmul.mubr.msk.f32.gmra.mxu1 %vm2249_vm1, %v7195_v54 }
 0x45a   :  { %v4907_v11 = vadd.f32 %v11605_v38, %v4680_v20  ;;  %11920 = vmatprep.mubr.msk.f32.mxu1 %vm2249_vm1, %v14478_v28  ;;  %v15755_v38 = vld [vmem:[#allocation14_spill] sm:$0xff] }
 0x45b   :  { %v4883_v63 = vpop.f32.mrf.mxu1 }
 0x45c   :  { %v4906_v9 = vadd.f32 %v4883_v63, %v4679_v7  ;;  %v14910_v7 = vpop.f32.mrf.mxu0 }
 0x45d   :  { %v11610_v18 = vpop.f32.mrf.mxu1  ;;  %11921 = vmatmul.mubr.msk.f32.vlgmr.msra.gmra.mxu1 %vm2249_vm1, %v14490_v45  ;;  %15750 = vst [vmem:[#allocation29_spill] sm:$0xff] %v14910_v7  ;;  %v7640_v45 = vld [vmem:[#allocation2 + $0xa4] sm:$0xff] }
 0x45e   :  { %v5120_v59 = vadd.f32 %v11610_v18, %v4893_v33  ;;  %11923 = vmatprep.mubr.msk.f32.mxu1 %vm2249_vm1, %v14494_v12  ;;  %v14915_v42 = vpop.f32.mrf.mxu0 }
 0x45f   :  { %v5040_v30 = vpop.f32.mrf.mxu1  ;;  %15751 = vst [vmem:[#allocation30_spill] sm:$0xff] %v14915_v42  ;;  %v15763_v42 = vld [vmem:[#allocation10_spill] sm:$0xff] }
 0x460   :  { %v14920_v46 = vpop.f32.mrf.mxu0 }
 0x461   :  { %v11613_v13 = vpop.f32.mrf.mxu1  ;;  %11924 = vmatmul.mubr.msk.f32.gmra.mxu1 %vm2249_vm1, %v14504_v1  ;;  %15752 = vst [vmem:[#allocation31_spill] sm:$0xff] %v14920_v46 }
 0x462   :  { %v5122_v28 = vadd.f32 %v11613_v13, %v4895_v5  ;;  %11926 = vmatprep.mubr.msk.f32.mxu1 %vm2249_vm1, %v14510_v61  ;;  %v14926_v27 = vpop.f32.mrf.mxu0 }
 0x463   :  { %v5050_v20 = vpop.f32.mrf.mxu1 }
 0x464   :  { %v14932_v18 = vpop.f32.mrf.mxu0  ;;  %v5349_v7 = vadd.f32 %v15763_v42, %v5122_v28 }
 0x465   :  { %v11616_v31 = vpop.f32.mrf.mxu1  ;;  %11927 = vmatmul.mubr.msk.f32.gmra.mxu1 %vm2249_vm1, %v14520_v51  ;;  %15757 = vst [vmem:[#allocation14_spill] sm:$0xff] %v14932_v18  ;;  %v15760_v18 = vld [vmem:[#allocation7_spill] sm:$0xff] }
 0x466   :  { %v5124_v12 = vadd.f32 %v11616_v31, %v4897_v24  ;;  %11929 = vmatprep.mubr.msk.f32.mxu1 %vm2249_vm1, %v7640_v45  ;;  %v15753_v24 = vld [vmem:[#allocation13_spill] sm:$0xff] }
 0x467   :  { %v5060_v33 = vpop.f32.mrf.mxu1  ;;  %15754 = vst [vmem:[#allocation13_spill] sm:$0xff] %v14926_v27  ;;  %v5347_v27 = vadd.f32 %v15760_v18, %v5120_v59 }
 0x469   :  { %v11619_v1 = vpop.f32.mrf.mxu1  ;;  %11930 = vmatmul.mubr.msk.f32.gmra.mxu1 %vm2249_vm1, %v7641_v2 }
 0x46a   :  { %v5126_v5 = vadd.f32 %v11619_v1, %v4899_v44  ;;  %11932 = vmatprep.mubr.msk.f32.mxu1 %vm2249_vm1, %v14536_v41  ;;  %v15756_v41 = vld [vmem:[#allocation12_spill] sm:$0xff]  ;;  %v7649_v1 = vld [vmem:[#allocation2 + $0x174] sm:$0xff] }
 0x46b   :  { %v5070_v61 = vpop.f32.mrf.mxu1 }
 0x46d   :  { %v11622_v16 = vpop.f32.mrf.mxu1  ;;  %11933 = vmatmul.mubr.msk.f32.gmra.mxu1 %vm2249_vm1, %v14546_v17  ;;  %v15758_v17 = vld [vmem:[#allocation15_spill] sm:$0xff] }
 0x46e   :  { %v5128_v51 = vadd.f32 %v11622_v16, %v4901_v6  ;;  %11935 = vmatprep.mubr.msk.f32.mxu1 %vm2249_vm1, %v15753_v24  ;;  %v7648_v6 = vld [vmem:[#allocation2 + $0x164] sm:$0xff]  ;;  %v14937_v16 = vpop.f32.mrf.mxu0  ;;  %v5119_v24 = vadd.f32 %v5040_v30, %v14848_v60  ;;  %v15764_v30 = vld [vmem:[#allocation9_spill] sm:$0xff] }
 0x46f   :  { %v5080_v53 = vpop.f32.mrf.mxu1  ;;  %15759 = vst [vmem:[#allocation12_spill] sm:$0xff] %v14937_v16 }
 0x471   :  { %v11625_v54 = vpop.f32.mrf.mxu1  ;;  %11936 = vmatmul.mubr.msk.f32.gmra.mxu1 %vm2249_vm1, %v15755_v38 }
 0x472   :  { %v5130_v44 = vadd.f32 %v11625_v54, %v4903_v37  ;;  %11938 = vmatprep.mubr.msk.f32.mxu1 %vm2249_vm1, %v15756_v41 }
 0x473   :  { %v5090_v63 = vpop.f32.mrf.mxu1 }
 0x475   :  { %v11628_v13 = vpop.f32.mrf.mxu1  ;;  %11939 = vmatmul.mubr.msk.f32.gmra.mxu1 %vm2249_vm1, %v15758_v17  ;;  %v14942_v17 = vpop.f32.mrf.mxu0 }
 0x476   :  { %v5132_v31 = vadd.f32 %v11628_v13, %v4905_v62  ;;  %11941 = vmatprep.mubr.msk.f32.mxu1 %vm2249_vm1, %v7648_v6  ;;  %15761 = vst [vmem:[#allocation15_spill] sm:$0xff] %v14942_v17  ;;  %v5121_v13 = vadd.f32 %v5050_v20, %v14856_v39 }
 0x477   :  { %v5100_v45 = vpop.f32.mrf.mxu1 }
 0x478   :  { %v5131_v2 = vadd.f32 %v5100_v45, %v4904_v36  ;;  %v15762_v36 = vld [vmem:[#allocation8_spill] sm:$0xff]  ;;  %v5348_v59 = vadd.f32 %v15764_v30, %v5121_v13 }
 0x479   :  { %v11631_v37 = vpop.f32.mrf.mxu1  ;;  %11942 = vmatmul.mubr.msk.f32.gmra.mxu1 %vm2249_vm1, %v7649_v1  ;;  %v5346_v45 = vadd.f32 %v15762_v36, %v5119_v24  ;;  %v14947_v1 = vpop.f32.mrf.mxu0  ;;  %v15766_v24 = vld [vmem:[#allocation16_spill] sm:$0xff]  ;;  %v15767_v36 = vld [vmem:[#allocation17_spill] sm:$0xff] }
 0x47a   :  { %v5134_v54 = vadd.f32 %v11631_v37, %v4907_v11  ;;  %v5123_v11 = vadd.f32 %v5060_v33, %v14863_v0  ;;  %v5127_v33 = vadd.f32 %v5080_v53, %v14878_v25 }
 0x47b   :  { %v5110_v38 = vpop.f32.mrf.mxu1  ;;  %v14952_v39 = vpop.f32.mrf.mxu0 }
 0x47c   :  { %v5133_v41 = vadd.f32 %v5110_v38, %v4906_v9  ;;  %v15765_v38 = vld [vmem:[#allocation11_spill] sm:$0xff]  ;;  %v5350_v28 = vadd.f32 %v15766_v24, %v5123_v11 }
 0x47d   :  { %v11662_v62 = vpop.f32.mrf.mxu1  ;;  %v5351_v17 = vadd.f32 %v15765_v38, %v5124_v12  ;;  %v14957_v0 = vpop.f32.mrf.mxu0 }
 0x47e   :  { %v5574_v6 = vadd.f32 %v11662_v62, %v5347_v27  ;;  %v5125_v27 = vadd.f32 %v5070_v61, %v14870_v49 }
 0x47f   :  { %v5494_v46 = vpop.f32.mrf.mxu1  ;;  %v14962_v49 = vpop.f32.mrf.mxu0 }
 0x480   :  { %v5573_v16 = vadd.f32 %v5494_v46, %v5346_v45  ;;  %v5353_v45 = vadd.f32 %v15767_v36, %v5126_v5 }
 0x481   :  { %v11665_v60 = vpop.f32.mrf.mxu1  ;;  %v14967_v25 = vpop.f32.mrf.mxu0 }
 0x482   :  { %v5576_v9 = vadd.f32 %v11665_v60, %v5349_v7  ;;  %v15768_v60 = vld [vmem:[#allocation19_spill] sm:$0xff] }
 0x483   :  { %v5504_v18 = vpop.f32.mrf.mxu1  ;;  %v5352_v12 = vadd.f32 %v15768_v60, %v5125_v27  ;;  %v14971_v60 = vpop.f32.mrf.mxu0 }
 0x484   :  { %v5575_v37 = vadd.f32 %v5504_v18, %v5348_v59  ;;  %v15769_v18 = vld [vmem:[#allocation20_spill] sm:$0xff] }
 0x485   :  { %v11668_v20 = vpop.f32.mrf.mxu1  ;;  %v5355_v38 = vadd.f32 %v15769_v18, %v5128_v51  ;;  %v15771_v18 = vld [vmem:[#allocation18_spill] sm:$0xff] }
 0x486   :  { %v5578_v46 = vadd.f32 %v11668_v20, %v5351_v17  ;;  %v5129_v17 = vadd.f32 %v5090_v63, %v14886_v22  ;;  %v15770_v20 = vld [vmem:[#allocation21_spill] sm:$0xff] }
 0x487   :  { %v5514_v42 = vpop.f32.mrf.mxu1  ;;  %v5354_v5 = vadd.f32 %v15770_v20, %v5127_v33  ;;  %v5358_v33 = vadd.f32 %v14660_v32, %v5131_v2  ;;  %v15772_v20 = vld [vmem:[#allocation22_spill] sm:$0xff] }
 0x488   :  { %v5577_v62 = vadd.f32 %v5514_v42, %v5350_v28  ;;  %v5357_v42 = vadd.f32 %v14630_v8, %v5130_v44  ;;  %v5356_v36 = vadd.f32 %v14640_v19, %v5129_v17  ;;  %v5361_v8 = vadd.f32 %v15771_v18, %v5134_v54  ;;  %v14975_v44 = vpop.f32.mrf.mxu0  ;;  %v15776_v18 = vld [vmem:[#allocation26_spill] sm:$0xff] }
 0x489   :  { %v11671_v7 = vpop.f32.mrf.mxu1  ;;  %v5360_v19 = vadd.f32 %v15772_v20, %v5133_v41  ;;  %v5803_v41 = vadd.f32 %v15776_v18, %v5575_v37 }
 0x48a   :  { %v5580_v13 = vadd.f32 %v11671_v7, %v5353_v45  ;;  %v5359_v7 = vadd.f32 %v14648_v52, %v5132_v31  ;;  %v14979_v31 = vpop.f32.mrf.mxu0 }
 0x48b   :  { %v5524_v30 = vpop.f32.mrf.mxu1 }
 0x48c   :  { %v5579_v59 = vadd.f32 %v5524_v30, %v5352_v12 }
 0x48d   :  { %v11674_v61 = vpop.f32.mrf.mxu1 }
 0x48e   :  { %v5582_v11 = vadd.f32 %v11674_v61, %v5355_v38 }
 0x48f   :  { %v5534_v24 = vpop.f32.mrf.mxu1 }
 0x490   :  { %v5581_v28 = vadd.f32 %v5534_v24, %v5354_v5  ;;  %v15773_v24 = vld [vmem:[#allocation23_spill] sm:$0xff] }
 0x491   :  { %v11677_v53 = vpop.f32.mrf.mxu1  ;;  %v5802_v52 = vadd.f32 %v15773_v24, %v5574_v6  ;;  %v15777_v6 = vld [vmem:[#allocation27_spill] sm:$0xff] }
 0x492   :  { %v5584_v27 = vadd.f32 %v11677_v53, %v5357_v42  ;;  %v5806_v20 = vadd.f32 %v15777_v6, %v5578_v46 }
 0x493   :  { %v5544_v45 = vpop.f32.mrf.mxu1 }
 0x494   :  { %v5583_v51 = vadd.f32 %v5544_v45, %v5356_v36  ;;  %v15774_v36 = vld [vmem:[#allocation24_spill] sm:$0xff]  ;;  %v5812_v6 = vadd.f32 %v14797_v10, %v5584_v27 }
 0x495   :  { %v11680_v22 = vpop.f32.mrf.mxu1  ;;  %v5801_v32 = vadd.f32 %v15774_v36, %v5573_v16  ;;  %v15778_v16 = vld [vmem:[#allocation28_spill] sm:$0xff]  ;;  %v5808_v36 = vadd.f32 %v14753_v34, %v5580_v13  ;;  %v10247_v34 = vld [vmem:[%s15654_s3 + $0x18] sm:$0xff] }
 0x496   :  { %v5586_v63 = vadd.f32 %v11680_v22, %v5359_v7  ;;  %v15775_v7 = vld [vmem:[#allocation25_spill] sm:$0xff]  ;;  %v14983_v22 = vpop.f32.mrf.mxu0 }
 0x497   :  { %v5554_v12 = vpop.f32.mrf.mxu1  ;;  %v5804_v54 = vadd.f32 %v15775_v7, %v5576_v9  ;;  %v5807_v7 = vadd.f32 %v14763_v21, %v5579_v59  ;;  %v5809_v21 = vadd.f32 %v14789_v57, %v5581_v28 }
 0x498   :  { %v5585_v30 = vadd.f32 %v5554_v12, %v5358_v33 }
 0x499   :  { %v11683_v38 = vpop.f32.mrf.mxu1 }
 0x49a   :  { %v5588_v61 = vadd.f32 %v11683_v38, %v5361_v8 }
 0x49b   :  { %v5564_v17 = vpop.f32.mrf.mxu1 }
 0x49c   :  { %v5587_v5 = vadd.f32 %v5564_v17, %v5360_v19  ;;  %v14989_v19 = vpop.f32.mrf.mxu0 }
 0x49d   :  { %v11714_v42 = vpop.f32.mrf.mxu1 }
 0x49e   :  { %v6029_v53 = vadd.f32 %v11714_v42, %v5802_v52  ;;  %v5805_v52 = vadd.f32 %v15778_v16, %v5577_v62  ;;  %v5810_v62 = vadd.f32 %v14779_v3, %v5582_v11 }
 0x49f   :  { %v5949_v2 = vpop.f32.mrf.mxu1 }
 0x4a0   :  { %v6028_v45 = vadd.f32 %v5949_v2, %v5801_v32  ;;  %v14997_v32 = vpop.f32.mrf.mxu0 }
 0x4a1   :  { %v11717_v33 = vpop.f32.mrf.mxu1  ;;  %15779 = vst [vmem:[#allocation7_spill] sm:$0xff] %v14997_v32 }
 0x4a2   :  { %v6031_v12 = vadd.f32 %v11717_v33, %v5804_v54  ;;  %v15680_v54 = vmov 0.0   ;;  %v15010_v13 = vpop.f32.mrf.mxu0 }
 0x4a3   :  { %v5959_v8 = vpop.f32.mrf.mxu1  ;;  %11944 = vmatprep.subr.mxu0 %v15680_v54  ;;  %11993 = vmatprep.subr.mxu1 %v15680_v54  ;;  %15780 = vst [vmem:[#allocation8_spill] sm:$0xff] %v15010_v13 }
 0x4a4   :  { %v14986_v38 = vadd.f32 %v5959_v8, %v5803_v41  ;;  %11945 = vmatpush3.msra.mxu0 %v10247_v34  ;;  %v15019_v3 = vpop.f32.mrf.mxu0  ;;  %v6256_v34 = vadd.f32 %v14841_v26, %v6029_v53  ;;  %11948 = vmatprep.mubr.msk.f32.mxu0 %vm12153_vm2, %v15680_v54 }
 0x4a5   :  { %v11720_v17 = vpop.f32.mrf.mxu1  ;;  %11946 = vmatprep.subr.mxu0 %v15680_v54  ;;  %15781 = vst [vmem:[#allocation10_spill] sm:$0xff] %v15019_v3  ;;  %11997 = vmatprep.mubr.msk.f32.mxu1 %vm12153_vm2, %v15680_v54 }
 0x4a6   :  { %v14991_v24 = vadd.f32 %v11720_v17, %v5806_v20  ;;  %v5811_v17 = vadd.f32 %v14804_v48, %v5583_v51  ;;  %v15027_v57 = vpop.f32.mrf.mxu0 }
 0x4a7   :  { %v5969_v42 = vpop.f32.mrf.mxu1  ;;  %15782 = vst [vmem:[#allocation9_spill] sm:$0xff] %v15027_v57 }
 0x4a8   :  { %v14994_v9 = vadd.f32 %v5969_v42, %v5805_v52  ;;  %v5814_v42 = vadd.f32 %v14811_v15, %v5586_v63 }
 0x4a9   :  { %v11723_v37 = vpop.f32.mrf.mxu1 }
 0x4aa   :  { %v14999_v2 = vadd.f32 %v11723_v37, %v5808_v36  ;;  %v5813_v37 = vadd.f32 %v14819_v14, %v5585_v30  ;;  %v10246_v14 = vld [vmem:[%s15654_s3 + $0x10] sm:$0xff] }
 0x4ab   :  { %v5979_v46 = vpop.f32.mrf.mxu1  ;;  %11947 = vmatpush3.msra.mxu0 %v10246_v14 }
 0x4ac   :  { %v15004_v33 = vadd.f32 %v5979_v46, %v5807_v7  ;;  %v5816_v7 = vadd.f32 %v14827_v58, %v5588_v61  ;;  %v15035_v46 = vpop.f32.mrf.mxu0  ;;  %v6255_v61 = vadd.f32 %v14850_v23, %v6028_v45  ;;  %11951 = vmatprep.subr.mxu0 %v15680_v54 }
 0x4ad   :  { %v11726_v18 = vpop.f32.mrf.mxu1  ;;  %15783 = vst [vmem:[#allocation11_spill] sm:$0xff] %v15035_v46 }
 0x4ae   :  { %v15012_v41 = vadd.f32 %v11726_v18, %v5810_v62  ;;  %v5815_v62 = vadd.f32 %v14834_v56, %v5587_v5  ;;  %v15046_v30 = vpop.f32.mrf.mxu0 }
 0x4af   :  { %v5989_v59 = vpop.f32.mrf.mxu1 }
 0x4b0   :  { %v15016_v8 = vadd.f32 %v5989_v59, %v5809_v21  ;;  %v6258_v21 = vadd.f32 %v14858_v4, %v6031_v12  ;;  %v15055_v26 = vpop.f32.mrf.mxu0  ;;  %v6260_v4 = vadd.f32 %v14872_v35, %v14991_v24 }
 0x4b1   :  { %v11729_v11 = vpop.f32.mrf.mxu1 }
 0x4b2   :  { %v15021_v20 = vadd.f32 %v11729_v11, %v5812_v6  ;;  %v6257_v6 = vadd.f32 %v14865_v50, %v14986_v38  ;;  %v10266_v11 = vld [vmem:[%s15654_s3 + $0x78] sm:$0xff]  ;;  %v15073_v50 = vpop.f32.mrf.mxu0 }
 0x4b3   :  { %v5999_v16 = vpop.f32.mrf.mxu1  ;;  %11994 = vmatpush3.msra.mxu1 %v10266_v11 }
 0x4b4   :  { %v15024_v52 = vadd.f32 %v5999_v16, %v5811_v17  ;;  %11995 = vmatprep.subr.mxu1 %v15680_v54  ;;  %v6259_v17 = vadd.f32 %v14880_v55, %v14994_v9  ;;  %v15083_v35 = vpop.f32.mrf.mxu0 }
 0x4b5   :  { %v11732_v28 = vpop.f32.mrf.mxu1 }
 0x4b6   :  { %v15029_v36 = vadd.f32 %v11732_v28, %v5814_v42  ;;  %v6262_v28 = vadd.f32 %v14888_v43, %v14999_v2  ;;  %v6264_v43 = vadd.f32 %v14898_v47, %v15012_v41  ;;  %v15097_v2 = vpop.f32.mrf.mxu0  ;;  %v15785_v47 = vld [vmem:[#allocation30_spill] sm:$0xff] }
 0x4b7   :  { %v6009_v10 = vpop.f32.mrf.mxu1  ;;  %v6265_v41 = vadd.f32 %v15785_v47, %v15024_v52 }
 0x4b8   :  { %v15032_v27 = vadd.f32 %v6009_v10, %v5813_v37  ;;  %v10265_v37 = vld [vmem:[%s15654_s3 + $0x70] sm:$0xff] }
 0x4b9   :  { %v11735_v48 = vpop.f32.mrf.mxu1  ;;  %11996 = vmatpush3.msra.mxu1 %v10265_v37 }
 0x4ba   :  { %v15037_v51 = vadd.f32 %v11735_v48, %v5816_v7  ;;  %v6261_v7 = vadd.f32 %v14893_v29, %v15004_v33  ;;  %12007 = vmatprep.subr.mxu1 %v15680_v54  ;;  %v15784_v29 = vld [vmem:[#allocation29_spill] sm:$0xff] }
 0x4bb   :  { %v6019_v15 = vpop.f32.mrf.mxu1  ;;  %v6266_v33 = vadd.f32 %v15784_v29, %v15021_v20  ;;  %v15789_v20 = vld [vmem:[#allocation13_spill] sm:$0xff] }
 0x4bc   :  { %v15040_v63 = vadd.f32 %v6019_v15, %v5815_v62  ;;  %v6263_v15 = vadd.f32 %v14904_v40, %v15016_v8 }
 0x4bd   :  { %v11766_v18 = vpop.f32.mrf.mxu1 }
 0x4be   :  { %v15048_v58 = vadd.f32 %v11766_v18, %v6256_v34  ;;  %v15107_v18 = vpop.f32.mrf.mxu0 }
 0x4bf   :  { %v6403_v56 = vpop.f32.mrf.mxu1 }
 0x4c0   :  { %v15052_v5 = vadd.f32 %v6403_v56, %v6255_v61  ;;  %v15117_v8 = vpop.f32.mrf.mxu0 }
 0x4c1   :  { %v11769_v53 = vpop.f32.mrf.mxu1 }
 0x4c2   :  { %v15057_v59 = vadd.f32 %v11769_v53, %v6258_v21 }
 0x4c3   :  { %v6413_v23 = vpop.f32.mrf.mxu1 }
 0x4c4   :  { %v15066_v45 = vadd.f32 %v6413_v23, %v6257_v6  ;;  %v15787_v6 = vld [vmem:[#allocation31_spill] sm:$0xff]  ;;  %v6712_v32 = vadd.f32 %v14952_v39, %v15057_v59 }
 0x4c5   :  { %v11772_v12 = vpop.f32.mrf.mxu1  ;;  %v6268_v40 = vadd.f32 %v15787_v6, %v15029_v36  ;;  %v15793_v36 = vld [vmem:[#allocation12_spill] sm:$0xff] }
 0x4c6   :  { %v15075_v38 = vadd.f32 %v11772_v12, %v6260_v4  ;;  %v6267_v4 = vadd.f32 %v15789_v20, %v15032_v27 }
 0x4c7   :  { %v6423_v16 = vpop.f32.mrf.mxu1 }
 0x4c8   :  { %v15079_v42 = vadd.f32 %v6423_v16, %v6259_v17  ;;  %v15791_v16 = vld [vmem:[#allocation14_spill] sm:$0xff] }
 0x4c9   :  { %v11775_v24 = vpop.f32.mrf.mxu1  ;;  %v6270_v52 = vadd.f32 %v15791_v16, %v15037_v51 }
 0x4ca   :  { %v15088_v10 = vadd.f32 %v11775_v24, %v6262_v28  ;;  %v15127_v28 = vpop.f32.mrf.mxu0 }
 0x4cb   :  { %v6433_v55 = vpop.f32.mrf.mxu1 }
 0x4cc   :  { %v15093_v9 = vadd.f32 %v6433_v55, %v6261_v7  ;;  %v6269_v7 = vadd.f32 %v15793_v36, %v15040_v63 }
 0x4cd   :  { %v11778_v48 = vpop.f32.mrf.mxu1 }
 0x4ce   :  { %v15099_v62 = vadd.f32 %v11778_v48, %v6264_v43  ;;  %v15135_v48 = vpop.f32.mrf.mxu0 }
 0x4cf   :  { %v6443_v34 = vpop.f32.mrf.mxu1  ;;  %15795 = vst [vmem:[#allocation18_spill] sm:$0xff] %v15135_v48 }
 0x4d0   :  { %v15103_v14 = vadd.f32 %v6443_v34, %v6263_v15  ;;  %v15137_v34 = vpop.f32.mrf.mxu0 }
 0x4d1   :  { %v11781_v61 = vpop.f32.mrf.mxu1  ;;  %15796 = vst [vmem:[#allocation22_spill] sm:$0xff] %v15137_v34 }
 0x4d2   :  { %v15109_v56 = vadd.f32 %v11781_v61, %v6266_v33  ;;  %v15139_v51 = vpop.f32.mrf.mxu0 }
 0x4d3   :  { %v6453_v21 = vpop.f32.mrf.mxu1  ;;  %15797 = vst [vmem:[#allocation23_spill] sm:$0xff] %v15139_v51 }
 0x4d4   :  { %v15113_v53 = vadd.f32 %v6453_v21, %v6265_v41  ;;  %v15141_v41 = vpop.f32.mrf.mxu0 }
 0x4d5   :  { %v11784_v11 = vpop.f32.mrf.mxu1  ;;  %15798 = vst [vmem:[#allocation24_spill] sm:$0xff] %v15141_v41 }
 0x4d6   :  { %15786 = vst [vmem:[#allocation16_spill] sm:$0xff] %v15113_v53  ;;  %v15119_v23 = vadd.f32 %v11784_v11, %v6268_v40  ;;  %v15145_v63 = vpop.f32.mrf.mxu0 }
 0x4d7   :  { %v6463_v12 = vpop.f32.mrf.mxu1  ;;  %15799 = vst [vmem:[#allocation25_spill] sm:$0xff] %v15145_v63 }
 0x4d8   :  { %15788 = vst [vmem:[#allocation17_spill] sm:$0xff] %v15119_v23  ;;  %v15123_v17 = vadd.f32 %v6463_v12, %v6267_v4  ;;  %v15151_v20 = vpop.f32.mrf.mxu0 }
 0x4d9   :  { %v11787_v24 = vpop.f32.mrf.mxu1  ;;  %15800 = vst [vmem:[#allocation26_spill] sm:$0xff] %v15151_v20 }
 0x4da   :  { %15790 = vst [vmem:[#allocation19_spill] sm:$0xff] %v15123_v17  ;;  %v15129_v37 = vadd.f32 %v11787_v24, %v6270_v52  ;;  %v15157_v16 = vpop.f32.mrf.mxu0 }
 0x4db   :  { %v6473_v55 = vpop.f32.mrf.mxu1  ;;  %15802 = vst [vmem:[#allocation28_spill] sm:$0xff] %v15157_v16 }
 0x4dc   :  { %15792 = vst [vmem:[#allocation20_spill] sm:$0xff] %v15129_v37  ;;  %v15133_v43 = vadd.f32 %v6473_v55, %v6269_v7  ;;  %v15163_v36 = vpop.f32.mrf.mxu0 }
 0x4dd   :  { %v11818_v27 = vpop.f32.mrf.mxu1  ;;  %15805 = vst [vmem:[#allocation31_spill] sm:$0xff] %v15163_v36 }
 0x4de   :  { %15794 = vst [vmem:[#allocation21_spill] sm:$0xff] %v15133_v43  ;;  %v11896_v54 = vpop.f32.mrf.mxu0 }
 0x4df   :  { %v6858_v15 = vpop.f32.mrf.mxu1 }
 0x4e0   :  { %v7539_v20 = vpop.f32.mrf.mxu0 }
 0x4e1   :  { %v11821_v29 = vpop.f32.mrf.mxu1 }
 0x4e2   :  { %v11899_v57 = vpop.f32.mrf.mxu0  ;;  %v6940_v53 = vadd.f32 %v11821_v29, %v6712_v32  ;;  %v6713_v32 = vadd.f32 %v14967_v25, %v15079_v42  ;;  %v6715_v25 = vadd.f32 %v14975_v44, %v15093_v9 }
 0x4e3   :  { %v6868_v33 = vpop.f32.mrf.mxu1 }
 0x4e4   :  { %v7549_v16 = vpop.f32.mrf.mxu0 }
 0x4e5   :  { %v11824_v61 = vpop.f32.mrf.mxu1 }
 0x4e7   :  { %v6878_v47 = vpop.f32.mrf.mxu1 }
 0x4e9   :  { %v11827_v21 = vpop.f32.mrf.mxu1 }
 0x4eb   :  { %v15143_v6 = vpop.f32.mrf.mxu1 }
 0x4ed   :  { %v15147_v40 = vpop.f32.mrf.mxu1 }
 0x4ef   :  { %v15149_v11 = vpop.f32.mrf.mxu1 }
 0x4f1   :  { %v15153_v4 = vpop.f32.mrf.mxu1 }
 0x4f3   :  { %v15155_v12 = vpop.f32.mrf.mxu1 }
 0x4f4   :  { %15801 = vst [vmem:[#allocation27_spill] sm:$0xff] %v15155_v12  ;;  %v6709_v12 = vadd.f32 %v14947_v1, %v15052_v5 }
 0x4f5   :  { %v15159_v52 = vpop.f32.mrf.mxu1 }
 0x4f6   :  { %15803 = vst [vmem:[#allocation29_spill] sm:$0xff] %v15159_v52 }
 0x4f7   :  { %v15161_v24 = vpop.f32.mrf.mxu1 }
 0x4f8   :  { %15804 = vst [vmem:[#allocation30_spill] sm:$0xff] %v15161_v24  ;;  %v15173_v24 = vpop.f32.mrf.mxu0 }
 0x4f9   :  { %v15165_v7 = vpop.f32.mrf.mxu1 }
 0x4fa   :  { %15806 = vst [vmem:[#allocation13_spill] sm:$0xff] %v15165_v7  ;;  %v15181_v34 = vpop.f32.mrf.mxu0 }
 0x4fb   :  { %v15167_v55 = vpop.f32.mrf.mxu1 }
 0x4fc   :  { %15807 = vst [vmem:[#allocation14_spill] sm:$0xff] %v15167_v55  ;;  %v15811_v55 = vld [vmem:[#allocation15_spill] sm:$0xff] }
 0x4fd   :  { %v11870_v63 = vpop.f32.mrf.mxu1  ;;  %v6710_v52 = vadd.f32 %v15811_v55, %v15048_v58  ;;  %v6711_v58 = vadd.f32 %v14957_v0, %v15066_v45  ;;  %v6941_v45 = vadd.f32 %v6878_v47, %v6713_v32  ;;  %v15814_v32 = vld [vmem:[#allocation18_spill] sm:$0xff] }
 0x4ff   :  { %v7312_v46 = vpop.f32.mrf.mxu1  ;;  %v6938_v23 = vadd.f32 %v11818_v27, %v6710_v52  ;;  %v6714_v27 = vadd.f32 %v14962_v49, %v15075_v38  ;;  %v6939_v5 = vadd.f32 %v6868_v33, %v6711_v58  ;;  %v6716_v49 = vadd.f32 %v14971_v60, %v15088_v10 }
 0x500   :  { %v7168_v47 = vadd.f32 %v15107_v18, %v6941_v45 }
 0x501   :  { %v11873_v43 = vpop.f32.mrf.mxu1  ;;  %v7165_v55 = vadd.f32 %v15046_v30, %v6938_v23  ;;  %v6942_v59 = vadd.f32 %v11824_v61, %v6714_v27  ;;  %v7167_v30 = vadd.f32 %v15073_v50, %v6940_v53  ;;  %v6944_v61 = vadd.f32 %v11827_v21, %v6716_v49  ;;  %v15223_v50 = vld [vmem:[%s15657_s6 + $0x1] ss:$0 sm:$0xff]  ;;  %v15816_v49 = vld [vmem:[#allocation27_spill] sm:$0xff] }
 0x503   :  { %v7322_v41 = vpop.f32.mrf.mxu1  ;;  %v7394_v23 = vadd.f32 %v11873_v43, %v7167_v30 }
 0x505   :  { %v11876_v37 = vpop.f32.mrf.mxu1  ;;  %v7621_v21 = vadd.f32 %v11899_v57, %v7394_v23  ;;  %v6720_v57 = vadd.f32 %v14989_v19, %v15109_v56 }
 0x507   :  { %v7332_v51 = vpop.f32.mrf.mxu1 }
 0x509   :  { %v15169_v3 = vpop.f32.mrf.mxu1 }
 0x50b   :  { %v15171_v17 = vpop.f32.mrf.mxu1 }
 0x50c   :  { %15808 = vst [vmem:[#allocation12_spill] sm:$0xff] %v15171_v17  ;;  %v6937_v17 = vadd.f32 %v6858_v15, %v6709_v12  ;;  %v7392_v15 = vadd.f32 %v11870_v63, %v7165_v55 }
 0x50d   :  { %v15175_v36 = vpop.f32.mrf.mxu1 }
 0x50e   :  { %15809 = vst [vmem:[#allocation32_spill] sm:$0xff] %v15175_v36  ;;  %v15191_v36 = vpop.f32.mrf.mxu0  ;;  %v7164_v12 = vadd.f32 %v15055_v26, %v6937_v17  ;;  %v7166_v26 = vadd.f32 %v15083_v35, %v6939_v5  ;;  %v7619_v17 = vadd.f32 %v11896_v54, %v7392_v15  ;;  %v6943_v35 = vadd.f32 %v15143_v6, %v6715_v25 }
 0x50f   :  { %v15177_v7 = vpop.f32.mrf.mxu1  ;;  %v6718_v54 = vadd.f32 %v14979_v31, %v15099_v62  ;;  %v7171_v6 = vadd.f32 %v15117_v8, %v6944_v61 }
 0x510   :  { %15810 = vst [vmem:[#allocation33_spill] sm:$0xff] %v15177_v7  ;;  %v15203_v39 = vpop.f32.mrf.mxu0  ;;  %v7391_v0 = vadd.f32 %v7312_v46, %v7164_v12  ;;  %v7169_v46 = vadd.f32 %v15097_v2, %v6942_v59  ;;  %v7393_v60 = vadd.f32 %v7322_v41, %v7166_v26  ;;  %v6717_v41 = vadd.f32 %v14983_v22, %v15103_v14  ;;  %v15812_v12 = vld [vmem:[#allocation16_spill] sm:$0xff]  ;;  %v15817_v26 = vld [vmem:[#allocation17_spill] sm:$0xff] }
 0x511   :  { %v15183_v13 = vpop.f32.mrf.mxu1  ;;  %v6946_v52 = vadd.f32 %v15147_v40, %v6718_v54  ;;  %v7170_v27 = vadd.f32 %v15127_v28, %v6943_v35  ;;  %v7398_v22 = vadd.f32 %v15169_v3, %v7171_v6 }
 0x512   :  { %v15215_v33 = vpop.f32.mrf.mxu0  ;;  %v7618_v53 = vadd.f32 %v7539_v20, %v7391_v0  ;;  %v7396_v43 = vadd.f32 %v11876_v37, %v7169_v46  ;;  %v7395_v20 = vadd.f32 %v7332_v51, %v7168_v47  ;;  %v7620_v37 = vadd.f32 %v7549_v16, %v7393_v60  ;;  %v15820_v46 = vld [vmem:[#allocation22_spill] sm:$0xff] }
 0x513   :  { %v15187_v48 = vpop.f32.mrf.mxu1  ;;  %v6945_v55 = vadd.f32 %v15149_v11, %v6717_v41  ;;  %v6948_v16 = vadd.f32 %v15153_v4, %v6720_v57  ;;  %v15813_v11 = vld [vmem:[#allocation7_spill] sm:$0xff]  ;;  %v7173_v19 = vadd.f32 %v15814_v32, %v6946_v52  ;;  %v15815_v0 = vld [vmem:[#allocation12_spill] sm:$0xff]  ;;  %v7625_v35 = vadd.f32 %v15191_v36, %v7398_v22  ;;  %v15828_v57 = vld [vmem:[#allocation9_spill] sm:$0xff] }
 0x514   :  { %v15230_v63 = vpop.f32.mrf.mxu0  ;;  %v7623_v5 = vadd.f32 %v15173_v24, %v7396_v43  ;;  %v6719_v59 = vadd.f32 %v15813_v11, %v15812_v12  ;;  %v7622_v28 = vadd.f32 %v15181_v34, %v7395_v20  ;;  %v7397_v24 = vadd.f32 %v15815_v0, %v7170_v27  ;;  %v15821_v43 = vld [vmem:[#allocation29_spill] sm:$0xff]  ;;  %v15825_v41 = vld [vmem:[#allocation23_spill] sm:$0xff] }
 0x515   :  { %v15193_v7 = vpop.f32.mrf.mxu1  ;;  %v15819_v61 = vld [vmem:[#allocation32_spill] sm:$0xff]  ;;  %v7175_v20 = vadd.f32 %v15825_v41, %v6948_v16  ;;  %v15831_v32 = vld [vmem:[#allocation21_spill] sm:$0xff] }
 0x516   :  { %v11911_v15 = vpop.f32.mrf.mxu0  ;;  %v6947_v23 = vadd.f32 %v15816_v49, %v6719_v59  ;;  %v7400_v25 = vadd.f32 %v15819_v61, %v7173_v19  ;;  %v15830_v59 = vld [vmem:[#allocation13_spill] sm:$0xff]  ;;  %v15832_v19 = vld [vmem:[#allocation11_spill] sm:$0xff]  ;;  %v15834_v49 = vld [vmem:[#allocation14_spill] sm:$0xff] }
 0x517   :  { %v15200_v1 = vpop.f32.mrf.mxu1 }
 0x518   :  { %v7589_v54 = vpop.f32.mrf.mxu0 }
 0x519   :  { %v15207_v29 = vpop.f32.mrf.mxu1 }
 0x51a   :  { %v11914_v11 = vpop.f32.mrf.mxu0 }
 0x51b   :  { %v15212_v38 = vpop.f32.mrf.mxu1 }
 0x51d   :  { %v11922_v42 = vpop.f32.mrf.mxu1 }
 0x51e   :  { %v7846_v10 = vadd.f32 %v11922_v42, %v7619_v17  ;;  %v15818_v17 = vld [vmem:[#allocation8_spill] sm:$0xff]  ;;  %v7172_v42 = vadd.f32 %v15820_v46, %v6945_v55 }
 0x51f   :  { %v7766_v44 = vpop.f32.mrf.mxu1  ;;  %v6722_v4 = vadd.f32 %v15818_v17, %v15817_v26  ;;  %v15827_v55 = vld [vmem:[#allocation20_spill] sm:$0xff]  ;;  %v15835_v17 = vld [vmem:[#allocation26_spill] sm:$0xff] }
 0x520   :  { %v7867_v9 = vadd.f32 %v15223_v50, %v7846_v10  ;;  %v7845_v2 = vadd.f32 %v7766_v44, %v7618_v53  ;;  %v15822_v44 = vld [vmem:[#allocation19_spill] sm:$0xff]  ;;  %v6724_v27 = vadd.f32 %v15828_v57, %v15827_v55 }
 0x521   :  { %v11925_v58 = vpop.f32.mrf.mxu1  ;;  %v6950_v47 = vadd.f32 %v15821_v43, %v6722_v4 }
 0x522   :  { %v7883_v31 = vmax.f32 %v7867_v9, 0.0  ;;  %v7866_v62 = vadd.f32 %v15223_v50, %v7845_v2  ;;  %v7848_v18 = vadd.f32 %v11925_v58, %v7621_v21  ;;  %v15823_v9 = vld [vmem:[#allocation10_spill] sm:$0xff]  ;;  %v15824_v21 = vld [vmem:[#allocation33_spill] sm:$0xff] }
 0x523   :  { %v7776_v40 = vpop.f32.mrf.mxu1  ;;  %v6721_v2 = vadd.f32 %v15823_v9, %v15822_v44  ;;  %v7399_v52 = vadd.f32 %v15824_v21, %v7172_v42  ;;  %v15837_v44 = vld [vmem:[#allocation31_spill] sm:$0xff] }
 0x524   :  { %7899 = vst [vmem:[#allocation3 + $0x8] sm:$0xff] %v7883_v31  ;;  %v7882_v14 = vmax.f32 %v7866_v62, 0.0  ;;  %v7869_v8 = vadd.f32 %v15223_v50, %v7848_v18  ;;  %v7847_v51 = vadd.f32 %v7776_v40, %v7620_v37  ;;  %v7624_v18 = vadd.f32 %v15203_v39, %v7397_v24  ;;  %v15826_v37 = vld [vmem:[#allocation30_spill] sm:$0xff]  ;;  %v15829_v40 = vld [vmem:[#allocation24_spill] sm:$0xff] }
 0x525   :  { %v11928_v56 = vpop.f32.mrf.mxu1  ;;  %v6949_v36 = vadd.f32 %v15826_v37, %v6721_v2  ;;  %v6952_v39 = vadd.f32 %v15830_v59, %v6724_v27 }
 0x526   :  { %7898 = vst [vmem:[#allocation3] sm:$0xff] %v7882_v14  ;;  %v7885_v3 = vmax.f32 %v7869_v8, 0.0  ;;  %v7868_v30 = vadd.f32 %v15223_v50, %v7847_v51  ;;  %v7850_v45 = vadd.f32 %v11928_v56, %v7623_v5  ;;  %v7174_v5 = vadd.f32 %v15829_v40, %v6947_v23 }
 0x527   :  { %v7786_v60 = vpop.f32.mrf.mxu1  ;;  %v7627_v14 = vadd.f32 %v15215_v33, %v7400_v25  ;;  %v7402_v8 = vadd.f32 %v15183_v13, %v7175_v20  ;;  %v6723_v56 = vadd.f32 %v15832_v19, %v15831_v32  ;;  %v7176_v4 = vadd.f32 %v15835_v17, %v6949_v36 }
 0x528   :  { %7901 = vst [vmem:[#allocation3 + $0x18] sm:$0xff] %v7885_v3  ;;  %v7884_v10 = vmax.f32 %v7868_v30, 0.0  ;;  %v7871_v34 = vadd.f32 %v15223_v50, %v7850_v45  ;;  %v7849_v53 = vadd.f32 %v7786_v60, %v7622_v28  ;;  %v15833_v28 = vld [vmem:[#allocation25_spill] sm:$0xff]  ;;  %v7626_v3 = vadd.f32 %v15230_v63, %v7399_v52  ;;  %v7599_v60 = vpop.f32.mrf.mxu0 }
 0x529   :  { %v11931_v6 = vpop.f32.mrf.mxu1  ;;  %v7177_v0 = vadd.f32 %v15833_v28, %v6950_v47  ;;  %v7401_v33 = vadd.f32 %v15187_v48, %v7174_v5  ;;  %v6951_v23 = vadd.f32 %v15834_v49, %v6723_v56  ;;  %v7629_v63 = vadd.f32 %v11911_v15, %v7402_v8 }
 0x52a   :  { %7900 = vst [vmem:[#allocation3 + $0x10] sm:$0xff] %v7884_v10  ;;  %v7887_v58 = vmax.f32 %v7871_v34, 0.0  ;;  %v7870_v31 = vadd.f32 %v15223_v50, %v7849_v53  ;;  %v7852_v62 = vadd.f32 %v11931_v6, %v7625_v35  ;;  %v7403_v48 = vadd.f32 %v15200_v1, %v7176_v4  ;;  %v15836_v10 = vld [vmem:[#allocation28_spill] sm:$0xff]  ;;  %v11917_v20 = vpop.f32.mrf.mxu0 }
 0x52b   :  { %v7796_v22 = vpop.f32.mrf.mxu1  ;;  %v7404_v26 = vadd.f32 %v15193_v7, %v7177_v0  ;;  %v7179_v34 = vadd.f32 %v15836_v10, %v6952_v39  ;;  %v7628_v47 = vadd.f32 %v7589_v54, %v7401_v33  ;;  %v7178_v9 = vadd.f32 %v15837_v44, %v6951_v23  ;;  %v7937_v59 = vld [vmem:[#allocation3 + $0xb] sm:$0x1] }
 0x52c   :  { %7903 = vst [vmem:[#allocation3 + $0x28] sm:$0xff] %v7887_v58  ;;  %v7886_v51 = vmax.f32 %v7870_v31, 0.0  ;;  %v7873_v16 = vadd.f32 %v15223_v50, %v7852_v62  ;;  %v7851_v12 = vadd.f32 %v7796_v22, %v7624_v18  ;;  %v7630_v58 = vadd.f32 %v7599_v60, %v7403_v48  ;;  %v7609_v27 = vpop.f32.mrf.mxu0 }
 0x52d   :  { %v11934_v24 = vpop.f32.mrf.mxu1  ;;  %v7631_v21 = vadd.f32 %v11914_v11, %v7404_v26  ;;  %v7406_v52 = vadd.f32 %v15207_v29, %v7179_v34  ;;  %v7405_v31 = vadd.f32 %v15212_v38, %v7178_v9  ;;  %v7931_v8 = vld [vmem:[#allocation3 + $0x2] sm:$0x1]  ;;  %v15294_v28 = vld [vmem:[#allocation3] sm:$0x1]  ;;  %v15296_v0 = vld [vmem:[#allocation3 + $0x1] sm:$0x1] }
 0x52e   :  { %7902 = vst [vmem:[#allocation3 + $0x20] sm:$0xff] %v7886_v51  ;;  %v7889_v13 = vmax.f32 %v7873_v16, 0.0  ;;  %v7872_v30 = vadd.f32 %v15223_v50, %v7851_v12  ;;  %v7854_v45 = vadd.f32 %v11934_v24, %v7627_v14  ;;  %v7933_v51 = vld [vmem:[#allocation3 + $0x3] sm:$0x1]  ;;  %v7935_v16 = vld [vmem:[#allocation3 + $0xa] sm:$0x1] }
 0x52f   :  { %v7806_v61 = vpop.f32.mrf.mxu1  ;;  %v7633_v57 = vadd.f32 %v11917_v20, %v7406_v52  ;;  %v7632_v38 = vadd.f32 %v7609_v27, %v7405_v31  ;;  %v7939_v49 = vmax.f32 %v7931_v8, %v7933_v51  ;;  %v7941_v48 = vmax.f32 %v7935_v16, %v7937_v59  ;;  %v8580_v44 = vld [vmem:[#allocation3 + $0x1f] sm:$0x1]  ;;  %v8106_v51 = vld [vmem:[#allocation3 + $0xc] sm:$0x1]  ;;  %v8108_v16 = vld [vmem:[#allocation3 + $0xd] sm:$0x1] }
 0x530   :  { %7905 = vst [vmem:[#allocation3 + $0x38] sm:$0xff] %v7889_v13  ;;  %v7888_v25 = vmax.f32 %v7872_v30, 0.0  ;;  %v7875_v46 = vadd.f32 %v15223_v50, %v7854_v45  ;;  %v7853_v42 = vadd.f32 %v7806_v61, %v7626_v3 }
 0x531   :  { %v11937_v53 = vpop.f32.mrf.mxu1  ;;  %v15298_v33 = vld [vmem:[#allocation3 + $0x16] sm:$0x1]  ;;  %v8576_v13 = vld [vmem:[#allocation3 + $0x17] sm:$0x1] }
 0x532   :  { %7904 = vst [vmem:[#allocation3 + $0x30] sm:$0xff] %v7888_v25  ;;  %v7891_v35 = vmax.f32 %v7875_v46, 0.0  ;;  %v7874_v43 = vadd.f32 %v15223_v50, %v7853_v42  ;;  %v7856_v7 = vadd.f32 %v11937_v53, %v7629_v63  ;;  %v7919_v46 = vld [vmem:[#allocation3 + $0x8] sm:$0x1]  ;;  %v7921_v42 = vld [vmem:[#allocation3 + $0x9] sm:$0x1] }
 0x533   :  { %v7816_v2 = vpop.f32.mrf.mxu1  ;;  %v8578_v63 = vld [vmem:[#allocation3 + $0x1e] sm:$0x1] }
 0x534   :  { %7907 = vst [vmem:[#allocation3 + $0x48] sm:$0xff] %v7891_v35  ;;  %v7890_v15 = vmax.f32 %v7874_v43, 0.0  ;;  %v7877_v41 = vadd.f32 %v15223_v50, %v7856_v7  ;;  %v7855_v1 = vadd.f32 %v7816_v2, %v7628_v47  ;;  %v7923_v2 = vmax.f32 %v15294_v28, %v15296_v0 }
 0x535   :  { %v11940_v6 = vpop.f32.mrf.mxu1 }
 0x536   :  { %7906 = vst [vmem:[#allocation3 + $0x40] sm:$0xff] %v7890_v15  ;;  %v7893_v62 = vmax.f32 %v7877_v41, 0.0  ;;  %v7876_v54 = vadd.f32 %v15223_v50, %v7855_v1  ;;  %v7858_v18 = vadd.f32 %v11940_v6, %v7631_v21  ;;  %v8582_v41 = vmax.f32 %v15298_v33, %v8576_v13  ;;  %v7930_v6 = vld [vmem:[%s15654_s3 + $0x8] sm:$0xff] }
 0x537   :  { %v7826_v37 = vpop.f32.mrf.mxu1 }
 0x538   :  { %7909 = vst [vmem:[#allocation3 + $0x58] sm:$0xff] %v7893_v62  ;;  %v7892_v36 = vmax.f32 %v7876_v54, 0.0  ;;  %v7879_v29 = vadd.f32 %v15223_v50, %v7858_v18  ;;  %v7857_v55 = vadd.f32 %v7826_v37, %v7630_v58  ;;  %v15307_v62 = vld [vmem:[#allocation3 + $0x4] sm:$0x1]  ;;  %v15309_v54 = vld [vmem:[#allocation3 + $0x5] sm:$0x1] }
 0x539   :  { %v11943_v40 = vpop.f32.mrf.mxu1  ;;  %v8764_v37 = vld [vmem:[#allocation3 + $0x22] sm:$0x1] }
 0x53a   :  { %7908 = vst [vmem:[#allocation3 + $0x50] sm:$0xff] %v7892_v36  ;;  %v7895_v5 = vmax.f32 %v7879_v29, 0.0  ;;  %v7878_v22 = vadd.f32 %v15223_v50, %v7857_v55  ;;  %v7860_v14 = vadd.f32 %v11943_v40, %v7633_v57  ;;  %v8766_v36 = vld [vmem:[#allocation3 + $0x23] sm:$0x1]  ;;  %v8768_v29 = vld [vmem:[#allocation3 + $0x2a] sm:$0x1]  ;;  %v7925_v55 = vmax.f32 %v7919_v46, %v7921_v42 }
 0x53b   :  { %v7836_v12 = vpop.f32.mrf.mxu1  ;;  %v7936_v11 = vld [vmem:[#allocation3 + $0x4a] sm:$0x1]  ;;  %v7938_v39 = vld [vmem:[#allocation3 + $0x4b] sm:$0x1]  ;;  %v7920_v24 = vld [vmem:[#allocation3 + $0x48] sm:$0x1]  ;;  %v8584_v57 = vmax.f32 %v8578_v63, %v8580_v44  ;;  %v8772_v28 = vmax.f32 %v8764_v37, %v8766_v36 }
 0x53c   :  { %7911 = vst [vmem:[#allocation3 + $0x68] sm:$0xff] %v7895_v5  ;;  %v7894_v32 = vmax.f32 %v7878_v22, 0.0  ;;  %v7881_v19 = vadd.f32 %v15223_v50, %v7860_v14  ;;  %v7859_v56 = vadd.f32 %v7836_v12, %v7632_v38  ;;  %v7922_v3 = vld [vmem:[#allocation3 + $0x49] sm:$0x1]  ;;  %v7942_v61 = vmax.f32 %v7936_v11, %v7938_v39  ;;  %v8107_v9 = vld [vmem:[#allocation3 + $0x4c] sm:$0x1] }
 0x53d   :  { %v7932_v30 = vld [vmem:[#allocation3 + $0x42] sm:$0x1]  ;;  %v7934_v45 = vld [vmem:[#allocation3 + $0x43] sm:$0x1]  ;;  %v7915_v23 = vld [vmem:[#allocation3 + $0x40] sm:$0x1]  ;;  %v7926_v34 = vmax.f32 %v7920_v24, %v7922_v3  ;;  %v7927_v39 = vmax.f32 %v7923_v2, %v7925_v55 }
 0x53e   :  { %7910 = vst [vmem:[#allocation3 + $0x60] sm:$0xff] %v7894_v32  ;;  %v7897_v26 = vmax.f32 %v7881_v19, 0.0  ;;  %v7880_v17 = vadd.f32 %v15223_v50, %v7859_v56  ;;  %v7940_v4 = vmax.f32 %v7932_v30, %v7934_v45  ;;  %v7917_v25 = vld [vmem:[#allocation3 + $0x41] sm:$0x1]  ;;  %v8103_v60 = vld [vmem:[#allocation3 + $0x44] sm:$0x1]  ;;  %v7943_v50 = vmax.f32 %v7939_v49, %v7941_v48 }
 0x53f   :  { %v7924_v10 = vmax.f32 %v7915_v23, %v7917_v25  ;;  %v8579_v53 = vld [vmem:[#allocation3 + $0x5e] sm:$0x1]  ;;  %v8581_v35 = vld [vmem:[#allocation3 + $0x5f] sm:$0x1]  ;;  %v8105_v43 = vld [vmem:[#allocation3 + $0x45] sm:$0x1]  ;;  %v8586_v32 = vmax.f32 %v8582_v41, %v8584_v57 }
 0x540   :  { %7913 = vst [vmem:[#allocation3 + $0x78] sm:$0xff] %v7897_v26  ;;  %v7896_v7 = vmax.f32 %v7880_v17, 0.0  ;;  %v7944_v47 = vmax.f32 %v7940_v4, %v7942_v61  ;;  %v8109_v1 = vld [vmem:[#allocation3 + $0x4d] sm:$0x1]  ;;  %v8585_v31 = vmax.f32 %v8579_v53, %v8581_v35  ;;  %v8111_v18 = vmax.f32 %v8103_v60, %v8105_v43  ;;  %v8770_v40 = vld [vmem:[#allocation3 + $0x2b] sm:$0x1] }
 0x541   :  { %v7928_v21 = vmax.f32 %v7924_v10, %v7926_v34  ;;  %v8575_v52 = vld [vmem:[#allocation3 + $0x56] sm:$0x1]  ;;  %v8577_v15 = vld [vmem:[#allocation3 + $0x57] sm:$0x1]  ;;  %v7929_v14 = vld [vmem:[%s15654_s3] sm:$0xff]  ;;  %v8113_v12 = vmax.f32 %v8107_v9, %v8109_v1  ;;  %v15838_v24 = vmov 0.0   ;;  %v8110_v26 = vmax.f32 %v15307_v62, %v15309_v54 }
 0x542   :  { %7912 = vst [vmem:[#allocation3 + $0x70] sm:$0xff] %v7896_v7  ;;  %v7950_v20 = vrot.slane %v7944_v47, 7  ;;  %v8583_v58 = vmax.f32 %v8575_v52, %v8577_v15  ;;  %v8197_v11 = vld [vmem:[#allocation3 + $0x46] sm:$0x1]  ;;  %v8199_v59 = vld [vmem:[#allocation3 + $0x47] sm:$0x1]  ;;  %v8774_v17 = vmax.f32 %v8768_v29, %v8770_v40  ;;  %v8112_v35 = vmax.f32 %v8106_v51, %v8108_v16 }
 0x543   :  { %v8769_v27 = vld [vmem:[#allocation3 + $0x6a] sm:$0x1]  ;;  %v8771_v5 = vld [vmem:[#allocation3 + $0x6b] sm:$0x1]  ;;  %v8028_v38 = vrot.slane %v7928_v21, 7  ;;  %v15321_v13 = vmax.f32 %v8111_v18, %v8113_v12  ;;  %v8205_v61 = vmax.f32 %v8197_v11, %v8199_v59  ;;  %v10272_v60 = vld [vmem:[%s15654_s3 + $0x98] sm:$0xff] }
 0x544   :  { %v7952_v22 = vsel %vm7951_vm3, %v7950_v20, %v7943_v50  ;;  %v8587_v8 = vmax.f32 %v8583_v58, %v8585_v31  ;;  %v8201_v0 = vld [vmem:[#allocation3 + $0x4e] sm:$0x1]  ;;  %v8775_v45 = vmax.f32 %v8769_v27, %v8771_v5  ;;  %v8203_v4 = vld [vmem:[#allocation3 + $0x4f] sm:$0x1]  ;;  %v10250_v48 = vld [vmem:[%s15654_s3 + $0x20] sm:$0xff]  ;;  %v8776_v43 = vmax.f32 %v8772_v28, %v8774_v17 }
 0x545   :  { %11949 = vmatmul.mubr.msk.f32.vlgmr.msra.gmra.mxu0 %vm7953_vm4, %v7952_v22  ;;  %v8765_v19 = vld [vmem:[#allocation3 + $0x62] sm:$0x1]  ;;  %v8767_v56 = vld [vmem:[#allocation3 + $0x63] sm:$0x1]  ;;  %v10251_v3 = vld [vmem:[%s15654_s3 + $0x28] sm:$0xff]  ;;  %v8029_v42 = vsel %vm7951_vm3, %v8028_v38, %v7927_v39  ;;  %v8121_v9 = vrot.slane %v15321_v13, 7  ;;  %v8207_v52 = vmax.f32 %v8201_v0, %v8203_v4  ;;  %v8114_v20 = vmax.f32 %v8110_v26, %v8112_v35 }
 0x546   :  { %11952 = vmatpush3.msra.mxu0 %v7930_v6  ;;  %11955 = vmatprep.mubr.msk.f32.mxu0 %vm12153_vm2, %v15838_v24  ;;  %v8593_v33 = vrot.slane %v8587_v8, 7  ;;  %v8773_v30 = vmax.f32 %v8765_v19, %v8767_v56  ;;  %v8953_v49 = vld [vmem:[#allocation3 + $0x66] sm:$0x1]  ;;  %v8955_v23 = vld [vmem:[#allocation3 + $0x67] sm:$0x1]  ;;  %v10271_v53 = vld [vmem:[%s15654_s3 + $0x90] sm:$0xff] }
 0x547   :  { %11953 = vmatprep.subr.mxu0 %v15838_v24  ;;  %v8957_v25 = vld [vmem:[#allocation3 + $0x6e] sm:$0x1]  ;;  %v8959_v46 = vld [vmem:[#allocation3 + $0x6f] sm:$0x1]  ;;  %v8961_v34 = vmax.f32 %v8953_v49, %v8955_v23  ;;  %v15339_v7 = vld [vmem:[#allocation3 + $0x6] sm:$0x1]  ;;  %v15351_v18 = vmax.f32 %v8205_v61, %v8207_v52 }
 0x548   :  { %11954 = vmatpush3.msra.mxu0 %v7929_v14  ;;  %v8594_v63 = vsel %vm7951_vm3, %v8593_v33, %v8586_v32  ;;  %v8777_v10 = vmax.f32 %v8773_v30, %v8775_v45  ;;  %v8198_v47 = vld [vmem:[#allocation3 + $0x7] sm:$0x1]  ;;  %v15341_v44 = vld [vmem:[#allocation3 + $0x26] sm:$0x1]  ;;  %v8200_v2 = vld [vmem:[#allocation3 + $0xe] sm:$0x1]  ;;  %v8963_v41 = vmax.f32 %v8957_v25, %v8959_v46  ;;  %v8122_v14 = vsel %vm7951_vm3, %v8121_v9, %v8114_v20 }
 0x549   :  { %11958 = vmatprep.subr.mxu0 %v15838_v24  ;;  %11956 = vmatmul.mubr.msk.f32.vlgmr.msra.gmra.mxu0 %vm7953_vm4, %v8029_v42  ;;  %v8202_v21 = vld [vmem:[#allocation3 + $0xf] sm:$0x1]  ;;  %v8954_v15 = vld [vmem:[#allocation3 + $0x27] sm:$0x1]  ;;  %v8292_v1 = vld [vmem:[#allocation3 + $0x50] sm:$0x1]  ;;  %v8204_v57 = vmax.f32 %v15339_v7, %v8198_v47 }
 0x54a   :  { %11959 = vmatpush3.msra.mxu0 %v10251_v3  ;;  %11998 = vmatmul.mubr.msk.f32.vlgmr.msra.gmra.mxu1 %vm7953_vm4, %v8594_v63  ;;  %v8783_v50 = vrot.slane %v8777_v10, 7  ;;  %v10254_v6 = vld [vmem:[%s15654_s3 + $0x38] sm:$0xff]  ;;  %v8294_v58 = vld [vmem:[#allocation3 + $0x51] sm:$0x1]  ;;  %v9143_v31 = vld [vmem:[#allocation3 + $0x72] sm:$0x1]  ;;  %v8965_v29 = vmax.f32 %v8961_v34, %v8963_v41  ;;  %v8960_v27 = vmax.f32 %v15341_v44, %v8954_v15  ;;  %v8206_v59 = vmax.f32 %v8200_v2, %v8202_v21 }
 0x54b   :  { %11960 = vmatprep.subr.mxu0 %v15838_v24  ;;  %12008 = vmatpush3.msra.mxu1 %v10272_v60  ;;  %v9145_v62 = vld [vmem:[#allocation3 + $0x73] sm:$0x1]  ;;  %v8956_v37 = vld [vmem:[#allocation3 + $0x2e] sm:$0x1]  ;;  %v8958_v36 = vld [vmem:[#allocation3 + $0x2f] sm:$0x1]  ;;  %v8301_v16 = vmax.f32 %v8292_v1, %v8294_v58 }
 0x54c   :  { %11961 = vmatpush3.msra.mxu0 %v10250_v48  ;;  %12009 = vmatprep.subr.mxu1 %v15838_v24  ;;  %v8784_v54 = vsel %vm7951_vm3, %v8783_v50, %v8776_v43  ;;  %v8297_v55 = vld [vmem:[#allocation3 + $0x58] sm:$0x1]  ;;  %v8299_v40 = vld [vmem:[#allocation3 + $0x59] sm:$0x1]  ;;  %v9147_v5 = vld [vmem:[#allocation3 + $0x7a] sm:$0x1]  ;;  %v9151_v12 = vmax.f32 %v9143_v31, %v9145_v62  ;;  %v8962_v39 = vmax.f32 %v8956_v37, %v8958_v36 }
 0x54d   :  { %11962 = vmatprep.mubr.msk.f32.mxu0 %vm12153_vm2, %v15838_v24  ;;  %11965 = vmatprep.subr.mxu0 %v15838_v24  ;;  %v9149_v22 = vld [vmem:[#allocation3 + $0x7b] sm:$0x1]  ;;  %v10253_v8 = vld [vmem:[%s15654_s3 + $0x30] sm:$0xff]  ;;  %v8215_v28 = vrot.slane %v15351_v18, 7  ;;  %v8971_v0 = vrot.slane %v8965_v29, 7  ;;  %v8303_v33 = vmax.f32 %v8297_v55, %v8299_v40  ;;  %v8208_v49 = vmax.f32 %v8204_v57, %v8206_v59  ;;  %v10257_v23 = vld [vmem:[%s15654_s3 + $0x48] sm:$0xff] }
 0x54e   :  { %12010 = vmatpush3.msra.mxu1 %v10271_v53  ;;  %12011 = vmatprep.mubr.msk.f32.mxu1 %vm12153_vm2, %v15838_v24  ;;  %v10278_v38 = vld [vmem:[%s15654_s3 + $0xb8] sm:$0xff]  ;;  %v15367_v51 = vld [vmem:[#allocation3 + $0x10] sm:$0x1]  ;;  %v8293_v32 = vld [vmem:[#allocation3 + $0x11] sm:$0x1]  ;;  %v9153_v13 = vmax.f32 %v9147_v5, %v9149_v22  ;;  %v8964_v61 = vmax.f32 %v8960_v27, %v8962_v39 }
 0x54f   :  { %11963 = vmatmul.mubr.msk.f32.vlgmr.msra.gmra.mxu0 %vm7953_vm4, %v8122_v14  ;;  %12012 = vmatmul.mubr.msk.f32.vlgmr.msra.gmra.mxu1 %vm7953_vm4, %v8784_v54  ;;  %v10277_v11 = vld [vmem:[%s15654_s3 + $0xb0] sm:$0xff]  ;;  %v8296_v3 = vld [vmem:[#allocation3 + $0x18] sm:$0x1]  ;;  %v8298_v26 = vld [vmem:[#allocation3 + $0x19] sm:$0x1]  ;;  %v15385_v25 = vmax.f32 %v8301_v16, %v8303_v33  ;;  %v8300_v48 = vmax.f32 %v15367_v51, %v8293_v32  ;;  %v8216_v7 = vsel %vm7951_vm3, %v8215_v28, %v8208_v49 }
 0x550   :  { %v15374_v19 = vld [vmem:[#allocation3 + $0x32] sm:$0x1]  ;;  %v15376_v56 = vld [vmem:[#allocation3 + $0x33] sm:$0x1]  ;;  %11966 = vmatpush3.msra.mxu0 %v10254_v6  ;;  %12021 = vmatprep.subr.mxu1 %v15838_v24  ;;  %v9331_v17 = vld [vmem:[#allocation3 + $0x76] sm:$0x1]  ;;  %v9155_v42 = vmax.f32 %v9151_v12, %v9153_v13  ;;  %v8972_v47 = vsel %vm7951_vm3, %v8971_v0, %v8964_v61  ;;  %v8302_v52 = vmax.f32 %v8296_v3, %v8298_v26 }
 0x551   :  { %v8387_v30 = vld [vmem:[#allocation3 + $0x52] sm:$0x1]  ;;  %v8389_v45 = vld [vmem:[#allocation3 + $0x53] sm:$0x1]  ;;  %11967 = vmatprep.subr.mxu0 %v15838_v24  ;;  %12022 = vmatpush3.msra.mxu1 %v10278_v38  ;;  %v9333_v4 = vld [vmem:[#allocation3 + $0x77] sm:$0x1]  ;;  %v9150_v34 = vmax.f32 %v15374_v19, %v15376_v56 }
 0x552   :  { %11968 = vmatpush3.msra.mxu0 %v10253_v8  ;;  %12023 = vmatprep.subr.mxu1 %v15838_v24  ;;  %v9146_v46 = vld [vmem:[#allocation3 + $0x3a] sm:$0x1]  ;;  %v8393_v60 = vld [vmem:[#allocation3 + $0x5b] sm:$0x1]  ;;  %v8395_v53 = vmax.f32 %v8387_v30, %v8389_v45  ;;  %v9335_v35 = vld [vmem:[#allocation3 + $0x7e] sm:$0x1]  ;;  %v9339_v2 = vmax.f32 %v9331_v17, %v9333_v4  ;;  %v8304_v37 = vmax.f32 %v8300_v48, %v8302_v52 }
 0x553   :  { %v8391_v63 = vld [vmem:[#allocation3 + $0x5a] sm:$0x1]  ;;  %11969 = vmatprep.mubr.msk.f32.mxu0 %vm12153_vm2, %v15838_v24  ;;  %11972 = vmatprep.subr.mxu0 %v15838_v24  ;;  %v9148_v10 = vld [vmem:[#allocation3 + $0x3b] sm:$0x1]  ;;  %v9337_v43 = vld [vmem:[#allocation3 + $0x7f] sm:$0x1] }
 0x554   :  { %12024 = vmatpush3.msra.mxu1 %v10277_v11  ;;  %12025 = vmatprep.mubr.msk.f32.mxu1 %vm12153_vm2, %v15838_v24  ;;  %v10284_v44 = vld [vmem:[%s15654_s3 + $0xd8] sm:$0xff]  ;;  %v10256_v9 = vld [vmem:[%s15654_s3 + $0x40] sm:$0xff]  ;;  %v15403_v50 = vld [vmem:[#allocation3 + $0x12] sm:$0x1]  ;;  %v8397_v41 = vmax.f32 %v8391_v63, %v8393_v60  ;;  %v8311_v6 = vrot.slane %v15385_v25, 7  ;;  %v9152_v58 = vmax.f32 %v9146_v46, %v9148_v10  ;;  %v9161_v31 = vrot.slane %v9155_v42, 7 }
 0x555   :  { %11970 = vmatmul.mubr.msk.f32.vlgmr.msra.gmra.mxu0 %vm7953_vm4, %v8216_v7  ;;  %12026 = vmatmul.mubr.msk.f32.vlgmr.msra.gmra.mxu1 %vm7953_vm4, %v8972_v47  ;;  %v10283_v21 = vld [vmem:[%s15654_s3 + $0xd0] sm:$0xff]  ;;  %v9341_v18 = vmax.f32 %v9335_v35, %v9337_v43  ;;  %v10260_v36 = vld [vmem:[%s15654_s3 + $0x58] sm:$0xff]  ;;  %v8670_v12 = vld [vmem:[#allocation3 + $0x60] sm:$0x1] }
 0x556   :  { %v8388_v15 = vld [vmem:[#allocation3 + $0x13] sm:$0x1]  ;;  %v8481_v1 = vld [vmem:[#allocation3 + $0x54] sm:$0x1]  ;;  %v8483_v20 = vld [vmem:[#allocation3 + $0x55] sm:$0x1]  ;;  %11973 = vmatpush3.msra.mxu0 %v10257_v23  ;;  %12035 = vmatprep.subr.mxu1 %v15838_v24  ;;  %v8399_v29 = vmax.f32 %v8395_v53, %v8397_v41  ;;  %v9154_v27 = vmax.f32 %v9150_v34, %v9152_v58  ;;  %v8312_v59 = vsel %vm7951_vm3, %v8311_v6, %v8304_v37 }
 0x557   :  { %v9330_v62 = vld [vmem:[#allocation3 + $0x36] sm:$0x1]  ;;  %v9332_v54 = vld [vmem:[#allocation3 + $0x37] sm:$0x1]  ;;  %11974 = vmatprep.subr.mxu0 %v15838_v24  ;;  %12036 = vmatpush3.msra.mxu1 %v10284_v44  ;;  %v8485_v55 = vld [vmem:[#allocation3 + $0x5c] sm:$0x1]  ;;  %v9343_v14 = vmax.f32 %v9339_v2, %v9341_v18  ;;  %v8489_v38 = vmax.f32 %v8481_v1, %v8483_v20  ;;  %v8394_v8 = vmax.f32 %v15403_v50, %v8388_v15 }
 0x558   :  { %v8487_v57 = vld [vmem:[#allocation3 + $0x5d] sm:$0x1]  ;;  %11975 = vmatpush3.msra.mxu0 %v10256_v9  ;;  %12037 = vmatprep.subr.mxu1 %v15838_v24  ;;  %v8390_v40 = vld [vmem:[#allocation3 + $0x1a] sm:$0x1]  ;;  %v8392_v5 = vld [vmem:[#allocation3 + $0x1b] sm:$0x1]  ;;  %v9338_v16 = vmax.f32 %v9330_v62, %v9332_v54  ;;  %v9162_v39 = vsel %vm7951_vm3, %v9161_v31, %v9154_v27 }
 0x559   :  { %v9334_v22 = vld [vmem:[#allocation3 + $0x3e] sm:$0x1]  ;;  %11976 = vmatprep.mubr.msk.f32.mxu0 %vm12153_vm2, %v15838_v24  ;;  %11979 = vmatprep.subr.mxu0 %v15838_v24  ;;  %v9336_v51 = vld [vmem:[#allocation3 + $0x3f] sm:$0x1]  ;;  %v8672_v11 = vld [vmem:[#allocation3 + $0x61] sm:$0x1]  ;;  %v8491_v28 = vmax.f32 %v8485_v55, %v8487_v57  ;;  %v8396_v3 = vmax.f32 %v8390_v40, %v8392_v5 }
 0x55a   :  { %12038 = vmatpush3.msra.mxu1 %v10283_v21  ;;  %12039 = vmatprep.mubr.msk.f32.mxu1 %vm12153_vm2, %v15838_v24  ;;  %v10290_v32 = vld [vmem:[%s15654_s3 + $0xf8] sm:$0xff]  ;;  %v8480_v19 = vld [vmem:[#allocation3 + $0x14] sm:$0x1]  ;;  %v8482_v56 = vld [vmem:[#allocation3 + $0x15] sm:$0x1]  ;;  %v8405_v33 = vrot.slane %v8399_v29, 7  ;;  %v9340_v45 = vmax.f32 %v9334_v22, %v9336_v51  ;;  %v8679_v4 = vmax.f32 %v8670_v12, %v8672_v11 }
 0x55b   :  { %11977 = vmatmul.mubr.msk.f32.vlgmr.msra.gmra.mxu0 %vm7953_vm4, %v8312_v59  ;;  %12040 = vmatmul.mubr.msk.f32.vlgmr.msra.gmra.mxu1 %vm7953_vm4, %v9162_v39  ;;  %v10259_v0 = vld [vmem:[%s15654_s3 + $0x50] sm:$0xff]  ;;  %v8675_v13 = vld [vmem:[#allocation3 + $0x68] sm:$0x1]  ;;  %v8677_v30 = vld [vmem:[#allocation3 + $0x69] sm:$0x1]  ;;  %v9349_v49 = vrot.slane %v9343_v14, 7  ;;  %v8493_v17 = vmax.f32 %v8489_v38, %v8491_v28  ;;  %v8398_v25 = vmax.f32 %v8394_v8, %v8396_v3  ;;  %v8488_v48 = vmax.f32 %v8480_v19, %v8482_v56 }
 0x55c   :  { %11980 = vmatpush3.msra.mxu0 %v10260_v36  ;;  %12049 = vmatprep.subr.mxu1 %v15838_v24  ;;  %v8484_v23 = vld [vmem:[#allocation3 + $0x1c] sm:$0x1]  ;;  %v8486_v26 = vld [vmem:[#allocation3 + $0x1d] sm:$0x1]  ;;  %v10289_v61 = vld [vmem:[%s15654_s3 + $0xf0] sm:$0xff]  ;;  %v9342_v60 = vmax.f32 %v9338_v16, %v9340_v45  ;;  %v8681_v34 = vmax.f32 %v8675_v13, %v8677_v30 }
 0x55d   :  { %11981 = vmatprep.subr.mxu0 %v15838_v24  ;;  %12050 = vmatpush3.msra.mxu1 %v10290_v32  ;;  %v8859_v46 = vld [vmem:[#allocation3 + $0x64] sm:$0x1]  ;;  %v8861_v42 = vld [vmem:[#allocation3 + $0x65] sm:$0x1]  ;;  %v10263_v63 = vld [vmem:[%s15654_s3 + $0x68] sm:$0xff]  ;;  %v8406_v53 = vsel %vm7951_vm3, %v8405_v33, %v8398_v25  ;;  %v8490_v35 = vmax.f32 %v8484_v23, %v8486_v26  ;;  %v8499_v9 = vrot.slane %v8493_v17, 7 }
 0x55e   :  { %11982 = vmatpush3.msra.mxu0 %v10259_v0  ;;  %12051 = vmatprep.subr.mxu1 %v15838_v24  ;;  %v8669_v10 = vld [vmem:[#allocation3 + $0x20] sm:$0x1]  ;;  %v8671_v43 = vld [vmem:[#allocation3 + $0x21] sm:$0x1]  ;;  %v8863_v7 = vld [vmem:[#allocation3 + $0x6c] sm:$0x1]  ;;  %v9350_v44 = vsel %vm7951_vm3, %v9349_v49, %v9342_v60  ;;  %v8683_v21 = vmax.f32 %v8679_v4, %v8681_v34  ;;  %v8867_v52 = vmax.f32 %v8859_v46, %v8861_v42 }
 0x55f   :  { %11983 = vmatprep.mubr.msk.f32.mxu0 %vm12153_vm2, %v15838_v24  ;;  %11986 = vmatprep.subr.mxu0 %v15838_v24  ;;  %v8865_v47 = vld [vmem:[#allocation3 + $0x6d] sm:$0x1]  ;;  %v8674_v50 = vld [vmem:[#allocation3 + $0x28] sm:$0x1]  ;;  %v8676_v2 = vld [vmem:[#allocation3 + $0x29] sm:$0x1]  ;;  %v8492_v20 = vmax.f32 %v8488_v48, %v8490_v35  ;;  %v8678_v58 = vmax.f32 %v8669_v10, %v8671_v43 }
 0x560   :  { %12052 = vmatpush3.msra.mxu1 %v10289_v61  ;;  %12053 = vmatprep.mubr.msk.f32.mxu1 %vm12153_vm2, %v15838_v24  ;;  %v10262_v15 = vld [vmem:[%s15654_s3 + $0x60] sm:$0xff]  ;;  %v9048_v41 = vld [vmem:[#allocation3 + $0x70] sm:$0x1]  ;;  %v9050_v1 = vld [vmem:[#allocation3 + $0x71] sm:$0x1]  ;;  %v8869_v62 = vmax.f32 %v8863_v7, %v8865_v47  ;;  %v8680_v54 = vmax.f32 %v8674_v50, %v8676_v2  ;;  %v8689_v55 = vrot.slane %v8683_v21, 7 }
 0x561   :  { %11984 = vmatmul.mubr.msk.f32.vlgmr.msra.gmra.mxu0 %vm7953_vm4, %v8406_v53  ;;  %12054 = vmatmul.mubr.msk.f32.vlgmr.msra.gmra.mxu1 %vm7953_vm4, %v9350_v44  ;;  %v10269_v6 = vld [vmem:[%s15654_s3 + $0x88] sm:$0xff]  ;;  %v8858_v31 = vld [vmem:[#allocation3 + $0x24] sm:$0x1]  ;;  %v8860_v18 = vld [vmem:[#allocation3 + $0x25] sm:$0x1]  ;;  %v8500_v29 = vsel %vm7951_vm3, %v8499_v9, %v8492_v20  ;;  %v9057_v5 = vmax.f32 %v9048_v41, %v9050_v1 }
 0x562   :  { %11987 = vmatpush3.msra.mxu0 %v10263_v63  ;;  %11990 = vmatprep.mubr.msk.f32.mxu0 %vm12153_vm2, %v15838_v24  ;;  %v9053_v37 = vld [vmem:[#allocation3 + $0x78] sm:$0x1]  ;;  %v9055_v36 = vld [vmem:[#allocation3 + $0x79] sm:$0x1]  ;;  %v8862_v57 = vld [vmem:[#allocation3 + $0x2c] sm:$0x1]  ;;  %v8871_v40 = vmax.f32 %v8867_v52, %v8869_v62  ;;  %v8682_v8 = vmax.f32 %v8678_v58, %v8680_v54  ;;  %v8866_v16 = vmax.f32 %v8858_v31, %v8860_v18 }
 0x563   :  { %11988 = vmatprep.subr.mxu0 %v15838_v24  ;;  %12091 = vmatprep.subr.mxu1 %v15838_v24  ;;  %v8864_v27 = vld [vmem:[#allocation3 + $0x2d] sm:$0x1]  ;;  %v10268_v22 = vld [vmem:[%s15654_s3 + $0x80] sm:$0xff]  ;;  %v9237_v14 = vld [vmem:[#allocation3 + $0x74] sm:$0x1]  ;;  %v9059_v11 = vmax.f32 %v9053_v37, %v9055_v36 }
 0x564   :  { %11989 = vmatpush3.msra.mxu0 %v10262_v15  ;;  %12123 = vmatprep.mubr.msk.f32.mxu1 %vm12153_vm2, %v15838_v24  ;;  %v9239_v38 = vld [vmem:[#allocation3 + $0x75] sm:$0x1]  ;;  %v10275_v51 = vld [vmem:[%s15654_s3 + $0xa8] sm:$0xff]  ;;  %v9047_v12 = vld [vmem:[#allocation3 + $0x30] sm:$0x1]  ;;  %v8868_v59 = vmax.f32 %v8862_v57, %v8864_v27  ;;  %v8690_v56 = vsel %vm7951_vm3, %v8689_v55, %v8682_v8  ;;  %v8877_v28 = vrot.slane %v8871_v40, 7 }
 0x565   :  { %12000 = vmatprep.subr.mxu0 %v15838_v24  ;;  %11991 = vmatmul.mubr.msk.f32.vlgmr.msra.gmra.mxu0 %vm7953_vm4, %v8500_v29  ;;  %v9049_v39 = vld [vmem:[#allocation3 + $0x31] sm:$0x1]  ;;  %v9241_v32 = vld [vmem:[#allocation3 + $0x7c] sm:$0x1]  ;;  %v9243_v19 = vld [vmem:[#allocation3 + $0x7d] sm:$0x1]  ;;  %v9061_v0 = vmax.f32 %v9057_v5, %v9059_v11  ;;  %v9245_v3 = vmax.f32 %v9237_v14, %v9239_v38 }
 0x566   :  { %12001 = vmatpush3.msra.mxu0 %v10269_v6  ;;  %12004 = vmatprep.mubr.msk.f32.mxu0 %vm12153_vm2, %v15838_v24  ;;  %v10274_v33 = vld [vmem:[%s15654_s3 + $0xa0] sm:$0xff]  ;;  %v9052_v13 = vld [vmem:[#allocation3 + $0x38] sm:$0x1]  ;;  %v9054_v30 = vld [vmem:[#allocation3 + $0x39] sm:$0x1]  ;;  %v8870_v45 = vmax.f32 %v8866_v16, %v8868_v59  ;;  %v9056_v49 = vmax.f32 %v9047_v12, %v9049_v39  ;;  %v9247_v23 = vmax.f32 %v9241_v32, %v9243_v19 }
 0x567   :  { %12002 = vmatprep.subr.mxu0 %v15838_v24  ;;  %v10281_v26 = vld [vmem:[%s15654_s3 + $0xc8] sm:$0xff]  ;;  %v9236_v17 = vld [vmem:[#allocation3 + $0x34] sm:$0x1]  ;;  %v9238_v4 = vld [vmem:[#allocation3 + $0x35] sm:$0x1]  ;;  %v9058_v25 = vmax.f32 %v9052_v13, %v9054_v30  ;;  %v9067_v46 = vrot.slane %v9061_v0, 7 }
 0x568   :  { %12003 = vmatpush3.msra.mxu0 %v10268_v22  ;;  %v8878_v61 = vsel %vm7951_vm3, %v8877_v28, %v8870_v45  ;;  %v9249_v42 = vmax.f32 %v9245_v3, %v9247_v23  ;;  %v10280_v63 = vld [vmem:[%s15654_s3 + $0xc0] sm:$0xff]  ;;  %v9240_v60 = vld [vmem:[#allocation3 + $0x3c] sm:$0x1]  ;;  %v9242_v48 = vld [vmem:[#allocation3 + $0x3d] sm:$0x1]  ;;  %v9244_v34 = vmax.f32 %v9236_v17, %v9238_v4 }
 0x569   :  { %12014 = vmatprep.subr.mxu0 %v15838_v24  ;;  %12005 = vmatmul.mubr.msk.f32.vlgmr.msra.gmra.mxu0 %vm7953_vm4, %v8690_v56  ;;  %v9060_v10 = vmax.f32 %v9056_v49, %v9058_v25  ;;  %v10287_v53 = vld [vmem:[%s15654_s3 + $0xe8] sm:$0xff]  ;;  %v9246_v43 = vmax.f32 %v9240_v60, %v9242_v48  ;;  %v10286_v47 = vld [vmem:[%s15654_s3 + $0xe0] sm:$0xff]  ;;  %v9446_v50 = vld [vmem:[%s15655_s4 + $0x78] sm:$0xff] }
 0x56a   :  { %12015 = vmatpush3.msra.mxu0 %v10275_v51  ;;  %12018 = vmatprep.mubr.msk.f32.mxu0 %vm12153_vm2, %v15838_v24  ;;  %v9255_v7 = vrot.slane %v9249_v42, 7  ;;  %v9445_v2 = vld [vmem:[%s15655_s4 + $0x70] sm:$0xff]  ;;  %v9444_v21 = vld [vmem:[%s15655_s4 + $0x68] sm:$0xff]  ;;  %v9443_v52 = vld [vmem:[%s15655_s4 + $0x60] sm:$0xff] }
 0x56b   :  { %12016 = vmatprep.subr.mxu0 %v15838_v24  ;;  %v9068_v35 = vsel %vm7951_vm3, %v9067_v46, %v9060_v10  ;;  %v9248_v44 = vmax.f32 %v9244_v34, %v9246_v43  ;;  %v9442_v15 = vld [vmem:[%s15655_s4 + $0x58] sm:$0xff]  ;;  %v9441_v41 = vld [vmem:[%s15655_s4 + $0x50] sm:$0xff]  ;;  %v9440_v1 = vld [vmem:[%s15655_s4 + $0x48] sm:$0xff] }
 0x56c   :  { %12017 = vmatpush3.msra.mxu0 %v10274_v33  ;;  %v9439_v20 = vld [vmem:[%s15655_s4 + $0x40] sm:$0xff]  ;;  %v9438_v6 = vld [vmem:[%s15655_s4 + $0x38] sm:$0xff]  ;;  %v9437_v58 = vld [vmem:[%s15655_s4 + $0x30] sm:$0xff] }
 0x56d   :  { %12028 = vmatprep.subr.mxu0 %v15838_v24  ;;  %12019 = vmatmul.mubr.msk.f32.vlgmr.msra.gmra.mxu0 %vm7953_vm4, %v8878_v61  ;;  %v9256_v9 = vsel %vm7951_vm3, %v9255_v7, %v9248_v44  ;;  %v9436_v31 = vld [vmem:[%s15655_s4 + $0x28] sm:$0xff]  ;;  %v9435_v62 = vld [vmem:[%s15655_s4 + $0x20] sm:$0xff]  ;;  %v9434_v54 = vld [vmem:[%s15655_s4 + $0x18] sm:$0xff] }
 0x56e   :  { %12029 = vmatpush3.msra.mxu0 %v10281_v26  ;;  %12032 = vmatprep.mubr.msk.f32.mxu0 %vm12153_vm2, %v15838_v24  ;;  %v9433_v18 = vld [vmem:[%s15655_s4 + $0x10] sm:$0xff]  ;;  %v9537_v37 = vld [vmem:[%s15656_s5 + $0x78] sm:$0xff]  ;;  %v9432_v29 = vld [vmem:[%s15655_s4 + $0x8] sm:$0xff] }
 0x56f   :  { %12030 = vmatprep.subr.mxu0 %v15838_v24  ;;  %v9536_v36 = vld [vmem:[%s15656_s5 + $0x70] sm:$0xff]  ;;  %12092 = vmatpush3.msra.mxu1 %v9537_v37  ;;  %v9535_v55 = vld [vmem:[%s15656_s5 + $0x68] sm:$0xff]  ;;  %v9431_v57 = vld [vmem:[%s15655_s4] sm:$0xff]  ;;  %s12154_s4 = smov [#allocation4]  }
 0x570   :  { %12031 = vmatpush3.msra.mxu0 %v10280_v63  ;;  %12093 = vmatprep.subr.mxu1 %v15838_v24  ;;  %v9534_v27 = vld [vmem:[%s15656_s5 + $0x60] sm:$0xff]  ;;  %v9533_v40 = vld [vmem:[%s15656_s5 + $0x58] sm:$0xff]  ;;  %v9532_v5 = vld [vmem:[%s15656_s5 + $0x50] sm:$0xff]  ;;  %s9620_s14 = sshll.u32 %s12154_s4, 4  ;;  %s9621_s14 = int_to_ptr.vmem [resolvable:$true] %s9620_s14 }
 0x571   :  { %12042 = vmatprep.subr.mxu0 %v15838_v24  ;;  %12033 = vmatmul.mubr.msk.f32.vlgmr.msra.gmra.mxu0 %vm7953_vm4, %v9068_v35  ;;  %v9531_v22 = vld [vmem:[%s15656_s5 + $0x48] sm:$0xff]  ;;  %v9530_v14 = vld [vmem:[%s15656_s5 + $0x40] sm:$0xff]  ;;  %v9529_v38 = vld [vmem:[%s15656_s5 + $0x38] sm:$0xff]  ;;  %p12135_p1 = scmp.lt.s32.totalorder %s9621_s14, %s9621_s14 }
 0x572   :  { %12043 = vmatpush3.msra.mxu0 %v10287_v53  ;;  %12046 = vmatprep.mubr.msk.f32.mxu0 %vm12153_vm2, %v15838_v24  ;;  %v9528_v8 = vld [vmem:[%s15656_s5 + $0x30] sm:$0xff]  ;;  %v9527_v51 = vld [vmem:[%s15656_s5 + $0x28] sm:$0xff]  ;;  %v9526_v16 = vld [vmem:[%s15656_s5 + $0x20] sm:$0xff] }
 0x573   :  { %12044 = vmatprep.subr.mxu0 %v15838_v24  ;;  %12094 = vmatpush3.msra.mxu1 %v9536_v36  ;;  %v9525_v12 = vld [vmem:[%s15656_s5 + $0x18] sm:$0xff]  ;;  %v9524_v11 = vld [vmem:[%s15656_s5 + $0x10] sm:$0xff] }
 0x574   :  { %12045 = vmatpush3.msra.mxu0 %v10286_v47  ;;  %12095 = vmatprep.subr.mxu1 %v15838_v24 }
 0x575   :  { %12047 = vmatmul.mubr.msk.f32.vlgmr.msra.gmra.mxu0 %vm7953_vm4, %v9256_v9  ;;  %12056 = vmatprep.subr.mxu0 %v15838_v24 }
 0x576   :  { %12088 = vmatprep.mubr.msk.f32.mxu0 %vm12153_vm2, %v15838_v24  ;;  %12057 = vmatpush3.msra.mxu0 %v9446_v50 }
 0x577   :  { %12058 = vmatprep.subr.mxu0 %v15838_v24  ;;  %12096 = vmatpush3.msra.mxu1 %v9535_v55  ;;  %v9523_v55 = vld [vmem:[%s15656_s5 + $0x8] sm:$0xff] }
 0x578   :  { %12059 = vmatpush3.msra.mxu0 %v9445_v2  ;;  %12097 = vmatprep.subr.mxu1 %v15838_v24 }
 0x579   :  { %12060 = vmatprep.subr.mxu0 %v15838_v24  ;;  %12098 = vmatpush3.msra.mxu1 %v9534_v27  ;;  %v10293_v27 = vld [vmem:[%s15657_s6 + $0x3] ss:$0 sm:$0xff] }
 0x57a   :  { %12061 = vmatpush3.msra.mxu0 %v9444_v21  ;;  %12099 = vmatprep.subr.mxu1 %v15838_v24 }
 0x57b   :  { %12062 = vmatprep.subr.mxu0 %v15838_v24  ;;  %12100 = vmatpush3.msra.mxu1 %v9533_v40 }
 0x57c   :  { %12063 = vmatpush3.msra.mxu0 %v9443_v52  ;;  %12101 = vmatprep.subr.mxu1 %v15838_v24 }
 0x57d   :  { %12064 = vmatprep.subr.mxu0 %v15838_v24  ;;  %12102 = vmatpush3.msra.mxu1 %v9532_v5 }
 0x57e   :  { %12065 = vmatpush3.msra.mxu0 %v9442_v15  ;;  %12103 = vmatprep.subr.mxu1 %v15838_v24 }
 0x57f   :  { %12066 = vmatprep.subr.mxu0 %v15838_v24  ;;  %12104 = vmatpush3.msra.mxu1 %v9531_v22 }
 0x580   :  { %12067 = vmatpush3.msra.mxu0 %v9441_v41  ;;  %12105 = vmatprep.subr.mxu1 %v15838_v24 }
 0x581   :  { %12068 = vmatprep.subr.mxu0 %v15838_v24  ;;  %12106 = vmatpush3.msra.mxu1 %v9530_v14  ;;  %v10294_v14 = vld [vmem:[%s15657_s6 + $0x4] ss:$0 sm:$0xff] }
 0x582   :  { %12069 = vmatpush3.msra.mxu0 %v9440_v1  ;;  %12107 = vmatprep.subr.mxu1 %v15838_v24 }
 0x583   :  { %12070 = vmatprep.subr.mxu0 %v15838_v24  ;;  %12108 = vmatpush3.msra.mxu1 %v9529_v38 }
 0x584   :  { %12071 = vmatpush3.msra.mxu0 %v9439_v20  ;;  %12109 = vmatprep.subr.mxu1 %v15838_v24 }
 0x585   :  { %12072 = vmatprep.subr.mxu0 %v15838_v24  ;;  %12110 = vmatpush3.msra.mxu1 %v9528_v8 }
 0x586   :  { %12073 = vmatpush3.msra.mxu0 %v9438_v6  ;;  %12111 = vmatprep.subr.mxu1 %v15838_v24 }
 0x587   :  { %12074 = vmatprep.subr.mxu0 %v15838_v24  ;;  %12112 = vmatpush3.msra.mxu1 %v9527_v51 }
 0x588   :  { %12075 = vmatpush3.msra.mxu0 %v9437_v58  ;;  %12113 = vmatprep.subr.mxu1 %v15838_v24 }
 0x589   :  { %12076 = vmatprep.subr.mxu0 %v15838_v24  ;;  %12114 = vmatpush3.msra.mxu1 %v9526_v16 }
 0x58a   :  { %12077 = vmatpush3.msra.mxu0 %v9436_v31  ;;  %12115 = vmatprep.subr.mxu1 %v15838_v24 }
 0x58b   :  { %12078 = vmatprep.subr.mxu0 %v15838_v24  ;;  %12116 = vmatpush3.msra.mxu1 %v9525_v12 }
 0x58c   :  { %12079 = vmatpush3.msra.mxu0 %v9435_v62  ;;  %12117 = vmatprep.subr.mxu1 %v15838_v24 }
 0x58d   :  { %12080 = vmatprep.subr.mxu0 %v15838_v24  ;;  %12118 = vmatpush3.msra.mxu1 %v9524_v11 }
 0x58e   :  { %12081 = vmatpush3.msra.mxu0 %v9434_v54  ;;  %12119 = vmatprep.subr.mxu1 %v15838_v24  ;;  %v10292_v54 = vld [vmem:[%s15657_s6 + $0x2] ss:$0 sm:$0xff] }
 0x58f   :  { %12082 = vmatprep.subr.mxu0 %v15838_v24  ;;  %12120 = vmatpush3.msra.mxu1 %v9523_v55 }
 0x590   :  { %12083 = vmatpush3.msra.mxu0 %v9433_v18  ;;  %12121 = vmatprep.subr.mxu1 %v15838_v24 }
 0x591   :  { %12084 = vmatprep.subr.mxu0 %v15838_v24 }
 0x592   :  { %12085 = vmatpush3.msra.mxu0 %v9432_v29 }
 0x593   :  { %12086 = vmatprep.subr.mxu0 %v15838_v24 }
 0x594   :  { %12087 = vmatpush3.msra.mxu0 %v9431_v57  ;;  %v9522_v57 = vld [vmem:[%s15656_s5] sm:$0xff]  ;;  %s12130_s5 = scalar_lea.vmem %s9621_s14, 32 }
 0x595   :  { %12122 = vmatpush3.msra.mxu1 %v9522_v57  ;;  %p12131_p0 = scmp.ne.s32.totalorder %s9621_s14, %s12130_s5  ;;  %p12136_p2 = scmp.lt.s32.totalorder %s12130_s5, %s12130_s5 }
 0x597   :  { %p12137_p3 = por %p12136_p2, %p12135_p1 }
 0x599   :  { %p12138_p4 = pnand %p12137_p3, %p12131_p0 }
 0x605   :  { %v8022_v59 = vpop.f32.mrf.mxu0 }
 0x607   :  { %v11950_v39 = vpop.f32.mrf.mxu0 }
 0x609   :  { %v8098_v32 = vpop.f32.mrf.mxu0 }
 0x60a   :  { %v8663_v19 = vpop.f32.mrf.mxu1  ;;  %v8099_v4 = vadd.f32 %v8098_v32, %v8022_v59 }
 0x60b   :  { %v11957_v56 = vpop.f32.mrf.mxu0 }
 0x60c   :  { %v11999_v28 = vpop.f32.mrf.mxu1 }
 0x60f   :  { %v8191_v0 = vpop.f32.mrf.mxu0  ;;  %v8853_v3 = vpop.f32.mrf.mxu1 }
 0x610   :  { %v8195_v46 = vadd.f32 %v8191_v0, %v8099_v4 }
 0x611   :  { %v11964_v33 = vpop.f32.mrf.mxu0  ;;  %v12013_v13 = vpop.f32.mrf.mxu1 }
 0x615   :  { %v8285_v30 = vpop.f32.mrf.mxu0  ;;  %v9041_v45 = vpop.f32.mrf.mxu1 }
 0x616   :  { %v8289_v42 = vadd.f32 %v8285_v30, %v8195_v46 }
 0x617   :  { %v11971_v49 = vpop.f32.mrf.mxu0  ;;  %v12027_v23 = vpop.f32.mrf.mxu1 }
 0x61b   :  { %v8381_v26 = vpop.f32.mrf.mxu0  ;;  %v9231_v17 = vpop.f32.mrf.mxu1 }
 0x61c   :  { %v8385_v48 = vadd.f32 %v8381_v26, %v8289_v42 }
 0x61d   :  { %v11978_v61 = vpop.f32.mrf.mxu0  ;;  %v12041_v25 = vpop.f32.mrf.mxu1 }
 0x621   :  { %v8475_v63 = vpop.f32.mrf.mxu0  ;;  %v9419_v60 = vpop.f32.mrf.mxu1 }
 0x622   :  { %v8479_v53 = vadd.f32 %v8475_v63, %v8385_v48 }
 0x623   :  { %v11985_v10 = vpop.f32.mrf.mxu0  ;;  %v12055_v34 = vpop.f32.mrf.mxu1 }
 0x625   :  { %v8569_v35 = vpop.f32.mrf.mxu0 }
 0x626   :  { %v8573_v43 = vadd.f32 %v8569_v35, %v8479_v53 }
 0x627   :  { %v11992_v7 = vpop.f32.mrf.mxu0 }
 0x628   :  { %v8667_v47 = vadd.f32 %v8663_v19, %v8573_v43 }
 0x629   :  { %v8759_v44 = vpop.f32.mrf.mxu0 }
 0x62a   :  { %v8763_v9 = vadd.f32 %v8759_v44, %v8667_v47 }
 0x62b   :  { %v12006_v50 = vpop.f32.mrf.mxu0 }
 0x62c   :  { %v8857_v2 = vadd.f32 %v8853_v3, %v8763_v9 }
 0x62d   :  { %v8947_v21 = vpop.f32.mrf.mxu0 }
 0x62e   :  { %v8951_v52 = vadd.f32 %v8947_v21, %v8857_v2 }
 0x62f   :  { %v12020_v15 = vpop.f32.mrf.mxu0 }
 0x630   :  { %v9045_v41 = vadd.f32 %v9041_v45, %v8951_v52 }
 0x631   :  { %v9137_v1 = vpop.f32.mrf.mxu0 }
 0x632   :  { %v9141_v20 = vadd.f32 %v9137_v1, %v9045_v41 }
 0x633   :  { %v12034_v6 = vpop.f32.mrf.mxu0 }
 0x634   :  { %v9235_v58 = vadd.f32 %v9231_v17, %v9141_v20 }
 0x635   :  { %v9325_v31 = vpop.f32.mrf.mxu0 }
 0x636   :  { %v9329_v62 = vadd.f32 %v9325_v31, %v9235_v58 }
 0x637   :  { %v12048_v18 = vpop.f32.mrf.mxu0 }
 0x638   :  { %v9423_v37 = vadd.f32 %v9419_v60, %v9329_v62 }
 0x63a   :  { %v9429_v36 = vadd.f32 %v10292_v54, %v9423_v37 }
 0x63c   :  { %v9430_v29 = vmax.f32 %v9429_v36, 0.0 }
 0x63e   :  { %12089 = vmatmul.mubr.f32.vlgmr.msra.gmra.mxu0 %v9430_v29 }
 0x6fe   :  { %v9518_v40 = vpop.f32.mrf.mxu0 }
 0x6ff   :  { %v9519_v5 = vadd.f32 %v10293_v27, %v9518_v40 }
 0x700   :  { %v12090_v22 = vpop.f32.mrf.mxu0 }
 0x701   :  { %12124 = vmatmul.mubr.f32.vlgmr.msra.gmra.mxu1 %v9519_v5 }
 0x7c1   :  { %v9609_v38 = vpop.f32.mrf.mxu1 }
 0x7c2   :  { %v9610_v8 = vadd.f32 %v10294_v14, %v9609_v38 }
 0x7c3   :  { %v12125_v51 = vpop.f32.mrf.mxu1 }
 0x7c4   :  { %9613 = vst [vmem:[#allocation4] sm:$0x3] %v9610_v8 }
 0x7c5   :  { %12141 = shalt.err (!%p12138_p4)
}
 0x7c6   :  { %9623 = dma.vmem_to_hbm [thread:$0]  %s9621_s14, 32, %s15658_s7, [#allocation5]  }
 0x7c7   :  { %12150 = dma.done.wait [#allocation5], 32  }
 0x7c8   :  { %12151 = vsyncadd [#allocation5], 4294967264 }
 0x7c9   :  { %9627 = vsyncpa [#allocation5], 1 }

</bundles_post_ra>
